<compile_context>
chip_gen: v5e
topology: v5e:2x2
jax: 0.10.0
libtpu: 0.0.40
codegen_flags: <defaults>
</compile_context>

<pallas_src>
import functools

import jax
import jax.numpy as jnp
from jax import lax
from jax.experimental import pallas as pl
from jax.experimental.pallas import tpu as pltpu

N_FRAMES = 140        # 140 * 42 = 5880 = head fc1 input dim
PHONE_IN = 360
PHONE_OUT = 42
BN_EPS = 1e-5


def _sigmoid(x):
    # tanh form: one EUP push instead of exp + divide.
    return 0.5 * jnp.tanh(0.5 * x) + 0.5


# ----------------------------------------------------------------------------
# Kernel 1: Phone_NN backbone (fc1..fc5 with sigmoids, NO softmax), applied to
# a (TM, 360) tile of the flattened (B*F, 360) frame matrix per grid step.
# ----------------------------------------------------------------------------
def phone_mlp_kernel(x_ref,
                     w1_ref, b1_ref, w2_ref, b2_ref, w3_ref, b3_ref,
                     w4_ref, b4_ref, w5_ref, b5_ref,
                     o_ref):
    h = _sigmoid(jnp.dot(x_ref[...], w1_ref[...],
                         preferred_element_type=jnp.float32) + b1_ref[...])
    h = _sigmoid(jnp.dot(h, w2_ref[...],
                         preferred_element_type=jnp.float32) + b2_ref[...])
    h = _sigmoid(jnp.dot(h, w3_ref[...],
                         preferred_element_type=jnp.float32) + b3_ref[...])
    h = _sigmoid(jnp.dot(h, w4_ref[...],
                         preferred_element_type=jnp.float32) + b4_ref[...])
    # fc5 -> logits only (Word_NN drops Phone_NN's softmax).
    o_ref[...] = (jnp.dot(h, w5_ref[...],
                          preferred_element_type=jnp.float32) + b5_ref[...])


def phone_forward(x2d, phone_params, *, tm=128):
    """x2d: (M, 360) with M = B * N_FRAMES. Returns (M, 42) logits."""
    M, D = x2d.shape
    (w1, b1), (w2, b2), (w3, b3), (w4, b4), (w5, b5) = phone_params
    n_out = w5.shape[1]

    def resident(shape):
        # Same block for every grid step -> weight stays VMEM-resident.
        return pl.BlockSpec(shape, lambda i: (0, 0))

    in_specs = [pl.BlockSpec((tm, D), lambda i: (i, 0))]
    for w, b in phone_params:
        in_specs.append(resident(w.shape))
        in_specs.append(resident(b.shape))

    return pl.pallas_call(
        phone_mlp_kernel,
        out_shape=jax.ShapeDtypeStruct((M, n_out), jnp.float32),
        grid=(pl.cdiv(M, tm),),
        in_specs=in_specs,
        out_specs=pl.BlockSpec((tm, n_out), lambda i: (i, 0)),
        compiler_params=pltpu.CompilerParams(
            dimension_semantics=("parallel",)),
    )(x2d, w1, b1, w2, b2, w3, b3, w4, b4, w5, b5)


# ----------------------------------------------------------------------------
# Kernel 2: classification head
#   fc1(5880->64) -> ReLU -> BatchNorm1d(64) -> fc2(64->2) -> ReLU -> softmax
# ----------------------------------------------------------------------------
def head_kernel(f_ref, w1_ref, b1_ref, gamma_ref, beta_ref, w2_ref, b2_ref,
                o_ref):
    h = jnp.dot(f_ref[...], w1_ref[...],
                preferred_element_type=jnp.float32) + b1_ref[...]
    h = jnp.maximum(h, 0.0)

    # BatchNorm1d, training-mode batch statistics (PyTorch default), biased var.
    mean = jnp.mean(h, axis=0, keepdims=True)
    diff = h - mean
    var = jnp.mean(diff * diff, axis=0, keepdims=True)
    h = diff * lax.rsqrt(var + BN_EPS) * gamma_ref[...] + beta_ref[...]

    logits = jnp.dot(h, w2_ref[...],
                     preferred_element_type=jnp.float32) + b2_ref[...]
    logits = jnp.maximum(logits, 0.0)

    # softmax over dim=1 with EUP approx reciprocal for the normalization.
    m = jnp.max(logits, axis=-1, keepdims=True)
    e = jnp.exp(logits - m)
    inv = pl.reciprocal(jnp.sum(e, axis=-1, keepdims=True), approx=True)
    o_ref[...] = e * inv


def head_forward(feats, head_params):
    (w1, b1), (gamma, beta), (w2, b2) = head_params
    B = feats.shape[0]
    n_out = w2.shape[1]
    vmem = pl.BlockSpec(memory_space=pltpu.MemorySpace.VMEM)
    return pl.pallas_call(
        head_kernel,
        out_shape=jax.ShapeDtypeStruct((B, n_out), jnp.float32),
        in_specs=[vmem] * 7,
        out_specs=vmem,
    )(feats, w1, b1, gamma, beta, w2, b2)


# ----------------------------------------------------------------------------
# Full Word_NN forward
# ----------------------------------------------------------------------------
@jax.jit
def word_nn_forward(x, phone_params, head_params):
    B, F, D = x.shape
    logits42 = phone_forward(x.reshape(B * F, D), phone_params)   # (B*F, 42)
    # Row-major reshape == torch.cat([frame_0, frame_1, ...], dim=1).
    feats = logits42.reshape(B, F * PHONE_OUT)                    # (B, 5880)
    return head_forward(feats, head_params)


# ----------------------------------------------------------------------------
# Parameter init (nn.Linear default U(-1/sqrt(in), 1/sqrt(in)); BN gamma=1,
# beta=0) and a pure-JAX reference.
# ----------------------------------------------------------------------------
def _linear_init(key, din, dout):
    kw, kb = jax.random.split(key)
    bound = 1.0 / jnp.sqrt(jnp.float32(din))
    w = jax.random.uniform(kw, (din, dout), jnp.float32, -bound, bound)
    b = jax.random.uniform(kb, (1, dout), jnp.float32, -bound, bound)
    return w, b


def init_params(key):
    phone_dims = [(PHONE_IN, 256), (256, 256), (256, 256), (256, 256),
                  (256, PHONE_OUT)]
    phone_params = []
    for din, dout in phone_dims:
        key, sub = jax.random.split(key)
        phone_params.append(_linear_init(sub, din, dout))

    key, k1, k2 = jax.random.split(key, 3)
    fc1 = _linear_init(k1, N_FRAMES * PHONE_OUT, 64)
    bn = (jnp.ones((1, 64), jnp.float32), jnp.zeros((1, 64), jnp.float32))
    fc2 = _linear_init(k2, 64, 2)
    head_params = [fc1, bn, fc2]
    return phone_params, head_params


def reference_forward(x, phone_params, head_params):
    B, F, D = x.shape
    h = x.reshape(B * F, D)
    for i, (w, b) in enumerate(phone_params):
        h = h @ w + b
        if i < 4:
            h = jax.nn.sigmoid(h)
    feats = h.reshape(B, F * PHONE_OUT)

    (w1, b1), (gamma, beta), (w2, b2) = head_params
    z = jnp.maximum(feats @ w1 + b1, 0.0)
    mean = jnp.mean(z, axis=0, keepdims=True)
    var = jnp.mean((z - mean) ** 2, axis=0, keepdims=True)
    z = (z - mean) / jnp.sqrt(var + BN_EPS) * gamma + beta
    z = jnp.maximum(z @ w2 + b2, 0.0)
    return jax.nn.softmax(z, axis=1)


if __name__ == "__main__":
    key = jax.random.PRNGKey(0)
    kx, kp = jax.random.split(key)

    B = 4                                   # small batch
    x = jax.random.normal(kx, (B, N_FRAMES, PHONE_IN), dtype=jnp.float32)
    phone_params, head_params = init_params(kp)

    out = word_nn_forward(x, phone_params, head_params)
    out = jax.block_until_ready(out)

    ref = reference_forward(x, phone_params, head_params)
    assert out.shape == (B, 2), out.shape
    assert jnp.allclose(out, ref, atol=2e-3, rtol=2e-3), "mismatch vs reference"
    assert jnp.allclose(jnp.sum(out, axis=1), 1.0, atol=2e-3), \
        "softmax rows must sum to 1"

    print("KERNEL_OK")
</pallas_src>

<mosaic_0001>
module attributes {stable_mosaic.version = 11 : i64} {
  func.func @phone_mlp_kernel(%arg0: i32, %arg1: memref<128x360xf32, #tpu.memory_space<vmem>>, %arg2: memref<360x256xf32, #tpu.memory_space<vmem>>, %arg3: memref<1x256xf32, #tpu.memory_space<vmem>>, %arg4: memref<256x256xf32, #tpu.memory_space<vmem>>, %arg5: memref<1x256xf32, #tpu.memory_space<vmem>>, %arg6: memref<256x256xf32, #tpu.memory_space<vmem>>, %arg7: memref<1x256xf32, #tpu.memory_space<vmem>>, %arg8: memref<256x256xf32, #tpu.memory_space<vmem>>, %arg9: memref<1x256xf32, #tpu.memory_space<vmem>>, %arg10: memref<256x42xf32, #tpu.memory_space<vmem>>, %arg11: memref<1x42xf32, #tpu.memory_space<vmem>>, %arg12: memref<128x42xf32, #tpu.memory_space<vmem>>) attributes {dimension_semantics = [#tpu.dimension_semantics<parallel>], iteration_bounds = array<i64: 5>, scalar_prefetch = 0 : i64, scratch_operands = 0 : i64, tpu.core_type = #tpu.core_type<tc>, window_params = [{transform_indices = @transform_0, window_bounds = array<i64: 128, 360>}, {pipeline_mode = #tpu.pipeline_mode<synchronous>, transform_indices = @transform_1, window_bounds = array<i64: 360, 256>}, {pipeline_mode = #tpu.pipeline_mode<synchronous>, transform_indices = @transform_2, window_bounds = array<i64: 1, 256>}, {pipeline_mode = #tpu.pipeline_mode<synchronous>, transform_indices = @transform_3, window_bounds = array<i64: 256, 256>}, {pipeline_mode = #tpu.pipeline_mode<synchronous>, transform_indices = @transform_4, window_bounds = array<i64: 1, 256>}, {pipeline_mode = #tpu.pipeline_mode<synchronous>, transform_indices = @transform_5, window_bounds = array<i64: 256, 256>}, {pipeline_mode = #tpu.pipeline_mode<synchronous>, transform_indices = @transform_6, window_bounds = array<i64: 1, 256>}, {pipeline_mode = #tpu.pipeline_mode<synchronous>, transform_indices = @transform_7, window_bounds = array<i64: 256, 256>}, {pipeline_mode = #tpu.pipeline_mode<synchronous>, transform_indices = @transform_8, window_bounds = array<i64: 1, 256>}, {pipeline_mode = #tpu.pipeline_mode<synchronous>, transform_indices = @transform_9, window_bounds = array<i64: 256, 42>}, {pipeline_mode = #tpu.pipeline_mode<synchronous>, transform_indices = @transform_10, window_bounds = array<i64: 1, 42>}, {transform_indices = @transform_11, window_bounds = array<i64: 128, 42>}]} {
    %c0 = arith.constant 0 : index
    %c0_0 = arith.constant 0 : index
    %0 = vector.load %arg1[%c0, %c0_0] : memref<128x360xf32, #tpu.memory_space<vmem>>, vector<128x360xf32>
    %c0_1 = arith.constant 0 : index
    %c0_2 = arith.constant 0 : index
    %1 = vector.load %arg2[%c0_1, %c0_2] : memref<360x256xf32, #tpu.memory_space<vmem>>, vector<360x256xf32>
    %cst = arith.constant dense<0.000000e+00> : vector<128x256xf32>
    %2 = tpu.matmul %0, %1, %cst {dimension_numbers = #tpu.dot_dimension_numbers<[1], [0], [0], [1], [0, 0, 1, 1], [], []>} : vector<128x360xf32>, vector<360x256xf32>, vector<128x256xf32> -> vector<128x256xf32>
    %c0_3 = arith.constant 0 : index
    %c0_4 = arith.constant 0 : index
    %3 = vector.load %arg3[%c0_3, %c0_4] : memref<1x256xf32, #tpu.memory_space<vmem>>, vector<1x256xf32>
    %4 = vector.broadcast %3 : vector<1x256xf32> to vector<128x256xf32>
    %5 = arith.addf %2, %4 : vector<128x256xf32>
    %cst_5 = arith.constant 5.000000e-01 : f32
    %6 = vector.broadcast %cst_5 : f32 to vector<128x256xf32>
    %7 = arith.mulf %6, %5 : vector<128x256xf32>
    %8 = math.tanh %7 : vector<128x256xf32>
    %cst_6 = arith.constant 5.000000e-01 : f32
    %9 = vector.broadcast %cst_6 : f32 to vector<128x256xf32>
    %10 = arith.mulf %9, %8 : vector<128x256xf32>
    %cst_7 = arith.constant 5.000000e-01 : f32
    %11 = vector.broadcast %cst_7 : f32 to vector<128x256xf32>
    %12 = arith.addf %10, %11 : vector<128x256xf32>
    %c0_8 = arith.constant 0 : index
    %c0_9 = arith.constant 0 : index
    %13 = vector.load %arg4[%c0_8, %c0_9] : memref<256x256xf32, #tpu.memory_space<vmem>>, vector<256x256xf32>
    %cst_10 = arith.constant dense<0.000000e+00> : vector<128x256xf32>
    %14 = tpu.matmul %12, %13, %cst_10 {dimension_numbers = #tpu.dot_dimension_numbers<[1], [0], [0], [1], [0, 0, 1, 1], [], []>} : vector<128x256xf32>, vector<256x256xf32>, vector<128x256xf32> -> vector<128x256xf32>
    %c0_11 = arith.constant 0 : index
    %c0_12 = arith.constant 0 : index
    %15 = vector.load %arg5[%c0_11, %c0_12] : memref<1x256xf32, #tpu.memory_space<vmem>>, vector<1x256xf32>
    %16 = vector.broadcast %15 : vector<1x256xf32> to vector<128x256xf32>
    %17 = arith.addf %14, %16 : vector<128x256xf32>
    %cst_13 = arith.constant 5.000000e-01 : f32
    %18 = vector.broadcast %cst_13 : f32 to vector<128x256xf32>
    %19 = arith.mulf %18, %17 : vector<128x256xf32>
    %20 = math.tanh %19 : vector<128x256xf32>
    %cst_14 = arith.constant 5.000000e-01 : f32
    %21 = vector.broadcast %cst_14 : f32 to vector<128x256xf32>
    %22 = arith.mulf %21, %20 : vector<128x256xf32>
    %cst_15 = arith.constant 5.000000e-01 : f32
    %23 = vector.broadcast %cst_15 : f32 to vector<128x256xf32>
    %24 = arith.addf %22, %23 : vector<128x256xf32>
    %c0_16 = arith.constant 0 : index
    %c0_17 = arith.constant 0 : index
    %25 = vector.load %arg6[%c0_16, %c0_17] : memref<256x256xf32, #tpu.memory_space<vmem>>, vector<256x256xf32>
    %cst_18 = arith.constant dense<0.000000e+00> : vector<128x256xf32>
    %26 = tpu.matmul %24, %25, %cst_18 {dimension_numbers = #tpu.dot_dimension_numbers<[1], [0], [0], [1], [0, 0, 1, 1], [], []>} : vector<128x256xf32>, vector<256x256xf32>, vector<128x256xf32> -> vector<128x256xf32>
    %c0_19 = arith.constant 0 : index
    %c0_20 = arith.constant 0 : index
    %27 = vector.load %arg7[%c0_19, %c0_20] : memref<1x256xf32, #tpu.memory_space<vmem>>, vector<1x256xf32>
    %28 = vector.broadcast %27 : vector<1x256xf32> to vector<128x256xf32>
    %29 = arith.addf %26, %28 : vector<128x256xf32>
    %cst_21 = arith.constant 5.000000e-01 : f32
    %30 = vector.broadcast %cst_21 : f32 to vector<128x256xf32>
    %31 = arith.mulf %30, %29 : vector<128x256xf32>
    %32 = math.tanh %31 : vector<128x256xf32>
    %cst_22 = arith.constant 5.000000e-01 : f32
    %33 = vector.broadcast %cst_22 : f32 to vector<128x256xf32>
    %34 = arith.mulf %33, %32 : vector<128x256xf32>
    %cst_23 = arith.constant 5.000000e-01 : f32
    %35 = vector.broadcast %cst_23 : f32 to vector<128x256xf32>
    %36 = arith.addf %34, %35 : vector<128x256xf32>
    %c0_24 = arith.constant 0 : index
    %c0_25 = arith.constant 0 : index
    %37 = vector.load %arg8[%c0_24, %c0_25] : memref<256x256xf32, #tpu.memory_space<vmem>>, vector<256x256xf32>
    %cst_26 = arith.constant dense<0.000000e+00> : vector<128x256xf32>
    %38 = tpu.matmul %36, %37, %cst_26 {dimension_numbers = #tpu.dot_dimension_numbers<[1], [0], [0], [1], [0, 0, 1, 1], [], []>} : vector<128x256xf32>, vector<256x256xf32>, vector<128x256xf32> -> vector<128x256xf32>
    %c0_27 = arith.constant 0 : index
    %c0_28 = arith.constant 0 : index
    %39 = vector.load %arg9[%c0_27, %c0_28] : memref<1x256xf32, #tpu.memory_space<vmem>>, vector<1x256xf32>
    %40 = vector.broadcast %39 : vector<1x256xf32> to vector<128x256xf32>
    %41 = arith.addf %38, %40 : vector<128x256xf32>
    %cst_29 = arith.constant 5.000000e-01 : f32
    %42 = vector.broadcast %cst_29 : f32 to vector<128x256xf32>
    %43 = arith.mulf %42, %41 : vector<128x256xf32>
    %44 = math.tanh %43 : vector<128x256xf32>
    %cst_30 = arith.constant 5.000000e-01 : f32
    %45 = vector.broadcast %cst_30 : f32 to vector<128x256xf32>
    %46 = arith.mulf %45, %44 : vector<128x256xf32>
    %cst_31 = arith.constant 5.000000e-01 : f32
    %47 = vector.broadcast %cst_31 : f32 to vector<128x256xf32>
    %48 = arith.addf %46, %47 : vector<128x256xf32>
    %c0_32 = arith.constant 0 : index
    %c0_33 = arith.constant 0 : index
    %49 = vector.load %arg10[%c0_32, %c0_33] : memref<256x42xf32, #tpu.memory_space<vmem>>, vector<256x42xf32>
    %cst_34 = arith.constant dense<0.000000e+00> : vector<128x42xf32>
    %50 = tpu.matmul %48, %49, %cst_34 {dimension_numbers = #tpu.dot_dimension_numbers<[1], [0], [0], [1], [0, 0, 1, 1], [], []>} : vector<128x256xf32>, vector<256x42xf32>, vector<128x42xf32> -> vector<128x42xf32>
    %c0_35 = arith.constant 0 : index
    %c0_36 = arith.constant 0 : index
    %51 = vector.load %arg11[%c0_35, %c0_36] : memref<1x42xf32, #tpu.memory_space<vmem>>, vector<1x42xf32>
    %52 = vector.broadcast %51 : vector<1x42xf32> to vector<128x42xf32>
    %53 = arith.addf %50, %52 : vector<128x42xf32>
    %c0_37 = arith.constant 0 : index
    %c0_38 = arith.constant 0 : index
    %54 = vector.load %arg12[%c0_37, %c0_38] : memref<128x42xf32, #tpu.memory_space<vmem>>, vector<128x42xf32>
    tpu.vector_store %arg12[%c0_37, %c0_38], %53 {strides = array<i32>} : memref<128x42xf32, #tpu.memory_space<vmem>>, vector<128x42xf32>,
    return
  }
  func.func @transform_0(%arg0: i32) -> (i32, i32) {
    %c0_i32 = arith.constant 0 : i32
    %c0_i32_0 = arith.constant 0 : i32
    return %arg0, %c0_i32 : i32, i32
  }
  func.func @transform_1(%arg0: i32) -> (i32, i32) {
    %c0_i32 = arith.constant 0 : i32
    %c0_i32_0 = arith.constant 0 : i32
    %c0_i32_1 = arith.constant 0 : i32
    return %c0_i32, %c0_i32_0 : i32, i32
  }
  func.func @transform_2(%arg0: i32) -> (i32, i32) {
    %c0_i32 = arith.constant 0 : i32
    %c0_i32_0 = arith.constant 0 : i32
    %c0_i32_1 = arith.constant 0 : i32
    return %c0_i32, %c0_i32_0 : i32, i32
  }
  func.func @transform_3(%arg0: i32) -> (i32, i32) {
    %c0_i32 = arith.constant 0 : i32
    %c0_i32_0 = arith.constant 0 : i32
    %c0_i32_1 = arith.constant 0 : i32
    return %c0_i32, %c0_i32_0 : i32, i32
  }
  func.func @transform_4(%arg0: i32) -> (i32, i32) {
    %c0_i32 = arith.constant 0 : i32
    %c0_i32_0 = arith.constant 0 : i32
    %c0_i32_1 = arith.constant 0 : i32
    return %c0_i32, %c0_i32_0 : i32, i32
  }
  func.func @transform_5(%arg0: i32) -> (i32, i32) {
    %c0_i32 = arith.constant 0 : i32
    %c0_i32_0 = arith.constant 0 : i32
    %c0_i32_1 = arith.constant 0 : i32
    return %c0_i32, %c0_i32_0 : i32, i32
  }
  func.func @transform_6(%arg0: i32) -> (i32, i32) {
    %c0_i32 = arith.constant 0 : i32
    %c0_i32_0 = arith.constant 0 : i32
    %c0_i32_1 = arith.constant 0 : i32
    return %c0_i32, %c0_i32_0 : i32, i32
  }
  func.func @transform_7(%arg0: i32) -> (i32, i32) {
    %c0_i32 = arith.constant 0 : i32
    %c0_i32_0 = arith.constant 0 : i32
    %c0_i32_1 = arith.constant 0 : i32
    return %c0_i32, %c0_i32_0 : i32, i32
  }
  func.func @transform_8(%arg0: i32) -> (i32, i32) {
    %c0_i32 = arith.constant 0 : i32
    %c0_i32_0 = arith.constant 0 : i32
    %c0_i32_1 = arith.constant 0 : i32
    return %c0_i32, %c0_i32_0 : i32, i32
  }
  func.func @transform_9(%arg0: i32) -> (i32, i32) {
    %c0_i32 = arith.constant 0 : i32
    %c0_i32_0 = arith.constant 0 : i32
    %c0_i32_1 = arith.constant 0 : i32
    return %c0_i32, %c0_i32_0 : i32, i32
  }
  func.func @transform_10(%arg0: i32) -> (i32, i32) {
    %c0_i32 = arith.constant 0 : i32
    %c0_i32_0 = arith.constant 0 : i32
    %c0_i32_1 = arith.constant 0 : i32
    return %c0_i32, %c0_i32_0 : i32, i32
  }
  func.func @transform_11(%arg0: i32) -> (i32, i32) {
    %c0_i32 = arith.constant 0 : i32
    %c0_i32_0 = arith.constant 0 : i32
    return %arg0, %c0_i32 : i32, i32
  }
}

module attributes {stable_mosaic.version = 11 : i64} {
  func.func @head_kernel(%arg0: memref<4x5880xf32, #tpu.memory_space<vmem>>, %arg1: memref<5880x64xf32, #tpu.memory_space<vmem>>, %arg2: memref<1x64xf32, #tpu.memory_space<vmem>>, %arg3: memref<1x64xf32, #tpu.memory_space<vmem>>, %arg4: memref<1x64xf32, #tpu.memory_space<vmem>>, %arg5: memref<64x2xf32, #tpu.memory_space<vmem>>, %arg6: memref<1x2xf32, #tpu.memory_space<vmem>>, %arg7: memref<4x2xf32, #tpu.memory_space<vmem>>) attributes {dimension_semantics = [], scalar_prefetch = 0 : i64, scratch_operands = 0 : i64, tpu.core_type = #tpu.core_type<tc>} {
    %c0 = arith.constant 0 : index
    %c0_0 = arith.constant 0 : index
    %0 = vector.load %arg0[%c0, %c0_0] : memref<4x5880xf32, #tpu.memory_space<vmem>>, vector<4x5880xf32>
    %c0_1 = arith.constant 0 : index
    %c0_2 = arith.constant 0 : index
    %1 = vector.load %arg1[%c0_1, %c0_2] : memref<5880x64xf32, #tpu.memory_space<vmem>>, vector<5880x64xf32>
    %cst = arith.constant dense<0.000000e+00> : vector<4x64xf32>
    %2 = tpu.matmul %0, %1, %cst {dimension_numbers = #tpu.dot_dimension_numbers<[1], [0], [0], [1], [0, 0, 1, 1], [], []>} : vector<4x5880xf32>, vector<5880x64xf32>, vector<4x64xf32> -> vector<4x64xf32>
    %c0_3 = arith.constant 0 : index
    %c0_4 = arith.constant 0 : index
    %3 = vector.load %arg2[%c0_3, %c0_4] : memref<1x64xf32, #tpu.memory_space<vmem>>, vector<1x64xf32>
    %4 = vector.broadcast %3 : vector<1x64xf32> to vector<4x64xf32>
    %5 = arith.addf %2, %4 : vector<4x64xf32>
    %cst_5 = arith.constant 0.000000e+00 : f32
    %6 = vector.broadcast %cst_5 : f32 to vector<4x64xf32>
    %7 = arith.maximumf %5, %6 : vector<4x64xf32>
    %cst_6 = arith.constant dense<0.000000e+00> : vector<64xf32>
    %8 = vector.multi_reduction <add>, %7, %cst_6 [0] : vector<4x64xf32> to vector<64xf32>
    %9 = vector.shape_cast %8 : vector<64xf32> to vector<1x64xf32>
    %cst_7 = arith.constant 4.000000e+00 : f32
    %10 = vector.broadcast %cst_7 : f32 to vector<1x64xf32>
    %11 = arith.divf %9, %10 : vector<1x64xf32>
    %12 = vector.broadcast %11 : vector<1x64xf32> to vector<4x64xf32>
    %13 = arith.subf %7, %12 : vector<4x64xf32>
    %14 = arith.mulf %13, %13 : vector<4x64xf32>
    %cst_8 = arith.constant dense<0.000000e+00> : vector<64xf32>
    %15 = vector.multi_reduction <add>, %14, %cst_8 [0] : vector<4x64xf32> to vector<64xf32>
    %16 = vector.shape_cast %15 : vector<64xf32> to vector<1x64xf32>
    %cst_9 = arith.constant 4.000000e+00 : f32
    %17 = vector.broadcast %cst_9 : f32 to vector<1x64xf32>
    %18 = arith.divf %16, %17 : vector<1x64xf32>
    %cst_10 = arith.constant 9.99999974E-6 : f32
    %19 = vector.broadcast %cst_10 : f32 to vector<1x64xf32>
    %20 = arith.addf %18, %19 : vector<1x64xf32>
    %21 = math.rsqrt %20 : vector<1x64xf32>
    %22 = vector.broadcast %21 : vector<1x64xf32> to vector<4x64xf32>
    %23 = arith.mulf %13, %22 : vector<4x64xf32>
    %c0_11 = arith.constant 0 : index
    %c0_12 = arith.constant 0 : index
    %24 = vector.load %arg3[%c0_11, %c0_12] : memref<1x64xf32, #tpu.memory_space<vmem>>, vector<1x64xf32>
    %25 = vector.broadcast %24 : vector<1x64xf32> to vector<4x64xf32>
    %26 = arith.mulf %23, %25 : vector<4x64xf32>
    %c0_13 = arith.constant 0 : index
    %c0_14 = arith.constant 0 : index
    %27 = vector.load %arg4[%c0_13, %c0_14] : memref<1x64xf32, #tpu.memory_space<vmem>>, vector<1x64xf32>
    %28 = vector.broadcast %27 : vector<1x64xf32> to vector<4x64xf32>
    %29 = arith.addf %26, %28 : vector<4x64xf32>
    %c0_15 = arith.constant 0 : index
    %c0_16 = arith.constant 0 : index
    %30 = vector.load %arg5[%c0_15, %c0_16] : memref<64x2xf32, #tpu.memory_space<vmem>>, vector<64x2xf32>
    %cst_17 = arith.constant dense<0.000000e+00> : vector<4x2xf32>
    %31 = tpu.matmul %29, %30, %cst_17 {dimension_numbers = #tpu.dot_dimension_numbers<[1], [0], [0], [1], [0, 0, 1, 1], [], []>} : vector<4x64xf32>, vector<64x2xf32>, vector<4x2xf32> -> vector<4x2xf32>
    %c0_18 = arith.constant 0 : index
    %c0_19 = arith.constant 0 : index
    %32 = vector.load %arg6[%c0_18, %c0_19] : memref<1x2xf32, #tpu.memory_space<vmem>>, vector<1x2xf32>
    %33 = vector.broadcast %32 : vector<1x2xf32> to vector<4x2xf32>
    %34 = arith.addf %31, %33 : vector<4x2xf32>
    %cst_20 = arith.constant 0.000000e+00 : f32
    %35 = vector.broadcast %cst_20 : f32 to vector<4x2xf32>
    %36 = arith.maximumf %34, %35 : vector<4x2xf32>
    %cst_21 = arith.constant dense<0xFF800000> : vector<4xf32>
    %37 = vector.multi_reduction <maximumf>, %36, %cst_21 [1] : vector<4x2xf32> to vector<4xf32>
    %38 = vector.shape_cast %37 : vector<4xf32> to vector<4x1xf32>
    %39 = vector.broadcast %38 : vector<4x1xf32> to vector<4x2xf32>
    %40 = arith.subf %36, %39 : vector<4x2xf32>
    %41 = math.exp %40 : vector<4x2xf32>
    %cst_22 = arith.constant dense<0.000000e+00> : vector<4xf32>
    %42 = vector.multi_reduction <add>, %41, %cst_22 [1] : vector<4x2xf32> to vector<4xf32>
    %43 = vector.shape_cast %42 : vector<4xf32> to vector<4x1xf32>
    %44 = tpu.reciprocal %43 {approx = true} : vector<4x1xf32> -> vector<4x1xf32>
    %45 = vector.broadcast %44 : vector<4x1xf32> to vector<4x2xf32>
    %46 = arith.mulf %41, %45 : vector<4x2xf32>
    %c0_23 = arith.constant 0 : index
    %c0_24 = arith.constant 0 : index
    %47 = vector.load %arg7[%c0_23, %c0_24] : memref<4x2xf32, #tpu.memory_space<vmem>>, vector<4x2xf32>
    tpu.vector_store %arg7[%c0_23, %c0_24], %46 {strides = array<i32>} : memref<4x2xf32, #tpu.memory_space<vmem>>, vector<4x2xf32>,
    return
  }
}

</mosaic_0001>

<bundles_post_ra>
// kernel: word_nn_forward.2
= control target key start
LH: loop header
LB: loop body
LE: loop exit
PB: predicated region body
PF: predicated region fallthrough
CT: control target
= control target key end

     0   :  { %s3513_s17 = smov 0   ;;  %s3515_s18 = smov 0   ;;  %s5189_s0 = inlined_call_operand.vmem [shape: f32[560,360], index: 0, kind: input, shape index: {}]   ;;  %s5190_s1 = inlined_call_operand.vmem [shape: f32[360,256], index: 1, kind: input, shape index: {}]   ;;  %s5191_s2 = inlined_call_operand.vmem [shape: f32[1,256], index: 2, kind: input, shape index: {}]   ;;  %s5192_s3 = inlined_call_operand.vmem [shape: f32[256,256], index: 3, kind: input, shape index: {}]   ;;  %s5193_s4 = inlined_call_operand.vmem [shape: f32[1,256], index: 4, kind: input, shape index: {}]   ;;  %s5194_s5 = inlined_call_operand.vmem [shape: f32[256,256], index: 5, kind: input, shape index: {}]   ;;  %s5195_s6 = inlined_call_operand.vmem [shape: f32[1,256], index: 6, kind: input, shape index: {}]   ;;  %s5196_s7 = inlined_call_operand.vmem [shape: f32[256,256], index: 7, kind: input, shape index: {}]   ;;  %s5197_s8 = inlined_call_operand.vmem [shape: f32[1,256], index: 8, kind: input, shape index: {}]   ;;  %s5198_s9 = inlined_call_operand.vmem [shape: f32[256,42], index: 9, kind: input, shape index: {}]   ;;  %s5199_s10 = inlined_call_operand.vmem [shape: f32[1,42], index: 10, kind: input, shape index: {}]   ;;  %s5200_s11 = inlined_call_operand.vmem [shape: f32[560,42], index: 11, kind: output, shape index: {}]  }
   0x1   :  { %s3517_s19 = smov 0  }
   0x2 LB: > { %s3526_s20 = sadd.s32 4294967295, %s3419_s19   ;;  %s3528_s21 = sadd.s32 1, %s3419_s19   ;;  %s3419_s19 = sphi %s3517_s19, %s5209_s19   ;;  %s3415_s18 = sphi %s3515_s18, %s5208_s18   ;;  %s3411_s17 = sphi %s3513_s17, %s5207_s17  }
   0x3   : > { %s261_s22 = ssub.s32 %s3419_s19, %s3528_s21  ;;  %s264_s23 = sadd.s32 1, %s3415_s18 }
   0x4   : > { %p262_p0 = scmp.eq.s32.totalorder %s261_s22, 0  ;;  %p274_p1 = scmp.ne.s32.totalorder %s3415_s18, %s3411_s17 }
   0x5   : > { %p275_p2 = scmp.eq.s32.totalorder %s3526_s20, 4  ;;  %p2963_p3 = scmp.ge.s32.totalorder %s3419_s19, 1 }
   0x6   : > { %s3536_s24 = scalar_select %p262_p0, %s3415_s18, %s264_s23  }
   0x7   : > { %p3538_p4 = por %p275_p2, %p274_p1  ;;  %p349_p5 = scmp.lt.s32.totalorder %s3419_s19, 6 }
   0x9   : > { %p350_p6 = pnand %p2963_p3, %p349_p5 }
   0xa   : > { %s3579_s22 = sshll.u32 (!%p350_p6), %s3526_s20, 4  ;;  %s391_s14 = sand.u32 (!%p350_p6), 1, %s3411_s17  }
   0xb   : > { %353 = sbr.rel (%p350_p6) target bundleno = 1061 (0x425), region = 64  ;;  %p400_p7 = scmp.lt.s32.totalorder (!%p350_p6), %s3579_s22, 69 }
  0x10   : > { %v494_v0 = vld [vmem:[%s5190_s1 + $0xf0] sm:$0xff]  ;;  %v552_v1 = vld [vmem:[%s5190_s1 + $0x2c0] sm:$0xff]  ;;  %s401_s16 = scalar_select %p400_p7, %s3579_s22, 69  ;;  %vm560_vm0 = vcmask 850944   ;;  %v527_v40 = vld [vmem:[%s5190_s1 + $0x1f8] sm:$0xff]  ;;  %vm2667_vm1 = vcmask 343040  }
  0x11   : > { %v492_v2 = vld [vmem:[%s5190_s1 + $0xe0] sm:$0xff]  ;;  %609 = vmatpush.msra.mxu0 %v494_v0  ;;  %742 = vmatpush.msra.mxu2 %v552_v1  ;;  %v526_v3 = vld [vmem:[%s5190_s1 + $0x1f0] sm:$0xff]  ;;  %v525_v44 = vld [vmem:[%s5190_s1 + $0x1e8] sm:$0xff]  ;;  %s2692_s17 = ssub.s32 (%p3538_p4), 70, %s3579_s22  ;;  %s3016_s26 = sshll.u32 (%p3538_p4), %s3526_s20, 7 }
  0x12   : > { %v550_v4 = vld [vmem:[%s5190_s1 + $0x2b0] sm:$0xff]  ;;  %674 = vmatpush.msra.mxu1 %v526_v3  ;;  %v524_v6 = vld [vmem:[%s5190_s1 + $0x1e0] sm:$0xff]  ;;  %s3019_s23 = smul.u32 24, %s401_s16  ;;  %v523_v47 = vld [vmem:[%s5190_s1 + $0x1d8] sm:$0xff]  ;;  %p2693_p8 = scmp.lt.s32.totalorder (%p3538_p4), %s2692_s17, 16 }
  0x13   : > { %v490_v5 = vld [vmem:[%s5190_s1 + $0xd0] sm:$0xff]  ;;  %v548_v7 = vld [vmem:[%s5190_s1 + $0x2a0] sm:$0xff]  ;;  %610 = vmatpush.msra.mxu0 %v492_v2  ;;  %743 = vmatpush.msra.mxu2 %v550_v4  ;;  %v553_v51 = vld [vmem:[%s5190_s1 + $0x2c8] sm:$0xff] }
  0x14   : > { %v522_v8 = vld [vmem:[%s5190_s1 + $0x1d0] sm:$0xff]  ;;  %675 = vmatpush.msra.mxu1 %v524_v6  ;;  %v488_v9 = vld [vmem:[%s5190_s1 + $0xc0] sm:$0xff]  ;;  %s3655_s29 = scalar_lea.vmem %s5189_s0, %s3019_s23  ;;  %v551_v53 = vld [vmem:[%s5190_s1 + $0x2b8] sm:$0xff]  ;;  %s2964_s23 = sshll.u32 %s391_s14, 7 }
  0x15   : > { %v546_v10 = vld [vmem:[%s5190_s1 + $0x290] sm:$0xff]  ;;  %611 = vmatpush.msra.mxu0 %v490_v5  ;;  %744 = vmatpush.msra.mxu2 %v548_v7  ;;  %v520_v11 = vld [vmem:[%s5190_s1 + $0x1c0] sm:$0xff]  ;;  %v3705_v50 = vld [vmem:[%s3655_s29 + $0x8] sm:$0xff]  ;;  %s5036_s19 = scalar_lea.vmem [#allocation2], %s2964_s23  }
  0x16   : > { %676 = vmatpush.msra.mxu1 %v522_v8  ;;  %v486_v12 = vld [vmem:[%s5190_s1 + $0xb0] sm:$0xff]  ;;  %v544_v13 = vld [vmem:[%s5190_s1 + $0x280] sm:$0xff]  ;;  %v3711_v52 = vld [vmem:[%s3655_s29 + $0x28] sm:$0xff] }
  0x17   : > { %612 = vmatpush.msra.mxu0 %v488_v9  ;;  %745 = vmatpush.msra.mxu2 %v546_v10  ;;  %v518_v14 = vld [vmem:[%s5190_s1 + $0x1b0] sm:$0xff]  ;;  %v484_v15 = vld [vmem:[%s5190_s1 + $0xa0] sm:$0xff]  ;;  %v521_v54 = vld [vmem:[%s5190_s1 + $0x1c8] sm:$0xff] }
  0x18   : > { %677 = vmatpush.msra.mxu1 %v520_v11  ;;  %v542_v16 = vld [vmem:[%s5190_s1 + $0x270] sm:$0xff]  ;;  %v516_v17 = vld [vmem:[%s5190_s1 + $0x1a0] sm:$0xff]  ;;  %v549_v55 = vld [vmem:[%s5190_s1 + $0x2a8] sm:$0xff] }
  0x19   : > { %613 = vmatpush.msra.mxu0 %v486_v12  ;;  %746 = vmatpush.msra.mxu2 %v544_v13  ;;  %v482_v18 = vld [vmem:[%s5190_s1 + $0x90] sm:$0xff]  ;;  %v540_v19 = vld [vmem:[%s5190_s1 + $0x260] sm:$0xff]  ;;  %v519_v56 = vld [vmem:[%s5190_s1 + $0x1b8] sm:$0xff] }
  0x1a   : > { %678 = vmatpush.msra.mxu1 %v518_v14  ;;  %v514_v20 = vld [vmem:[%s5190_s1 + $0x190] sm:$0xff]  ;;  %v480_v21 = vld [vmem:[%s5190_s1 + $0x80] sm:$0xff]  ;;  %v547_v57 = vld [vmem:[%s5190_s1 + $0x298] sm:$0xff] }
  0x1b   : > { %614 = vmatpush.msra.mxu0 %v484_v15  ;;  %747 = vmatpush.msra.mxu2 %v542_v16  ;;  %v538_v22 = vld [vmem:[%s5190_s1 + $0x250] sm:$0xff]  ;;  %v512_v23 = vld [vmem:[%s5190_s1 + $0x180] sm:$0xff]  ;;  %v517_v58 = vld [vmem:[%s5190_s1 + $0x1a8] sm:$0xff] }
  0x1c   : > { %679 = vmatpush.msra.mxu1 %v516_v17  ;;  %v478_v24 = vld [vmem:[%s5190_s1 + $0x70] sm:$0xff]  ;;  %v536_v25 = vld [vmem:[%s5190_s1 + $0x240] sm:$0xff]  ;;  %v3736_v59 = vld [vmem:[%s3655_s29 + $0x18] sm:$0xff] }
  0x1d   : > { %615 = vmatpush.msra.mxu0 %v482_v18  ;;  %748 = vmatpush.msra.mxu2 %v540_v19  ;;  %v510_v26 = vld [vmem:[%s5190_s1 + $0x170] sm:$0xff]  ;;  %v476_v27 = vld [vmem:[%s5190_s1 + $0x60] sm:$0xff]  ;;  %v515_v62 = vld [vmem:[%s5190_s1 + $0x198] sm:$0xff] }
  0x1e   : > { %680 = vmatpush.msra.mxu1 %v514_v20  ;;  %v534_v28 = vld [vmem:[%s5190_s1 + $0x230] sm:$0xff]  ;;  %v508_v29 = vld [vmem:[%s5190_s1 + $0x160] sm:$0xff]  ;;  %v545_v63 = vld [vmem:[%s5190_s1 + $0x288] sm:$0xff] }
  0x1f   : > { %616 = vmatpush.msra.mxu0 %v480_v21  ;;  %749 = vmatpush.msra.mxu2 %v538_v22  ;;  %v474_v30 = vld [vmem:[%s5190_s1 + $0x50] sm:$0xff]  ;;  %v532_v31 = vld [vmem:[%s5190_s1 + $0x220] sm:$0xff]  ;;  %v3758_v1 = vld [vmem:[%s3655_s29 + $0x38] sm:$0xff] }
  0x20   : > { %681 = vmatpush.msra.mxu1 %v512_v23  ;;  %v506_v32 = vld [vmem:[%s5190_s1 + $0x150] sm:$0xff]  ;;  %v472_v33 = vld [vmem:[%s5190_s1 + $0x40] sm:$0xff]  ;;  %v3761_v2 = vld [vmem:[%s3655_s29 + $0x58] sm:$0xff] }
  0x21   : > { %617 = vmatpush.msra.mxu0 %v478_v24  ;;  %750 = vmatpush.msra.mxu2 %v536_v25  ;;  %v530_v34 = vld [vmem:[%s5190_s1 + $0x210] sm:$0xff]  ;;  %v504_v35 = vld [vmem:[%s5190_s1 + $0x140] sm:$0xff]  ;;  %v513_v3 = vld [vmem:[%s5190_s1 + $0x188] sm:$0xff] }
  0x22   : > { %682 = vmatpush.msra.mxu1 %v510_v26  ;;  %v470_v36 = vld [vmem:[%s5190_s1 + $0x30] sm:$0xff]  ;;  %v528_v37 = vld [vmem:[%s5190_s1 + $0x200] sm:$0xff]  ;;  %v543_v4 = vld [vmem:[%s5190_s1 + $0x278] sm:$0xff] }
  0x23   : > { %618 = vmatpush.msra.mxu0 %v476_v27  ;;  %751 = vmatpush.msra.mxu2 %v534_v28  ;;  %v3667_v38 = vld [vmem:[%s3655_s29 + $0x10] sm:$0xff]  ;;  %v468_v41 = vld [vmem:[%s5190_s1 + $0x20] sm:$0xff]  ;;  %v3774_v5 = vld [vmem:[%s3655_s29 + $0x48] sm:$0xff] }
  0x24   : > { %683 = vmatpush.msra.mxu1 %v508_v29  ;;  %v502_v39 = vld [vmem:[%s5190_s1 + $0x130] sm:$0xff]  ;;  %v500_v42 = vld [vmem:[%s5190_s1 + $0x120] sm:$0xff]  ;;  %v511_v8 = vld [vmem:[%s5190_s1 + $0x178] sm:$0xff] }
  0x25   : > { %619 = vmatpush.msra.mxu0 %v474_v30  ;;  %752 = vmatpush.msra.mxu2 %v532_v31  ;;  %v466_v43 = vld [vmem:[%s5190_s1 + $0x10] sm:$0xff]  ;;  %v464_v46 = vld [vmem:[%s5190_s1] sm:$0xff]  ;;  %v541_v9 = vld [vmem:[%s5190_s1 + $0x268] sm:$0xff] }
  0x26   : > { %684 = vmatpush.msra.mxu1 %v506_v32  ;;  %v498_v45 = vld [vmem:[%s5190_s1 + $0x110] sm:$0xff]  ;;  %v3699_v48 = vld [vmem:[%s3655_s29] sm:$0xff]  ;;  %v3796_v11 = vld [vmem:[%s3655_s29 + $0x68] sm:$0xff] }
  0x27   : > { %620 = vmatpush.msra.mxu0 %v472_v33  ;;  %753 = vmatpush.msra.mxu2 %v530_v34  ;;  %v496_v49 = vld [vmem:[%s5190_s1 + $0x100] sm:$0xff]  ;;  %v3755_v0 = vld [vmem:[%s3655_s29 + $0x30] sm:$0xff]  ;;  %v3799_v12 = vld [vmem:[%s3655_s29 + $0x88] sm:$0xff] }
  0x28   : > { %685 = vmatpush.msra.mxu1 %v504_v35  ;;  %v3739_v60 = vld [vmem:[%s3655_s29 + $0x20] sm:$0xff]  ;;  %v3777_v6 = vld [vmem:[%s3655_s29 + $0x50] sm:$0xff]  ;;  %v509_v13 = vld [vmem:[%s5190_s1 + $0x168] sm:$0xff] }
  0x29   : > { %621 = vmatpush.msra.mxu0 %v470_v36  ;;  %754 = vmatpush.msra.mxu2 %v528_v37  ;;  %v3742_v61 = vld [vmem:[%s3655_s29 + $0x40] sm:$0xff]  ;;  %v3780_v7 = vld [vmem:[%s3655_s29 + $0x70] sm:$0xff]  ;;  %v539_v14 = vld [vmem:[%s5190_s1 + $0x258] sm:$0xff] }
  0x2a   : > { %2967 = vmatmul.msk.f32.vlgmr.msra.gmra.mxu2 %vm560_vm0, %v3667_v38  ;;  %686 = vmatpush.msra.mxu1 %v502_v39  ;;  %v3793_v10 = vld [vmem:[%s3655_s29 + $0x60] sm:$0xff]  ;;  %v3812_v15 = vld [vmem:[%s3655_s29 + $0x78] sm:$0xff]  ;;  %v3828_v19 = vld [vmem:[%s3655_s29 + $0x90] sm:$0xff] }
  0x2b   : > { %869 = vmatpush.msrb.mxu2 %v527_v40  ;;  %622 = vmatpush.msra.mxu0 %v468_v41  ;;  %v3815_v16 = vld [vmem:[%s3655_s29 + $0x80] sm:$0xff]  ;;  %v507_v18 = vld [vmem:[%s5190_s1 + $0x158] sm:$0xff]  ;;  %v537_v22 = vld [vmem:[%s5190_s1 + $0x248] sm:$0xff] }
  0x2c   : > { %687 = vmatpush.msra.mxu1 %v500_v42  ;;  %v3818_v17 = vld [vmem:[%s3655_s29 + $0xa0] sm:$0xff]  ;;  %v3831_v20 = vld [vmem:[%s3655_s29 + $0x98] sm:$0xff]  ;;  %v505_v23 = vld [vmem:[%s5190_s1 + $0x148] sm:$0xff] }
  0x2d   : > { %623 = vmatpush.msra.mxu0 %v466_v43  ;;  %870 = vmatpush.msrb.mxu2 %v525_v44  ;;  %v3834_v21 = vld [vmem:[%s3655_s29 + $0xb8] sm:$0xff]  ;;  %v3847_v24 = vld [vmem:[%s3655_s29 + $0xa8] sm:$0xff]  ;;  %v3850_v25 = vld [vmem:[%s3655_s29 + $0xb0] sm:$0xff] }
  0x2e   : > { %688 = vmatpush.msra.mxu1 %v498_v45  ;;  %v3853_v26 = vld [vmem:[%s3655_s29 + $0xd0] sm:$0xff]  ;;  %v495_v27 = vld [vmem:[%s5190_s1 + $0xf8] sm:$0xff]  ;;  %v493_v29 = vld [vmem:[%s5190_s1 + $0xe8] sm:$0xff] }
  0x2f   : > { %624 = vmatpush.msra.mxu0 %v464_v46  ;;  %871 = vmatpush.msrb.mxu2 %v523_v47  ;;  %v503_v28 = vld [vmem:[%s5190_s1 + $0x138] sm:$0xff]  ;;  %v489_v32 = vld [vmem:[%s5190_s1 + $0xc8] sm:$0xff]  ;;  %v3878_v33 = vld [vmem:[%s3655_s29 + $0xc0] sm:$0xff] }
  0x30   : > { %625 = vmatmul.f32.vlgmr.msra.gmra.mxu0 %v3699_v48  ;;  %689 = vmatpush.msra.mxu1 %v496_v49  ;;  %v535_v30 = vld [vmem:[%s5190_s1 + $0x238] sm:$0xff]  ;;  %v3881_v34 = vld [vmem:[%s3655_s29 + $0xc8] sm:$0xff]  ;;  %v3912_v44 = vld [vmem:[%s3655_s29 + $0xe0] sm:$0xff] }
  0x31   : > { %690 = vmatmul.f32.vlgmr.msra.gmra.mxu1 %v3705_v50  ;;  %937 = vmatpush.msrb.mxu0 %v553_v51  ;;  %v491_v31 = vld [vmem:[%s5190_s1 + $0xd8] sm:$0xff]  ;;  %v3884_v35 = vld [vmem:[%s3655_s29 + $0xe8] sm:$0xff]  ;;  %v3915_v45 = vld [vmem:[%s3655_s29 + $0x100] sm:$0xff] }
  0x32   : > { %2968 = vmatmul.msk.f32.gmra.mxu2 %vm560_vm0, %v3711_v52  ;;  %804 = vmatpush.msra.mxu3 %v495_v27  ;;  %v487_v36 = vld [vmem:[%s5190_s1 + $0xb8] sm:$0xff]  ;;  %v501_v37 = vld [vmem:[%s5190_s1 + $0x128] sm:$0xff] }
  0x33   : > { %938 = vmatpush.msrb.mxu0 %v551_v53  ;;  %872 = vmatpush.msrb.mxu2 %v521_v54  ;;  %v485_v39 = vld [vmem:[%s5190_s1 + $0xa8] sm:$0xff]  ;;  %v483_v40 = vld [vmem:[%s5190_s1 + $0x98] sm:$0xff] }
  0x34   : > { %805 = vmatpush.msra.mxu3 %v493_v29  ;;  %v533_v41 = vld [vmem:[%s5190_s1 + $0x228] sm:$0xff]  ;;  %v3909_v43 = vld [vmem:[%s3655_s29 + $0xd8] sm:$0xff]  ;;  %v1147_v29 = vld [vmem:[%s5192_s3 + $0xa0] sm:$0xff] }
  0x35   : > { %939 = vmatpush.msrb.mxu0 %v549_v55  ;;  %873 = vmatpush.msrb.mxu2 %v519_v56  ;;  %v481_v42 = vld [vmem:[%s5190_s1 + $0x88] sm:$0xff]  ;;  %v479_v46 = vld [vmem:[%s5190_s1 + $0x78] sm:$0xff]  ;;  %v3940_v55 = vld [vmem:[%s3655_s29 + $0xf0] sm:$0xff] }
  0x36   : > { %806 = vmatpush.msra.mxu3 %v491_v31  ;;  %v499_v47 = vld [vmem:[%s5190_s1 + $0x118] sm:$0xff]  ;;  %v477_v49 = vld [vmem:[%s5190_s1 + $0x68] sm:$0xff] }
  0x37   : > { %940 = vmatpush.msrb.mxu0 %v547_v57  ;;  %874 = vmatpush.msrb.mxu2 %v517_v58  ;;  %v475_v51 = vld [vmem:[%s5190_s1 + $0x58] sm:$0xff]  ;;  %v473_v54 = vld [vmem:[%s5190_s1 + $0x48] sm:$0xff] }
  0x38   : > { %628 = vmatmul.f32.gmra.mxu0 %v3736_v59  ;;  %807 = vmatpush.msra.mxu3 %v489_v32  ;;  %v531_v53 = vld [vmem:[%s5190_s1 + $0x218] sm:$0xff]  ;;  %v529_v27 = vld [vmem:[%s5190_s1 + $0x208] sm:$0xff] }
  0x39   : > { %693 = vmatmul.f32.gmra.mxu1 %v3739_v60  ;;  %875 = vmatpush.msrb.mxu2 %v515_v62  ;;  %v3943_v56 = vld [vmem:[%s3655_s29 + $0xf8] sm:$0xff]  ;;  %v1157_v62 = vld [vmem:[%s5192_s3 + $0xf0] sm:$0xff]  ;;  %v4009_v31 = vld [vmem:[%s3655_s29 + $0x128] sm:$0xff] }
  0x3a   : > { %2969 = vmatmul.msk.f32.gmra.mxu2 %vm560_vm0, %v3742_v61  ;;  %941 = vmatpush.msrb.mxu0 %v545_v63  ;;  %v3946_v57 = vld [vmem:[%s3655_s29 + $0x118] sm:$0xff]  ;;  %v497_v63 = vld [vmem:[%s5190_s1 + $0x108] sm:$0xff] }
  0x3b   : > { %876 = vmatpush.msrb.mxu2 %v513_v3  ;;  %808 = vmatpush.msra.mxu3 %v487_v36  ;;  %v471_v58 = vld [vmem:[%s5190_s1 + $0x38] sm:$0xff]  ;;  %v469_v3 = vld [vmem:[%s5190_s1 + $0x28] sm:$0xff]  ;;  %v1143_v36 = vld [vmem:[%s5192_s3 + $0x80] sm:$0xff] }
  0x3c   : > { %942 = vmatpush.msrb.mxu0 %v543_v4  ;;  %1197 = vmatpush.msrb.mxu1 %v1157_v62  ;;  %v1155_v4 = vld [vmem:[%s5192_s3 + $0xe0] sm:$0xff]  ;;  %v4012_v32 = vld [vmem:[%s3655_s29 + $0x148] sm:$0xff] }
  0x3d   : > { %877 = vmatpush.msrb.mxu2 %v511_v8  ;;  %809 = vmatpush.msra.mxu3 %v485_v39  ;;  %v467_v8 = vld [vmem:[%s5190_s1 + $0x18] sm:$0xff]  ;;  %v1139_v39 = vld [vmem:[%s5192_s3 + $0x60] sm:$0xff] }
  0x3e   : > { %943 = vmatpush.msrb.mxu0 %v541_v9  ;;  %v1153_v9 = vld [vmem:[%s5192_s3 + $0xd0] sm:$0xff]  ;;  %1198 = vmatpush.msrb.mxu1 %v1155_v4  ;;  %v1127_v62 = vld [vmem:[%s5192_s3] sm:$0xff]  ;;  %v1190_v4 = vld [vmem:[%s5192_s3 + $0x1f8] sm:$0xff] }
  0x3f   : > { %878 = vmatpush.msrb.mxu2 %v509_v13  ;;  %810 = vmatpush.msra.mxu3 %v483_v40  ;;  %v465_v13 = vld [vmem:[%s5190_s1 + $0x8] sm:$0xff]  ;;  %v4029_v40 = vld [vmem:[%s3655_s29 + $0x138] sm:$0xff] }
  0x40   : > { %631 = vmatmul.f32.gmra.mxu0 %v3755_v0  ;;  %1199 = vmatpush.msrb.mxu1 %v1153_v9  ;;  %v4095_v9 = vld [vmem:[%s5191_s2] sm:$0x3] }
  0x41   : > { %696 = vmatmul.f32.gmra.mxu1 %v3758_v1  ;;  %944 = vmatpush.msrb.mxu0 %v539_v14  ;;  %v3977_v14 = vld [vmem:[%s3655_s29 + $0x108] sm:$0xff] }
  0x42   : > { %2970 = vmatmul.msk.f32.gmra.mxu2 %vm560_vm0, %v3761_v2  ;;  %811 = vmatpush.msra.mxu3 %v481_v42  ;;  %v4038_v42 = vld [vmem:[%s3655_s29 + $0x160] sm:$0xff] }
  0x43   : > { %879 = vmatpush.msrb.mxu2 %v507_v18  ;;  %945 = vmatpush.msrb.mxu0 %v537_v22  ;;  %v3980_v18 = vld [vmem:[%s3655_s29 + $0x110] sm:$0xff] }
  0x44   : > { %812 = vmatpush.msra.mxu3 %v479_v46  ;;  %v3983_v22 = vld [vmem:[%s3655_s29 + $0x130] sm:$0xff]  ;;  %v1135_v46 = vld [vmem:[%s5192_s3 + $0x40] sm:$0xff] }
  0x45   : > { %880 = vmatpush.msrb.mxu2 %v505_v23  ;;  %946 = vmatpush.msrb.mxu0 %v535_v30  ;;  %v1151_v23 = vld [vmem:[%s5192_s3 + $0xc0] sm:$0xff]  ;;  %v1145_v30 = vld [vmem:[%s5192_s3 + $0x90] sm:$0xff] }
  0x46   : > { %813 = vmatpush.msra.mxu3 %v477_v49  ;;  %1200 = vmatpush.msrb.mxu1 %v1151_v23  ;;  %v1158_v49 = vld [vmem:[%s5192_s3 + $0xf8] sm:$0xff]  ;;  %v1187_v23 = vld [vmem:[%s5192_s3 + $0x1e0] sm:$0xff] }
  0x47   : > { %881 = vmatpush.msrb.mxu2 %v503_v28  ;;  %947 = vmatpush.msrb.mxu0 %v533_v41  ;;  %v1149_v28 = vld [vmem:[%s5192_s3 + $0xb0] sm:$0xff] }
  0x48   : > { %634 = vmatmul.f32.gmra.mxu0 %v3774_v5  ;;  %814 = vmatpush.msra.mxu3 %v475_v51  ;;  %v1137_v41 = vld [vmem:[%s5192_s3 + $0x50] sm:$0xff]  ;;  %v1131_v51 = vld [vmem:[%s5192_s3 + $0x20] sm:$0xff] }
  0x49   : > { %699 = vmatmul.f32.gmra.mxu1 %v3777_v6  ;;  %882 = vmatpush.msrb.mxu2 %v501_v37  ;;  %v1141_v37 = vld [vmem:[%s5192_s3 + $0x70] sm:$0xff] }
  0x4a   : > { %2971 = vmatmul.msk.f32.gmra.mxu2 %vm560_vm0, %v3780_v7  ;;  %948 = vmatpush.msrb.mxu0 %v531_v53  ;;  %v4058_v53 = vld [vmem:[%s3655_s29 + $0x150] sm:$0xff] }
  0x4b   : > { %883 = vmatpush.msrb.mxu2 %v499_v47  ;;  %815 = vmatpush.msra.mxu3 %v473_v54  ;;  %v1133_v47 = vld [vmem:[%s5192_s3 + $0x30] sm:$0xff]  ;;  %v4064_v54 = vld [vmem:[%s3655_s29 + $0x158] sm:$0xff] }
  0x4c   : > { %949 = vmatpush.msrb.mxu0 %v529_v27  ;;  %1201 = vmatpush.msrb.mxu1 %v1149_v28  ;;  %v1154_v27 = vld [vmem:[%s5192_s3 + $0xd8] sm:$0xff]  ;;  %v1188_v28 = vld [vmem:[%s5192_s3 + $0x1e8] sm:$0xff] }
  0x4d   : > { %816 = vmatpush.msra.mxu3 %v471_v58  ;;  %884 = vmatpush.msrb.mxu2 %v497_v63  ;;  %v4067_v58 = vld [vmem:[%s3655_s29 + $0x178] sm:$0xff]  ;;  %v1189_v63 = vld [vmem:[%s5192_s3 + $0x1f0] sm:$0xff] }
  0x4e   : > { %1202 = vmatpush.msrb.mxu1 %v1147_v29  ;;  %1392 = vmatpush.msra.mxu0 %v1190_v4 }
  0x4f   : > { %817 = vmatpush.msra.mxu3 %v469_v3  ;;  %1327 = vmatpush.msra.mxu2 %v1158_v49  ;;  %v1156_v3 = vld [vmem:[%s5192_s3 + $0xe8] sm:$0xff] }
  0x50   : > { %637 = vmatmul.f32.gmra.mxu0 %v3793_v10  ;;  %1203 = vmatpush.msrb.mxu1 %v1145_v30 }
  0x51   : > { %702 = vmatmul.f32.gmra.mxu1 %v3796_v11  ;;  %818 = vmatpush.msra.mxu3 %v467_v8  ;;  %v4090_v8 = vld [vmem:[%s3655_s29 + $0x170] sm:$0xff] }
  0x52   : > { %2972 = vmatmul.msk.f32.gmra.mxu2 %vm560_vm0, %v3799_v12  ;;  %1204 = vmatpush.msrb.mxu1 %v1143_v36 }
  0x53   : > { %819 = vmatpush.msra.mxu3 %v465_v13  ;;  %1328 = vmatpush.msra.mxu2 %v1156_v3  ;;  %v4102_v13 = vperm.slane %v4095_v9, 0  ;;  %v1184_v3 = vld [vmem:[%s5192_s3 + $0x1c8] sm:$0xff] }
  0x54   : > { %820 = vmatmul.f32.vlgmr.msra.gmra.mxu3 %v3699_v48  ;;  %v4003_v48 = vld [vmem:[%s3655_s29 + $0x120] sm:$0xff]  ;;  %1205 = vmatpush.msrb.mxu1 %v1141_v37 }
  0x55   : > { %1262 = vmatpush.msrb.mxu3 %v1189_v63  ;;  %1329 = vmatpush.msra.mxu2 %v1154_v27  ;;  %v1150_v63 = vld [vmem:[%s5192_s3 + $0xb8] sm:$0xff] }
  0x56   : > { %1206 = vmatpush.msrb.mxu1 %v1139_v39  ;;  %1393 = vmatpush.msra.mxu0 %v1188_v28  ;;  %v1185_v39 = vld [vmem:[%s5192_s3 + $0x1d0] sm:$0xff] }
  0x57   : > { %1263 = vmatpush.msrb.mxu3 %v1187_v23 }
  0x58   : > { %640 = vmatmul.f32.gmra.mxu0 %v3812_v15  ;;  %1207 = vmatpush.msrb.mxu1 %v1137_v41  ;;  %v1152_v41 = vld [vmem:[%s5192_s3 + $0xc8] sm:$0xff] }
  0x59   : > { %705 = vmatmul.f32.gmra.mxu1 %v3815_v16  ;;  %1264 = vmatpush.msrb.mxu3 %v1185_v39 }
  0x5a   : > { %2973 = vmatmul.msk.f32.gmra.mxu2 %vm560_vm0, %v3818_v17  ;;  %1208 = vmatpush.msrb.mxu1 %v1135_v46  ;;  %v1186_v46 = vld [vmem:[%s5192_s3 + $0x1d8] sm:$0xff] }
  0x5b   : > { %1330 = vmatpush.msra.mxu2 %v1152_v41  ;;  %1394 = vmatpush.msra.mxu0 %v1186_v46 }
  0x5c   : > { %823 = vmatmul.f32.gmra.mxu3 %v3736_v59  ;;  %v4035_v59 = vld [vmem:[%s3655_s29 + $0x140] sm:$0xff]  ;;  %1209 = vmatpush.msrb.mxu1 %v1133_v47 }
  0x5d   : > { %1331 = vmatpush.msra.mxu2 %v1150_v63  ;;  %1395 = vmatpush.msra.mxu0 %v1184_v3 }
  0x5e   : > { %1210 = vmatpush.msrb.mxu1 %v1131_v51 }
  0x60   : > { %643 = vmatmul.f32.gmra.mxu0 %v3828_v19 }
  0x61   : > { %708 = vmatmul.f32.gmra.mxu1 %v3831_v20 }
  0x62   : > { %2974 = vmatmul.msk.f32.gmra.mxu2 %vm560_vm0, %v3834_v21 }
  0x64   : > { %826 = vmatmul.f32.gmra.mxu3 %v3755_v0  ;;  %v1129_v0 = vld [vmem:[%s5192_s3 + $0x10] sm:$0xff] }
  0x65   : > { %1211 = vmatpush.msrb.mxu1 %v1129_v0 }
  0x67   : > { %1212 = vmatpush.msrb.mxu1 %v1127_v62  ;;  %v1183_v62 = vld [vmem:[%s5192_s3 + $0x1c0] sm:$0xff] }
  0x68   : > { %646 = vmatmul.f32.gmra.mxu0 %v3847_v24  ;;  %1265 = vmatpush.msrb.mxu3 %v1183_v62 }
  0x69   : > { %711 = vmatmul.f32.gmra.mxu1 %v3850_v25 }
  0x6a   : > { %2975 = vmatmul.msk.f32.gmra.mxu2 %vm560_vm0, %v3853_v26 }
  0x6c   : > { %829 = vmatmul.f32.gmra.mxu3 %v3774_v5  ;;  %v4087_v5 = vld [vmem:[%s3655_s29 + $0x168] sm:$0xff]  ;;  %s5092_s29 = scalar_lea.vmem (%p3538_p4), %s5200_s11, %s3016_s26  }
  0x70   : > { %649 = vmatmul.f32.gmra.mxu0 %v3878_v33 }
  0x71   : > { %714 = vmatmul.f32.gmra.mxu1 %v3881_v34 }
  0x72   : > { %2976 = vmatmul.msk.f32.gmra.mxu2 %vm560_vm0, %v3884_v35 }
  0x74   : > { %832 = vmatmul.f32.gmra.mxu3 %v3793_v10 }
  0x78   : > { %652 = vmatmul.f32.gmra.mxu0 %v3909_v43 }
  0x79   : > { %717 = vmatmul.f32.gmra.mxu1 %v3912_v44 }
  0x7a   : > { %2977 = vmatmul.msk.f32.gmra.mxu2 %vm560_vm0, %v3915_v45 }
  0x7c   : > { %835 = vmatmul.f32.gmra.mxu3 %v3812_v15 }
  0x80   : > { %655 = vmatmul.f32.gmra.mxu0 %v3940_v55 }
  0x81   : > { %720 = vmatmul.f32.gmra.mxu1 %v3943_v56 }
  0x82   : > { %2978 = vmatmul.msk.f32.gmra.mxu2 %vm560_vm0, %v3946_v57 }
  0x84   : > { %838 = vmatmul.f32.gmra.mxu3 %v3828_v19 }
  0x88   : > { %658 = vmatmul.f32.gmra.mxu0 %v3977_v14 }
  0x89   : > { %723 = vmatmul.f32.gmra.mxu1 %v3980_v18 }
  0x8a   : > { %2979 = vmatmul.msk.f32.gmra.mxu2 %vm560_vm0, %v3983_v22 }
  0x8c   : > { %841 = vmatmul.f32.gmra.mxu3 %v3847_v24 }
  0x90   : > { %661 = vmatmul.f32.gmra.mxu0 %v4003_v48 }
  0x91   : > { %726 = vmatmul.f32.gmra.mxu1 %v4009_v31 }
  0x92   : > { %2980 = vmatmul.msk.f32.gmra.mxu2 %vm560_vm0, %v4012_v32 }
  0x94   : > { %844 = vmatmul.f32.gmra.mxu3 %v3878_v33 }
  0x98   : > { %664 = vmatmul.f32.gmra.mxu0 %v4029_v40 }
  0x99   : > { %729 = vmatmul.f32.gmra.mxu1 %v4035_v59 }
  0x9a   : > { %2981 = vmatmul.msk.f32.gmra.mxu2 %vm560_vm0, %v4038_v42 }
  0x9c   : > { %847 = vmatmul.f32.gmra.mxu3 %v3909_v43  ;;  %v1144_v43 = vld [vmem:[%s5192_s3 + $0x88] sm:$0xff] }
  0xa0   : > { %667 = vmatmul.f32.gmra.mxu0 %v4058_v53 }
  0xa1   : > { %732 = vmatmul.f32.gmra.mxu1 %v4064_v54 }
  0xa2   : > { %2982 = vmatmul.msk.f32.gmra.mxu2 %vm560_vm0, %v4067_v58 }
  0xa4   : > { %850 = vmatmul.f32.gmra.mxu3 %v3940_v55 }
  0xa8   : > { %670 = vmatmul.f32.gmra.mxu0 %v4087_v5 }
  0xa9   : > { %735 = vmatmul.f32.gmra.mxu1 %v4090_v8 }
  0xaa   : > { %885 = vmatmul.f32.vlgmr.msrb.gmra.mxu2 %v3705_v50 }
  0xac   : > { %853 = vmatmul.f32.gmra.mxu3 %v3977_v14 }
  0xad   : > { %v626_v10 = vpop.f32.mrf.mxu0  ;;  %v756_v50 = vpop.f32.mrf.mxu2 }
  0xae   : > { %v627_v29 = vadd.f32 %v626_v10, %v4102_v13  ;;  %v691_v30 = vpop.f32.mrf.mxu1 }
  0xb0   : > { %v692_v36 = vadd.f32 %v691_v30, %v627_v29  ;;  %2983 = vmatmul.msk.f32.vlgmr.msrb.gmra.mxu0 %vm560_vm0, %v3667_v38  ;;  %v1181_v30 = vld [vmem:[%s5192_s3 + $0x1b0] sm:$0xff] }
  0xb1   : > { %1266 = vmatpush.msrb.mxu3 %v1181_v30 }
  0xb2   : > { %v757_v37 = vadd.f32 %v756_v50, %v692_v36  ;;  %888 = vmatmul.f32.gmra.mxu2 %v3739_v60  ;;  %v1148_v36 = vld [vmem:[%s5192_s3 + $0xa8] sm:$0xff] }
  0xb3   : > { %1332 = vmatpush.msra.mxu2 %v1148_v36 }
  0xb4   : > { %v999_v38 = vmul.f32 0.5, %v757_v37  ;;  %v1182_v37 = vld [vmem:[%s5192_s3 + $0x1b8] sm:$0xff]  ;;  %856 = vmatmul.f32.gmra.mxu3 %v4003_v48 }
  0xb5   : > { %v629_v15 = vpop.f32.mrf.mxu0  ;;  %v759_v47 = vpop.f32.mrf.mxu2  ;;  %1396 = vmatpush.msra.mxu0 %v1182_v37 }
  0xb6   : > { %3109 = vtanh.f32 %v999_v38  ;;  %v630_v60 = vadd.f32 %v629_v15, %v4102_v13  ;;  %v694_v49 = vpop.f32.mrf.mxu1 }
  0xb8   : > { %v695_v51 = vadd.f32 %v694_v49, %v630_v60  ;;  %2984 = vmatmul.msk.f32.gmra.mxu0 %vm560_vm0, %v3711_v52  ;;  %v1179_v49 = vld [vmem:[%s5192_s3 + $0x1a0] sm:$0xff] }
  0xb9   : > { %1267 = vmatpush.msrb.mxu3 %v1179_v49  ;;  %v1142_v49 = vld [vmem:[%s5192_s3 + $0x78] sm:$0xff] }
  0xba   : > { %v760_v0 = vadd.f32 %v759_v47, %v695_v51  ;;  %891 = vmatmul.f32.gmra.mxu2 %v3758_v1  ;;  %v1146_v51 = vld [vmem:[%s5192_s3 + $0x98] sm:$0xff] }
  0xbb   : > { %1333 = vmatpush.msra.mxu2 %v1146_v51 }
  0xbc   : > { %v3110_v52 = vpop.eup %3109  ;;  %v1001_v4 = vmul.f32 0.5, %v760_v0  ;;  %v1180_v0 = vld [vmem:[%s5192_s3 + $0x1a8] sm:$0xff]  ;;  %859 = vmatmul.f32.gmra.mxu3 %v4029_v40 }
  0xbd   : > { %v632_v19 = vpop.f32.mrf.mxu0  ;;  %v762_v23 = vpop.f32.mrf.mxu2  ;;  %v1063_v1 = vmul.f32 0.5, %v3110_v52  ;;  %1397 = vmatpush.msra.mxu0 %v1180_v0  ;;  %1334 = vmatpush.msra.mxu2 %v1144_v43  ;;  %v1138_v43 = vld [vmem:[%s5192_s3 + $0x58] sm:$0xff] }
  0xbe   : > { %v633_v27 = vadd.f32 %v632_v19, %v4102_v13  ;;  %v697_v28 = vpop.f32.mrf.mxu1  ;;  %3111 = vtanh.f32 %v1001_v4 }
  0xbf   : > { %v4142_v10 = vadd.f32 0.5, %v1063_v1  ;;  %1335 = vmatpush.msra.mxu2 %v1142_v49 }
  0xc0   : > { %v698_v50 = vadd.f32 %v697_v28, %v633_v27  ;;  %2985 = vmatmul.msk.f32.gmra.mxu0 %vm560_vm0, %v3742_v61 }
  0xc1   : > { %1213 = vmatmul.f32.vlgmr.msrb.gmra.mxu1 %v4142_v10 }
  0xc2   : > { %v763_v29 = vadd.f32 %v762_v23, %v698_v50  ;;  %894 = vmatmul.f32.gmra.mxu2 %v3777_v6 }
  0xc4   : > { %v3112_v61 = vpop.eup %3111  ;;  %v1003_v39 = vmul.f32 0.5, %v763_v29  ;;  %862 = vmatmul.f32.gmra.mxu3 %v4058_v53 }
  0xc5   : > { %v635_v24 = vpop.f32.mrf.mxu0  ;;  %v765_v41 = vpop.f32.mrf.mxu2  ;;  %v1065_v6 = vmul.f32 0.5, %v3112_v61 }
  0xc6   : > { %v636_v46 = vadd.f32 %v635_v24, %v4102_v13  ;;  %v700_v38 = vpop.f32.mrf.mxu1  ;;  %3113 = vtanh.f32 %v1003_v39 }
  0xc7   : > { %v4159_v15 = vadd.f32 0.5, %v1065_v6 }
  0xc8   : > { %v701_v47 = vadd.f32 %v700_v38, %v636_v46  ;;  %2986 = vmatmul.msk.f32.gmra.mxu0 %vm560_vm0, %v3761_v2 }
  0xc9   : > { %1216 = vmatmul.f32.gmra.mxu1 %v4159_v15 }
  0xca   : > { %v766_v60 = vadd.f32 %v765_v41, %v701_v47  ;;  %897 = vmatmul.f32.gmra.mxu2 %v3796_v11 }
  0xcc   : > { %v3114_v2 = vpop.eup %3113  ;;  %v1005_v62 = vmul.f32 0.5, %v766_v60  ;;  %865 = vmatmul.f32.gmra.mxu3 %v4087_v5  ;;  %v1166_v5 = vld [vmem:[%s5192_s3 + $0x138] sm:$0xff] }
  0xcd   : > { %v638_v33 = vpop.f32.mrf.mxu0  ;;  %v768_v63 = vpop.f32.mrf.mxu2  ;;  %v1067_v11 = vmul.f32 0.5, %v3114_v2 }
  0xce   : > { %v639_v3 = vadd.f32 %v638_v33, %v4102_v13  ;;  %v703_v52 = vpop.f32.mrf.mxu1  ;;  %3115 = vtanh.f32 %v1005_v62 }
  0xcf   : > { %v4176_v4 = vadd.f32 0.5, %v1067_v11 }
  0xd0   : > { %v704_v19 = vadd.f32 %v703_v52, %v639_v3  ;;  %2987 = vmatmul.msk.f32.gmra.mxu0 %vm560_vm0, %v3780_v7  ;;  %v1177_v7 = vld [vmem:[%s5192_s3 + $0x190] sm:$0xff] }
  0xd1   : > { %1219 = vmatmul.f32.gmra.mxu1 %v4176_v4  ;;  %1268 = vmatpush.msrb.mxu3 %v1177_v7 }
  0xd2   : > { %v769_v23 = vadd.f32 %v768_v63, %v704_v19  ;;  %900 = vmatmul.f32.gmra.mxu2 %v3815_v16  ;;  %v1178_v16 = vld [vmem:[%s5192_s3 + $0x198] sm:$0xff]  ;;  %v1140_v19 = vld [vmem:[%s5192_s3 + $0x68] sm:$0xff] }
  0xd3   : > { %1398 = vmatpush.msra.mxu0 %v1178_v16  ;;  %1336 = vmatpush.msra.mxu2 %v1140_v19 }
  0xd4   : > { %v3116_v1 = vpop.eup %3115  ;;  %v1007_v27 = vmul.f32 0.5, %v769_v23 }
  0xd5   : > { %v641_v28 = vpop.f32.mrf.mxu0  ;;  %v771_v50 = vpop.f32.mrf.mxu2  ;;  %v1069_v29 = vmul.f32 0.5, %v3116_v1  ;;  %1337 = vmatpush.msra.mxu2 %v1138_v43 }
  0xd6   : > { %v642_v30 = vadd.f32 %v641_v28, %v4102_v13  ;;  %v706_v36 = vpop.f32.mrf.mxu1  ;;  %3117 = vtanh.f32 %v1007_v27 }
  0xd7   : > { %v4193_v37 = vadd.f32 0.5, %v1069_v29 }
  0xd8   : > { %v707_v61 = vadd.f32 %v706_v36, %v642_v30  ;;  %2988 = vmatmul.msk.f32.gmra.mxu0 %vm560_vm0, %v3799_v12  ;;  %v1175_v12 = vld [vmem:[%s5192_s3 + $0x180] sm:$0xff] }
  0xd9   : > { %1222 = vmatmul.f32.gmra.mxu1 %v4193_v37  ;;  %1269 = vmatpush.msrb.mxu3 %v1175_v12 }
  0xda   : > { %v772_v39 = vadd.f32 %v771_v50, %v707_v61  ;;  %903 = vmatmul.f32.gmra.mxu2 %v3831_v20  ;;  %v1176_v20 = vld [vmem:[%s5192_s3 + $0x188] sm:$0xff] }
  0xdb   : > { %1399 = vmatpush.msra.mxu0 %v1176_v20 }
  0xdc   : > { %v3118_v24 = vpop.eup %3117  ;;  %v1009_v41 = vmul.f32 0.5, %v772_v39 }
  0xdd   : > { %v644_v6 = vpop.f32.mrf.mxu0  ;;  %v774_v46 = vpop.f32.mrf.mxu2  ;;  %v1071_v38 = vmul.f32 0.5, %v3118_v24 }
  0xde   : > { %v645_v47 = vadd.f32 %v644_v6, %v4102_v13  ;;  %v709_v60 = vpop.f32.mrf.mxu1  ;;  %3119 = vtanh.f32 %v1009_v41 }
  0xdf   : > { %v4210_v55 = vadd.f32 0.5, %v1071_v38 }
  0xe0   : > { %v710_v51 = vadd.f32 %v709_v60, %v645_v47  ;;  %2989 = vmatmul.msk.f32.gmra.mxu0 %vm560_vm0, %v3818_v17  ;;  %v1173_v17 = vld [vmem:[%s5192_s3 + $0x170] sm:$0xff]  ;;  %v1136_v60 = vld [vmem:[%s5192_s3 + $0x48] sm:$0xff] }
  0xe1   : > { %1225 = vmatmul.f32.gmra.mxu1 %v4210_v55  ;;  %1270 = vmatpush.msrb.mxu3 %v1173_v17 }
  0xe2   : > { %v775_v0 = vadd.f32 %v774_v46, %v710_v51  ;;  %906 = vmatmul.f32.gmra.mxu2 %v3850_v25  ;;  %v1174_v25 = vld [vmem:[%s5192_s3 + $0x178] sm:$0xff] }
  0xe3   : > { %1400 = vmatpush.msra.mxu0 %v1174_v25  ;;  %1338 = vmatpush.msra.mxu2 %v1136_v60  ;;  %v1132_v25 = vld [vmem:[%s5192_s3 + $0x28] sm:$0xff]  ;;  %v1161_v60 = vld [vmem:[%s5192_s3 + $0x110] sm:$0xff] }
  0xe4   : > { %v3120_v2 = vpop.eup %3119  ;;  %v1011_v62 = vmul.f32 0.5, %v775_v0 }
  0xe5   : > { %v647_v33 = vpop.f32.mrf.mxu0  ;;  %v777_v63 = vpop.f32.mrf.mxu2  ;;  %v1073_v11 = vmul.f32 0.5, %v3120_v2 }
  0xe6   : > { %v648_v3 = vadd.f32 %v647_v33, %v4102_v13  ;;  %v712_v52 = vpop.f32.mrf.mxu1  ;;  %3121 = vtanh.f32 %v1011_v62 }
  0xe7   : > { %v4227_v14 = vadd.f32 0.5, %v1073_v11  ;;  %v1134_v11 = vld [vmem:[%s5192_s3 + $0x38] sm:$0xff] }
  0xe8   : > { %v713_v23 = vadd.f32 %v712_v52, %v648_v3  ;;  %2990 = vmatmul.msk.f32.gmra.mxu0 %vm560_vm0, %v3834_v21  ;;  %v1171_v21 = vld [vmem:[%s5192_s3 + $0x160] sm:$0xff]  ;;  %1339 = vmatpush.msra.mxu2 %v1134_v11  ;;  %v1160_v11 = vld [vmem:[%s5192_s3 + $0x108] sm:$0xff] }
  0xe9   : > { %1228 = vmatmul.f32.gmra.mxu1 %v4227_v14  ;;  %1271 = vmatpush.msrb.mxu3 %v1171_v21  ;;  %v4307_v21 = vpop.f32.mrf.mxu3 }
  0xea   : > { %v778_v1 = vadd.f32 %v777_v63, %v713_v23  ;;  %909 = vmatmul.f32.gmra.mxu2 %v3881_v34  ;;  %v1172_v34 = vld [vmem:[%s5192_s3 + $0x168] sm:$0xff] }
  0xeb   : > { %1401 = vmatpush.msra.mxu0 %v1172_v34  ;;  %1340 = vmatpush.msra.mxu2 %v1132_v25 }
  0xec   : > { %v3122_v27 = vpop.eup %3121  ;;  %v1013_v28 = vmul.f32 0.5, %v778_v1 }
  0xed   : > { %v650_v50 = vpop.f32.mrf.mxu0  ;;  %v780_v29 = vpop.f32.mrf.mxu2  ;;  %v1075_v30 = vmul.f32 0.5, %v3122_v27 }
  0xee   : > { %v651_v36 = vadd.f32 %v650_v50, %v4102_v13  ;;  %v715_v7 = vpop.f32.mrf.mxu1  ;;  %3123 = vtanh.f32 %v1013_v28  ;;  %v1130_v50 = vld [vmem:[%s5192_s3 + $0x18] sm:$0xff] }
  0xef   : > { %v4244_v48 = vadd.f32 0.5, %v1075_v30  ;;  %1341 = vmatpush.msra.mxu2 %v1130_v50 }
  0xf0   : > { %v716_v16 = vadd.f32 %v715_v7, %v651_v36  ;;  %2991 = vmatmul.msk.f32.gmra.mxu0 %vm560_vm0, %v3853_v26  ;;  %v1169_v26 = vld [vmem:[%s5192_s3 + $0x150] sm:$0xff]  ;;  %v1128_v36 = vld [vmem:[%s5192_s3 + $0x8] sm:$0xff] }
  0xf1   : > { %1231 = vmatmul.f32.gmra.mxu1 %v4244_v48  ;;  %1272 = vmatpush.msrb.mxu3 %v1169_v26 }
  0xf2   : > { %v781_v61 = vadd.f32 %v780_v29, %v716_v16  ;;  %912 = vmatmul.f32.gmra.mxu2 %v3912_v44  ;;  %v1170_v44 = vld [vmem:[%s5192_s3 + $0x158] sm:$0xff] }
  0xf3   : > { %1402 = vmatpush.msra.mxu0 %v1170_v44  ;;  %1342 = vmatpush.msra.mxu2 %v1128_v36  ;;  %v1162_v44 = vld [vmem:[%s5192_s3 + $0x118] sm:$0xff] }
  0xf4   : > { %v3124_v39 = vpop.eup %3123  ;;  %v1015_v24 = vmul.f32 0.5, %v781_v61 }
  0xf5   : > { %v653_v41 = vpop.f32.mrf.mxu0  ;;  %v783_v6 = vpop.f32.mrf.mxu2  ;;  %v1077_v46 = vmul.f32 0.5, %v3124_v39 }
  0xf6   : > { %3125 = vtanh.f32 %v1015_v24  ;;  %v654_v38 = vadd.f32 %v653_v41, %v4102_v13  ;;  %v718_v47 = vpop.f32.mrf.mxu1  ;;  %v1163_v41 = vld [vmem:[%s5192_s3 + $0x120] sm:$0xff] }
  0xf7   : > { %v4261_v40 = vadd.f32 0.5, %v1077_v46 }
  0xf8   : > { %v719_v12 = vadd.f32 %v718_v47, %v654_v38  ;;  %2992 = vmatmul.msk.f32.gmra.mxu0 %vm560_vm0, %v3884_v35  ;;  %v1167_v35 = vld [vmem:[%s5192_s3 + $0x140] sm:$0xff] }
  0xf9   : > { %1234 = vmatmul.f32.gmra.mxu1 %v4261_v40  ;;  %1273 = vmatpush.msrb.mxu3 %v1167_v35  ;;  %v1159_v35 = vld [vmem:[%s5192_s3 + $0x100] sm:$0xff] }
  0xfa   : > { %v784_v49 = vadd.f32 %v783_v6, %v719_v12  ;;  %915 = vmatmul.f32.gmra.mxu2 %v3943_v56  ;;  %v1168_v56 = vld [vmem:[%s5192_s3 + $0x148] sm:$0xff]  ;;  %v4328_v12 = vpop.f32.mrf.mxu3 }
  0xfb   : > { %1403 = vmatpush.msra.mxu0 %v1168_v56 }
  0xfc   : > { %v3126_v20 = vpop.eup %3125  ;;  %v1017_v51 = vmul.f32 0.5, %v784_v49 }
  0xfd   : > { %v656_v0 = vpop.f32.mrf.mxu0  ;;  %v786_v2 = vpop.f32.mrf.mxu2  ;;  %v1079_v62 = vmul.f32 0.5, %v3126_v20  ;;  %1404 = vmatpush.msra.mxu0 %v1166_v5 }
  0xfe   : > { %3127 = vtanh.f32 %v1017_v51  ;;  %v657_v33 = vadd.f32 %v656_v0, %v4102_v13  ;;  %v721_v63 = vpop.f32.mrf.mxu1 }
  0xff   : > { %v4278_v53 = vadd.f32 0.5, %v1079_v62 }
 0x100   : > { %v722_v3 = vadd.f32 %v721_v63, %v657_v33  ;;  %2993 = vmatmul.msk.f32.gmra.mxu0 %vm560_vm0, %v3915_v45 }
 0x101   : > { %1237 = vmatmul.f32.gmra.mxu1 %v4278_v53 }
 0x102   : > { %v787_v52 = vadd.f32 %v786_v2, %v722_v3  ;;  %918 = vmatmul.f32.gmra.mxu2 %v3980_v18  ;;  %v1165_v18 = vld [vmem:[%s5192_s3 + $0x130] sm:$0xff]  ;;  %v4343_v56 = vpop.f32.mrf.mxu3 }
 0x103   : > { %1274 = vmatpush.msrb.mxu3 %v1165_v18 }
 0x104   : > { %v3128_v17 = vpop.eup %3127  ;;  %v1019_v19 = vmul.f32 0.5, %v787_v52 }
 0x105   : > { %v659_v23 = vpop.f32.mrf.mxu0  ;;  %v789_v1 = vpop.f32.mrf.mxu2  ;;  %v1081_v27 = vmul.f32 0.5, %v3128_v17  ;;  %1275 = vmatpush.msrb.mxu3 %v1163_v41 }
 0x106   : > { %3129 = vtanh.f32 %v1019_v19  ;;  %v660_v45 = vadd.f32 %v659_v23, %v4102_v13  ;;  %v724_v28 = vpop.f32.mrf.mxu1 }
 0x107   : > { %v4298_v29 = vadd.f32 0.5, %v1081_v27  ;;  %1276 = vmatpush.msrb.mxu3 %v1161_v60 }
 0x108   : > { %v725_v30 = vadd.f32 %v724_v28, %v660_v45  ;;  %2994 = vmatmul.msk.f32.gmra.mxu0 %vm560_vm0, %v3946_v57 }
 0x109   : > { %1240 = vmatmul.f32.gmra.mxu1 %v4298_v29  ;;  %1277 = vmatpush.msrb.mxu3 %v1159_v35 }
 0x10a   : > { %v790_v7 = vadd.f32 %v789_v1, %v725_v30  ;;  %921 = vmatmul.f32.gmra.mxu2 %v4009_v31  ;;  %v1164_v31 = vld [vmem:[%s5192_s3 + $0x128] sm:$0xff]  ;;  %v4354_v30 = vperm.slane %v4095_v9, 1  ;;  %v4356_v36 = vpop.f32.mrf.mxu3 }
 0x10b   : > { %1405 = vmatpush.msra.mxu0 %v1164_v31 }
 0x10c   : > { %v3130_v43 = vpop.eup %3129  ;;  %v1021_v34 = vmul.f32 0.5, %v790_v7 }
 0x10d   : > { %v662_v16 = vpop.f32.mrf.mxu0  ;;  %v792_v61 = vpop.f32.mrf.mxu2  ;;  %v1083_v39 = vmul.f32 0.5, %v3130_v43  ;;  %1406 = vmatpush.msra.mxu0 %v1162_v44 }
 0x10e   : > { %3131 = vtanh.f32 %v1021_v34  ;;  %v663_v57 = vadd.f32 %v662_v16, %v4102_v13  ;;  %v727_v24 = vpop.f32.mrf.mxu1 }
 0x10f   : > { %v4316_v6 = vadd.f32 0.5, %v1083_v39  ;;  %1407 = vmatpush.msra.mxu0 %v1160_v11 }
 0x110   : > { %v728_v46 = vadd.f32 %v727_v24, %v663_v57  ;;  %2995 = vmatmul.msk.f32.gmra.mxu0 %vm560_vm0, %v3983_v22 }
 0x111   : > { %1243 = vmatmul.f32.gmra.mxu1 %v4316_v6 }
 0x112   : > { %v793_v38 = vadd.f32 %v792_v61, %v728_v46  ;;  %924 = vmatmul.f32.gmra.mxu2 %v4035_v59  ;;  %v4371_v41 = vpop.f32.mrf.mxu3  ;;  %v1615_v46 = vld [vmem:[%s5194_s5 + $0xf0] sm:$0xff] }
 0x113   : > { %1655 = vmatpush.msra.mxu1 %v1615_v46 }
 0x114   : > { %v3132_v47 = vpop.eup %3131  ;;  %v1023_v26 = vmul.f32 0.5, %v793_v38  ;;  %v1616_v38 = vld [vmem:[%s5194_s5 + $0xf8] sm:$0xff] }
 0x115   : > { %v665_v49 = vpop.f32.mrf.mxu0  ;;  %v795_v20 = vpop.f32.mrf.mxu2  ;;  %v1085_v22 = vmul.f32 0.5, %v3132_v47  ;;  %1785 = vmatpush.msrb.mxu2 %v1616_v38 }
 0x116   : > { %3133 = vtanh.f32 %v1023_v26  ;;  %v666_v59 = vadd.f32 %v665_v49, %v4102_v13  ;;  %v730_v51 = vpop.f32.mrf.mxu1 }
 0x117   : > { %v4331_v0 = vadd.f32 0.5, %v1085_v22 }
 0x118   : > { %v731_v2 = vadd.f32 %v730_v51, %v666_v59  ;;  %2996 = vmatmul.msk.f32.gmra.mxu0 %vm560_vm0, %v4012_v32  ;;  %v828_v59 = vadd.f32 %v4343_v56, %v4354_v30 }
 0x119   : > { %1246 = vmatmul.f32.gmra.mxu1 %v4331_v0 }
 0x11a   : > { %v796_v62 = vadd.f32 %v795_v20, %v731_v2  ;;  %927 = vmatmul.f32.gmra.mxu2 %v4064_v54  ;;  %v4392_v51 = vpop.f32.mrf.mxu3 }
 0x11b   : > { %v837_v46 = vadd.f32 %v4392_v51, %v4354_v30 }
 0x11c   : > { %v3134_v33 = vpop.eup %3133  ;;  %v1025_v63 = vmul.f32 0.5, %v796_v62  ;;  %v1613_v62 = vld [vmem:[%s5194_s5 + $0xe0] sm:$0xff] }
 0x11d   : > { %v668_v3 = vpop.f32.mrf.mxu0  ;;  %v798_v52 = vpop.f32.mrf.mxu2  ;;  %v1087_v32 = vmul.f32 0.5, %v3134_v33  ;;  %v1614_v33 = vld [vmem:[%s5194_s5 + $0xe8] sm:$0xff]  ;;  %1656 = vmatpush.msra.mxu1 %v1613_v62 }
 0x11e   : > { %3135 = vtanh.f32 %v1025_v63  ;;  %v669_v54 = vadd.f32 %v668_v3, %v4102_v13  ;;  %v733_v17 = vpop.f32.mrf.mxu1  ;;  %v1648_v63 = vld [vmem:[%s5194_s5 + $0x1f8] sm:$0xff]  ;;  %1786 = vmatpush.msrb.mxu2 %v1614_v33  ;;  %v1643_v3 = vld [vmem:[%s5194_s5 + $0x1d0] sm:$0xff] }
 0x11f   : > { %v4346_v19 = vadd.f32 0.5, %v1087_v32  ;;  %1850 = vmatpush.msrb.mxu0 %v1648_v63  ;;  %v1605_v63 = vld [vmem:[%s5194_s5 + $0xa0] sm:$0xff] }
 0x120   : > { %v734_v25 = vadd.f32 %v733_v17, %v669_v54  ;;  %2997 = vmatmul.msk.f32.gmra.mxu0 %vm560_vm0, %v4038_v42  ;;  %v831_v17 = vadd.f32 %v4356_v36, %v4354_v30 }
 0x121   : > { %1249 = vmatmul.f32.gmra.mxu1 %v4346_v19 }
 0x122   : > { %v799_v23 = vadd.f32 %v798_v52, %v734_v25  ;;  %930 = vmatmul.f32.gmra.mxu2 %v4090_v8 }
 0x124   : > { %v3136_v1 = vpop.eup %3135  ;;  %v1027_v27 = vmul.f32 0.5, %v799_v23  ;;  %v4409_v23 = vpop.f32.mrf.mxu3 }
 0x125   : > { %v671_v45 = vpop.f32.mrf.mxu0  ;;  %v801_v28 = vpop.f32.mrf.mxu2  ;;  %v1089_v18 = vmul.f32 0.5, %v3136_v1  ;;  %v1611_v1 = vld [vmem:[%s5194_s5 + $0xd0] sm:$0xff]  ;;  %v840_v62 = vadd.f32 %v4409_v23, %v4354_v30 }
 0x126   : > { %3137 = vtanh.f32 %v1027_v27  ;;  %v672_v5 = vadd.f32 %v671_v45, %v4102_v13  ;;  %v736_v50 = vpop.f32.mrf.mxu1  ;;  %v822_v13 = vadd.f32 %v4307_v21, %v4354_v30  ;;  %v825_v21 = vadd.f32 %v4328_v12, %v4354_v30  ;;  %v1645_v12 = vld [vmem:[%s5194_s5 + $0x1e0] sm:$0xff]  ;;  %v1612_v27 = vld [vmem:[%s5194_s5 + $0xd8] sm:$0xff]  ;;  %v1646_v45 = vld [vmem:[%s5194_s5 + $0x1e8] sm:$0xff]  ;;  %1657 = vmatpush.msra.mxu1 %v1611_v1 }
 0x127   : > { %v4358_v42 = vadd.f32 0.5, %v1089_v18  ;;  %1787 = vmatpush.msrb.mxu2 %v1612_v27  ;;  %1851 = vmatpush.msrb.mxu0 %v1646_v45  ;;  %v1603_v27 = vld [vmem:[%s5194_s5 + $0x90] sm:$0xff]  ;;  %v1604_v45 = vld [vmem:[%s5194_s5 + $0x98] sm:$0xff] }
 0x128   : > { %v737_v7 = vadd.f32 %v736_v50, %v672_v5  ;;  %2998 = vmatmul.msk.f32.gmra.mxu0 %vm560_vm0, %v4067_v58  ;;  %v1647_v58 = vld [vmem:[%s5194_s5 + $0x1f0] sm:$0xff]  ;;  %v1641_v50 = vld [vmem:[%s5194_s5 + $0x1c0] sm:$0xff] }
 0x129   : > { %1252 = vmatmul.f32.gmra.mxu1 %v4358_v42  ;;  %1720 = vmatpush.msra.mxu3 %v1647_v58 }
 0x12a   : > { %v802_v8 = vadd.f32 %v801_v28, %v737_v7  ;;  %1343 = vmatmul.f32.vlgmr.msra.gmra.mxu2 %v4142_v10 }
 0x12b   : > { %1721 = vmatpush.msra.mxu3 %v1645_v12 }
 0x12c   : > { %v3138_v43 = vpop.eup %3137  ;;  %v1029_v34 = vmul.f32 0.5, %v802_v8 }
 0x12d   : > { %v886_v9 = vpop.f32.mrf.mxu2  ;;  %v951_v16 = vpop.f32.mrf.mxu0  ;;  %v1091_v61 = vmul.f32 0.5, %v3138_v43  ;;  %1722 = vmatpush.msra.mxu3 %v1643_v3 }
 0x12e   : > { %3139 = vtanh.f32 %v1029_v34  ;;  %v887_v39 = vadd.f32 %v886_v9, %v822_v13  ;;  %v834_v13 = vadd.f32 %v4371_v41, %v4354_v30  ;;  %v1609_v34 = vld [vmem:[%s5194_s5 + $0xc0] sm:$0xff]  ;;  %v1610_v9 = vld [vmem:[%s5194_s5 + $0xc8] sm:$0xff]  ;;  %v1639_v41 = vld [vmem:[%s5194_s5 + $0x1b0] sm:$0xff] }
 0x12f   : > { %v4366_v57 = vadd.f32 0.5, %v1091_v61  ;;  %1723 = vmatpush.msra.mxu3 %v1641_v50  ;;  %1658 = vmatpush.msra.mxu1 %v1609_v34  ;;  %v1633_v50 = vld [vmem:[%s5194_s5 + $0x180] sm:$0xff] }
 0x130   : > { %v952_v24 = vadd.f32 %v951_v16, %v887_v39  ;;  %v1644_v16 = vld [vmem:[%s5194_s5 + $0x1d8] sm:$0xff]  ;;  %1788 = vmatpush.msrb.mxu2 %v1610_v9  ;;  %v1601_v9 = vld [vmem:[%s5194_s5 + $0x80] sm:$0xff] }
 0x131   : > { %1255 = vmatmul.f32.gmra.mxu1 %v4366_v57  ;;  %1852 = vmatpush.msrb.mxu0 %v1644_v16  ;;  %v1602_v16 = vld [vmem:[%s5194_s5 + $0x88] sm:$0xff] }
 0x132   : > { %v1000_v10 = vmul.f32 0.5, %v952_v24  ;;  %1346 = vmatmul.f32.gmra.mxu2 %v4159_v15  ;;  %v842_v24 = vpop.f32.mrf.mxu3  ;;  %1724 = vmatpush.msra.mxu3 %v1639_v41 }
 0x134   : > { %v3140_v31 = vpop.eup %3139  ;;  %3141 = vtanh.f32 %v1000_v10 }
 0x135   : > { %v889_v47 = vpop.f32.mrf.mxu2  ;;  %v954_v26 = vpop.f32.mrf.mxu0  ;;  %v1093_v60 = vmul.f32 0.5, %v3140_v31 }
 0x136   : > { %v890_v44 = vadd.f32 %v889_v47, %v825_v21  ;;  %v1607_v47 = vld [vmem:[%s5194_s5 + $0xb0] sm:$0xff] }
 0x137   : > { %v4383_v15 = vadd.f32 0.5, %v1093_v60  ;;  %v1642_v60 = vld [vmem:[%s5194_s5 + $0x1c8] sm:$0xff]  ;;  %1659 = vmatpush.msra.mxu1 %v1607_v47  ;;  %v1600_v47 = vld [vmem:[%s5194_s5 + $0x78] sm:$0xff] }
 0x138   : > { %v955_v49 = vadd.f32 %v954_v26, %v890_v44  ;;  %v1608_v26 = vld [vmem:[%s5194_s5 + $0xb8] sm:$0xff]  ;;  %1853 = vmatpush.msrb.mxu0 %v1642_v60 }
 0x139   : > { %1258 = vmatmul.f32.gmra.mxu1 %v4383_v15  ;;  %1789 = vmatpush.msrb.mxu2 %v1608_v26  ;;  %v1634_v26 = vld [vmem:[%s5194_s5 + $0x188] sm:$0xff] }
 0x13a   : > { %v3142_v20 = vpop.eup %3141  ;;  %v1002_v22 = vmul.f32 0.5, %v955_v49  ;;  %1349 = vmatmul.f32.gmra.mxu2 %v4176_v4  ;;  %1660 = vmatpush.msra.mxu1 %v1605_v63  ;;  %v1632_v63 = vld [vmem:[%s5194_s5 + $0x178] sm:$0xff] }
 0x13b   : > { %v1064_v2 = vmul.f32 0.5, %v3142_v20  ;;  %v1637_v20 = vld [vmem:[%s5194_s5 + $0x1a0] sm:$0xff] }
 0x13c   : > { %3143 = vtanh.f32 %v1002_v22  ;;  %1725 = vmatpush.msra.mxu3 %v1637_v20  ;;  %1661 = vmatpush.msra.mxu1 %v1603_v27 }
 0x13d   : > { %v892_v4 = vpop.f32.mrf.mxu2  ;;  %v957_v35 = vpop.f32.mrf.mxu0  ;;  %v1096_v11 = vadd.f32 0.5, %v1064_v2 }
 0x13e   : > { %v893_v56 = vadd.f32 %v892_v4, %v828_v59  ;;  %v845_v59 = vpop.f32.mrf.mxu3  ;;  %v1606_v4 = vld [vmem:[%s5194_s5 + $0xa8] sm:$0xff]  ;;  %1662 = vmatpush.msra.mxu1 %v1601_v9 }
 0x13f   : > { %1278 = vmatmul.f32.vlgmr.msrb.gmra.mxu3 %v1096_v11  ;;  %1408 = vmatmul.f32.vlgmr.msra.gmra.mxu0 %v1096_v11 }
 0x140   : > { %v958_v52 = vadd.f32 %v957_v35, %v893_v56  ;;  %v1640_v35 = vld [vmem:[%s5194_s5 + $0x1b8] sm:$0xff]  ;;  %1790 = vmatpush.msrb.mxu2 %v1606_v4 }
 0x141   : > { %1854 = vmatpush.msrb.mxu0 %v1640_v35 }
 0x142   : > { %v3144_v32 = vpop.eup %3143  ;;  %v1004_v54 = vmul.f32 0.5, %v958_v52  ;;  %1352 = vmatmul.f32.gmra.mxu2 %v4193_v37  ;;  %v1635_v52 = vld [vmem:[%s5194_s5 + $0x190] sm:$0xff] }
 0x143   : > { %v1066_v25 = vmul.f32 0.5, %v3144_v32  ;;  %1726 = vmatpush.msra.mxu3 %v1635_v52  ;;  %1791 = vmatpush.msrb.mxu2 %v1604_v45 }
 0x144   : > { %3145 = vtanh.f32 %v1004_v54 }
 0x145   : > { %v895_v37 = vpop.f32.mrf.mxu2  ;;  %v960_v28 = vpop.f32.mrf.mxu0  ;;  %v1098_v18 = vadd.f32 0.5, %v1066_v25  ;;  %v843_v25 = vadd.f32 %v842_v24, %v4354_v30  ;;  %1727 = vmatpush.msra.mxu3 %v1633_v50  ;;  %1792 = vmatpush.msrb.mxu2 %v1602_v16  ;;  %v1631_v24 = vld [vmem:[%s5194_s5 + $0x170] sm:$0xff] }
 0x146   : > { %v896_v5 = vadd.f32 %v895_v37, %v831_v17  ;;  %v848_v23 = vpop.f32.mrf.mxu3  ;;  %v1638_v37 = vld [vmem:[%s5194_s5 + $0x1a8] sm:$0xff] }
 0x147   : > { %1281 = vmatmul.f32.gmra.mxu3 %v1098_v18  ;;  %1411 = vmatmul.f32.gmra.mxu0 %v1098_v18 }
 0x148   : > { %v961_v36 = vadd.f32 %v960_v28, %v896_v5  ;;  %1855 = vmatpush.msrb.mxu0 %v1638_v37  ;;  %1728 = vmatpush.msra.mxu3 %v1631_v24 }
 0x149   : > { %1793 = vmatpush.msrb.mxu2 %v1600_v47 }
 0x14a   : > { %v3146_v7 = vpop.eup %3145  ;;  %v1006_v8 = vmul.f32 0.5, %v961_v36  ;;  %1355 = vmatmul.f32.gmra.mxu2 %v4210_v55 }
 0x14b   : > { %v1068_v43 = vmul.f32 0.5, %v3146_v7 }
 0x14c   : > { %3147 = vtanh.f32 %v1006_v8 }
 0x14d   : > { %v898_v61 = vpop.f32.mrf.mxu2  ;;  %v963_v39 = vpop.f32.mrf.mxu0  ;;  %v1100_v55 = vadd.f32 0.5, %v1068_v43 }
 0x14e   : > { %v899_v58 = vadd.f32 %v898_v61, %v834_v13  ;;  %v846_v13 = vadd.f32 %v845_v59, %v4354_v30  ;;  %v851_v34 = vpop.f32.mrf.mxu3  ;;  %v1636_v61 = vld [vmem:[%s5194_s5 + $0x198] sm:$0xff] }
 0x14f   : > { %1284 = vmatmul.f32.gmra.mxu3 %v1100_v55  ;;  %1414 = vmatmul.f32.gmra.mxu0 %v1100_v55 }
 0x150   : > { %v964_v10 = vadd.f32 %v963_v39, %v899_v58  ;;  %1856 = vmatpush.msrb.mxu0 %v1636_v61  ;;  %v1623_v61 = vld [vmem:[%s5194_s5 + $0x130] sm:$0xff] }
 0x152   : > { %v3148_v21 = vpop.eup %3147  ;;  %v1008_v31 = vmul.f32 0.5, %v964_v10  ;;  %1358 = vmatmul.f32.gmra.mxu2 %v4227_v14  ;;  %1857 = vmatpush.msrb.mxu0 %v1634_v26 }
 0x153   : > { %v1070_v38 = vmul.f32 0.5, %v3148_v21 }
 0x154   : > { %3149 = vtanh.f32 %v1008_v31  ;;  %v849_v31 = vadd.f32 %v848_v23, %v4354_v30  ;;  %1858 = vmatpush.msrb.mxu0 %v1632_v63  ;;  %v1596_v23 = vld [vmem:[%s5194_s5 + $0x58] sm:$0xff]  ;;  %v1214_v63 = vpop.f32.mrf.mxu1 }
 0x155   : > { %v901_v44 = vpop.f32.mrf.mxu2  ;;  %v966_v12 = vpop.f32.mrf.mxu0  ;;  %v1102_v14 = vadd.f32 0.5, %v1070_v38  ;;  %v1599_v38 = vld [vmem:[%s5194_s5 + $0x70] sm:$0xff] }
 0x156   : > { %v902_v49 = vadd.f32 %v901_v44, %v837_v46  ;;  %1663 = vmatpush.msra.mxu1 %v1599_v38 }
 0x157   : > { %1287 = vmatmul.f32.gmra.mxu3 %v1102_v14  ;;  %1417 = vmatmul.f32.gmra.mxu0 %v1102_v14  ;;  %v854_v14 = vpop.f32.mrf.mxu3 }
 0x158   : > { %v967_v22 = vadd.f32 %v966_v12, %v902_v49  ;;  %v1629_v49 = vld [vmem:[%s5194_s5 + $0x160] sm:$0xff] }
 0x159   : > { %1729 = vmatpush.msra.mxu3 %v1629_v49 }
 0x15a   : > { %v3150_v51 = vpop.eup %3149  ;;  %v1010_v2 = vmul.f32 0.5, %v967_v22  ;;  %1361 = vmatmul.f32.gmra.mxu2 %v4244_v48 }
 0x15b   : > { %v1072_v33 = vmul.f32 0.5, %v3150_v51  ;;  %v852_v51 = vadd.f32 %v851_v34, %v4354_v30 }
 0x15c   : > { %3151 = vtanh.f32 %v1010_v2 }
 0x15d   : > { %v904_v11 = vpop.f32.mrf.mxu2  ;;  %v969_v56 = vpop.f32.mrf.mxu0  ;;  %v1104_v48 = vadd.f32 0.5, %v1072_v33  ;;  %v1598_v33 = vld [vmem:[%s5194_s5 + $0x68] sm:$0xff] }
 0x15e   : > { %v905_v3 = vadd.f32 %v904_v11, %v840_v62  ;;  %v1597_v62 = vld [vmem:[%s5194_s5 + $0x60] sm:$0xff]  ;;  %1794 = vmatpush.msrb.mxu2 %v1598_v33 }
 0x15f   : > { %1290 = vmatmul.f32.gmra.mxu3 %v1104_v48  ;;  %1420 = vmatmul.f32.gmra.mxu0 %v1104_v48 }
 0x160   : > { %v970_v32 = vadd.f32 %v969_v56, %v905_v3  ;;  %1664 = vmatpush.msra.mxu1 %v1597_v62  ;;  %v1627_v56 = vld [vmem:[%s5194_s5 + $0x150] sm:$0xff]  ;;  %v857_v3 = vpop.f32.mrf.mxu3  ;;  %1795 = vmatpush.msrb.mxu2 %v1596_v23 }
 0x161   : > { %1730 = vmatpush.msra.mxu3 %v1627_v56  ;;  %v858_v50 = vadd.f32 %v857_v3, %v4354_v30 }
 0x162   : > { %v3152_v54 = vpop.eup %3151  ;;  %v1012_v17 = vmul.f32 0.5, %v970_v32  ;;  %1364 = vmatmul.f32.gmra.mxu2 %v4261_v40 }
 0x163   : > { %v1074_v1 = vmul.f32 0.5, %v3152_v54  ;;  %v855_v54 = vadd.f32 %v854_v14, %v4354_v30 }
 0x164   : > { %3153 = vtanh.f32 %v1012_v17 }
 0x165   : > { %v907_v28 = vpop.f32.mrf.mxu2  ;;  %v972_v18 = vpop.f32.mrf.mxu0  ;;  %v1106_v40 = vadd.f32 0.5, %v1074_v1  ;;  %v1630_v1 = vld [vmem:[%s5194_s5 + $0x168] sm:$0xff] }
 0x166   : > { %v908_v5 = vadd.f32 %v907_v28, %v843_v25  ;;  %v1595_v25 = vld [vmem:[%s5194_s5 + $0x50] sm:$0xff]  ;;  %1859 = vmatpush.msrb.mxu0 %v1630_v1  ;;  %v1625_v28 = vld [vmem:[%s5194_s5 + $0x140] sm:$0xff] }
 0x167   : > { %1293 = vmatmul.f32.gmra.mxu3 %v1106_v40  ;;  %1423 = vmatmul.f32.gmra.mxu0 %v1106_v40  ;;  %v1617_v1 = vld [vmem:[%s5194_s5 + $0x100] sm:$0xff] }
 0x168   : > { %v973_v36 = vadd.f32 %v972_v18, %v908_v5  ;;  %1665 = vmatpush.msra.mxu1 %v1595_v25  ;;  %1731 = vmatpush.msra.mxu3 %v1625_v28  ;;  %v1217_v25 = vpop.f32.mrf.mxu1  ;;  %v1587_v28 = vld [vmem:[%s5194_s5 + $0x10] sm:$0xff] }
 0x16a   : > { %v3154_v7 = vpop.eup %3153  ;;  %v1014_v8 = vmul.f32 0.5, %v973_v36  ;;  %1367 = vmatmul.f32.gmra.mxu2 %v4278_v53  ;;  %v860_v36 = vpop.f32.mrf.mxu3  ;;  %1732 = vmatpush.msra.mxu3 %v1623_v61 }
 0x16b   : > { %v1076_v43 = vmul.f32 0.5, %v3154_v7 }
 0x16c   : > { %3155 = vtanh.f32 %v1014_v8  ;;  %v1593_v8 = vld [vmem:[%s5194_s5 + $0x40] sm:$0xff] }
 0x16d   : > { %v910_v39 = vpop.f32.mrf.mxu2  ;;  %v975_v55 = vpop.f32.mrf.mxu0  ;;  %v1108_v53 = vadd.f32 0.5, %v1076_v43  ;;  %v1628_v43 = vld [vmem:[%s5194_s5 + $0x158] sm:$0xff]  ;;  %1666 = vmatpush.msra.mxu1 %v1593_v8 }
 0x16e   : > { %v911_v58 = vadd.f32 %v910_v39, %v846_v13  ;;  %v1594_v13 = vld [vmem:[%s5194_s5 + $0x48] sm:$0xff]  ;;  %1860 = vmatpush.msrb.mxu0 %v1628_v43  ;;  %v1591_v39 = vld [vmem:[%s5194_s5 + $0x30] sm:$0xff]  ;;  %v1191_v43 = vld [vmem:[%s5193_s4] sm:$0x3] }
 0x16f   : > { %1296 = vmatmul.f32.gmra.mxu3 %v1108_v53  ;;  %1426 = vmatmul.f32.gmra.mxu0 %v1108_v53 }
 0x170   : > { %v976_v41 = vadd.f32 %v975_v55, %v911_v58  ;;  %1796 = vmatpush.msrb.mxu2 %v1594_v13  ;;  %v1592_v55 = vld [vmem:[%s5194_s5 + $0x38] sm:$0xff]  ;;  %1667 = vmatpush.msra.mxu1 %v1591_v39  ;;  %v1626_v58 = vld [vmem:[%s5194_s5 + $0x148] sm:$0xff] }
 0x171   : > { %1861 = vmatpush.msrb.mxu0 %v1626_v58 }
 0x172   : > { %v3156_v10 = vpop.eup %3155  ;;  %v1016_v21 = vmul.f32 0.5, %v976_v41  ;;  %1370 = vmatmul.f32.gmra.mxu2 %v4298_v29 }
 0x173   : > { %v1078_v46 = vmul.f32 0.5, %v3156_v10  ;;  %1797 = vmatpush.msrb.mxu2 %v1592_v55  ;;  %v861_v10 = vadd.f32 %v860_v36, %v4354_v30 }
 0x174   : > { %3157 = vtanh.f32 %v1016_v21 }
 0x175   : > { %v913_v60 = vpop.f32.mrf.mxu2  ;;  %v978_v44 = vpop.f32.mrf.mxu0  ;;  %v1110_v12 = vadd.f32 0.5, %v1078_v46 }
 0x176   : > { %v914_v29 = vadd.f32 %v913_v60, %v849_v31  ;;  %v863_v31 = vpop.f32.mrf.mxu3  ;;  %v1621_v60 = vld [vmem:[%s5194_s5 + $0x120] sm:$0xff] }
 0x177   : > { %1299 = vmatmul.f32.gmra.mxu3 %v1110_v12  ;;  %1429 = vmatmul.f32.gmra.mxu0 %v1110_v12 }
 0x178   : > { %v979_v20 = vadd.f32 %v978_v44, %v914_v29  ;;  %v1589_v44 = vld [vmem:[%s5194_s5 + $0x20] sm:$0xff]  ;;  %1733 = vmatpush.msra.mxu3 %v1621_v60  ;;  %v1624_v29 = vld [vmem:[%s5194_s5 + $0x138] sm:$0xff] }
 0x179   : > { %1668 = vmatpush.msra.mxu1 %v1589_v44  ;;  %1862 = vmatpush.msrb.mxu0 %v1624_v29  ;;  %v2105_v29 = vld [vmem:[%s5196_s7 + $0x1f0] sm:$0xff] }
 0x17a   : > { %v3158_v22 = vpop.eup %3157  ;;  %v1018_v59 = vmul.f32 0.5, %v979_v20  ;;  %1373 = vmatmul.f32.gmra.mxu2 %v4316_v6  ;;  %v864_v20 = vadd.f32 %v863_v31, %v4354_v30 }
 0x17b   : > { %v1080_v2 = vmul.f32 0.5, %v3158_v22  ;;  %1669 = vmatpush.msra.mxu1 %v1587_v28 }
 0x17c   : > { %3159 = vtanh.f32 %v1018_v59 }
 0x17d   : > { %v916_v4 = vpop.f32.mrf.mxu2  ;;  %v981_v35 = vpop.f32.mrf.mxu0  ;;  %v1112_v11 = vadd.f32 0.5, %v1080_v2 }
 0x17e   : > { %v917_v6 = vadd.f32 %v916_v4, %v852_v51  ;;  %v866_v33 = vpop.f32.mrf.mxu3 }
 0x17f   : > { %1302 = vmatmul.f32.gmra.mxu3 %v1112_v11  ;;  %1432 = vmatmul.f32.gmra.mxu0 %v1112_v11 }
 0x180   : > { %v982_v48 = vadd.f32 %v981_v35, %v917_v6  ;;  %v867_v6 = vadd.f32 %v866_v33, %v4354_v30  ;;  %v1620_v30 = vld [vmem:[%s5194_s5 + $0x118] sm:$0xff] }
 0x182   : > { %v3160_v52 = vpop.eup %3159  ;;  %v1020_v32 = vmul.f32 0.5, %v982_v48  ;;  %1376 = vmatmul.f32.gmra.mxu2 %v4331_v0 }
 0x183   : > { %v1082_v17 = vmul.f32 0.5, %v3160_v52 }
 0x184   : > { %3161 = vtanh.f32 %v1020_v32  ;;  %v1622_v32 = vld [vmem:[%s5194_s5 + $0x128] sm:$0xff] }
 0x185   : > { %v919_v27 = vpop.f32.mrf.mxu2  ;;  %v984_v45 = vpop.f32.mrf.mxu0  ;;  %v1114_v37 = vadd.f32 0.5, %v1082_v17  ;;  %v1619_v17 = vld [vmem:[%s5194_s5 + $0x110] sm:$0xff]  ;;  %1863 = vmatpush.msrb.mxu0 %v1622_v32  ;;  %v2070_v32 = vld [vmem:[%s5196_s7 + $0xd8] sm:$0xff] }
 0x186   : > { %v920_v0 = vadd.f32 %v919_v27, %v855_v54  ;;  %1734 = vmatpush.msra.mxu3 %v1619_v17  ;;  %v1618_v27 = vld [vmem:[%s5194_s5 + $0x108] sm:$0xff] }
 0x187   : > { %1305 = vmatmul.f32.gmra.mxu3 %v1114_v37  ;;  %1435 = vmatmul.f32.gmra.mxu0 %v1114_v37 }
 0x188   : > { %v985_v18 = vadd.f32 %v984_v45, %v920_v0  ;;  %1864 = vmatpush.msrb.mxu0 %v1620_v30  ;;  %1735 = vmatpush.msra.mxu3 %v1617_v1 }
 0x18a   : > { %v3162_v40 = vpop.eup %3161  ;;  %v1022_v5 = vmul.f32 0.5, %v985_v18  ;;  %1379 = vmatmul.f32.gmra.mxu2 %v4346_v19  ;;  %1865 = vmatpush.msrb.mxu0 %v1618_v27  ;;  %v1588_v18 = vld [vmem:[%s5194_s5 + $0x18] sm:$0xff] }
 0x18b   : > { %v1084_v7 = vmul.f32 0.5, %v3162_v40  ;;  %v1585_v40 = vld [vmem:[%s5194_s5] sm:$0xff]  ;;  %2178 = vmatpush.msrb.mxu3 %v2105_v29 }
 0x18c   : > { %3163 = vtanh.f32 %v1022_v5  ;;  %v1586_v5 = vld [vmem:[%s5194_s5 + $0x8] sm:$0xff]  ;;  %1670 = vmatpush.msra.mxu1 %v1585_v40 }
 0x18d   : > { %v922_v34 = vpop.f32.mrf.mxu2  ;;  %v987_v9 = vpop.f32.mrf.mxu0  ;;  %v1116_v19 = vadd.f32 0.5, %v1084_v7 }
 0x18e   : > { %v923_v16 = vadd.f32 %v922_v34, %v858_v50  ;;  %v1220_v7 = vpop.f32.mrf.mxu1  ;;  %v4609_v34 = vperm.slane %v1191_v43, 1 }
 0x18f   : > { %1308 = vmatmul.f32.gmra.mxu3 %v1116_v19  ;;  %1438 = vmatmul.f32.gmra.mxu0 %v1116_v19 }
 0x190   : > { %v988_v53 = vadd.f32 %v987_v9, %v923_v16  ;;  %v4612_v16 = vperm.slane %v1191_v43, 0 }
 0x192   : > { %v3164_v24 = vpop.eup %3163  ;;  %v1024_v41 = vmul.f32 0.5, %v988_v53  ;;  %1382 = vmatmul.f32.gmra.mxu2 %v4358_v42  ;;  %v1590_v42 = vld [vmem:[%s5194_s5 + $0x28] sm:$0xff]  ;;  %v1215_v58 = vadd.f32 %v1214_v63, %v4612_v16 }
 0x193   : > { %v1086_v21 = vmul.f32 0.5, %v3164_v24  ;;  %1798 = vmatpush.msrb.mxu2 %v1590_v42  ;;  %v2074_v24 = vld [vmem:[%s5196_s7 + $0xf8] sm:$0xff] }
 0x194   : > { %3165 = vtanh.f32 %v1024_v41 }
 0x195   : > { %v925_v46 = vpop.f32.mrf.mxu2  ;;  %v990_v38 = vpop.f32.mrf.mxu0  ;;  %v1118_v47 = vadd.f32 0.5, %v1086_v21  ;;  %1799 = vmatpush.msrb.mxu2 %v1588_v18 }
 0x196   : > { %v926_v26 = vadd.f32 %v925_v46, %v861_v10  ;;  %v4614_v55 = vpop.f32.mrf.mxu1 }
 0x197   : > { %1311 = vmatmul.f32.gmra.mxu3 %v1118_v47  ;;  %1441 = vmatmul.f32.gmra.mxu0 %v1118_v47 }
 0x198   : > { %v991_v12 = vadd.f32 %v990_v38, %v926_v26  ;;  %1800 = vmatpush.msrb.mxu2 %v1586_v5  ;;  %v2071_v5 = vld [vmem:[%s5196_s7 + $0xe0] sm:$0xff] }
 0x19a   : > { %v3166_v14 = vpop.eup %3165  ;;  %v1026_v49 = vmul.f32 0.5, %v991_v12  ;;  %1385 = vmatmul.f32.gmra.mxu2 %v4366_v57  ;;  %v1218_v12 = vadd.f32 %v1217_v25, %v4612_v16 }
 0x19b   : > { %v1088_v22 = vmul.f32 0.5, %v3166_v14  ;;  %2243 = vmatpush.msra.mxu2 %v2074_v24  ;;  %v2072_v14 = vld [vmem:[%s5196_s7 + $0xe8] sm:$0xff] }
 0x19c   : > { %3167 = vtanh.f32 %v1026_v49  ;;  %v2106_v49 = vld [vmem:[%s5196_s7 + $0x1f8] sm:$0xff] }
 0x19d   : > { %v928_v59 = vpop.f32.mrf.mxu2  ;;  %v993_v51 = vpop.f32.mrf.mxu0  ;;  %v1120_v2 = vadd.f32 0.5, %v1088_v22  ;;  %2244 = vmatpush.msra.mxu2 %v2072_v14  ;;  %2308 = vmatpush.msra.mxu0 %v2106_v49  ;;  %v2100_v49 = vld [vmem:[%s5196_s7 + $0x1c8] sm:$0xff] }
 0x19e   : > { %v929_v62 = vadd.f32 %v928_v59, %v864_v20  ;;  %v4621_v44 = vpop.f32.mrf.mxu1 }
 0x19f   : > { %1314 = vmatmul.f32.gmra.mxu3 %v1120_v2  ;;  %1444 = vmatmul.f32.gmra.mxu0 %v1120_v2 }
 0x1a0   : > { %v994_v4 = vadd.f32 %v993_v51, %v929_v62  ;;  %2245 = vmatpush.msra.mxu2 %v2070_v32 }
 0x1a2   : > { %v3168_v35 = vpop.eup %3167  ;;  %v1028_v11 = vmul.f32 0.5, %v994_v4  ;;  %1388 = vmatmul.f32.gmra.mxu2 %v4383_v15 }
 0x1a3   : > { %v1090_v57 = vmul.f32 0.5, %v3168_v35 }
 0x1a4   : > { %3169 = vtanh.f32 %v1028_v11 }
 0x1a5   : > { %v931_v56 = vpop.f32.mrf.mxu2  ;;  %v996_v48 = vpop.f32.mrf.mxu0  ;;  %v1122_v3 = vadd.f32 0.5, %v1090_v57  ;;  %v2073_v57 = vld [vmem:[%s5196_s7 + $0xf0] sm:$0xff] }
 0x1a6   : > { %v932_v52 = vadd.f32 %v931_v56, %v867_v6  ;;  %2113 = vmatpush.msrb.mxu1 %v2073_v57 }
 0x1a7   : > { %1317 = vmatmul.f32.gmra.mxu3 %v1122_v3  ;;  %1447 = vmatmul.f32.gmra.mxu0 %v1122_v3  ;;  %v1221_v3 = vadd.f32 %v1220_v7, %v4612_v16  ;;  %v1224_v7 = vadd.f32 %v4614_v55, %v4612_v16 }
 0x1a8   : > { %v997_v54 = vadd.f32 %v996_v48, %v932_v52  ;;  %v2103_v52 = vld [vmem:[%s5196_s7 + $0x1e0] sm:$0xff]  ;;  %2114 = vmatpush.msrb.mxu1 %v2071_v5 }
 0x1a9   : > { %2179 = vmatpush.msrb.mxu3 %v2103_v52 }
 0x1aa   : > { %v3170_v15 = vpop.eup %3169  ;;  %v1030_v23 = vmul.f32 0.5, %v997_v54  ;;  %v4644_v54 = vpop.f32.mrf.mxu1 }
 0x1ab   : > { %v1092_v45 = vmul.f32 0.5, %v3170_v15  ;;  %v2104_v15 = vld [vmem:[%s5196_s7 + $0x1e8] sm:$0xff] }
 0x1ac   : > { %3171 = vtanh.f32 %v1030_v23  ;;  %2309 = vmatpush.msra.mxu0 %v2104_v15 }
 0x1ad   : > { %v1344_v37 = vpop.f32.mrf.mxu2  ;;  %v1124_v0 = vadd.f32 0.5, %v1092_v45 }
 0x1ae   : > { %v1345_v9 = vadd.f32 %v1344_v37, %v4609_v34 }
 0x1af   : > { %1320 = vmatmul.f32.gmra.mxu3 %v1124_v0  ;;  %1450 = vmatmul.f32.gmra.mxu0 %v1124_v0 }
 0x1b2   : > { %v3172_v50 = vpop.eup %3171  ;;  %v4665_v55 = vpop.f32.mrf.mxu1 }
 0x1b3   : > { %v1094_v36 = vmul.f32 0.5, %v3172_v50 }
 0x1b5   : > { %v1347_v8 = vpop.f32.mrf.mxu2  ;;  %v1126_v13 = vadd.f32 0.5, %v1094_v36 }
 0x1b6   : > { %v1348_v10 = vadd.f32 %v1347_v8, %v4609_v34  ;;  %v2101_v8 = vld [vmem:[%s5196_s7 + $0x1d0] sm:$0xff] }
 0x1b7   : > { %1323 = vmatmul.f32.gmra.mxu3 %v1126_v13  ;;  %1453 = vmatmul.f32.gmra.mxu0 %v1126_v13  ;;  %v2068_v13 = vld [vmem:[%s5196_s7 + $0xc8] sm:$0xff] }
 0x1b8   : > { %2180 = vmatpush.msrb.mxu3 %v2101_v8  ;;  %2246 = vmatpush.msra.mxu2 %v2068_v13 }
 0x1bc   : > { %v1409_v19 = vpop.f32.mrf.mxu0 }
 0x1bd   : > { %v1410_v61 = vadd.f32 %v1409_v19, %v1345_v9  ;;  %v1350_v39 = vpop.f32.mrf.mxu2  ;;  %v2102_v19 = vld [vmem:[%s5196_s7 + $0x1d8] sm:$0xff] }
 0x1be   : > { %v1351_v59 = vadd.f32 %v1350_v39, %v4609_v34  ;;  %2310 = vmatpush.msra.mxu0 %v2102_v19 }
 0x1bf   : > { %v1458_v53 = vmul.f32 0.5, %v1410_v61 }
 0x1c0   : > { %2311 = vmatpush.msra.mxu0 %v2100_v49 }
 0x1c1   : > { %3173 = vtanh.f32 %v1458_v53 }
 0x1c2   : > { %v1279_v41 = vpop.f32.mrf.mxu3 }
 0x1c3   : > { %v1280_v21 = vadd.f32 %v1279_v41, %v1215_v58 }
 0x1c4   : > { %v1412_v31 = vpop.f32.mrf.mxu0 }
 0x1c5   : > { %v1457_v46 = vmul.f32 0.5, %v1280_v21  ;;  %v1413_v38 = vadd.f32 %v1412_v31, %v1348_v10  ;;  %v1353_v47 = vpop.f32.mrf.mxu2 }
 0x1c6   : > { %v1354_v25 = vadd.f32 %v1353_v47, %v4609_v34 }
 0x1c7   : > { %v3174_v26 = vpop.eup %3173  ;;  %3175 = vtanh.f32 %v1457_v46  ;;  %v1460_v60 = vmul.f32 0.5, %v1413_v38  ;;  %v2069_v38 = vld [vmem:[%s5196_s7 + $0xd0] sm:$0xff] }
 0x1c8   : > { %v1522_v42 = vmul.f32 0.5, %v3174_v26  ;;  %2115 = vmatpush.msrb.mxu1 %v2069_v38 }
 0x1c9   : > { %3177 = vtanh.f32 %v1460_v60  ;;  %v1227_v60 = vadd.f32 %v4621_v44, %v4612_v16 }
 0x1ca   : > { %v1554_v20 = vadd.f32 0.5, %v1522_v42  ;;  %v1282_v22 = vpop.f32.mrf.mxu3  ;;  %v2099_v42 = vld [vmem:[%s5196_s7 + $0x1c0] sm:$0xff] }
 0x1cb   : > { %v1283_v51 = vadd.f32 %v1282_v22, %v1218_v12  ;;  %v2066_v12 = vld [vmem:[%s5196_s7 + $0xb8] sm:$0xff]  ;;  %2181 = vmatpush.msrb.mxu3 %v2099_v42 }
 0x1cc   : > { %v1415_v2 = vpop.f32.mrf.mxu0  ;;  %1736 = vmatmul.f32.vlgmr.msra.gmra.mxu3 %v1554_v20  ;;  %1866 = vmatmul.f32.vlgmr.msrb.gmra.mxu0 %v1554_v20 }
 0x1cd   : > { %v3176_v62 = vpop.eup %3175  ;;  %v1459_v33 = vmul.f32 0.5, %v1283_v51  ;;  %v1416_v63 = vadd.f32 %v1415_v2, %v1351_v59  ;;  %v1356_v4 = vpop.f32.mrf.mxu2  ;;  %2247 = vmatpush.msra.mxu2 %v2066_v12 }
 0x1ce   : > { %v1521_v35 = vmul.f32 0.5, %v3176_v62  ;;  %v1357_v61 = vadd.f32 %v1356_v4, %v4609_v34 }
 0x1cf   : > { %v3178_v11 = vpop.eup %3177  ;;  %3179 = vtanh.f32 %v1459_v33  ;;  %v1462_v6 = vmul.f32 0.5, %v1416_v63  ;;  %v4682_v33 = vpop.f32.mrf.mxu1 }
 0x1d0   : > { %v1553_v56 = vadd.f32 0.5, %v1521_v35  ;;  %v1524_v48 = vmul.f32 0.5, %v3178_v11  ;;  %v2067_v11 = vld [vmem:[%s5196_s7 + $0xc0] sm:$0xff]  ;;  %v1236_v38 = vadd.f32 %v4682_v33, %v4612_v16 }
 0x1d1   : > { %3181 = vtanh.f32 %v1462_v6  ;;  %2116 = vmatpush.msrb.mxu1 %v2067_v11 }
 0x1d2   : > { %v1285_v17 = vpop.f32.mrf.mxu3  ;;  %1671 = vmatmul.f32.vlgmr.msra.gmra.mxu1 %v1553_v56  ;;  %1801 = vmatmul.f32.vlgmr.msrb.gmra.mxu2 %v1553_v56  ;;  %v1556_v30 = vadd.f32 0.5, %v1524_v48  ;;  %v1230_v56 = vadd.f32 %v4644_v54, %v4612_v16  ;;  %v2097_v48 = vld [vmem:[%s5196_s7 + $0x1b0] sm:$0xff] }
 0x1d3   : > { %v1286_v23 = vadd.f32 %v1285_v17, %v1221_v3  ;;  %v2064_v3 = vld [vmem:[%s5196_s7 + $0xa8] sm:$0xff]  ;;  %v2098_v17 = vld [vmem:[%s5196_s7 + $0x1b8] sm:$0xff]  ;;  %2182 = vmatpush.msrb.mxu3 %v2097_v48 }
 0x1d4   : > { %v1418_v1 = vpop.f32.mrf.mxu0  ;;  %1739 = vmatmul.f32.gmra.mxu3 %v1556_v30  ;;  %1869 = vmatmul.f32.gmra.mxu0 %v1556_v30 }
 0x1d5   : > { %v3180_v27 = vpop.eup %3179  ;;  %v1461_v45 = vmul.f32 0.5, %v1286_v23  ;;  %v1419_v37 = vadd.f32 %v1418_v1, %v1354_v25  ;;  %v1359_v0 = vpop.f32.mrf.mxu2  ;;  %2248 = vmatpush.msra.mxu2 %v2064_v3  ;;  %2312 = vmatpush.msra.mxu0 %v2098_v17  ;;  %v2092_v3 = vld [vmem:[%s5196_s7 + $0x188] sm:$0xff] }
 0x1d6   : > { %v1523_v28 = vmul.f32 0.5, %v3180_v27  ;;  %v1360_v20 = vadd.f32 %v1359_v0, %v4609_v34 }
 0x1d7   : > { %v3182_v18 = vpop.eup %3181  ;;  %3183 = vtanh.f32 %v1461_v45  ;;  %v1464_v40 = vmul.f32 0.5, %v1419_v37 }
 0x1d8   : > { %v1555_v50 = vadd.f32 0.5, %v1523_v28  ;;  %v1526_v36 = vmul.f32 0.5, %v3182_v18  ;;  %v2065_v28 = vld [vmem:[%s5196_s7 + $0xb0] sm:$0xff]  ;;  %v4702_v18 = vpop.f32.mrf.mxu1 }
 0x1d9   : > { %3185 = vtanh.f32 %v1464_v40  ;;  %2117 = vmatpush.msrb.mxu1 %v2065_v28  ;;  %v1239_v11 = vadd.f32 %v4702_v18, %v4612_v16 }
 0x1da   : > { %v1288_v43 = vpop.f32.mrf.mxu3  ;;  %1674 = vmatmul.f32.gmra.mxu1 %v1555_v50  ;;  %1804 = vmatmul.f32.gmra.mxu2 %v1555_v50  ;;  %v1558_v9 = vadd.f32 0.5, %v1526_v36  ;;  %v1233_v50 = vadd.f32 %v4665_v55, %v4612_v16  ;;  %v2095_v36 = vld [vmem:[%s5196_s7 + $0x1a0] sm:$0xff] }
 0x1db   : > { %v1289_v39 = vadd.f32 %v1288_v43, %v1224_v7  ;;  %v2062_v7 = vld [vmem:[%s5196_s7 + $0x98] sm:$0xff]  ;;  %v2096_v43 = vld [vmem:[%s5196_s7 + $0x1a8] sm:$0xff]  ;;  %2183 = vmatpush.msrb.mxu3 %v2095_v36 }
 0x1dc   : > { %v1421_v53 = vpop.f32.mrf.mxu0  ;;  %1742 = vmatmul.f32.gmra.mxu3 %v1558_v9  ;;  %1872 = vmatmul.f32.gmra.mxu0 %v1558_v9 }
 0x1dd   : > { %v3184_v58 = vpop.eup %3183  ;;  %v1463_v24 = vmul.f32 0.5, %v1289_v39  ;;  %v1422_v41 = vadd.f32 %v1421_v53, %v1357_v61  ;;  %v1362_v10 = vpop.f32.mrf.mxu2  ;;  %2249 = vmatpush.msra.mxu2 %v2062_v7  ;;  %2313 = vmatpush.msra.mxu0 %v2096_v43  ;;  %v2090_v7 = vld [vmem:[%s5196_s7 + $0x178] sm:$0xff] }
 0x1de   : > { %v1525_v21 = vmul.f32 0.5, %v3184_v58  ;;  %v1363_v30 = vadd.f32 %v1362_v10, %v4609_v34 }
 0x1df   : > { %v3186_v31 = vpop.eup %3185  ;;  %3187 = vtanh.f32 %v1463_v24  ;;  %v1466_v46 = vmul.f32 0.5, %v1422_v41 }
 0x1e0   : > { %v1557_v47 = vadd.f32 0.5, %v1525_v21  ;;  %v1528_v26 = vmul.f32 0.5, %v3186_v31  ;;  %v2063_v21 = vld [vmem:[%s5196_s7 + $0xa0] sm:$0xff] }
 0x1e1   : > { %3189 = vtanh.f32 %v1466_v46  ;;  %2118 = vmatpush.msrb.mxu1 %v2063_v21 }
 0x1e2   : > { %v1291_v29 = vpop.f32.mrf.mxu3  ;;  %1677 = vmatmul.f32.gmra.mxu1 %v1557_v47  ;;  %1807 = vmatmul.f32.gmra.mxu2 %v1557_v47  ;;  %v1560_v14 = vadd.f32 0.5, %v1528_v26  ;;  %v2093_v47 = vld [vmem:[%s5196_s7 + $0x190] sm:$0xff]  ;;  %v2060_v26 = vld [vmem:[%s5196_s7 + $0x88] sm:$0xff] }
 0x1e3   : > { %v1292_v44 = vadd.f32 %v1291_v29, %v1227_v60  ;;  %v1241_v60 = vpop.f32.mrf.mxu1  ;;  %v2094_v29 = vld [vmem:[%s5196_s7 + $0x198] sm:$0xff]  ;;  %2184 = vmatpush.msrb.mxu3 %v2093_v47  ;;  %2250 = vmatpush.msra.mxu2 %v2060_v26 }
 0x1e4   : > { %v1424_v22 = vpop.f32.mrf.mxu0  ;;  %1745 = vmatmul.f32.gmra.mxu3 %v1560_v14  ;;  %1875 = vmatmul.f32.gmra.mxu0 %v1560_v14  ;;  %v1242_v18 = vadd.f32 %v1241_v60, %v4612_v16  ;;  %v2088_v60 = vld [vmem:[%s5196_s7 + $0x168] sm:$0xff] }
 0x1e5   : > { %v3188_v59 = vpop.eup %3187  ;;  %v1465_v51 = vmul.f32 0.5, %v1292_v44  ;;  %v1425_v2 = vadd.f32 %v1424_v22, %v1360_v20  ;;  %v1365_v62 = vpop.f32.mrf.mxu2  ;;  %2314 = vmatpush.msra.mxu0 %v2094_v29 }
 0x1e6   : > { %v1527_v63 = vmul.f32 0.5, %v3188_v59  ;;  %v1366_v9 = vadd.f32 %v1365_v62, %v4609_v34 }
 0x1e7   : > { %v3190_v4 = vpop.eup %3189  ;;  %3191 = vtanh.f32 %v1465_v51  ;;  %v1468_v35 = vmul.f32 0.5, %v1425_v2  ;;  %2315 = vmatpush.msra.mxu0 %v2092_v3 }
 0x1e8   : > { %v1559_v6 = vadd.f32 0.5, %v1527_v63  ;;  %v1530_v57 = vmul.f32 0.5, %v3190_v4  ;;  %v2061_v63 = vld [vmem:[%s5196_s7 + $0x90] sm:$0xff] }
 0x1e9   : > { %3193 = vtanh.f32 %v1468_v35  ;;  %2119 = vmatpush.msrb.mxu1 %v2061_v63  ;;  %2316 = vmatpush.msra.mxu0 %v2090_v7 }
 0x1ea   : > { %v1294_v52 = vpop.f32.mrf.mxu3  ;;  %1680 = vmatmul.f32.gmra.mxu1 %v1559_v6  ;;  %1810 = vmatmul.f32.gmra.mxu2 %v1559_v6  ;;  %v1562_v32 = vadd.f32 0.5, %v1530_v57  ;;  %v2091_v6 = vld [vmem:[%s5196_s7 + $0x180] sm:$0xff]  ;;  %v2058_v57 = vld [vmem:[%s5196_s7 + $0x78] sm:$0xff] }
 0x1eb   : > { %v1295_v54 = vadd.f32 %v1294_v52, %v1230_v56  ;;  %2185 = vmatpush.msrb.mxu3 %v2091_v6  ;;  %2251 = vmatpush.msra.mxu2 %v2058_v57  ;;  %v1244_v17 = vpop.f32.mrf.mxu1  ;;  %v2086_v57 = vld [vmem:[%s5196_s7 + $0x158] sm:$0xff] }
 0x1ec   : > { %v1427_v15 = vpop.f32.mrf.mxu0  ;;  %1748 = vmatmul.f32.gmra.mxu3 %v1562_v32  ;;  %1878 = vmatmul.f32.gmra.mxu0 %v1562_v32  ;;  %v1245_v21 = vadd.f32 %v1244_v17, %v4612_v16 }
 0x1ed   : > { %v3192_v25 = vpop.eup %3191  ;;  %v1467_v23 = vmul.f32 0.5, %v1295_v54  ;;  %v1428_v1 = vadd.f32 %v1427_v15, %v1363_v30  ;;  %v1368_v27 = vpop.f32.mrf.mxu2  ;;  %2317 = vmatpush.msra.mxu0 %v2088_v60 }
 0x1ee   : > { %v1529_v45 = vmul.f32 0.5, %v3192_v25  ;;  %v1369_v14 = vadd.f32 %v1368_v27, %v4609_v34 }
 0x1ef   : > { %v3194_v37 = vpop.eup %3193  ;;  %3195 = vtanh.f32 %v1467_v23  ;;  %v1470_v0 = vmul.f32 0.5, %v1428_v1  ;;  %2318 = vmatpush.msra.mxu0 %v2086_v57 }
 0x1f0   : > { %v1561_v40 = vadd.f32 0.5, %v1529_v45  ;;  %v1532_v5 = vmul.f32 0.5, %v3194_v37  ;;  %v2059_v45 = vld [vmem:[%s5196_s7 + $0x80] sm:$0xff] }
 0x1f1   : > { %3197 = vtanh.f32 %v1470_v0  ;;  %2120 = vmatpush.msrb.mxu1 %v2059_v45 }
 0x1f2   : > { %v1297_v8 = vpop.f32.mrf.mxu3  ;;  %1683 = vmatmul.f32.gmra.mxu1 %v1561_v40  ;;  %1813 = vmatmul.f32.gmra.mxu2 %v1561_v40  ;;  %v1564_v13 = vadd.f32 0.5, %v1532_v5  ;;  %v2089_v40 = vld [vmem:[%s5196_s7 + $0x170] sm:$0xff]  ;;  %v2056_v5 = vld [vmem:[%s5196_s7 + $0x68] sm:$0xff] }
 0x1f3   : > { %v1298_v19 = vadd.f32 %v1297_v8, %v1233_v50  ;;  %2186 = vmatpush.msrb.mxu3 %v2089_v40  ;;  %2252 = vmatpush.msra.mxu2 %v2056_v5 }
 0x1f4   : > { %v1430_v61 = vpop.f32.mrf.mxu0  ;;  %1751 = vmatmul.f32.gmra.mxu3 %v1564_v13  ;;  %1881 = vmatmul.f32.gmra.mxu0 %v1564_v13 }
 0x1f5   : > { %v3196_v39 = vpop.eup %3195  ;;  %v1469_v55 = vmul.f32 0.5, %v1298_v19  ;;  %v1431_v53 = vadd.f32 %v1430_v61, %v1366_v9  ;;  %v1371_v58 = vpop.f32.mrf.mxu2 }
 0x1f6   : > { %v1531_v24 = vmul.f32 0.5, %v3196_v39  ;;  %v1372_v52 = vadd.f32 %v1371_v58, %v4609_v34  ;;  %v1247_v39 = vpop.f32.mrf.mxu1 }
 0x1f7   : > { %v3198_v41 = vpop.eup %3197  ;;  %3199 = vtanh.f32 %v1469_v55  ;;  %v1472_v10 = vmul.f32 0.5, %v1431_v53  ;;  %v1248_v63 = vadd.f32 %v1247_v39, %v4612_v16 }
 0x1f8   : > { %v1563_v31 = vadd.f32 0.5, %v1531_v24  ;;  %v1534_v46 = vmul.f32 0.5, %v3198_v41  ;;  %v2057_v24 = vld [vmem:[%s5196_s7 + $0x70] sm:$0xff] }
 0x1f9   : > { %3201 = vtanh.f32 %v1472_v10  ;;  %2121 = vmatpush.msrb.mxu1 %v2057_v24 }
 0x1fa   : > { %v1300_v42 = vpop.f32.mrf.mxu3  ;;  %1686 = vmatmul.f32.gmra.mxu1 %v1563_v31  ;;  %1816 = vmatmul.f32.gmra.mxu2 %v1563_v31  ;;  %v1566_v12 = vadd.f32 0.5, %v1534_v46  ;;  %v2087_v31 = vld [vmem:[%s5196_s7 + $0x160] sm:$0xff]  ;;  %v2054_v46 = vld [vmem:[%s5196_s7 + $0x58] sm:$0xff] }
 0x1fb   : > { %v1301_v49 = vadd.f32 %v1300_v42, %v1236_v38  ;;  %2187 = vmatpush.msrb.mxu3 %v2087_v31  ;;  %2253 = vmatpush.msra.mxu2 %v2054_v46 }
 0x1fc   : > { %v1433_v20 = vpop.f32.mrf.mxu0  ;;  %1754 = vmatmul.f32.gmra.mxu3 %v1566_v12  ;;  %1884 = vmatmul.f32.gmra.mxu0 %v1566_v12 }
 0x1fd   : > { %v3200_v44 = vpop.eup %3199  ;;  %v1471_v22 = vmul.f32 0.5, %v1301_v49  ;;  %v1434_v59 = vadd.f32 %v1433_v20, %v1369_v14  ;;  %v1374_v51 = vpop.f32.mrf.mxu2 }
 0x1fe   : > { %v1533_v2 = vmul.f32 0.5, %v3200_v44  ;;  %v1375_v8 = vadd.f32 %v1374_v51, %v4609_v34  ;;  %v2055_v51 = vld [vmem:[%s5196_s7 + $0x60] sm:$0xff] }
 0x1ff   : > { %v3202_v62 = vpop.eup %3201  ;;  %3203 = vtanh.f32 %v1471_v22  ;;  %v1474_v33 = vmul.f32 0.5, %v1434_v59  ;;  %2122 = vmatpush.msrb.mxu1 %v2055_v51 }
 0x200   : > { %v1565_v4 = vadd.f32 0.5, %v1533_v2  ;;  %v1536_v35 = vmul.f32 0.5, %v3202_v62  ;;  %v1250_v2 = vpop.f32.mrf.mxu1 }
 0x201   : > { %3205 = vtanh.f32 %v1474_v33 }
 0x202   : > { %v1303_v56 = vpop.f32.mrf.mxu3  ;;  %1689 = vmatmul.f32.gmra.mxu1 %v1565_v4  ;;  %1819 = vmatmul.f32.gmra.mxu2 %v1565_v4  ;;  %v1568_v48 = vadd.f32 0.5, %v1536_v35  ;;  %v2085_v4 = vld [vmem:[%s5196_s7 + $0x150] sm:$0xff]  ;;  %v2052_v35 = vld [vmem:[%s5196_s7 + $0x48] sm:$0xff] }
 0x203   : > { %v1304_v32 = vadd.f32 %v1303_v56, %v1239_v11  ;;  %2188 = vmatpush.msrb.mxu3 %v2085_v4  ;;  %2254 = vmatpush.msra.mxu2 %v2052_v35 }
 0x204   : > { %v1436_v30 = vpop.f32.mrf.mxu0  ;;  %1757 = vmatmul.f32.gmra.mxu3 %v1568_v48  ;;  %1887 = vmatmul.f32.gmra.mxu0 %v1568_v48 }
 0x205   : > { %v3204_v54 = vpop.eup %3203  ;;  %v1473_v15 = vmul.f32 0.5, %v1304_v32  ;;  %v1437_v25 = vadd.f32 %v1436_v30, %v1372_v52  ;;  %v1377_v37 = vpop.f32.mrf.mxu2 }
 0x206   : > { %v1535_v23 = vmul.f32 0.5, %v3204_v54  ;;  %v1378_v42 = vadd.f32 %v1377_v37, %v4609_v34 }
 0x207   : > { %v3206_v1 = vpop.eup %3205  ;;  %3207 = vtanh.f32 %v1473_v15  ;;  %v1476_v27 = vmul.f32 0.5, %v1437_v25 }
 0x208   : > { %v1567_v0 = vadd.f32 0.5, %v1535_v23  ;;  %v1538_v28 = vmul.f32 0.5, %v3206_v1  ;;  %v2053_v23 = vld [vmem:[%s5196_s7 + $0x50] sm:$0xff]  ;;  %v2083_v1 = vld [vmem:[%s5196_s7 + $0x140] sm:$0xff] }
 0x209   : > { %3209 = vtanh.f32 %v1476_v27  ;;  %v2050_v27 = vld [vmem:[%s5196_s7 + $0x38] sm:$0xff]  ;;  %2123 = vmatpush.msrb.mxu1 %v2053_v23  ;;  %2189 = vmatpush.msrb.mxu3 %v2083_v1 }
 0x20a   : > { %v1306_v50 = vpop.f32.mrf.mxu3  ;;  %1692 = vmatmul.f32.gmra.mxu1 %v1567_v0  ;;  %1822 = vmatmul.f32.gmra.mxu2 %v1567_v0  ;;  %v1570_v36 = vadd.f32 0.5, %v1538_v28  ;;  %v2084_v0 = vld [vmem:[%s5196_s7 + $0x148] sm:$0xff]  ;;  %v1251_v28 = vadd.f32 %v1250_v2, %v4612_v16 }
 0x20b   : > { %v1307_v13 = vadd.f32 %v1306_v50, %v1242_v18  ;;  %2255 = vmatpush.msra.mxu2 %v2050_v27  ;;  %2319 = vmatpush.msra.mxu0 %v2084_v0  ;;  %v1253_v18 = vpop.f32.mrf.mxu1  ;;  %v2051_v50 = vld [vmem:[%s5196_s7 + $0x40] sm:$0xff]  ;;  %v2046_v27 = vld [vmem:[%s5196_s7 + $0x18] sm:$0xff] }
 0x20c   : > { %v1439_v43 = vpop.f32.mrf.mxu0  ;;  %1760 = vmatmul.f32.gmra.mxu3 %v1570_v36  ;;  %1890 = vmatmul.f32.gmra.mxu0 %v1570_v36  ;;  %v2079_v0 = vld [vmem:[%s5196_s7 + $0x120] sm:$0xff] }
 0x20d   : > { %v3208_v9 = vpop.eup %3207  ;;  %v1475_v19 = vmul.f32 0.5, %v1307_v13  ;;  %v1440_v61 = vadd.f32 %v1439_v43, %v1375_v8  ;;  %v1380_v38 = vpop.f32.mrf.mxu2  ;;  %2124 = vmatpush.msrb.mxu1 %v2051_v50  ;;  %v2081_v13 = vld [vmem:[%s5196_s7 + $0x130] sm:$0xff]  ;;  %v2043_v50 = vld [vmem:[%s5196_s7] sm:$0xff] }
 0x20e   : > { %v1537_v55 = vmul.f32 0.5, %v3208_v9  ;;  %v1381_v56 = vadd.f32 %v1380_v38, %v4609_v34  ;;  %2190 = vmatpush.msrb.mxu3 %v2081_v13  ;;  %v2049_v38 = vld [vmem:[%s5196_s7 + $0x30] sm:$0xff] }
 0x20f   : > { %v3210_v53 = vpop.eup %3209  ;;  %3211 = vtanh.f32 %v1475_v19  ;;  %v1478_v58 = vmul.f32 0.5, %v1440_v61  ;;  %2125 = vmatpush.msrb.mxu1 %v2049_v38 }
 0x210   : > { %v1569_v41 = vadd.f32 0.5, %v1537_v55  ;;  %v1540_v10 = vmul.f32 0.5, %v3210_v53  ;;  %2191 = vmatpush.msrb.mxu3 %v2079_v0 }
 0x211   : > { %3213 = vtanh.f32 %v1478_v58 }
 0x212   : > { %v1309_v47 = vpop.f32.mrf.mxu3  ;;  %1695 = vmatmul.f32.gmra.mxu1 %v1569_v41  ;;  %1825 = vmatmul.f32.gmra.mxu2 %v1569_v41  ;;  %v1572_v26 = vadd.f32 0.5, %v1540_v10  ;;  %v1254_v41 = vadd.f32 %v1253_v18, %v4612_v16  ;;  %v2048_v10 = vld [vmem:[%s5196_s7 + $0x28] sm:$0xff] }
 0x213   : > { %v1310_v12 = vadd.f32 %v1309_v47, %v1245_v21  ;;  %v2082_v21 = vld [vmem:[%s5196_s7 + $0x138] sm:$0xff]  ;;  %2256 = vmatpush.msra.mxu2 %v2048_v10  ;;  %v1256_v60 = vpop.f32.mrf.mxu1  ;;  %v2044_v18 = vld [vmem:[%s5196_s7 + $0x8] sm:$0xff] }
 0x214   : > { %v1442_v29 = vpop.f32.mrf.mxu0  ;;  %1763 = vmatmul.f32.gmra.mxu3 %v1572_v26  ;;  %1893 = vmatmul.f32.gmra.mxu0 %v1572_v26  ;;  %v1257_v2 = vadd.f32 %v1256_v60, %v4612_v16 }
 0x215   : > { %v3212_v14 = vpop.eup %3211  ;;  %v1477_v49 = vmul.f32 0.5, %v1310_v12  ;;  %v1443_v20 = vadd.f32 %v1442_v29, %v1378_v42  ;;  %v1383_v3 = vpop.f32.mrf.mxu2  ;;  %2320 = vmatpush.msra.mxu0 %v2082_v21  ;;  %2257 = vmatpush.msra.mxu2 %v2046_v27 }
 0x216   : > { %v1539_v44 = vmul.f32 0.5, %v3212_v14  ;;  %v1384_v36 = vadd.f32 %v1383_v3, %v4609_v34 }
 0x217   : > { %v3214_v22 = vpop.eup %3213  ;;  %3215 = vtanh.f32 %v1477_v49  ;;  %v1480_v59 = vmul.f32 0.5, %v1443_v20  ;;  %2258 = vmatpush.msra.mxu2 %v2044_v18 }
 0x218   : > { %v1571_v62 = vadd.f32 0.5, %v1539_v44  ;;  %v1542_v33 = vmul.f32 0.5, %v3214_v22 }
 0x219   : > { %3217 = vtanh.f32 %v1480_v59 }
 0x21a   : > { %v1312_v11 = vpop.f32.mrf.mxu3  ;;  %1698 = vmatmul.f32.gmra.mxu1 %v1571_v62  ;;  %1828 = vmatmul.f32.gmra.mxu2 %v1571_v62  ;;  %v1574_v6 = vadd.f32 0.5, %v1542_v33 }
 0x21b   : > { %v1313_v48 = vadd.f32 %v1312_v11, %v1248_v63 }
 0x21c   : > { %v1445_v52 = vpop.f32.mrf.mxu0  ;;  %1766 = vmatmul.f32.gmra.mxu3 %v1574_v6  ;;  %1896 = vmatmul.f32.gmra.mxu0 %v1574_v6 }
 0x21d   : > { %v3216_v32 = vpop.eup %3215  ;;  %v1479_v17 = vmul.f32 0.5, %v1313_v48  ;;  %v1446_v30 = vadd.f32 %v1445_v52, %v1381_v56  ;;  %v1386_v61 = vpop.f32.mrf.mxu2 }
 0x21e   : > { %v1541_v54 = vmul.f32 0.5, %v3216_v32  ;;  %v1387_v47 = vadd.f32 %v1386_v61, %v4609_v34  ;;  %v1259_v56 = vpop.f32.mrf.mxu1 }
 0x21f   : > { %v3218_v15 = vpop.eup %3217  ;;  %3219 = vtanh.f32 %v1479_v17  ;;  %v1482_v25 = vmul.f32 0.5, %v1446_v30  ;;  %v1260_v30 = vadd.f32 %v1259_v56, %v4612_v16  ;;  %v2045_v16 = vld [vmem:[%s5196_s7 + $0x10] sm:$0xff] }
 0x220   : > { %v1573_v45 = vadd.f32 0.5, %v1541_v54  ;;  %v1544_v37 = vmul.f32 0.5, %v3218_v15 }
 0x221   : > { %3221 = vtanh.f32 %v1482_v25  ;;  %v2047_v25 = vld [vmem:[%s5196_s7 + $0x20] sm:$0xff] }
 0x222   : > { %v1315_v40 = vpop.f32.mrf.mxu3  ;;  %1701 = vmatmul.f32.gmra.mxu1 %v1573_v45  ;;  %1831 = vmatmul.f32.gmra.mxu2 %v1573_v45  ;;  %v1576_v5 = vadd.f32 0.5, %v1544_v37 }
 0x223   : > { %v1316_v7 = vadd.f32 %v1315_v40, %v1251_v28  ;;  %2126 = vmatpush.msrb.mxu1 %v2047_v25  ;;  %v2080_v28 = vld [vmem:[%s5196_s7 + $0x128] sm:$0xff]  ;;  %v2515_v25 = vld [vmem:[%s5198_s9 + $0x70] sm:$0xff] }
 0x224   : > { %v1448_v8 = vpop.f32.mrf.mxu0  ;;  %1769 = vmatmul.f32.gmra.mxu3 %v1576_v5  ;;  %1899 = vmatmul.f32.gmra.mxu0 %v1576_v5 }
 0x225   : > { %v3220_v43 = vpop.eup %3219  ;;  %v1481_v9 = vmul.f32 0.5, %v1316_v7  ;;  %v1449_v19 = vadd.f32 %v1448_v8, %v1384_v36  ;;  %v1389_v22 = vpop.f32.mrf.mxu2  ;;  %2127 = vmatpush.msrb.mxu1 %v2045_v16  ;;  %2321 = vmatpush.msra.mxu0 %v2080_v28  ;;  %v2077_v7 = vld [vmem:[%s5196_s7 + $0x110] sm:$0xff]  ;;  %v2078_v8 = vld [vmem:[%s5196_s7 + $0x118] sm:$0xff] }
 0x226   : > { %v1543_v39 = vmul.f32 0.5, %v3220_v43  ;;  %v1390_v63 = vadd.f32 %v1389_v22, %v4609_v34  ;;  %2192 = vmatpush.msrb.mxu3 %v2077_v7  ;;  %v2075_v43 = vld [vmem:[%s5196_s7 + $0x100] sm:$0xff]  ;;  %v2532_v22 = vld [vmem:[%s5198_s9 + $0xf8] sm:$0xff] }
 0x227   : > { %v3222_v55 = vpop.eup %3221  ;;  %3223 = vtanh.f32 %v1481_v9  ;;  %v1484_v53 = vmul.f32 0.5, %v1449_v19  ;;  %2128 = vmatpush.msrb.mxu1 %v2043_v50  ;;  %2322 = vmatpush.msra.mxu0 %v2078_v8  ;;  %v2076_v9 = vld [vmem:[%s5196_s7 + $0x108] sm:$0xff] }
 0x228   : > { %v1575_v58 = vadd.f32 0.5, %v1543_v39  ;;  %v1546_v24 = vmul.f32 0.5, %v3222_v55  ;;  %2193 = vmatpush.msrb.mxu3 %v2075_v43  ;;  %v1649_v55 = vld [vmem:[%s5195_s6] sm:$0x3] }
 0x229   : > { %3225 = vtanh.f32 %v1484_v53  ;;  %2323 = vmatpush.msra.mxu0 %v2076_v9  ;;  %v4858_v53 = vperm.slane %v1649_v55, 0  ;;  %v2514_v9 = vld [vmem:[%s5198_s9 + $0x68] sm:$0xff] }
 0x22a   : > { %v1318_v31 = vpop.f32.mrf.mxu3  ;;  %1704 = vmatmul.f32.gmra.mxu1 %v1575_v58  ;;  %1834 = vmatmul.f32.gmra.mxu2 %v1575_v58  ;;  %v1578_v46 = vadd.f32 0.5, %v1546_v24 }
 0x22b   : > { %v1319_v26 = vadd.f32 %v1318_v31, %v1254_v41  ;;  %v4861_v31 = vperm.slane %v1649_v55, 1  ;;  %2602 = vmatpush.msra.mxu3 %v2532_v22 }
 0x22c   : > { %v1451_v42 = vpop.f32.mrf.mxu0  ;;  %1772 = vmatmul.f32.gmra.mxu3 %v1578_v46  ;;  %1902 = vmatmul.f32.gmra.mxu0 %v1578_v46 }
 0x22d   : > { %v3224_v12 = vpop.eup %3223  ;;  %v1483_v29 = vmul.f32 0.5, %v1319_v26  ;;  %v1452_v14 = vadd.f32 %v1451_v42, %v1387_v47 }
 0x22e   : > { %v1545_v49 = vmul.f32 0.5, %v3224_v12 }
 0x22f   : > { %v3226_v20 = vpop.eup %3225  ;;  %3227 = vtanh.f32 %v1483_v29  ;;  %v1486_v44 = vmul.f32 0.5, %v1452_v14 }
 0x230   : > { %v1577_v59 = vadd.f32 0.5, %v1545_v49  ;;  %v1548_v51 = vmul.f32 0.5, %v3226_v20 }
 0x231   : > { %3229 = vtanh.f32 %v1486_v44 }
 0x232   : > { %v1321_v62 = vpop.f32.mrf.mxu3  ;;  %1707 = vmatmul.f32.gmra.mxu1 %v1577_v59  ;;  %1837 = vmatmul.f32.gmra.mxu2 %v1577_v59  ;;  %v1580_v33 = vadd.f32 0.5, %v1548_v51 }
 0x233   : > { %v1322_v4 = vadd.f32 %v1321_v62, %v1257_v2  ;;  %v2516_v62 = vld [vmem:[%s5198_s9 + $0x78] sm:$0xff] }
 0x234   : > { %v1454_v35 = vpop.f32.mrf.mxu0  ;;  %1775 = vmatmul.f32.gmra.mxu3 %v1580_v33  ;;  %1905 = vmatmul.f32.gmra.mxu0 %v1580_v33 }
 0x235   : > { %v3228_v11 = vpop.eup %3227  ;;  %v1485_v6 = vmul.f32 0.5, %v1322_v4  ;;  %v1455_v57 = vadd.f32 %v1454_v35, %v1390_v63  ;;  %2537 = vmatpush.msra.mxu1 %v2516_v62 }
 0x236   : > { %v1547_v48 = vmul.f32 0.5, %v3228_v11 }
 0x237   : > { %v3230_v3 = vpop.eup %3229  ;;  %3231 = vtanh.f32 %v1485_v6  ;;  %v1488_v52 = vmul.f32 0.5, %v1455_v57  ;;  %2538 = vmatpush.msra.mxu1 %v2515_v25 }
 0x238   : > { %v1579_v32 = vadd.f32 0.5, %v1547_v48  ;;  %v1550_v17 = vmul.f32 0.5, %v3230_v3 }
 0x239   : > { %3233 = vtanh.f32 %v1488_v52  ;;  %2539 = vmatpush.msra.mxu1 %v2514_v9 }
 0x23a   : > { %v1324_v54 = vpop.f32.mrf.mxu3  ;;  %1710 = vmatmul.f32.gmra.mxu1 %v1579_v32  ;;  %1840 = vmatmul.f32.gmra.mxu2 %v1579_v32  ;;  %v1582_v34 = vadd.f32 0.5, %v1550_v17  ;;  %v2531_v17 = vld [vmem:[%s5198_s9 + $0xf0] sm:$0xff] }
 0x23b   : > { %v1325_v15 = vadd.f32 %v1324_v54, %v1260_v30  ;;  %2603 = vmatpush.msra.mxu3 %v2531_v17 }
 0x23c   : > { %1778 = vmatmul.f32.gmra.mxu3 %v1582_v34  ;;  %1908 = vmatmul.f32.gmra.mxu0 %v1582_v34 }
 0x23d   : > { %v3232_v23 = vpop.eup %3231  ;;  %v1487_v1 = vmul.f32 0.5, %v1325_v15 }
 0x23e   : > { %v1549_v45 = vmul.f32 0.5, %v3232_v23 }
 0x23f   : > { %v3234_v37 = vpop.eup %3233  ;;  %3235 = vtanh.f32 %v1487_v1 }
 0x240   : > { %v1581_v40 = vadd.f32 0.5, %v1549_v45  ;;  %v1552_v5 = vmul.f32 0.5, %v3234_v37 }
 0x242   : > { %1713 = vmatmul.f32.gmra.mxu1 %v1581_v40  ;;  %1843 = vmatmul.f32.gmra.mxu2 %v1581_v40  ;;  %v1584_v36 = vadd.f32 0.5, %v1552_v5 }
 0x244   : > { %1781 = vmatmul.f32.gmra.mxu3 %v1584_v36  ;;  %1911 = vmatmul.f32.gmra.mxu0 %v1584_v36  ;;  %v2530_v36 = vld [vmem:[%s5198_s9 + $0xe8] sm:$0xff] }
 0x245   : > { %v3236_v13 = vpop.eup %3235  ;;  %2604 = vmatpush.msra.mxu3 %v2530_v36 }
 0x246   : > { %v1551_v19 = vmul.f32 0.5, %v3236_v13 }
 0x248   : > { %v1583_v61 = vadd.f32 0.5, %v1551_v19 }
 0x249   : > { %v1867_v39 = vpop.f32.mrf.mxu0 }
 0x24a   : > { %1716 = vmatmul.f32.gmra.mxu1 %v1583_v61  ;;  %1846 = vmatmul.f32.gmra.mxu2 %v1583_v61 }
 0x24f   : > { %v1672_v58 = vpop.f32.mrf.mxu1  ;;  %v1737_v24 = vpop.f32.mrf.mxu3 }
 0x250   : > { %v1673_v41 = vadd.f32 %v1672_v58, %v4858_v53 }
 0x251   : > { %v1870_v10 = vpop.f32.mrf.mxu0 }
 0x252   : > { %v1738_v21 = vadd.f32 %v1737_v24, %v1673_v41 }
 0x254   : > { %v1915_v46 = vmul.f32 0.5, %v1738_v21 }
 0x255   : > { %v1802_v38 = vpop.f32.mrf.mxu2 }
 0x256   : > { %3237 = vtanh.f32 %v1915_v46  ;;  %v1803_v47 = vadd.f32 %v1802_v38, %v4861_v31 }
 0x257   : > { %v1675_v26 = vpop.f32.mrf.mxu1  ;;  %v1740_v60 = vpop.f32.mrf.mxu3 }
 0x258   : > { %v1868_v42 = vadd.f32 %v1867_v39, %v1803_v47  ;;  %v1676_v12 = vadd.f32 %v1675_v26, %v4858_v53  ;;  %v2529_v26 = vld [vmem:[%s5198_s9 + $0xe0] sm:$0xff] }
 0x259   : > { %v1873_v29 = vpop.f32.mrf.mxu0  ;;  %2605 = vmatpush.msra.mxu3 %v2529_v26 }
 0x25a   : > { %v1916_v14 = vmul.f32 0.5, %v1868_v42  ;;  %v1741_v49 = vadd.f32 %v1740_v60, %v1676_v12 }
 0x25c   : > { %v3238_v20 = vpop.eup %3237  ;;  %3239 = vtanh.f32 %v1916_v14  ;;  %v1917_v44 = vmul.f32 0.5, %v1741_v49  ;;  %v2513_v14 = vld [vmem:[%s5198_s9 + $0x60] sm:$0xff] }
 0x25d   : > { %v1979_v59 = vmul.f32 0.5, %v3238_v20  ;;  %v1805_v51 = vpop.f32.mrf.mxu2  ;;  %2540 = vmatpush.msra.mxu1 %v2513_v14 }
 0x25e   : > { %3241 = vtanh.f32 %v1917_v44  ;;  %v1806_v2 = vadd.f32 %v1805_v51, %v4861_v31 }
 0x25f   : > { %v2011_v33 = vadd.f32 0.5, %v1979_v59  ;;  %v1678_v63 = vpop.f32.mrf.mxu1  ;;  %v1743_v4 = vpop.f32.mrf.mxu3 }
 0x260   : > { %v1871_v35 = vadd.f32 %v1870_v10, %v1806_v2  ;;  %v1679_v11 = vadd.f32 %v1678_v63, %v4858_v53 }
 0x261   : > { %v1876_v6 = vpop.f32.mrf.mxu0  ;;  %2129 = vmatmul.f32.vlgmr.msrb.gmra.mxu1 %v2011_v33  ;;  %2259 = vmatmul.f32.vlgmr.msra.gmra.mxu2 %v2011_v33 }
 0x262   : > { %v3240_v57 = vpop.eup %3239  ;;  %v1918_v56 = vmul.f32 0.5, %v1871_v35  ;;  %v1744_v48 = vadd.f32 %v1743_v4, %v1679_v11  ;;  %v2528_v11 = vld [vmem:[%s5198_s9 + $0xd8] sm:$0xff] }
 0x263   : > { %v1980_v3 = vmul.f32 0.5, %v3240_v57  ;;  %2606 = vmatpush.msra.mxu3 %v2528_v11 }
 0x264   : > { %v3242_v52 = vpop.eup %3241  ;;  %3243 = vtanh.f32 %v1918_v56  ;;  %v1919_v32 = vmul.f32 0.5, %v1744_v48 }
 0x265   : > { %v2012_v30 = vadd.f32 0.5, %v1980_v3  ;;  %v1808_v54 = vpop.f32.mrf.mxu2  ;;  %v1981_v34 = vmul.f32 0.5, %v3242_v52  ;;  %v2512_v3 = vld [vmem:[%s5198_s9 + $0x58] sm:$0xff] }
 0x266   : > { %3245 = vtanh.f32 %v1919_v32  ;;  %v1809_v15 = vadd.f32 %v1808_v54, %v4861_v31  ;;  %2541 = vmatpush.msra.mxu1 %v2512_v3 }
 0x267   : > { %v1681_v23 = vpop.f32.mrf.mxu1  ;;  %v1746_v1 = vpop.f32.mrf.mxu3  ;;  %2194 = vmatmul.f32.vlgmr.msrb.gmra.mxu3 %v2012_v30  ;;  %2324 = vmatmul.f32.vlgmr.msra.gmra.mxu0 %v2012_v30  ;;  %v2013_v27 = vadd.f32 0.5, %v1981_v34 }
 0x268   : > { %v1874_v16 = vadd.f32 %v1873_v29, %v1809_v15  ;;  %v1682_v45 = vadd.f32 %v1681_v23, %v4858_v53 }
 0x269   : > { %v1879_v37 = vpop.f32.mrf.mxu0  ;;  %2132 = vmatmul.f32.gmra.mxu1 %v2013_v27  ;;  %2262 = vmatmul.f32.gmra.mxu2 %v2013_v27 }
 0x26a   : > { %v3244_v0 = vpop.eup %3243  ;;  %v1920_v28 = vmul.f32 0.5, %v1874_v16  ;;  %v1747_v18 = vadd.f32 %v1746_v1, %v1682_v45  ;;  %v2527_v45 = vld [vmem:[%s5198_s9 + $0xd0] sm:$0xff] }
 0x26b   : > { %v1982_v40 = vmul.f32 0.5, %v3244_v0  ;;  %2607 = vmatpush.msra.mxu3 %v2527_v45 }
 0x26c   : > { %v3246_v5 = vpop.eup %3245  ;;  %3247 = vtanh.f32 %v1920_v28  ;;  %v1921_v50 = vmul.f32 0.5, %v1747_v18 }
 0x26d   : > { %v1811_v7 = vpop.f32.mrf.mxu2  ;;  %v2014_v8 = vadd.f32 0.5, %v1982_v40  ;;  %v1983_v13 = vmul.f32 0.5, %v3246_v5  ;;  %v2511_v40 = vld [vmem:[%s5198_s9 + $0x50] sm:$0xff] }
 0x26e   : > { %3249 = vtanh.f32 %v1921_v50  ;;  %v1812_v43 = vadd.f32 %v1811_v7, %v4861_v31  ;;  %2542 = vmatpush.msra.mxu1 %v2511_v40 }
 0x26f   : > { %v1684_v19 = vpop.f32.mrf.mxu1  ;;  %v1749_v61 = vpop.f32.mrf.mxu3  ;;  %2197 = vmatmul.f32.gmra.mxu3 %v2014_v8  ;;  %2327 = vmatmul.f32.gmra.mxu0 %v2014_v8  ;;  %v2015_v39 = vadd.f32 0.5, %v1983_v13 }
 0x270   : > { %v1877_v55 = vadd.f32 %v1876_v6, %v1812_v43  ;;  %v1685_v58 = vadd.f32 %v1684_v19, %v4858_v53 }
 0x271   : > { %v1882_v24 = vpop.f32.mrf.mxu0  ;;  %2135 = vmatmul.f32.gmra.mxu1 %v2015_v39  ;;  %2265 = vmatmul.f32.gmra.mxu2 %v2015_v39 }
 0x272   : > { %v3248_v41 = vpop.eup %3247  ;;  %v1922_v10 = vmul.f32 0.5, %v1877_v55  ;;  %v1750_v21 = vadd.f32 %v1749_v61, %v1685_v58  ;;  %v2526_v58 = vld [vmem:[%s5198_s9 + $0xc8] sm:$0xff] }
 0x273   : > { %v1984_v46 = vmul.f32 0.5, %v3248_v41  ;;  %2608 = vmatpush.msra.mxu3 %v2526_v58 }
 0x274   : > { %v3250_v38 = vpop.eup %3249  ;;  %3251 = vtanh.f32 %v1922_v10  ;;  %v1923_v47 = vmul.f32 0.5, %v1750_v21 }
 0x275   : > { %v1814_v60 = vpop.f32.mrf.mxu2  ;;  %v2016_v42 = vadd.f32 0.5, %v1984_v46  ;;  %v1985_v12 = vmul.f32 0.5, %v3250_v38  ;;  %v2510_v46 = vld [vmem:[%s5198_s9 + $0x48] sm:$0xff] }
 0x276   : > { %3253 = vtanh.f32 %v1923_v47  ;;  %v1815_v29 = vadd.f32 %v1814_v60, %v4861_v31  ;;  %2543 = vmatpush.msra.mxu1 %v2510_v46 }
 0x277   : > { %v1687_v49 = vpop.f32.mrf.mxu1  ;;  %v1752_v20 = vpop.f32.mrf.mxu3  ;;  %2200 = vmatmul.f32.gmra.mxu3 %v2016_v42  ;;  %2330 = vmatmul.f32.gmra.mxu0 %v2016_v42  ;;  %v2017_v44 = vadd.f32 0.5, %v1985_v12 }
 0x278   : > { %v1880_v22 = vadd.f32 %v1879_v37, %v1815_v29  ;;  %v1688_v59 = vadd.f32 %v1687_v49, %v4858_v53 }
 0x279   : > { %v1885_v51 = vpop.f32.mrf.mxu0  ;;  %2138 = vmatmul.f32.gmra.mxu1 %v2017_v44  ;;  %2268 = vmatmul.f32.gmra.mxu2 %v2017_v44 }
 0x27a   : > { %v3252_v2 = vpop.eup %3251  ;;  %v1924_v62 = vmul.f32 0.5, %v1880_v22  ;;  %v1753_v33 = vadd.f32 %v1752_v20, %v1688_v59  ;;  %v2525_v59 = vld [vmem:[%s5198_s9 + $0xc0] sm:$0xff] }
 0x27b   : > { %v1986_v63 = vmul.f32 0.5, %v3252_v2  ;;  %2609 = vmatpush.msra.mxu3 %v2525_v59 }
 0x27c   : > { %v3254_v4 = vpop.eup %3253  ;;  %3255 = vtanh.f32 %v1924_v62  ;;  %v1925_v35 = vmul.f32 0.5, %v1753_v33 }
 0x27d   : > { %v1817_v6 = vpop.f32.mrf.mxu2  ;;  %v2018_v57 = vadd.f32 0.5, %v1986_v63  ;;  %v1987_v56 = vmul.f32 0.5, %v3254_v4  ;;  %v2509_v63 = vld [vmem:[%s5198_s9 + $0x40] sm:$0xff] }
 0x27e   : > { %3257 = vtanh.f32 %v1925_v35  ;;  %v1818_v48 = vadd.f32 %v1817_v6, %v4861_v31  ;;  %2544 = vmatpush.msra.mxu1 %v2509_v63 }
 0x27f   : > { %v1690_v52 = vpop.f32.mrf.mxu1  ;;  %v1755_v32 = vpop.f32.mrf.mxu3  ;;  %2203 = vmatmul.f32.gmra.mxu3 %v2018_v57  ;;  %2333 = vmatmul.f32.gmra.mxu0 %v2018_v57  ;;  %v2019_v17 = vadd.f32 0.5, %v1987_v56 }
 0x280   : > { %v1883_v30 = vadd.f32 %v1882_v24, %v1818_v48  ;;  %v1691_v54 = vadd.f32 %v1690_v52, %v4858_v53 }
 0x281   : > { %v1888_v34 = vpop.f32.mrf.mxu0  ;;  %2141 = vmatmul.f32.gmra.mxu1 %v2019_v17  ;;  %2271 = vmatmul.f32.gmra.mxu2 %v2019_v17 }
 0x282   : > { %v3256_v15 = vpop.eup %3255  ;;  %v1926_v25 = vmul.f32 0.5, %v1883_v30  ;;  %v1756_v23 = vadd.f32 %v1755_v32, %v1691_v54  ;;  %v2524_v54 = vld [vmem:[%s5198_s9 + $0xb8] sm:$0xff] }
 0x283   : > { %v1988_v1 = vmul.f32 0.5, %v3256_v15  ;;  %2610 = vmatpush.msra.mxu3 %v2524_v54 }
 0x284   : > { %v3258_v27 = vpop.eup %3257  ;;  %3259 = vtanh.f32 %v1926_v25  ;;  %v1927_v16 = vmul.f32 0.5, %v1756_v23 }
 0x285   : > { %v1820_v37 = vpop.f32.mrf.mxu2  ;;  %v2020_v0 = vadd.f32 0.5, %v1988_v1  ;;  %v1989_v28 = vmul.f32 0.5, %v3258_v27  ;;  %v2508_v1 = vld [vmem:[%s5198_s9 + $0x38] sm:$0xff] }
 0x286   : > { %3261 = vtanh.f32 %v1927_v16  ;;  %v1821_v18 = vadd.f32 %v1820_v37, %v4861_v31  ;;  %2545 = vmatpush.msra.mxu1 %v2508_v1 }
 0x287   : > { %v1693_v5 = vpop.f32.mrf.mxu1  ;;  %v1758_v50 = vpop.f32.mrf.mxu3  ;;  %2206 = vmatmul.f32.gmra.mxu3 %v2020_v0  ;;  %2336 = vmatmul.f32.gmra.mxu0 %v2020_v0  ;;  %v2021_v36 = vadd.f32 0.5, %v1989_v28 }
 0x288   : > { %v1886_v7 = vadd.f32 %v1885_v51, %v1821_v18  ;;  %v1694_v8 = vadd.f32 %v1693_v5, %v4858_v53 }
 0x289   : > { %v1891_v13 = vpop.f32.mrf.mxu0  ;;  %2144 = vmatmul.f32.gmra.mxu1 %v2021_v36  ;;  %2274 = vmatmul.f32.gmra.mxu2 %v2021_v36 }
 0x28a   : > { %v3260_v43 = vpop.eup %3259  ;;  %v1928_v9 = vmul.f32 0.5, %v1886_v7  ;;  %v1759_v19 = vadd.f32 %v1758_v50, %v1694_v8  ;;  %v2523_v7 = vld [vmem:[%s5198_s9 + $0xb0] sm:$0xff] }
 0x28b   : > { %v1990_v61 = vmul.f32 0.5, %v3260_v43  ;;  %2611 = vmatpush.msra.mxu3 %v2523_v7 }
 0x28c   : > { %v3262_v39 = vpop.eup %3261  ;;  %3263 = vtanh.f32 %v1928_v9  ;;  %v1929_v55 = vmul.f32 0.5, %v1759_v19 }
 0x28d   : > { %v1823_v24 = vpop.f32.mrf.mxu2  ;;  %v2022_v41 = vadd.f32 0.5, %v1990_v61  ;;  %v1991_v10 = vmul.f32 0.5, %v3262_v39  ;;  %v2507_v61 = vld [vmem:[%s5198_s9 + $0x30] sm:$0xff] }
 0x28e   : > { %3265 = vtanh.f32 %v1929_v55  ;;  %v1824_v21 = vadd.f32 %v1823_v24, %v4861_v31  ;;  %2546 = vmatpush.msra.mxu1 %v2507_v61 }
 0x28f   : > { %v1696_v38 = vpop.f32.mrf.mxu1  ;;  %v1761_v47 = vpop.f32.mrf.mxu3  ;;  %2209 = vmatmul.f32.gmra.mxu3 %v2022_v41  ;;  %2339 = vmatmul.f32.gmra.mxu0 %v2022_v41  ;;  %v2023_v26 = vadd.f32 0.5, %v1991_v10 }
 0x290   : > { %v1889_v60 = vadd.f32 %v1888_v34, %v1824_v21  ;;  %v1697_v42 = vadd.f32 %v1696_v38, %v4858_v53 }
 0x291   : > { %2147 = vmatmul.f32.gmra.mxu1 %v2023_v26  ;;  %2277 = vmatmul.f32.gmra.mxu2 %v2023_v26  ;;  %v1894_v49 = vpop.f32.mrf.mxu0 }
 0x292   : > { %v3264_v12 = vpop.eup %3263  ;;  %v1930_v29 = vmul.f32 0.5, %v1889_v60  ;;  %v1762_v14 = vadd.f32 %v1761_v47, %v1697_v42  ;;  %v2522_v60 = vld [vmem:[%s5198_s9 + $0xa8] sm:$0xff] }
 0x293   : > { %v1992_v20 = vmul.f32 0.5, %v3264_v12  ;;  %2612 = vmatpush.msra.mxu3 %v2522_v60 }
 0x294   : > { %v3266_v44 = vpop.eup %3265  ;;  %3267 = vtanh.f32 %v1930_v29  ;;  %v1931_v22 = vmul.f32 0.5, %v1762_v14 }
 0x295   : > { %v1826_v51 = vpop.f32.mrf.mxu2  ;;  %v2024_v2 = vadd.f32 0.5, %v1992_v20  ;;  %v1993_v62 = vmul.f32 0.5, %v3266_v44 }
 0x296   : > { %3269 = vtanh.f32 %v1931_v22  ;;  %v1827_v33 = vadd.f32 %v1826_v51, %v4861_v31 }
 0x297   : > { %v1699_v4 = vpop.f32.mrf.mxu1  ;;  %v1764_v35 = vpop.f32.mrf.mxu3  ;;  %2212 = vmatmul.f32.gmra.mxu3 %v2024_v2  ;;  %2342 = vmatmul.f32.gmra.mxu0 %v2024_v2  ;;  %v2025_v11 = vadd.f32 0.5, %v1993_v62 }
 0x298   : > { %v1892_v6 = vadd.f32 %v1891_v13, %v1827_v33  ;;  %v1700_v57 = vadd.f32 %v1699_v4, %v4858_v53 }
 0x299   : > { %2150 = vmatmul.f32.gmra.mxu1 %v2025_v11  ;;  %2280 = vmatmul.f32.gmra.mxu2 %v2025_v11  ;;  %v1897_v30 = vpop.f32.mrf.mxu0 }
 0x29a   : > { %v3268_v56 = vpop.eup %3267  ;;  %v1932_v48 = vmul.f32 0.5, %v1892_v6  ;;  %v1765_v3 = vadd.f32 %v1764_v35, %v1700_v57  ;;  %v2521_v6 = vld [vmem:[%s5198_s9 + $0xa0] sm:$0xff] }
 0x29b   : > { %v1994_v52 = vmul.f32 0.5, %v3268_v56  ;;  %v2505_v57 = vld [vmem:[%s5198_s9 + $0x20] sm:$0xff]  ;;  %2613 = vmatpush.msra.mxu3 %v2521_v6 }
 0x29c   : > { %v3270_v32 = vpop.eup %3269  ;;  %3271 = vtanh.f32 %v1932_v48  ;;  %v1933_v17 = vmul.f32 0.5, %v1765_v3 }
 0x29d   : > { %v1829_v34 = vpop.f32.mrf.mxu2  ;;  %v2026_v15 = vadd.f32 0.5, %v1994_v52  ;;  %v1995_v25 = vmul.f32 0.5, %v3270_v32  ;;  %v2520_v52 = vld [vmem:[%s5198_s9 + $0x98] sm:$0xff] }
 0x29e   : > { %3273 = vtanh.f32 %v1933_v17  ;;  %v1830_v23 = vadd.f32 %v1829_v34, %v4861_v31  ;;  %2614 = vmatpush.msra.mxu3 %v2520_v52 }
 0x29f   : > { %v1702_v27 = vpop.f32.mrf.mxu1  ;;  %v1767_v16 = vpop.f32.mrf.mxu3  ;;  %2215 = vmatmul.f32.gmra.mxu3 %v2026_v15  ;;  %2345 = vmatmul.f32.gmra.mxu0 %v2026_v15  ;;  %v2027_v45 = vadd.f32 0.5, %v1995_v25  ;;  %v2504_v25 = vld [vmem:[%s5198_s9 + $0x18] sm:$0xff] }
 0x2a0   : > { %v1895_v37 = vadd.f32 %v1894_v49, %v1830_v23  ;;  %v1703_v0 = vadd.f32 %v1702_v27, %v4858_v53  ;;  %v2506_v49 = vld [vmem:[%s5198_s9 + $0x28] sm:$0xff] }
 0x2a1   : > { %2153 = vmatmul.f32.gmra.mxu1 %v2027_v45  ;;  %2283 = vmatmul.f32.gmra.mxu2 %v2027_v45  ;;  %v1900_v9 = vpop.f32.mrf.mxu0 }
 0x2a2   : > { %v3272_v28 = vpop.eup %3271  ;;  %v1934_v18 = vmul.f32 0.5, %v1895_v37  ;;  %v1768_v40 = vadd.f32 %v1767_v16, %v1703_v0  ;;  %2547 = vmatpush.msra.mxu1 %v2506_v49 }
 0x2a3   : > { %v1996_v5 = vmul.f32 0.5, %v3272_v28 }
 0x2a4   : > { %v3274_v50 = vpop.eup %3273  ;;  %3275 = vtanh.f32 %v1934_v18  ;;  %v1935_v36 = vmul.f32 0.5, %v1768_v40  ;;  %2548 = vmatpush.msra.mxu1 %v2505_v57 }
 0x2a5   : > { %v1832_v8 = vpop.f32.mrf.mxu2  ;;  %v2028_v13 = vadd.f32 0.5, %v1996_v5  ;;  %v1997_v43 = vmul.f32 0.5, %v3274_v50 }
 0x2a6   : > { %3277 = vtanh.f32 %v1935_v36  ;;  %v1833_v19 = vadd.f32 %v1832_v8, %v4861_v31  ;;  %2549 = vmatpush.msra.mxu1 %v2504_v25  ;;  %v2519_v8 = vld [vmem:[%s5198_s9 + $0x90] sm:$0xff] }
 0x2a7   : > { %v1705_v39 = vpop.f32.mrf.mxu1  ;;  %v1770_v55 = vpop.f32.mrf.mxu3  ;;  %2218 = vmatmul.f32.gmra.mxu3 %v2028_v13  ;;  %2348 = vmatmul.f32.gmra.mxu0 %v2028_v13  ;;  %v2029_v58 = vadd.f32 0.5, %v1997_v43  ;;  %v2503_v13 = vld [vmem:[%s5198_s9 + $0x10] sm:$0xff] }
 0x2a8   : > { %v1898_v24 = vadd.f32 %v1897_v30, %v1833_v19  ;;  %v1706_v41 = vadd.f32 %v1705_v39, %v4858_v53  ;;  %2615 = vmatpush.msra.mxu3 %v2519_v8  ;;  %2550 = vmatpush.msra.mxu1 %v2503_v13 }
 0x2a9   : > { %2156 = vmatmul.f32.gmra.mxu1 %v2029_v58  ;;  %2286 = vmatmul.f32.gmra.mxu2 %v2029_v58  ;;  %v1903_v2 = vpop.f32.mrf.mxu0 }
 0x2aa   : > { %v3276_v10 = vpop.eup %3275  ;;  %v1936_v21 = vmul.f32 0.5, %v1898_v24  ;;  %v1771_v46 = vadd.f32 %v1770_v55, %v1706_v41 }
 0x2ab   : > { %v1998_v38 = vmul.f32 0.5, %v3276_v10 }
 0x2ac   : > { %v3278_v47 = vpop.eup %3277  ;;  %3279 = vtanh.f32 %v1936_v21  ;;  %v1937_v26 = vmul.f32 0.5, %v1771_v46 }
 0x2ad   : > { %v1835_v42 = vpop.f32.mrf.mxu2  ;;  %v2030_v12 = vadd.f32 0.5, %v1998_v38  ;;  %v1999_v29 = vmul.f32 0.5, %v3278_v47 }
 0x2ae   : > { %3281 = vtanh.f32 %v1937_v26  ;;  %v1836_v14 = vadd.f32 %v1835_v42, %v4861_v31 }
 0x2af   : > { %v1708_v20 = vpop.f32.mrf.mxu1  ;;  %v1773_v44 = vpop.f32.mrf.mxu3  ;;  %2221 = vmatmul.f32.gmra.mxu3 %v2030_v12  ;;  %2351 = vmatmul.f32.gmra.mxu0 %v2030_v12  ;;  %v2031_v22 = vadd.f32 0.5, %v1999_v29 }
 0x2b0   : > { %v1901_v59 = vadd.f32 %v1900_v9, %v1836_v14  ;;  %v1709_v51 = vadd.f32 %v1708_v20, %v4858_v53 }
 0x2b1   : > { %2159 = vmatmul.f32.gmra.mxu1 %v2031_v22  ;;  %2289 = vmatmul.f32.gmra.mxu2 %v2031_v22  ;;  %v1906_v16 = vpop.f32.mrf.mxu0 }
 0x2b2   : > { %v3280_v62 = vpop.eup %3279  ;;  %v1938_v33 = vmul.f32 0.5, %v1901_v59  ;;  %v1774_v63 = vadd.f32 %v1773_v44, %v1709_v51 }
 0x2b3   : > { %v2000_v4 = vmul.f32 0.5, %v3280_v62 }
 0x2b4   : > { %v3282_v35 = vpop.eup %3281  ;;  %3283 = vtanh.f32 %v1938_v33  ;;  %v1939_v11 = vmul.f32 0.5, %v1774_v63 }
 0x2b5   : > { %v1838_v56 = vpop.f32.mrf.mxu2  ;;  %v2032_v48 = vadd.f32 0.5, %v2000_v4  ;;  %v2001_v3 = vmul.f32 0.5, %v3282_v35 }
 0x2b6   : > { %3285 = vtanh.f32 %v1939_v11  ;;  %v1839_v32 = vadd.f32 %v1838_v56, %v4861_v31  ;;  %v2518_v11 = vld [vmem:[%s5198_s9 + $0x88] sm:$0xff] }
 0x2b7   : > { %v1711_v17 = vpop.f32.mrf.mxu1  ;;  %v1776_v30 = vpop.f32.mrf.mxu3  ;;  %2224 = vmatmul.f32.gmra.mxu3 %v2032_v48  ;;  %2354 = vmatmul.f32.gmra.mxu0 %v2032_v48  ;;  %v2033_v54 = vadd.f32 0.5, %v2001_v3  ;;  %v2502_v3 = vld [vmem:[%s5198_s9 + $0x8] sm:$0xff] }
 0x2b8   : > { %v1904_v34 = vadd.f32 %v1903_v2, %v1839_v32  ;;  %v1712_v15 = vadd.f32 %v1711_v17, %v4858_v53  ;;  %2616 = vmatpush.msra.mxu3 %v2518_v11  ;;  %2551 = vmatpush.msra.mxu1 %v2502_v3  ;;  %v2501_v32 = vld [vmem:[%s5198_s9] sm:$0xff] }
 0x2b9   : > { %2162 = vmatmul.f32.gmra.mxu1 %v2033_v54  ;;  %2292 = vmatmul.f32.gmra.mxu2 %v2033_v54  ;;  %v1909_v41 = vpop.f32.mrf.mxu0 }
 0x2ba   : > { %v3284_v23 = vpop.eup %3283  ;;  %v1940_v1 = vmul.f32 0.5, %v1904_v34  ;;  %v1777_v27 = vadd.f32 %v1776_v30, %v1712_v15  ;;  %2552 = vmatpush.msra.mxu1 %v2501_v32  ;;  %v2107_v15 = vld [vmem:[%s5197_s8] sm:$0x3] }
 0x2bb   : > { %v2002_v45 = vmul.f32 0.5, %v3284_v23  ;;  %v4993_v25 = vperm.slane %v2107_v15, 1 }
 0x2bc   : > { %v3286_v37 = vpop.eup %3285  ;;  %3287 = vtanh.f32 %v1940_v1  ;;  %v1941_v0 = vmul.f32 0.5, %v1777_v27  ;;  %v4995_v27 = vperm.slane %v2107_v15, 0 }
 0x2bd   : > { %v1841_v28 = vpop.f32.mrf.mxu2  ;;  %v2034_v18 = vadd.f32 0.5, %v2002_v45  ;;  %v2003_v40 = vmul.f32 0.5, %v3286_v37 }
 0x2be   : > { %3289 = vtanh.f32 %v1941_v0  ;;  %v1842_v5 = vadd.f32 %v1841_v28, %v4861_v31 }
 0x2bf   : > { %v1714_v50 = vpop.f32.mrf.mxu1  ;;  %v1779_v36 = vpop.f32.mrf.mxu3  ;;  %2227 = vmatmul.f32.gmra.mxu3 %v2034_v18  ;;  %2357 = vmatmul.f32.gmra.mxu0 %v2034_v18  ;;  %v2035_v7 = vadd.f32 0.5, %v2003_v40 }
 0x2c0   : > { %v1907_v43 = vadd.f32 %v1906_v16, %v1842_v5  ;;  %v1715_v9 = vadd.f32 %v1714_v50, %v4858_v53 }
 0x2c1   : > { %2165 = vmatmul.f32.gmra.mxu1 %v2035_v7  ;;  %2295 = vmatmul.f32.gmra.mxu2 %v2035_v7  ;;  %v1912_v33 = vpop.f32.mrf.mxu0 }
 0x2c2   : > { %v3288_v19 = vpop.eup %3287  ;;  %v1942_v61 = vmul.f32 0.5, %v1907_v43  ;;  %v1780_v39 = vadd.f32 %v1779_v36, %v1715_v9 }
 0x2c3   : > { %v2004_v55 = vmul.f32 0.5, %v3288_v19 }
 0x2c4   : > { %v3290_v58 = vpop.eup %3289  ;;  %3291 = vtanh.f32 %v1942_v61  ;;  %v1943_v24 = vmul.f32 0.5, %v1780_v39 }
 0x2c5   : > { %v1844_v10 = vpop.f32.mrf.mxu2  ;;  %v2036_v21 = vadd.f32 0.5, %v2004_v55  ;;  %v2005_v46 = vmul.f32 0.5, %v3290_v58 }
 0x2c6   : > { %3293 = vtanh.f32 %v1943_v24  ;;  %v1845_v38 = vadd.f32 %v1844_v10, %v4861_v31 }
 0x2c7   : > { %v1717_v47 = vpop.f32.mrf.mxu1  ;;  %2230 = vmatmul.f32.gmra.mxu3 %v2036_v21  ;;  %2360 = vmatmul.f32.gmra.mxu0 %v2036_v21  ;;  %v2037_v26 = vadd.f32 0.5, %v2005_v46  ;;  %v1782_v12 = vpop.f32.mrf.mxu3 }
 0x2c8   : > { %v1910_v60 = vadd.f32 %v1909_v41, %v1845_v38  ;;  %v1718_v42 = vadd.f32 %v1717_v47, %v4858_v53 }
 0x2c9   : > { %2168 = vmatmul.f32.gmra.mxu1 %v2037_v26  ;;  %2298 = vmatmul.f32.gmra.mxu2 %v2037_v26 }
 0x2ca   : > { %v3292_v29 = vpop.eup %3291  ;;  %v1944_v14 = vmul.f32 0.5, %v1910_v60  ;;  %v1783_v49 = vadd.f32 %v1782_v12, %v1718_v42 }
 0x2cb   : > { %v2006_v20 = vmul.f32 0.5, %v3292_v29 }
 0x2cc   : > { %v3294_v44 = vpop.eup %3293  ;;  %3295 = vtanh.f32 %v1944_v14  ;;  %v1945_v22 = vmul.f32 0.5, %v1783_v49 }
 0x2cd   : > { %v1847_v59 = vpop.f32.mrf.mxu2  ;;  %v2038_v51 = vadd.f32 0.5, %v2006_v20  ;;  %v2007_v2 = vmul.f32 0.5, %v3294_v44 }
 0x2ce   : > { %3297 = vtanh.f32 %v1945_v22  ;;  %v1848_v62 = vadd.f32 %v1847_v59, %v4861_v31  ;;  %v2517_v31 = vld [vmem:[%s5198_s9 + $0x80] sm:$0xff] }
 0x2cf   : > { %2233 = vmatmul.f32.gmra.mxu3 %v2038_v51  ;;  %2363 = vmatmul.f32.gmra.mxu0 %v2038_v51  ;;  %v2039_v53 = vadd.f32 0.5, %v2007_v2 }
 0x2d0   : > { %v1913_v63 = vadd.f32 %v1912_v33, %v1848_v62  ;;  %2617 = vmatpush.msra.mxu3 %v2517_v31 }
 0x2d1   : > { %2171 = vmatmul.f32.gmra.mxu1 %v2039_v53  ;;  %2301 = vmatmul.f32.gmra.mxu2 %v2039_v53 }
 0x2d2   : > { %v3296_v4 = vpop.eup %3295  ;;  %v1946_v35 = vmul.f32 0.5, %v1913_v63 }
 0x2d3   : > { %v2008_v6 = vmul.f32 0.5, %v3296_v4 }
 0x2d4   : > { %v3298_v57 = vpop.eup %3297  ;;  %3299 = vtanh.f32 %v1946_v35 }
 0x2d5   : > { %v2040_v56 = vadd.f32 0.5, %v2008_v6  ;;  %v2009_v48 = vmul.f32 0.5, %v3298_v57 }
 0x2d7   : > { %2236 = vmatmul.f32.gmra.mxu3 %v2040_v56  ;;  %2366 = vmatmul.f32.gmra.mxu0 %v2040_v56  ;;  %v2041_v52 = vadd.f32 0.5, %v2009_v48 }
 0x2d9   : > { %2174 = vmatmul.f32.gmra.mxu1 %v2041_v52  ;;  %2304 = vmatmul.f32.gmra.mxu2 %v2041_v52 }
 0x2da   : > { %v3300_v17 = vpop.eup %3299 }
 0x2db   : > { %v2010_v30 = vmul.f32 0.5, %v3300_v17 }
 0x2dd   : > { %v2042_v54 = vadd.f32 0.5, %v2010_v30 }
 0x2de   : > { %v2130_v34 = vpop.f32.mrf.mxu1 }
 0x2df   : > { %2239 = vmatmul.f32.gmra.mxu3 %v2042_v54  ;;  %2369 = vmatmul.f32.gmra.mxu0 %v2042_v54  ;;  %v2131_v0 = vadd.f32 %v2130_v34, %v4995_v27 }
 0x2e4   : > { %v2260_v23 = vpop.f32.mrf.mxu2  ;;  %v2325_v1 = vpop.f32.mrf.mxu0 }
 0x2e5   : > { %v2261_v16 = vadd.f32 %v2260_v23, %v4993_v25 }
 0x2e6   : > { %v2133_v45 = vpop.f32.mrf.mxu1 }
 0x2e7   : > { %v2326_v37 = vadd.f32 %v2325_v1, %v2261_v16  ;;  %v2134_v9 = vadd.f32 %v2133_v45, %v4995_v27 }
 0x2e9   : > { %v2374_v28 = vmul.f32 0.5, %v2326_v37 }
 0x2ea   : > { %v2195_v18 = vpop.f32.mrf.mxu3 }
 0x2eb   : > { %3301 = vtanh.f32 %v2374_v28  ;;  %v2196_v40 = vadd.f32 %v2195_v18, %v2131_v0 }
 0x2ec   : > { %v2263_v5 = vpop.f32.mrf.mxu2  ;;  %v2328_v50 = vpop.f32.mrf.mxu0 }
 0x2ed   : > { %v2373_v36 = vmul.f32 0.5, %v2196_v40  ;;  %v2264_v7 = vadd.f32 %v2263_v5, %v4993_v25 }
 0x2ee   : > { %v2136_v8 = vpop.f32.mrf.mxu1 }
 0x2ef   : > { %3303 = vtanh.f32 %v2373_v36  ;;  %v2329_v13 = vadd.f32 %v2328_v50, %v2264_v7  ;;  %v2137_v12 = vadd.f32 %v2136_v8, %v4995_v27 }
 0x2f1   : > { %v3302_v43 = vpop.eup %3301  ;;  %v2376_v19 = vmul.f32 0.5, %v2329_v13 }
 0x2f2   : > { %v2438_v61 = vmul.f32 0.5, %v3302_v43  ;;  %v2198_v39 = vpop.f32.mrf.mxu3 }
 0x2f3   : > { %3305 = vtanh.f32 %v2376_v19  ;;  %v2199_v55 = vadd.f32 %v2198_v39, %v2134_v9 }
 0x2f4   : > { %v2470_v58 = vadd.f32 0.5, %v2438_v61  ;;  %v2266_v24 = vpop.f32.mrf.mxu2  ;;  %v2331_v41 = vpop.f32.mrf.mxu0 }
 0x2f5   : > { %v3304_v10 = vpop.eup %3303  ;;  %v2375_v21 = vmul.f32 0.5, %v2199_v55  ;;  %v2267_v46 = vadd.f32 %v2266_v24, %v4993_v25 }
 0x2f6   : > { %v2437_v38 = vmul.f32 0.5, %v3304_v10  ;;  %v2139_v47 = vpop.f32.mrf.mxu1  ;;  %2618 = vmatmul.f32.vlgmr.msra.gmra.mxu3 %v2470_v58 }
 0x2f7   : > { %3307 = vtanh.f32 %v2375_v21  ;;  %v2332_v26 = vadd.f32 %v2331_v41, %v2267_v46  ;;  %v2140_v11 = vadd.f32 %v2139_v47, %v4995_v27 }
 0x2f8   : > { %v2469_v60 = vadd.f32 0.5, %v2437_v38 }
 0x2f9   : > { %v3306_v42 = vpop.eup %3305  ;;  %v2378_v29 = vmul.f32 0.5, %v2332_v26 }
 0x2fa   : > { %v2440_v14 = vmul.f32 0.5, %v3306_v42  ;;  %v2201_v49 = vpop.f32.mrf.mxu3  ;;  %2553 = vmatmul.f32.vlgmr.msra.gmra.mxu1 %v2469_v60 }
 0x2fb   : > { %3309 = vtanh.f32 %v2378_v29  ;;  %v2202_v20 = vadd.f32 %v2201_v49, %v2137_v12 }
 0x2fc   : > { %v2472_v44 = vadd.f32 0.5, %v2440_v14  ;;  %v2269_v22 = vpop.f32.mrf.mxu2  ;;  %v2334_v59 = vpop.f32.mrf.mxu0 }
 0x2fd   : > { %v3308_v51 = vpop.eup %3307  ;;  %v2377_v2 = vmul.f32 0.5, %v2202_v20  ;;  %v2270_v62 = vadd.f32 %v2269_v22, %v4993_v25 }
 0x2fe   : > { %v2142_v33 = vpop.f32.mrf.mxu1  ;;  %2621 = vmatmul.f32.gmra.mxu3 %v2472_v44  ;;  %v2439_v53 = vmul.f32 0.5, %v3308_v51 }
 0x2ff   : > { %3311 = vtanh.f32 %v2377_v2  ;;  %v2335_v63 = vadd.f32 %v2334_v59, %v2270_v62  ;;  %v2143_v16 = vadd.f32 %v2142_v33, %v4995_v27 }
 0x300   : > { %v2471_v4 = vadd.f32 0.5, %v2439_v53 }
 0x301   : > { %v3310_v35 = vpop.eup %3309  ;;  %v2380_v6 = vmul.f32 0.5, %v2335_v63 }
 0x302   : > { %v2442_v57 = vmul.f32 0.5, %v3310_v35  ;;  %v2204_v31 = vpop.f32.mrf.mxu3  ;;  %2556 = vmatmul.f32.gmra.mxu1 %v2471_v4 }
 0x303   : > { %3313 = vtanh.f32 %v2380_v6  ;;  %v2205_v56 = vadd.f32 %v2204_v31, %v2140_v11 }
 0x304   : > { %v2474_v48 = vadd.f32 0.5, %v2442_v57  ;;  %v2272_v3 = vpop.f32.mrf.mxu2  ;;  %v2337_v52 = vpop.f32.mrf.mxu0 }
 0x305   : > { %v3312_v32 = vpop.eup %3311  ;;  %v2379_v17 = vmul.f32 0.5, %v2205_v56  ;;  %v2273_v30 = vadd.f32 %v2272_v3, %v4993_v25 }
 0x306   : > { %v2145_v54 = vpop.f32.mrf.mxu1  ;;  %2624 = vmatmul.f32.gmra.mxu3 %v2474_v48  ;;  %v2441_v34 = vmul.f32 0.5, %v3312_v32 }
 0x307   : > { %3315 = vtanh.f32 %v2379_v17  ;;  %v2338_v15 = vadd.f32 %v2337_v52, %v2273_v30  ;;  %v2146_v61 = vadd.f32 %v2145_v54, %v4995_v27 }
 0x308   : > { %v2473_v23 = vadd.f32 0.5, %v2441_v34 }
 0x309   : > { %v3314_v1 = vpop.eup %3313  ;;  %v2382_v45 = vmul.f32 0.5, %v2338_v15 }
 0x30a   : > { %v2444_v37 = vmul.f32 0.5, %v3314_v1  ;;  %v2207_v0 = vpop.f32.mrf.mxu3  ;;  %2559 = vmatmul.f32.gmra.mxu1 %v2473_v23 }
 0x30b   : > { %3317 = vtanh.f32 %v2382_v45  ;;  %v2208_v28 = vadd.f32 %v2207_v0, %v2143_v16 }
 0x30c   : > { %v2476_v18 = vadd.f32 0.5, %v2444_v37  ;;  %v2275_v40 = vpop.f32.mrf.mxu2  ;;  %v2340_v5 = vpop.f32.mrf.mxu0 }
 0x30d   : > { %v3316_v50 = vpop.eup %3315  ;;  %v2381_v36 = vmul.f32 0.5, %v2208_v28  ;;  %v2276_v7 = vadd.f32 %v2275_v40, %v4993_v25 }
 0x30e   : > { %v2148_v8 = vpop.f32.mrf.mxu1  ;;  %2627 = vmatmul.f32.gmra.mxu3 %v2476_v18  ;;  %v2443_v13 = vmul.f32 0.5, %v3316_v50 }
 0x30f   : > { %3319 = vtanh.f32 %v2381_v36  ;;  %v2341_v43 = vadd.f32 %v2340_v5, %v2276_v7  ;;  %v2149_v14 = vadd.f32 %v2148_v8, %v4995_v27 }
 0x310   : > { %v2475_v9 = vadd.f32 0.5, %v2443_v13 }
 0x311   : > { %v3318_v19 = vpop.eup %3317  ;;  %v2384_v39 = vmul.f32 0.5, %v2341_v43 }
 0x312   : > { %v2446_v55 = vmul.f32 0.5, %v3318_v19  ;;  %v2210_v58 = vpop.f32.mrf.mxu3  ;;  %2562 = vmatmul.f32.gmra.mxu1 %v2475_v9 }
 0x313   : > { %3321 = vtanh.f32 %v2384_v39  ;;  %v2211_v24 = vadd.f32 %v2210_v58, %v2146_v61 }
 0x314   : > { %v2478_v41 = vadd.f32 0.5, %v2446_v55  ;;  %v2278_v10 = vpop.f32.mrf.mxu2  ;;  %v2343_v21 = vpop.f32.mrf.mxu0 }
 0x315   : > { %v3320_v46 = vpop.eup %3319  ;;  %v2383_v38 = vmul.f32 0.5, %v2211_v24  ;;  %v2279_v47 = vadd.f32 %v2278_v10, %v4993_v25 }
 0x316   : > { %v2151_v26 = vpop.f32.mrf.mxu1  ;;  %2630 = vmatmul.f32.gmra.mxu3 %v2478_v41  ;;  %v2445_v60 = vmul.f32 0.5, %v3320_v46 }
 0x317   : > { %3323 = vtanh.f32 %v2383_v38  ;;  %v2344_v42 = vadd.f32 %v2343_v21, %v2279_v47  ;;  %v2152_v57 = vadd.f32 %v2151_v26, %v4995_v27 }
 0x318   : > { %v2477_v12 = vadd.f32 0.5, %v2445_v60 }
 0x319   : > { %v3322_v29 = vpop.eup %3321  ;;  %v2386_v49 = vmul.f32 0.5, %v2344_v42 }
 0x31a   : > { %v2448_v20 = vmul.f32 0.5, %v3322_v29  ;;  %v2213_v44 = vpop.f32.mrf.mxu3  ;;  %2565 = vmatmul.f32.gmra.mxu1 %v2477_v12 }
 0x31b   : > { %3325 = vtanh.f32 %v2386_v49  ;;  %v2214_v22 = vadd.f32 %v2213_v44, %v2149_v14 }
 0x31c   : > { %v2480_v59 = vadd.f32 0.5, %v2448_v20  ;;  %v2281_v51 = vpop.f32.mrf.mxu2  ;;  %v2346_v2 = vpop.f32.mrf.mxu0 }
 0x31d   : > { %v3324_v62 = vpop.eup %3323  ;;  %v2385_v33 = vmul.f32 0.5, %v2214_v22  ;;  %v2282_v53 = vadd.f32 %v2281_v51, %v4993_v25 }
 0x31e   : > { %v2154_v63 = vpop.f32.mrf.mxu1  ;;  %2633 = vmatmul.f32.gmra.mxu3 %v2480_v59  ;;  %v2447_v4 = vmul.f32 0.5, %v3324_v62 }
 0x31f   : > { %3327 = vtanh.f32 %v2385_v33  ;;  %v2347_v35 = vadd.f32 %v2346_v2, %v2282_v53  ;;  %v2155_v37 = vadd.f32 %v2154_v63, %v4995_v27 }
 0x320   : > { %v2479_v11 = vadd.f32 0.5, %v2447_v4 }
 0x321   : > { %v3326_v6 = vpop.eup %3325  ;;  %v2388_v31 = vmul.f32 0.5, %v2347_v35 }
 0x322   : > { %v2450_v56 = vmul.f32 0.5, %v3326_v6  ;;  %v2216_v48 = vpop.f32.mrf.mxu3  ;;  %2568 = vmatmul.f32.gmra.mxu1 %v2479_v11 }
 0x323   : > { %3329 = vtanh.f32 %v2388_v31  ;;  %v2217_v3 = vadd.f32 %v2216_v48, %v2152_v57 }
 0x324   : > { %v2482_v52 = vadd.f32 0.5, %v2450_v56  ;;  %v2284_v32 = vpop.f32.mrf.mxu2  ;;  %v2349_v17 = vpop.f32.mrf.mxu0 }
 0x325   : > { %v3328_v30 = vpop.eup %3327  ;;  %v2387_v54 = vmul.f32 0.5, %v2217_v3  ;;  %v2285_v34 = vadd.f32 %v2284_v32, %v4993_v25 }
 0x326   : > { %v2157_v15 = vpop.f32.mrf.mxu1  ;;  %2636 = vmatmul.f32.gmra.mxu3 %v2482_v52  ;;  %v2449_v23 = vmul.f32 0.5, %v3328_v30 }
 0x327   : > { %3331 = vtanh.f32 %v2387_v54  ;;  %v2350_v1 = vadd.f32 %v2349_v17, %v2285_v34  ;;  %v2158_v55 = vadd.f32 %v2157_v15, %v4995_v27 }
 0x328   : > { %v2481_v16 = vadd.f32 0.5, %v2449_v23 }
 0x329   : > { %v3330_v45 = vpop.eup %3329  ;;  %v2390_v0 = vmul.f32 0.5, %v2350_v1 }
 0x32a   : > { %v2452_v28 = vmul.f32 0.5, %v3330_v45  ;;  %v2219_v18 = vpop.f32.mrf.mxu3  ;;  %2571 = vmatmul.f32.gmra.mxu1 %v2481_v16 }
 0x32b   : > { %3333 = vtanh.f32 %v2390_v0  ;;  %v2220_v40 = vadd.f32 %v2219_v18, %v2155_v37 }
 0x32c   : > { %v2484_v5 = vadd.f32 0.5, %v2452_v28  ;;  %v2287_v50 = vpop.f32.mrf.mxu2  ;;  %v2352_v36 = vpop.f32.mrf.mxu0 }
 0x32d   : > { %v3332_v7 = vpop.eup %3331  ;;  %v2389_v8 = vmul.f32 0.5, %v2220_v40  ;;  %v2288_v13 = vadd.f32 %v2287_v50, %v4993_v25 }
 0x32e   : > { %v2160_v43 = vpop.f32.mrf.mxu1  ;;  %2639 = vmatmul.f32.gmra.mxu3 %v2484_v5  ;;  %v2451_v9 = vmul.f32 0.5, %v3332_v7 }
 0x32f   : > { %3335 = vtanh.f32 %v2389_v8  ;;  %v2353_v19 = vadd.f32 %v2352_v36, %v2288_v13  ;;  %v2161_v20 = vadd.f32 %v2160_v43, %v4995_v27 }
 0x330   : > { %v2483_v61 = vadd.f32 0.5, %v2451_v9 }
 0x331   : > { %v3334_v39 = vpop.eup %3333  ;;  %v2392_v58 = vmul.f32 0.5, %v2353_v19 }
 0x332   : > { %v2454_v24 = vmul.f32 0.5, %v3334_v39  ;;  %v2222_v41 = vpop.f32.mrf.mxu3  ;;  %2574 = vmatmul.f32.gmra.mxu1 %v2483_v61 }
 0x333   : > { %3337 = vtanh.f32 %v2392_v58  ;;  %v2223_v10 = vadd.f32 %v2222_v41, %v2158_v55 }
 0x334   : > { %v2486_v21 = vadd.f32 0.5, %v2454_v24  ;;  %v2290_v46 = vpop.f32.mrf.mxu2  ;;  %v2355_v38 = vpop.f32.mrf.mxu0 }
 0x335   : > { %v3336_v47 = vpop.eup %3335  ;;  %v2391_v26 = vmul.f32 0.5, %v2223_v10  ;;  %v2291_v60 = vadd.f32 %v2290_v46, %v4993_v25 }
 0x336   : > { %v2453_v42 = vmul.f32 0.5, %v3336_v47  ;;  %v2163_v12 = vpop.f32.mrf.mxu1  ;;  %2642 = vmatmul.f32.gmra.mxu3 %v2486_v21 }
 0x337   : > { %3339 = vtanh.f32 %v2391_v26  ;;  %v2356_v29 = vadd.f32 %v2355_v38, %v2291_v60  ;;  %v2164_v56 = vadd.f32 %v2163_v12, %v4995_v27 }
 0x338   : > { %v2485_v14 = vadd.f32 0.5, %v2453_v42 }
 0x339   : > { %v3338_v49 = vpop.eup %3337  ;;  %v2394_v44 = vmul.f32 0.5, %v2356_v29 }
 0x33a   : > { %v2456_v22 = vmul.f32 0.5, %v3338_v49  ;;  %v2225_v59 = vpop.f32.mrf.mxu3  ;;  %2577 = vmatmul.f32.gmra.mxu1 %v2485_v14 }
 0x33b   : > { %3341 = vtanh.f32 %v2394_v44  ;;  %v2226_v51 = vadd.f32 %v2225_v59, %v2161_v20 }
 0x33c   : > { %v2488_v2 = vadd.f32 0.5, %v2456_v22  ;;  %v2293_v62 = vpop.f32.mrf.mxu2  ;;  %v2358_v33 = vpop.f32.mrf.mxu0 }
 0x33d   : > { %v3340_v53 = vpop.eup %3339  ;;  %v2393_v63 = vmul.f32 0.5, %v2226_v51  ;;  %v2294_v4 = vadd.f32 %v2293_v62, %v4993_v25 }
 0x33e   : > { %v2455_v35 = vmul.f32 0.5, %v3340_v53  ;;  %2645 = vmatmul.f32.gmra.mxu3 %v2488_v2  ;;  %v2166_v6 = vpop.f32.mrf.mxu1 }
 0x33f   : > { %3343 = vtanh.f32 %v2393_v63  ;;  %v2359_v11 = vadd.f32 %v2358_v33, %v2294_v4  ;;  %v2167_v0 = vadd.f32 %v2166_v6, %v4995_v27 }
 0x340   : > { %v2487_v57 = vadd.f32 0.5, %v2455_v35 }
 0x341   : > { %v3342_v31 = vpop.eup %3341  ;;  %v2396_v48 = vmul.f32 0.5, %v2359_v11 }
 0x342   : > { %v2458_v3 = vmul.f32 0.5, %v3342_v31  ;;  %v2228_v52 = vpop.f32.mrf.mxu3  ;;  %2580 = vmatmul.f32.gmra.mxu1 %v2487_v57 }
 0x343   : > { %3345 = vtanh.f32 %v2396_v48  ;;  %v2229_v32 = vadd.f32 %v2228_v52, %v2164_v56 }
 0x344   : > { %v2490_v17 = vadd.f32 0.5, %v2458_v3  ;;  %v2296_v30 = vpop.f32.mrf.mxu2  ;;  %v2361_v54 = vpop.f32.mrf.mxu0 }
 0x345   : > { %v3344_v34 = vpop.eup %3343  ;;  %v2395_v15 = vmul.f32 0.5, %v2229_v32  ;;  %v2297_v23 = vadd.f32 %v2296_v30, %v4993_v25 }
 0x346   : > { %v2457_v1 = vmul.f32 0.5, %v3344_v34  ;;  %2648 = vmatmul.f32.gmra.mxu3 %v2490_v17  ;;  %v2169_v18 = vpop.f32.mrf.mxu1 }
 0x347   : > { %3347 = vtanh.f32 %v2395_v15  ;;  %v2362_v16 = vadd.f32 %v2361_v54, %v2297_v23  ;;  %v2170_v58 = vadd.f32 %v2169_v18, %v4995_v27 }
 0x348   : > { %v2489_v45 = vadd.f32 0.5, %v2457_v1 }
 0x349   : > { %v3346_v37 = vpop.eup %3345  ;;  %v2398_v28 = vmul.f32 0.5, %v2362_v16 }
 0x34a   : > { %v2460_v40 = vmul.f32 0.5, %v3346_v37  ;;  %v2231_v5 = vpop.f32.mrf.mxu3  ;;  %2583 = vmatmul.f32.gmra.mxu1 %v2489_v45 }
 0x34b   : > { %3349 = vtanh.f32 %v2398_v28  ;;  %v2232_v50 = vadd.f32 %v2231_v5, %v2167_v0  ;;  %v5033_v0 = vld [vmem:[%s5199_s10] ss:$0 sm:$0xff] }
 0x34c   : > { %v2492_v36 = vadd.f32 0.5, %v2460_v40  ;;  %v2299_v7 = vpop.f32.mrf.mxu2  ;;  %v2364_v8 = vpop.f32.mrf.mxu0 }
 0x34d   : > { %v3348_v13 = vpop.eup %3347  ;;  %v2397_v43 = vmul.f32 0.5, %v2232_v50  ;;  %v2300_v9 = vadd.f32 %v2299_v7, %v4993_v25 }
 0x34e   : > { %v2459_v19 = vmul.f32 0.5, %v3348_v13  ;;  %2651 = vmatmul.f32.gmra.mxu3 %v2492_v36  ;;  %v2172_v21 = vpop.f32.mrf.mxu1 }
 0x34f   : > { %3351 = vtanh.f32 %v2397_v43  ;;  %v2365_v61 = vadd.f32 %v2364_v8, %v2300_v9  ;;  %v2173_v44 = vadd.f32 %v2172_v21, %v4995_v27 }
 0x350   : > { %v2491_v39 = vadd.f32 0.5, %v2459_v19 }
 0x351   : > { %v3350_v55 = vpop.eup %3349  ;;  %v2400_v24 = vmul.f32 0.5, %v2365_v61 }
 0x352   : > { %v2462_v41 = vmul.f32 0.5, %v3350_v55  ;;  %v2234_v10 = vpop.f32.mrf.mxu3  ;;  %2586 = vmatmul.f32.gmra.mxu1 %v2491_v39 }
 0x353   : > { %3353 = vtanh.f32 %v2400_v24  ;;  %v2235_v46 = vadd.f32 %v2234_v10, %v2170_v58 }
 0x354   : > { %v2494_v38 = vadd.f32 0.5, %v2462_v41  ;;  %v2302_v47 = vpop.f32.mrf.mxu2  ;;  %v2367_v26 = vpop.f32.mrf.mxu0 }
 0x355   : > { %v3352_v60 = vpop.eup %3351  ;;  %v2399_v42 = vmul.f32 0.5, %v2235_v46  ;;  %v2303_v12 = vadd.f32 %v2302_v47, %v4993_v25 }
 0x356   : > { %v2461_v29 = vmul.f32 0.5, %v3352_v60  ;;  %2654 = vmatmul.f32.gmra.mxu3 %v2494_v38  ;;  %v2175_v11 = vpop.f32.mrf.mxu1 }
 0x357   : > { %3355 = vtanh.f32 %v2399_v42  ;;  %v2368_v14 = vadd.f32 %v2367_v26, %v2303_v12  ;;  %v2176_v48 = vadd.f32 %v2175_v11, %v4995_v27 }
 0x358   : > { %v2493_v49 = vadd.f32 0.5, %v2461_v29 }
 0x359   : > { %v3354_v20 = vpop.eup %3353  ;;  %v2402_v22 = vmul.f32 0.5, %v2368_v14 }
 0x35a   : > { %v2464_v59 = vmul.f32 0.5, %v3354_v20  ;;  %v2237_v51 = vpop.f32.mrf.mxu3  ;;  %2589 = vmatmul.f32.gmra.mxu1 %v2493_v49 }
 0x35b   : > { %3357 = vtanh.f32 %v2402_v22  ;;  %v2238_v2 = vadd.f32 %v2237_v51, %v2173_v44 }
 0x35c   : > { %v2496_v62 = vadd.f32 0.5, %v2464_v59  ;;  %v2305_v33 = vpop.f32.mrf.mxu2  ;;  %v2370_v6 = vpop.f32.mrf.mxu0 }
 0x35d   : > { %v3356_v53 = vpop.eup %3355  ;;  %v2401_v63 = vmul.f32 0.5, %v2238_v2  ;;  %v2306_v4 = vadd.f32 %v2305_v33, %v4993_v25 }
 0x35e   : > { %v2463_v35 = vmul.f32 0.5, %v3356_v53  ;;  %2657 = vmatmul.f32.gmra.mxu3 %v2496_v62 }
 0x35f   : > { %3359 = vtanh.f32 %v2401_v63  ;;  %v2371_v57 = vadd.f32 %v2370_v6, %v2306_v4 }
 0x360   : > { %v2495_v31 = vadd.f32 0.5, %v2463_v35 }
 0x361   : > { %v3358_v56 = vpop.eup %3357  ;;  %v2404_v3 = vmul.f32 0.5, %v2371_v57 }
 0x362   : > { %v2466_v52 = vmul.f32 0.5, %v3358_v56  ;;  %v2240_v32 = vpop.f32.mrf.mxu3  ;;  %2592 = vmatmul.f32.gmra.mxu1 %v2495_v31 }
 0x363   : > { %3361 = vtanh.f32 %v2404_v3  ;;  %v2241_v17 = vadd.f32 %v2240_v32, %v2176_v48 }
 0x364   : > { %v2498_v30 = vadd.f32 0.5, %v2466_v52 }
 0x365   : > { %v3360_v54 = vpop.eup %3359  ;;  %v2403_v25 = vmul.f32 0.5, %v2241_v17 }
 0x366   : > { %v2465_v34 = vmul.f32 0.5, %v3360_v54  ;;  %2660 = vmatmul.f32.gmra.mxu3 %v2498_v30 }
 0x367   : > { %3363 = vtanh.f32 %v2403_v25 }
 0x368   : > { %v2497_v15 = vadd.f32 0.5, %v2465_v34 }
 0x369   : > { %v3362_v23 = vpop.eup %3361 }
 0x36a   : > { %v2468_v1 = vmul.f32 0.5, %v3362_v23  ;;  %2595 = vmatmul.f32.gmra.mxu1 %v2497_v15 }
 0x36c   : > { %v2500_v16 = vadd.f32 0.5, %v2468_v1 }
 0x36d   : > { %v3364_v45 = vpop.eup %3363 }
 0x36e   : > { %v2467_v27 = vmul.f32 0.5, %v3364_v45  ;;  %2663 = vmatmul.f32.gmra.mxu3 %v2500_v16 }
 0x370   : > { %v2499_v37 = vadd.f32 0.5, %v2467_v27 }
 0x372   : > { %2598 = vmatmul.f32.gmra.mxu1 %v2499_v37 }
 0x377   : > { %v2554_v28 = vpop.f32.mrf.mxu1 }
 0x378   : > { %v2555_v18 = vadd.f32 %v5033_v0, %v2554_v28 }
 0x379   : > { %v2619_v40 = vpop.f32.mrf.mxu3 }
 0x37a   : > { %v2620_v5 = vadd.f32 %v2619_v40, %v2555_v18 }
 0x37c   : > { %2668 = vst.msk [vmem:[%s5036_s19] sm:$0xff] %vm2667_vm1, %v2620_v5 }
 0x37f   : > { %v2557_v50 = vpop.f32.mrf.mxu1 }
 0x380   : > { %v2558_v36 = vadd.f32 %v5033_v0, %v2557_v50 }
 0x381   : > { %v2622_v7 = vpop.f32.mrf.mxu3 }
 0x382   : > { %v2623_v8 = vadd.f32 %v2622_v7, %v2558_v36 }
 0x384   : > { %2669 = vst.msk [vmem:[%s5036_s19 + $0x8] sm:$0xff] %vm2667_vm1, %v2623_v8 }
 0x387   : > { %v2560_v13 = vpop.f32.mrf.mxu1 }
 0x388   : > { %v2561_v43 = vadd.f32 %v5033_v0, %v2560_v13 }
 0x389   : > { %v2625_v9 = vpop.f32.mrf.mxu3 }
 0x38a   : > { %v2626_v19 = vadd.f32 %v2625_v9, %v2561_v43 }
 0x38c   : > { %2670 = vst.msk [vmem:[%s5036_s19 + $0x10] sm:$0xff] %vm2667_vm1, %v2626_v19 }
 0x38f   : > { %v2563_v61 = vpop.f32.mrf.mxu1 }
 0x390   : > { %v2564_v39 = vadd.f32 %v5033_v0, %v2563_v61 }
 0x391   : > { %v2628_v55 = vpop.f32.mrf.mxu3 }
 0x392   : > { %v2629_v58 = vadd.f32 %v2628_v55, %v2564_v39 }
 0x394   : > { %2671 = vst.msk [vmem:[%s5036_s19 + $0x18] sm:$0xff] %vm2667_vm1, %v2629_v58 }
 0x397   : > { %v2566_v24 = vpop.f32.mrf.mxu1 }
 0x398   : > { %v2567_v41 = vadd.f32 %v5033_v0, %v2566_v24 }
 0x399   : > { %v2631_v10 = vpop.f32.mrf.mxu3 }
 0x39a   : > { %v2632_v21 = vadd.f32 %v2631_v10, %v2567_v41 }
 0x39c   : > { %2672 = vst.msk [vmem:[%s5036_s19 + $0x20] sm:$0xff] %vm2667_vm1, %v2632_v21 }
 0x39f   : > { %v2569_v46 = vpop.f32.mrf.mxu1 }
 0x3a0   : > { %v2570_v38 = vadd.f32 %v5033_v0, %v2569_v46 }
 0x3a1   : > { %v2634_v47 = vpop.f32.mrf.mxu3 }
 0x3a2   : > { %v2635_v26 = vadd.f32 %v2634_v47, %v2570_v38 }
 0x3a4   : > { %2673 = vst.msk [vmem:[%s5036_s19 + $0x28] sm:$0xff] %vm2667_vm1, %v2635_v26 }
 0x3a7   : > { %v2572_v60 = vpop.f32.mrf.mxu1 }
 0x3a8   : > { %v2573_v42 = vadd.f32 %v5033_v0, %v2572_v60 }
 0x3a9   : > { %v2637_v12 = vpop.f32.mrf.mxu3 }
 0x3aa   : > { %v2638_v29 = vadd.f32 %v2637_v12, %v2573_v42 }
 0x3ac   : > { %2674 = vst.msk [vmem:[%s5036_s19 + $0x30] sm:$0xff] %vm2667_vm1, %v2638_v29 }
 0x3af   : > { %v2575_v14 = vpop.f32.mrf.mxu1 }
 0x3b0   : > { %v2576_v49 = vadd.f32 %v5033_v0, %v2575_v14 }
 0x3b1   : > { %v2640_v20 = vpop.f32.mrf.mxu3 }
 0x3b2   : > { %v2641_v44 = vadd.f32 %v2640_v20, %v2576_v49 }
 0x3b4   : > { %2675 = vst.msk [vmem:[%s5036_s19 + $0x38] sm:$0xff] %vm2667_vm1, %v2641_v44 }
 0x3b7   : > { %v2578_v22 = vpop.f32.mrf.mxu1 }
 0x3b8   : > { %v2579_v59 = vadd.f32 %v5033_v0, %v2578_v22 }
 0x3b9   : > { %v2643_v51 = vpop.f32.mrf.mxu3 }
 0x3ba   : > { %v2644_v2 = vadd.f32 %v2643_v51, %v2579_v59 }
 0x3bc   : > { %2676 = vst.msk [vmem:[%s5036_s19 + $0x40] sm:$0xff] %vm2667_vm1, %v2644_v2 }
 0x3bf   : > { %v2581_v62 = vpop.f32.mrf.mxu1 }
 0x3c0   : > { %v2582_v33 = vadd.f32 %v5033_v0, %v2581_v62 }
 0x3c1   : > { %v2646_v53 = vpop.f32.mrf.mxu3 }
 0x3c2   : > { %v2647_v63 = vadd.f32 %v2646_v53, %v2582_v33 }
 0x3c4   : > { %2677 = vst.msk [vmem:[%s5036_s19 + $0x48] sm:$0xff] %vm2667_vm1, %v2647_v63 }
 0x3c7   : > { %v2584_v4 = vpop.f32.mrf.mxu1 }
 0x3c8   : > { %v2585_v35 = vadd.f32 %v5033_v0, %v2584_v4 }
 0x3c9   : > { %v2649_v11 = vpop.f32.mrf.mxu3 }
 0x3ca   : > { %v2650_v6 = vadd.f32 %v2649_v11, %v2585_v35 }
 0x3cc   : > { %2678 = vst.msk [vmem:[%s5036_s19 + $0x50] sm:$0xff] %vm2667_vm1, %v2650_v6 }
 0x3cf   : > { %v2587_v57 = vpop.f32.mrf.mxu1 }
 0x3d0   : > { %v2588_v31 = vadd.f32 %v5033_v0, %v2587_v57 }
 0x3d1   : > { %v2652_v56 = vpop.f32.mrf.mxu3 }
 0x3d2   : > { %v2653_v48 = vadd.f32 %v2652_v56, %v2588_v31 }
 0x3d4   : > { %2679 = vst.msk [vmem:[%s5036_s19 + $0x58] sm:$0xff] %vm2667_vm1, %v2653_v48 }
 0x3d7   : > { %v2590_v3 = vpop.f32.mrf.mxu1 }
 0x3d8   : > { %v2591_v52 = vadd.f32 %v5033_v0, %v2590_v3 }
 0x3d9   : > { %v2655_v32 = vpop.f32.mrf.mxu3 }
 0x3da   : > { %v2656_v17 = vadd.f32 %v2655_v32, %v2591_v52 }
 0x3dc   : > { %2680 = vst.msk [vmem:[%s5036_s19 + $0x60] sm:$0xff] %vm2667_vm1, %v2656_v17 }
 0x3df   : > { %v2593_v30 = vpop.f32.mrf.mxu1 }
 0x3e0   : > { %v2594_v54 = vadd.f32 %v5033_v0, %v2593_v30 }
 0x3e1   : > { %v2658_v25 = vpop.f32.mrf.mxu3 }
 0x3e2   : > { %v2659_v34 = vadd.f32 %v2658_v25, %v2594_v54 }
 0x3e4   : > { %2681 = vst.msk [vmem:[%s5036_s19 + $0x68] sm:$0xff] %vm2667_vm1, %v2659_v34 }
 0x3e7   : > { %v2596_v15 = vpop.f32.mrf.mxu1 }
 0x3e8   : > { %v2597_v23 = vadd.f32 %v5033_v0, %v2596_v15 }
 0x3e9   : > { %v2661_v1 = vpop.f32.mrf.mxu3 }
 0x3ea   : > { %v2662_v16 = vadd.f32 %v2661_v1, %v2597_v23 }
 0x3ec   : > { %2682 = vst.msk [vmem:[%s5036_s19 + $0x70] sm:$0xff] %vm2667_vm1, %v2662_v16 }
 0x3ef   : > { %v2599_v45 = vpop.f32.mrf.mxu1 }
 0x3f0   : > { %v2600_v27 = vadd.f32 %v5033_v0, %v2599_v45  ;;  %2690 = sbr.rel (!%p3538_p4) target bundleno = 1061 (0x425), region = 68 }
 0x3f1   : > { %v2664_v37 = vpop.f32.mrf.mxu3 }
 0x3f2   : > { %v2665_v28 = vadd.f32 %v2664_v37, %v2600_v27 }
 0x3f4   : > { %2683 = vst.msk [vmem:[%s5036_s19 + $0x78] sm:$0xff] %vm2667_vm1, %v2665_v28 }
 0x3f5   : > { %s5211_s17 = smov (!%p2693_p8, %s2692_s17), 16 }
 0x3f6   : > { %s3001_s30 = sshll.u32 %s5211_s17, 3 }
 0x3f7   : > { %p3004_p9 = scmp.eq.s32.totalorder %s3001_s30, 0 }
 0x3f8   : > { %s5098_s12 = sshrl.u32 (!%p3004_p9), %s5211_s17, 4 }
 0x3f9   : > { %2701 = sbr.rel (%p3004_p9) target bundleno = 1061 (0x425), region = 72  ;;  %p3005_p10 = scmp.le.s32.totalorder (!%p3004_p9), %s5098_s12, 0 }
 0x3fe   : > { %2916 = sbr.rel (%p3005_p10) target bundleno = 1044 (0x414), region = 148  ;;  %s5202_s20 = smov (!%p3005_p10), %s5092_s29 }
 0x3ff   : > { %s5203_s25 = smov (!%p3005_p10), %s5036_s19  ;;  %s5107_s22 = smov (!%p3005_p10), 0  }
 0x400   : > { %s5109_s13 = smov (!%p3005_p10), 0  }
 0x403 LB: >> { %v2794_v0 = vld [vmem:[%s3427_s25] sm:$0xff]  ;;  %v2796_v18 = vld [vmem:[%s3427_s25 + $0x8] sm:$0xff]  ;;  %v2798_v40 = vld [vmem:[%s3427_s25 + $0x10] sm:$0xff]  ;;  %s2826_s14 = sadd.s32 1, %s3431_s22  ;;  %s2788_s13 = sadd.s32 1, %s3435_s13   ;;  %s3435_s13 = sphi %s5109_s13, %s2788_s13   ;;  %s3431_s22 = sphi %s5107_s22, %s5206_s22   ;;  %s3427_s25 = sphi %s5203_s25, %s5205_s25   ;;  %s3423_s20 = sphi %s5202_s20, %s5204_s20  }
 0x404   : >> { %2795 = vst [vmem:[%s3423_s20] sm:$0xff] %v2794_v0  ;;  %v2800_v5 = vld [vmem:[%s3427_s25 + $0x18] sm:$0xff]  ;;  %p2827_p11 = scmp.ge.s32.totalorder %s2826_s14, %s5098_s12  ;;  %v2802_v50 = vld [vmem:[%s3427_s25 + $0x20] sm:$0xff]  ;;  %v2804_v36 = vld [vmem:[%s3427_s25 + $0x28] sm:$0xff]  ;;  %p2787_p12 = scmp.ge.s32.totalorder %s2788_s13, %s5098_s12 }
 0x405   : >> { %2797 = vst [vmem:[%s3423_s20 + $0x8] sm:$0xff] %v2796_v18  ;;  %v2806_v7 = vld [vmem:[%s3427_s25 + $0x30] sm:$0xff]  ;;  %v2808_v8 = vld [vmem:[%s3427_s25 + $0x38] sm:$0xff]  ;;  %v2810_v13 = vld [vmem:[%s3427_s25 + $0x40] sm:$0xff] }
 0x406   : >> { %2799 = vst [vmem:[%s3423_s20 + $0x10] sm:$0xff] %v2798_v40  ;;  %s5213_s14 = smov (%p2827_p11, %s2826_s14), 0  ;;  %v2812_v43 = vld [vmem:[%s3427_s25 + $0x48] sm:$0xff]  ;;  %v2814_v9 = vld [vmem:[%s3427_s25 + $0x50] sm:$0xff]  ;;  %v2816_v19 = vld [vmem:[%s3427_s25 + $0x58] sm:$0xff] }
 0x407   : >> { %2801 = vst [vmem:[%s3423_s20 + $0x18] sm:$0xff] %v2800_v5  ;;  %s3006_s16 = sshll.u32 %s5213_s14, 7  ;;  %v2818_v61 = vld [vmem:[%s3427_s25 + $0x60] sm:$0xff]  ;;  %v2820_v39 = vld [vmem:[%s3427_s25 + $0x68] sm:$0xff]  ;;  %v2822_v55 = vld [vmem:[%s3427_s25 + $0x70] sm:$0xff]  ;;  %s5206_s22 = smov %s5213_s14 }
 0x408   : >> { %2803 = vst [vmem:[%s3423_s20 + $0x20] sm:$0xff] %v2802_v50  ;;  %s2831_s15 = scalar_lea.vmem %s5036_s19, %s3006_s16 [#allocation2]   ;;  %s2832_s23 = scalar_lea.vmem %s5092_s29, %s3006_s16   ;;  %v2824_v58 = vld [vmem:[%s3427_s25 + $0x78] sm:$0xff] }
 0x409   : >> { %2805 = vst [vmem:[%s3423_s20 + $0x28] sm:$0xff] %v2804_v36  ;;  %s5205_s25 = smov %s2831_s15 }
 0x40a   : >> { %2807 = vst [vmem:[%s3423_s20 + $0x30] sm:$0xff] %v2806_v7 }
 0x40b   : >> { %2809 = vst [vmem:[%s3423_s20 + $0x38] sm:$0xff] %v2808_v8 }
 0x40c   : >> { %2811 = vst [vmem:[%s3423_s20 + $0x40] sm:$0xff] %v2810_v13 }
 0x40d   : >> { %2813 = vst [vmem:[%s3423_s20 + $0x48] sm:$0xff] %v2812_v43 }
 0x40e   : >> { %2815 = vst [vmem:[%s3423_s20 + $0x50] sm:$0xff] %v2814_v9 }
 0x40f   : >> { %2817 = vst [vmem:[%s3423_s20 + $0x58] sm:$0xff] %v2816_v19  ;;  %2790 = sbr.rel (!%p2787_p12) target bundleno = 1027 (0x403), region = 154 }
 0x410   : >> { %2819 = vst [vmem:[%s3423_s20 + $0x60] sm:$0xff] %v2818_v61 }
 0x411   : >> { %2821 = vst [vmem:[%s3423_s20 + $0x68] sm:$0xff] %v2820_v39 }
 0x412   : >> { %2823 = vst [vmem:[%s3423_s20 + $0x70] sm:$0xff] %v2822_v55 }
 0x413   : >> { %2825 = vst [vmem:[%s3423_s20 + $0x78] sm:$0xff] %v2824_v58  ;;  %s5204_s20 = smov %s2832_s23 }
 0x414 PF: > { %s5171_s26 = sand.u32 15, %s5211_s17   ;;  %s3017_s27 = sshll.u32 %s5098_s12, 7 }
 0x415   : > { %s2837_s28 = scalar_lea.vmem %s5036_s19, %s3017_s27 [#allocation2]   ;;  %s2839_s30 = scalar_lea.vmem %s5092_s29, %s3017_s27  }
 0x416   : > { %p3011_p13 = scmp.le.s32.totalorder %s5171_s26, 0 }
 0x417   : > { %s3437_s16 = smov (!%p3011_p13), %s2839_s30   ;;  %s3441_s15 = smov (!%p3011_p13), %s2837_s28  }
 0x418   : > { %2930 = sbr.rel (%p3011_p13) target bundleno = 1061 (0x425), region = 159  ;;  %s3445_s23 = smov (!%p3011_p13), 0  }
 0x419   : > { %s3449_s14 = smov (!%p3011_p13), 0  }
 0x41d LB: >> { %v2849_v24 = vld [vmem:[%s3443_s15] sm:$0xff]  ;;  %s2851_s17 = sadd.s32 1, %s3447_s23  ;;  %s2843_s14 = sadd.s32 1, %s3451_s14   ;;  %s3451_s14 = sphi %s3449_s14, %s2843_s14   ;;  %s3447_s23 = sphi %s3445_s23, %s3446_s23   ;;  %s3443_s15 = sphi %s3441_s15, %s2856_s15   ;;  %s3439_s16 = sphi %s3437_s16, %s2857_s16  }
 0x41e   : >> { %2850 = vst [vmem:[%s3439_s16] sm:$0xff] %v2849_v24  ;;  %p2852_p0 = scmp.ge.s32.totalorder %s2851_s17, %s5171_s26  ;;  %p2842_p1 = scmp.ge.s32.totalorder %s2843_s14, %s5171_s26 }
 0x420   : >> { %s5215_s17 = smov (%p2852_p0, %s2851_s17), 0  ;;  %2845 = sbr.rel (!%p2842_p1) target bundleno = 1053 (0x41d), region = 165 }
 0x421   : >> { %s3012_s19 = sshll.u32 %s5215_s17, 3  ;;  %s3446_s23 = smov %s5215_s17  }
 0x422   : >> { %s2856_s15 = scalar_lea.vmem %s2837_s28, %s3012_s19 [#allocation2]   ;;  %s2857_s16 = scalar_lea.vmem %s2839_s30, %s3012_s19  }
 0x425 PF: > { %p18_p2 = scmp.ge.s32.totalorder %s3528_s21, 7   ;;  %s5207_s17 = smov %s3415_s18 }
 0x426   : > { %s5208_s18 = smov %s3536_s24  ;;  %s5209_s19 = smov %s3528_s21 }
 0x427   :  { %20 = sbr.rel (!%p18_p2) target bundleno = 2 (0x2), region = 176 }

// kernel: word_nn_forward.3
= control target key start
LH: loop header
LB: loop body
LE: loop exit
PB: predicated region body
PF: predicated region fallthrough
CT: control target
= control target key end

     0   :  { %vm928_vm0 = vcmask 982016   ;;  %vm1852_vm1 = vcmask 519168   ;;  %vm1912_vm6 = vcmask 523264   ;;  %vm1937_vm7 = vcmask 11264   ;;  %s4418_s1 = inlined_call_operand.vmem [shape: f32[5880,64], index: 1, kind: input, shape index: {}]   ;;  %s4419_s0 = inlined_call_operand.vmem [shape: f32[4,5880], index: 0, kind: input, shape index: {}]   ;;  %s4420_s2 = inlined_call_operand.vmem [shape: f32[1,64], index: 2, kind: input, shape index: {}]   ;;  %s4421_s3 = inlined_call_operand.vmem [shape: f32[1,64], index: 3, kind: input, shape index: {}]   ;;  %s4422_s4 = inlined_call_operand.vmem [shape: f32[1,64], index: 4, kind: input, shape index: {}]   ;;  %s4423_s6 = inlined_call_operand.vmem [shape: f32[1,2], index: 6, kind: input, shape index: {}]   ;;  %s4424_s5 = inlined_call_operand.vmem [shape: f32[64,2], index: 5, kind: input, shape index: {}]   ;;  %s4425_s7 = inlined_call_operand.vmem [shape: f32[4,2], index: 7, kind: output, shape index: {}]  }
   0x1   :  { %v64_v0 = vld [vmem:[%s4418_s1 + $0x78] sm:$0xff]  ;;  %v63_v2 = vld [vmem:[%s4418_s1 + $0x70] sm:$0xff]  ;;  %v62_v6 = vld [vmem:[%s4418_s1 + $0x68] sm:$0xff] }
   0x2   :  { %v96_v1 = vld [vmem:[%s4418_s1 + $0x178] sm:$0xff]  ;;  %931 = vmatpush.msra.mxu0 %v64_v0  ;;  %v95_v4 = vld [vmem:[%s4418_s1 + $0x170] sm:$0xff]  ;;  %v94_v8 = vld [vmem:[%s4418_s1 + $0x168] sm:$0xff] }
   0x3   :  { %971 = vmatpush.msra.mxu2 %v96_v1  ;;  %v80_v3 = vld [vmem:[%s4418_s1 + $0xf8] sm:$0xff]  ;;  %v79_v7 = vld [vmem:[%s4418_s1 + $0xf0] sm:$0xff]  ;;  %v78_v10 = vld [vmem:[%s4418_s1 + $0xe8] sm:$0xff] }
   0x4   :  { %v112_v5 = vld [vmem:[%s4418_s1 + $0x1f8] sm:$0xff]  ;;  %951 = vmatpush.msra.mxu1 %v80_v3  ;;  %932 = vmatpush.msra.mxu0 %v63_v2  ;;  %v111_v9 = vld [vmem:[%s4418_s1 + $0x1f0] sm:$0xff]  ;;  %v61_v11 = vld [vmem:[%s4418_s1 + $0x60] sm:$0xff] }
   0x5   :  { %991 = vmatpush.msra.mxu3 %v112_v5  ;;  %972 = vmatpush.msra.mxu2 %v95_v4  ;;  %v93_v12 = vld [vmem:[%s4418_s1 + $0x160] sm:$0xff]  ;;  %v110_v13 = vld [vmem:[%s4418_s1 + $0x1e8] sm:$0xff]  ;;  %v60_v16 = vld [vmem:[%s4418_s1 + $0x58] sm:$0xff] }
   0x6   :  { %952 = vmatpush.msra.mxu1 %v79_v7  ;;  %933 = vmatpush.msra.mxu0 %v62_v6  ;;  %v77_v14 = vld [vmem:[%s4418_s1 + $0xe0] sm:$0xff]  ;;  %v92_v17 = vld [vmem:[%s4418_s1 + $0x158] sm:$0xff]  ;;  %v59_v20 = vld [vmem:[%s4418_s1 + $0x50] sm:$0xff] }
   0x7   :  { %992 = vmatpush.msra.mxu3 %v111_v9  ;;  %973 = vmatpush.msra.mxu2 %v94_v8  ;;  %v109_v15 = vld [vmem:[%s4418_s1 + $0x1e0] sm:$0xff]  ;;  %v76_v18 = vld [vmem:[%s4418_s1 + $0xd8] sm:$0xff]  ;;  %v91_v21 = vld [vmem:[%s4418_s1 + $0x150] sm:$0xff] }
   0x8   :  { %953 = vmatpush.msra.mxu1 %v78_v10  ;;  %934 = vmatpush.msra.mxu0 %v61_v11  ;;  %v108_v19 = vld [vmem:[%s4418_s1 + $0x1d8] sm:$0xff]  ;;  %v75_v22 = vld [vmem:[%s4418_s1 + $0xd0] sm:$0xff]  ;;  %v58_v24 = vld [vmem:[%s4418_s1 + $0x48] sm:$0xff] }
   0x9   :  { %993 = vmatpush.msra.mxu3 %v110_v13  ;;  %974 = vmatpush.msra.mxu2 %v93_v12  ;;  %v107_v23 = vld [vmem:[%s4418_s1 + $0x1d0] sm:$0xff]  ;;  %v90_v25 = vld [vmem:[%s4418_s1 + $0x148] sm:$0xff]  ;;  %v57_v28 = vld [vmem:[%s4418_s1 + $0x40] sm:$0xff] }
   0xa   :  { %954 = vmatpush.msra.mxu1 %v77_v14  ;;  %935 = vmatpush.msra.mxu0 %v60_v16  ;;  %v74_v26 = vld [vmem:[%s4418_s1 + $0xc8] sm:$0xff]  ;;  %v89_v29 = vld [vmem:[%s4418_s1 + $0x140] sm:$0xff]  ;;  %v56_v32 = vld [vmem:[%s4418_s1 + $0x38] sm:$0xff] }
   0xb   :  { %994 = vmatpush.msra.mxu3 %v109_v15  ;;  %975 = vmatpush.msra.mxu2 %v92_v17  ;;  %v106_v27 = vld [vmem:[%s4418_s1 + $0x1c8] sm:$0xff]  ;;  %v73_v30 = vld [vmem:[%s4418_s1 + $0xc0] sm:$0xff]  ;;  %v88_v33 = vld [vmem:[%s4418_s1 + $0x138] sm:$0xff] }
   0xc   :  { %955 = vmatpush.msra.mxu1 %v76_v18  ;;  %936 = vmatpush.msra.mxu0 %v59_v20  ;;  %v105_v31 = vld [vmem:[%s4418_s1 + $0x1c0] sm:$0xff]  ;;  %v72_v34 = vld [vmem:[%s4418_s1 + $0xb8] sm:$0xff]  ;;  %v55_v36 = vld [vmem:[%s4418_s1 + $0x30] sm:$0xff] }
   0xd   :  { %995 = vmatpush.msra.mxu3 %v108_v19  ;;  %976 = vmatpush.msra.mxu2 %v91_v21  ;;  %v104_v35 = vld [vmem:[%s4418_s1 + $0x1b8] sm:$0xff]  ;;  %v87_v37 = vld [vmem:[%s4418_s1 + $0x130] sm:$0xff]  ;;  %v54_v40 = vld [vmem:[%s4418_s1 + $0x28] sm:$0xff] }
   0xe   :  { %956 = vmatpush.msra.mxu1 %v75_v22  ;;  %937 = vmatpush.msra.mxu0 %v58_v24  ;;  %v71_v38 = vld [vmem:[%s4418_s1 + $0xb0] sm:$0xff]  ;;  %v86_v41 = vld [vmem:[%s4418_s1 + $0x128] sm:$0xff]  ;;  %v53_v44 = vld [vmem:[%s4418_s1 + $0x20] sm:$0xff] }
   0xf   :  { %996 = vmatpush.msra.mxu3 %v107_v23  ;;  %977 = vmatpush.msra.mxu2 %v90_v25  ;;  %v103_v39 = vld [vmem:[%s4418_s1 + $0x1b0] sm:$0xff]  ;;  %v70_v42 = vld [vmem:[%s4418_s1 + $0xa8] sm:$0xff]  ;;  %v85_v45 = vld [vmem:[%s4418_s1 + $0x120] sm:$0xff] }
  0x10   :  { %957 = vmatpush.msra.mxu1 %v74_v26  ;;  %938 = vmatpush.msra.mxu0 %v57_v28  ;;  %v102_v43 = vld [vmem:[%s4418_s1 + $0x1a8] sm:$0xff]  ;;  %v69_v46 = vld [vmem:[%s4418_s1 + $0xa0] sm:$0xff]  ;;  %v52_v48 = vld [vmem:[%s4418_s1 + $0x18] sm:$0xff] }
  0x11   :  { %997 = vmatpush.msra.mxu3 %v106_v27  ;;  %978 = vmatpush.msra.mxu2 %v89_v29  ;;  %v101_v47 = vld [vmem:[%s4418_s1 + $0x1a0] sm:$0xff]  ;;  %v84_v49 = vld [vmem:[%s4418_s1 + $0x118] sm:$0xff]  ;;  %v51_v52 = vld [vmem:[%s4418_s1 + $0x10] sm:$0xff] }
  0x12   :  { %958 = vmatpush.msra.mxu1 %v73_v30  ;;  %939 = vmatpush.msra.mxu0 %v56_v32  ;;  %v68_v50 = vld [vmem:[%s4418_s1 + $0x98] sm:$0xff]  ;;  %v83_v53 = vld [vmem:[%s4418_s1 + $0x110] sm:$0xff]  ;;  %v50_v56 = vld [vmem:[%s4418_s1 + $0x8] sm:$0xff] }
  0x13   :  { %998 = vmatpush.msra.mxu3 %v105_v31  ;;  %979 = vmatpush.msra.mxu2 %v88_v33  ;;  %v100_v51 = vld [vmem:[%s4418_s1 + $0x198] sm:$0xff]  ;;  %v67_v54 = vld [vmem:[%s4418_s1 + $0x90] sm:$0xff]  ;;  %v82_v57 = vld [vmem:[%s4418_s1 + $0x108] sm:$0xff] }
  0x14   :  { %959 = vmatpush.msra.mxu1 %v72_v34  ;;  %940 = vmatpush.msra.mxu0 %v55_v36  ;;  %v99_v55 = vld [vmem:[%s4418_s1 + $0x190] sm:$0xff]  ;;  %v66_v58 = vld [vmem:[%s4418_s1 + $0x88] sm:$0xff]  ;;  %v49_v60 = vld [vmem:[%s4418_s1] sm:$0xff] }
  0x15   :  { %999 = vmatpush.msra.mxu3 %v104_v35  ;;  %980 = vmatpush.msra.mxu2 %v87_v37  ;;  %v98_v59 = vld [vmem:[%s4418_s1 + $0x188] sm:$0xff]  ;;  %v81_v61 = vld [vmem:[%s4418_s1 + $0x100] sm:$0xff]  ;;  %v128_v62 = vld [vmem:[%s4418_s1 + $0x278] sm:$0xff] }
  0x16   :  { %960 = vmatpush.msra.mxu1 %v71_v38  ;;  %941 = vmatpush.msra.mxu0 %v54_v40  ;;  %v160_v63 = vld [vmem:[%s4418_s1 + $0x378] sm:$0xff]  ;;  %v65_v0 = vld [vmem:[%s4418_s1 + $0x80] sm:$0xff]  ;;  %v127_v2 = vld [vmem:[%s4418_s1 + $0x270] sm:$0xff] }
  0x17   :  { %1000 = vmatpush.msra.mxu3 %v103_v39  ;;  %981 = vmatpush.msra.mxu2 %v86_v41  ;;  %v97_v1 = vld [vmem:[%s4418_s1 + $0x180] sm:$0xff]  ;;  %v144_v3 = vld [vmem:[%s4418_s1 + $0x2f8] sm:$0xff]  ;;  %v159_v4 = vld [vmem:[%s4418_s1 + $0x370] sm:$0xff] }
  0x18   :  { %961 = vmatpush.msra.mxu1 %v70_v42  ;;  %942 = vmatpush.msra.mxu0 %v53_v44  ;;  %v176_v5 = vld [vmem:[%s4418_s1 + $0x3f8] sm:$0xff]  ;;  %v126_v6 = vld [vmem:[%s4418_s1 + $0x268] sm:$0xff]  ;;  %v143_v7 = vld [vmem:[%s4418_s1 + $0x2f0] sm:$0xff] }
  0x19   :  { %1001 = vmatpush.msra.mxu3 %v102_v43  ;;  %982 = vmatpush.msra.mxu2 %v85_v45  ;;  %v158_v8 = vld [vmem:[%s4418_s1 + $0x368] sm:$0xff]  ;;  %v175_v9 = vld [vmem:[%s4418_s1 + $0x3f0] sm:$0xff]  ;;  %v125_v10 = vld [vmem:[%s4418_s1 + $0x260] sm:$0xff] }
  0x1a   :  { %962 = vmatpush.msra.mxu1 %v69_v46  ;;  %943 = vmatpush.msra.mxu0 %v52_v48  ;;  %v142_v11 = vld [vmem:[%s4418_s1 + $0x2e8] sm:$0xff]  ;;  %v157_v12 = vld [vmem:[%s4418_s1 + $0x360] sm:$0xff]  ;;  %v124_v14 = vld [vmem:[%s4418_s1 + $0x258] sm:$0xff] }
  0x1b   :  { %1002 = vmatpush.msra.mxu3 %v101_v47  ;;  %983 = vmatpush.msra.mxu2 %v84_v49  ;;  %v174_v13 = vld [vmem:[%s4418_s1 + $0x3e8] sm:$0xff]  ;;  %v141_v15 = vld [vmem:[%s4418_s1 + $0x2e0] sm:$0xff]  ;;  %v156_v16 = vld [vmem:[%s4418_s1 + $0x358] sm:$0xff] }
  0x1c   :  { %963 = vmatpush.msra.mxu1 %v68_v50  ;;  %944 = vmatpush.msra.mxu0 %v51_v52  ;;  %v173_v17 = vld [vmem:[%s4418_s1 + $0x3e0] sm:$0xff]  ;;  %v123_v18 = vld [vmem:[%s4418_s1 + $0x250] sm:$0xff]  ;;  %v140_v19 = vld [vmem:[%s4418_s1 + $0x2d8] sm:$0xff] }
  0x1d   :  { %1003 = vmatpush.msra.mxu3 %v100_v51  ;;  %984 = vmatpush.msra.mxu2 %v83_v53  ;;  %v155_v20 = vld [vmem:[%s4418_s1 + $0x350] sm:$0xff]  ;;  %v172_v21 = vld [vmem:[%s4418_s1 + $0x3d8] sm:$0xff]  ;;  %v27_v22 = vld [vmem:[%s4419_s0 + $0x8] sm:$0xff] }
  0x1e   :  { %964 = vmatpush.msra.mxu1 %v67_v54  ;;  %945 = vmatpush.msra.mxu0 %v50_v56  ;;  %v122_v23 = vld [vmem:[%s4418_s1 + $0x248] sm:$0xff]  ;;  %v139_v24 = vld [vmem:[%s4418_s1 + $0x2d0] sm:$0xff]  ;;  %813 = vst [vmem:[#allocation1 + $0x10] ss:$2 sm:$0xff] %v27_v22  ;;  %v121_v27 = vld [vmem:[%s4418_s1 + $0x240] sm:$0xff] }
  0x1f   :  { %1004 = vmatpush.msra.mxu3 %v99_v55  ;;  %985 = vmatpush.msra.mxu2 %v82_v57  ;;  %v154_v25 = vld [vmem:[%s4418_s1 + $0x348] sm:$0xff]  ;;  %v171_v26 = vld [vmem:[%s4418_s1 + $0x3d0] sm:$0xff]  ;;  %v26_v28 = vld [vmem:[%s4419_s0] sm:$0xff] }
  0x20   :  { %965 = vmatpush.msra.mxu1 %v66_v58  ;;  %946 = vmatpush.msra.mxu0 %v49_v60  ;;  %v138_v29 = vld [vmem:[%s4418_s1 + $0x2c8] sm:$0xff]  ;;  %v153_v30 = vld [vmem:[%s4418_s1 + $0x340] sm:$0xff]  ;;  %811 = vst [vmem:[#allocation1] ss:$2 sm:$0xff] %v26_v28  ;;  %v120_v32 = vld [vmem:[%s4418_s1 + $0x238] sm:$0xff] }
  0x21   :  { %1005 = vmatpush.msra.mxu3 %v98_v59  ;;  %986 = vmatpush.msra.mxu2 %v81_v61  ;;  %v170_v31 = vld [vmem:[%s4418_s1 + $0x3c8] sm:$0xff]  ;;  %v137_v33 = vld [vmem:[%s4418_s1 + $0x2c0] sm:$0xff]  ;;  %v152_v34 = vld [vmem:[%s4418_s1 + $0x338] sm:$0xff] }
  0x22   :  { %1011 = vmatpush.msrb.mxu0 %v128_v62  ;;  %966 = vmatpush.msra.mxu1 %v65_v0  ;;  %v169_v35 = vld [vmem:[%s4418_s1 + $0x3c0] sm:$0xff]  ;;  %v119_v36 = vld [vmem:[%s4418_s1 + $0x230] sm:$0xff]  ;;  %v136_v37 = vld [vmem:[%s4418_s1 + $0x2b8] sm:$0xff] }
  0x23   :  { %1051 = vmatpush.msrb.mxu2 %v160_v63  ;;  %1006 = vmatpush.msra.mxu3 %v97_v1  ;;  %v151_v38 = vld [vmem:[%s4418_s1 + $0x330] sm:$0xff]  ;;  %v168_v39 = vld [vmem:[%s4418_s1 + $0x3b8] sm:$0xff]  ;;  %v31_v40 = vld [vmem:[%s4419_s0 + $0x28] sm:$0xff] }
  0x24   :  { %1012 = vmatpush.msrb.mxu0 %v127_v2  ;;  %1031 = vmatpush.msrb.mxu1 %v144_v3  ;;  %v118_v41 = vld [vmem:[%s4418_s1 + $0x228] sm:$0xff]  ;;  %v135_v42 = vld [vmem:[%s4418_s1 + $0x2b0] sm:$0xff]  ;;  %v30_v43 = vld [vmem:[%s4419_s0 + $0x20] sm:$0xff] }
  0x25   :  { %1052 = vmatpush.msrb.mxu2 %v159_v4  ;;  %1071 = vmatpush.msrb.mxu3 %v176_v5  ;;  %v2334_v44 = vld.sshfl [vmem:[#allocation1 + $0x10] sm:$0xff pattern:$0x75316420]  ;;  %v2336_v45 = vld.sshfl [vmem:[#allocation1 + $0x18] sm:$0xff pattern:$0x75316420] }
  0x26   :  { %1013 = vmatpush.msrb.mxu0 %v126_v6  ;;  %1032 = vmatpush.msrb.mxu1 %v143_v7  ;;  %v150_v46 = vld [vmem:[%s4418_s1 + $0x328] sm:$0xff]  ;;  %v167_v47 = vld [vmem:[%s4418_s1 + $0x3b0] sm:$0xff]  ;;  %827 = vst [vmem:[#allocation1 + $0x10] ss:$2 sm:$0xff] %v31_v40  ;;  %v29_v48 = vld [vmem:[%s4419_s0 + $0x18] sm:$0xff] }
  0x27   :  { %1053 = vmatpush.msrb.mxu2 %v158_v8  ;;  %1072 = vmatpush.msrb.mxu3 %v175_v9  ;;  %v2347_v49 = vld.sshfl [vmem:[#allocation1] sm:$0xff pattern:$0x75316420]  ;;  %v2349_v50 = vld.sshfl [vmem:[#allocation1 + $0x8] sm:$0xff pattern:$0x75316420] }
  0x28   :  { %1014 = vmatpush.msrb.mxu0 %v125_v10  ;;  %1033 = vmatpush.msrb.mxu1 %v142_v11  ;;  %v117_v51 = vld [vmem:[%s4418_s1 + $0x220] sm:$0xff]  ;;  %v134_v52 = vld [vmem:[%s4418_s1 + $0x2a8] sm:$0xff]  ;;  %826 = vst [vmem:[#allocation1] ss:$2 sm:$0xff] %v30_v43  ;;  %v28_v53 = vld [vmem:[%s4419_s0 + $0x10] sm:$0xff] }
  0x29   :  { %1054 = vmatpush.msrb.mxu2 %v157_v12  ;;  %1073 = vmatpush.msrb.mxu3 %v174_v13  ;;  %v149_v54 = vld [vmem:[%s4418_s1 + $0x320] sm:$0xff]  ;;  %v166_v55 = vld [vmem:[%s4418_s1 + $0x3a8] sm:$0xff]  ;;  %817 = vst [vmem:[#allocation1 + $0x30] ss:$2 sm:$0xff] %v29_v48  ;;  %v116_v56 = vld [vmem:[%s4418_s1 + $0x218] sm:$0xff] }
  0x2a   :  { %1015 = vmatpush.msrb.mxu0 %v124_v14  ;;  %1034 = vmatpush.msrb.mxu1 %v141_v15  ;;  %v133_v57 = vld [vmem:[%s4418_s1 + $0x2a0] sm:$0xff]  ;;  %815 = vst [vmem:[#allocation1 + $0x20] ss:$2 sm:$0xff] %v28_v53  ;;  %v148_v58 = vld [vmem:[%s4418_s1 + $0x318] sm:$0xff]  ;;  %v115_v60 = vld [vmem:[%s4418_s1 + $0x210] sm:$0xff] }
  0x2b   :  { %1055 = vmatpush.msrb.mxu2 %v156_v16  ;;  %1074 = vmatpush.msrb.mxu3 %v173_v17  ;;  %v165_v59 = vld [vmem:[%s4418_s1 + $0x3a0] sm:$0xff]  ;;  %v132_v61 = vld [vmem:[%s4418_s1 + $0x298] sm:$0xff]  ;;  %v147_v62 = vld [vmem:[%s4418_s1 + $0x310] sm:$0xff] }
  0x2c   :  { %1016 = vmatpush.msrb.mxu0 %v123_v18  ;;  %1035 = vmatpush.msrb.mxu1 %v140_v19  ;;  %v164_v63 = vld [vmem:[%s4418_s1 + $0x398] sm:$0xff]  ;;  %v114_v0 = vld [vmem:[%s4418_s1 + $0x208] sm:$0xff]  ;;  %v131_v1 = vld [vmem:[%s4418_s1 + $0x290] sm:$0xff] }
  0x2d   :  { %1056 = vmatpush.msrb.mxu2 %v155_v20  ;;  %1075 = vmatpush.msrb.mxu3 %v172_v21  ;;  %v146_v2 = vld [vmem:[%s4418_s1 + $0x308] sm:$0xff]  ;;  %v33_v3 = vld [vmem:[%s4419_s0 + $0x38] sm:$0xff]  ;;  %v163_v4 = vld [vmem:[%s4418_s1 + $0x390] sm:$0xff] }
  0x2e   :  { %1017 = vmatpush.msrb.mxu0 %v122_v23  ;;  %1036 = vmatpush.msrb.mxu1 %v139_v24  ;;  %v113_v5 = vld [vmem:[%s4418_s1 + $0x200] sm:$0xff]  ;;  %v32_v6 = vld [vmem:[%s4419_s0 + $0x30] sm:$0xff]  ;;  %v130_v9 = vld [vmem:[%s4418_s1 + $0x288] sm:$0xff] }
  0x2f   :  { %1057 = vmatpush.msrb.mxu2 %v154_v25  ;;  %1076 = vmatpush.msrb.mxu3 %v171_v26  ;;  %v145_v10 = vld [vmem:[%s4418_s1 + $0x300] sm:$0xff]  ;;  %v162_v11 = vld [vmem:[%s4418_s1 + $0x388] sm:$0xff]  ;;  %v192_v14 = vld [vmem:[%s4418_s1 + $0x478] sm:$0xff] }
  0x30   :  { %1018 = vmatpush.msrb.mxu0 %v121_v27  ;;  %1037 = vmatpush.msrb.mxu1 %v138_v29  ;;  %v824_v7 = vld.sshfl [vmem:[#allocation1 + $0x30] sm:$0xff pattern:$0x75316420]  ;;  %v2411_v8 = vld.sshfl [vmem:[#allocation1 + $0x38] sm:$0xff pattern:$0x75316420] }
  0x31   :  { %1058 = vmatpush.msrb.mxu2 %v153_v30  ;;  %1077 = vmatpush.msrb.mxu3 %v170_v31  ;;  %829 = vst [vmem:[#allocation1 + $0x30] ss:$2 sm:$0xff] %v33_v3  ;;  %v822_v12 = vld.sshfl [vmem:[#allocation1 + $0x20] sm:$0xff pattern:$0x75316420]  ;;  %v224_v15 = vld [vmem:[%s4418_s1 + $0x578] sm:$0xff] }
  0x32   :  { %1019 = vmatpush.msrb.mxu0 %v120_v32  ;;  %1038 = vmatpush.msrb.mxu1 %v137_v33  ;;  %v2422_v13 = vld.sshfl [vmem:[#allocation1 + $0x28] sm:$0xff pattern:$0x75316420]  ;;  %v129_v16 = vld [vmem:[%s4418_s1 + $0x280] sm:$0xff]  ;;  %v191_v18 = vld [vmem:[%s4418_s1 + $0x470] sm:$0xff] }
  0x33   :  { %1059 = vmatpush.msrb.mxu2 %v152_v34  ;;  %1078 = vmatpush.msrb.mxu3 %v169_v35  ;;  %828 = vst [vmem:[#allocation1 + $0x20] ss:$2 sm:$0xff] %v32_v6  ;;  %v161_v17 = vld [vmem:[%s4418_s1 + $0x380] sm:$0xff]  ;;  %v208_v19 = vld [vmem:[%s4418_s1 + $0x4f8] sm:$0xff]  ;;  %v223_v20 = vld [vmem:[%s4418_s1 + $0x570] sm:$0xff] }
  0x34   :  { %1020 = vmatpush.msrb.mxu0 %v119_v36  ;;  %1039 = vmatpush.msrb.mxu1 %v136_v37  ;;  %v240_v21 = vld [vmem:[%s4418_s1 + $0x5f8] sm:$0xff]  ;;  %v190_v22 = vld [vmem:[%s4418_s1 + $0x468] sm:$0xff]  ;;  %v207_v23 = vld [vmem:[%s4418_s1 + $0x4f0] sm:$0xff] }
  0x35   :  { %1060 = vmatpush.msrb.mxu2 %v151_v38  ;;  %1079 = vmatpush.msrb.mxu3 %v168_v39  ;;  %v222_v24 = vld [vmem:[%s4418_s1 + $0x568] sm:$0xff]  ;;  %v239_v25 = vld [vmem:[%s4418_s1 + $0x5f0] sm:$0xff]  ;;  %v189_v26 = vld [vmem:[%s4418_s1 + $0x460] sm:$0xff] }
  0x36   :  { %1021 = vmatpush.msrb.mxu0 %v118_v41  ;;  %1040 = vmatpush.msrb.mxu1 %v135_v42  ;;  %v206_v27 = vld [vmem:[%s4418_s1 + $0x4e8] sm:$0xff]  ;;  %v221_v28 = vld [vmem:[%s4418_s1 + $0x560] sm:$0xff]  ;;  %v188_v30 = vld [vmem:[%s4418_s1 + $0x458] sm:$0xff] }
  0x37   :  { %1061 = vmatpush.msrb.mxu2 %v150_v46  ;;  %1080 = vmatpush.msrb.mxu3 %v167_v47  ;;  %v238_v29 = vld [vmem:[%s4418_s1 + $0x5e8] sm:$0xff]  ;;  %v205_v31 = vld [vmem:[%s4418_s1 + $0x4e0] sm:$0xff]  ;;  %v2484_v33 = vld.sshfl [vmem:[#allocation1 + $0x10] sm:$0xff pattern:$0x75316420] }
  0x38   :  { %1022 = vmatpush.msrb.mxu0 %v117_v51  ;;  %1041 = vmatpush.msrb.mxu1 %v134_v52  ;;  %v2482_v32 = vld.sshfl [vmem:[#allocation1] sm:$0xff pattern:$0x75316420]  ;;  %v220_v34 = vld [vmem:[%s4418_s1 + $0x558] sm:$0xff]  ;;  %v35_v37 = vld [vmem:[%s4419_s0 + $0x48] sm:$0xff] }
  0x39   :  { %1062 = vmatpush.msrb.mxu2 %v149_v54  ;;  %1081 = vmatpush.msrb.mxu3 %v166_v55  ;;  %v34_v35 = vld [vmem:[%s4419_s0 + $0x40] sm:$0xff]  ;;  %v2492_v36 = vld.sshfl [vmem:[#allocation1 + $0x8] sm:$0xff pattern:$0x75316420]  ;;  %v187_v40 = vld [vmem:[%s4418_s1 + $0x450] sm:$0xff] }
  0x3a   :  { %1023 = vmatpush.msrb.mxu0 %v116_v56  ;;  %1042 = vmatpush.msrb.mxu1 %v133_v57  ;;  %838 = vst [vmem:[#allocation1] ss:$2 sm:$0xff] %v34_v35  ;;  %v2497_v38 = vld.sshfl [vmem:[#allocation1 + $0x18] sm:$0xff pattern:$0x75316420]  ;;  %v237_v39 = vld [vmem:[%s4418_s1 + $0x5e0] sm:$0xff] }
  0x3b   :  { %1063 = vmatpush.msrb.mxu2 %v148_v58  ;;  %1082 = vmatpush.msrb.mxu3 %v165_v59  ;;  %839 = vst [vmem:[#allocation1 + $0x10] ss:$2 sm:$0xff] %v35_v37  ;;  %v204_v41 = vld [vmem:[%s4418_s1 + $0x4d8] sm:$0xff]  ;;  %v219_v42 = vld [vmem:[%s4418_s1 + $0x550] sm:$0xff]  ;;  %v218_v46 = vld [vmem:[%s4418_s1 + $0x548] sm:$0xff] }
  0x3c   :  { %1024 = vmatpush.msrb.mxu0 %v115_v60  ;;  %1043 = vmatpush.msrb.mxu1 %v132_v61  ;;  %v236_v43 = vld [vmem:[%s4418_s1 + $0x5d8] sm:$0xff]  ;;  %v235_v47 = vld [vmem:[%s4418_s1 + $0x5d0] sm:$0xff]  ;;  %v185_v48 = vld [vmem:[%s4418_s1 + $0x440] sm:$0xff] }
  0x3d   :  { %1064 = vmatpush.msrb.mxu2 %v147_v62  ;;  %1083 = vmatpush.msrb.mxu3 %v164_v63  ;;  %v234_v51 = vld [vmem:[%s4418_s1 + $0x5c8] sm:$0xff]  ;;  %v184_v52 = vld [vmem:[%s4418_s1 + $0x438] sm:$0xff]  ;;  %v201_v53 = vld [vmem:[%s4418_s1 + $0x4c0] sm:$0xff] }
  0x3e   :  { %1025 = vmatpush.msrb.mxu0 %v114_v0  ;;  %1044 = vmatpush.msrb.mxu1 %v131_v1  ;;  %v216_v54 = vld [vmem:[%s4418_s1 + $0x538] sm:$0xff]  ;;  %v233_v55 = vld [vmem:[%s4418_s1 + $0x5c0] sm:$0xff]  ;;  %v183_v56 = vld [vmem:[%s4418_s1 + $0x430] sm:$0xff] }
  0x3f   :  { %1065 = vmatpush.msrb.mxu2 %v146_v2  ;;  %1084 = vmatpush.msrb.mxu3 %v163_v4  ;;  %v200_v57 = vld [vmem:[%s4418_s1 + $0x4b8] sm:$0xff]  ;;  %v215_v58 = vld [vmem:[%s4418_s1 + $0x530] sm:$0xff]  ;;  %v182_v60 = vld [vmem:[%s4418_s1 + $0x428] sm:$0xff] }
  0x40   :  { %987 = vmatmul.f32.vlgmr.msra.gmra.mxu2 %v2334_v44  ;;  %1026 = vmatpush.msrb.mxu0 %v113_v5  ;;  %v186_v44 = vld [vmem:[%s4418_s1 + $0x448] sm:$0xff]  ;;  %v232_v59 = vld [vmem:[%s4418_s1 + $0x5b8] sm:$0xff]  ;;  %v199_v61 = vld [vmem:[%s4418_s1 + $0x4b0] sm:$0xff] }
  0x41   :  { %1045 = vmatpush.msrb.mxu1 %v130_v9  ;;  %1066 = vmatpush.msrb.mxu2 %v145_v10  ;;  %v214_v62 = vld [vmem:[%s4418_s1 + $0x528] sm:$0xff]  ;;  %v231_v63 = vld [vmem:[%s4418_s1 + $0x5b0] sm:$0xff]  ;;  %v181_v0 = vld [vmem:[%s4418_s1 + $0x420] sm:$0xff] }
  0x42   :  { %1085 = vmatpush.msrb.mxu3 %v162_v11  ;;  %947 = vmatmul.f32.vlgmr.msra.gmra.mxu0 %v2347_v49  ;;  %v202_v49 = vld [vmem:[%s4418_s1 + $0x4c8] sm:$0xff]  ;;  %v213_v2 = vld [vmem:[%s4418_s1 + $0x520] sm:$0xff]  ;;  %v180_v4 = vld [vmem:[%s4418_s1 + $0x418] sm:$0xff] }
  0x43   :  { %1007 = vmatmul.f32.vlgmr.msra.gmra.mxu3 %v2336_v45  ;;  %1091 = vmatpush.msra.mxu0 %v192_v14  ;;  %v203_v45 = vld [vmem:[%s4418_s1 + $0x4d0] sm:$0xff]  ;;  %v198_v1 = vld [vmem:[%s4418_s1 + $0x4a8] sm:$0xff]  ;;  %v197_v5 = vld [vmem:[%s4418_s1 + $0x4a0] sm:$0xff] }
  0x44   :  { %1131 = vmatpush.msra.mxu2 %v224_v15  ;;  %1046 = vmatpush.msrb.mxu1 %v129_v16  ;;  %v230_v3 = vld [vmem:[%s4418_s1 + $0x5a8] sm:$0xff]  ;;  %v212_v6 = vld [vmem:[%s4418_s1 + $0x518] sm:$0xff]  ;;  %v211_v10 = vld [vmem:[%s4418_s1 + $0x510] sm:$0xff] }
  0x45   :  { %1086 = vmatpush.msrb.mxu3 %v161_v17  ;;  %967 = vmatmul.f32.vlgmr.msra.gmra.mxu1 %v2349_v50  ;;  %v217_v50 = vld [vmem:[%s4418_s1 + $0x540] sm:$0xff]  ;;  %v196_v9 = vld [vmem:[%s4418_s1 + $0x498] sm:$0xff]  ;;  %v210_v14 = vld [vmem:[%s4418_s1 + $0x508] sm:$0xff] }
  0x46   :  { %1092 = vmatpush.msra.mxu0 %v191_v18  ;;  %1111 = vmatpush.msra.mxu1 %v208_v19  ;;  %v228_v11 = vld [vmem:[%s4418_s1 + $0x598] sm:$0xff]  ;;  %v227_v15 = vld [vmem:[%s4418_s1 + $0x590] sm:$0xff]  ;;  %v177_v16 = vld [vmem:[%s4418_s1 + $0x400] sm:$0xff] }
  0x47   :  { %1132 = vmatpush.msra.mxu2 %v223_v20  ;;  %1151 = vmatpush.msra.mxu3 %v240_v21  ;;  %v194_v17 = vld [vmem:[%s4418_s1 + $0x488] sm:$0xff]  ;;  %v209_v18 = vld [vmem:[%s4418_s1 + $0x500] sm:$0xff]  ;;  %v256_v20 = vld [vmem:[%s4418_s1 + $0x678] sm:$0xff] }
  0x48   :  { %1093 = vmatpush.msra.mxu0 %v190_v22  ;;  %1112 = vmatpush.msra.mxu1 %v207_v23  ;;  %v226_v19 = vld [vmem:[%s4418_s1 + $0x588] sm:$0xff]  ;;  %v288_v21 = vld [vmem:[%s4418_s1 + $0x778] sm:$0xff]  ;;  %v193_v22 = vld [vmem:[%s4418_s1 + $0x480] sm:$0xff] }
  0x49   :  { %1133 = vmatpush.msra.mxu2 %v222_v24  ;;  %1152 = vmatpush.msra.mxu3 %v239_v25  ;;  %v225_v23 = vld [vmem:[%s4418_s1 + $0x580] sm:$0xff]  ;;  %v255_v24 = vld [vmem:[%s4418_s1 + $0x670] sm:$0xff]  ;;  %v272_v25 = vld [vmem:[%s4418_s1 + $0x6f8] sm:$0xff] }
  0x4a   :  { %1067 = vmatmul.f32.vlgmr.msrb.gmra.mxu2 %v824_v7  ;;  %1094 = vmatpush.msra.mxu0 %v189_v26  ;;  %v229_v7 = vld [vmem:[%s4418_s1 + $0x5a0] sm:$0xff]  ;;  %v287_v26 = vld [vmem:[%s4418_s1 + $0x770] sm:$0xff]  ;;  %v270_v35 = vld [vmem:[%s4418_s1 + $0x6e8] sm:$0xff] }
  0x4b   :  { %1113 = vmatpush.msra.mxu1 %v206_v27  ;;  %1134 = vmatpush.msra.mxu2 %v221_v28  ;;  %v304_v27 = vld [vmem:[%s4418_s1 + $0x7f8] sm:$0xff]  ;;  %v254_v28 = vld [vmem:[%s4418_s1 + $0x668] sm:$0xff] }
  0x4c   :  { %1153 = vmatpush.msra.mxu3 %v238_v29  ;;  %1027 = vmatmul.f32.vlgmr.msrb.gmra.mxu0 %v822_v12  ;;  %v178_v12 = vld [vmem:[%s4418_s1 + $0x408] sm:$0xff]  ;;  %v271_v29 = vld [vmem:[%s4418_s1 + $0x6f0] sm:$0xff] }
  0x4d   :  { %1087 = vmatmul.f32.vlgmr.msrb.gmra.mxu3 %v2411_v8  ;;  %1095 = vmatpush.msra.mxu0 %v188_v30  ;;  %v179_v8 = vld [vmem:[%s4418_s1 + $0x410] sm:$0xff]  ;;  %v286_v30 = vld [vmem:[%s4418_s1 + $0x768] sm:$0xff] }
  0x4e   :  { %1114 = vmatpush.msra.mxu1 %v205_v31  ;;  %1135 = vmatpush.msra.mxu2 %v220_v34  ;;  %v303_v31 = vld [vmem:[%s4418_s1 + $0x7f0] sm:$0xff]  ;;  %v2689_v37 = vld.sshfl [vmem:[#allocation1 + $0x28] sm:$0xff pattern:$0x75316420] }
  0x4f   :  { %1154 = vmatpush.msra.mxu3 %v237_v39  ;;  %1047 = vmatmul.f32.vlgmr.msrb.gmra.mxu1 %v2422_v13  ;;  %v195_v13 = vld [vmem:[%s4418_s1 + $0x490] sm:$0xff]  ;;  %v2694_v39 = vld.sshfl [vmem:[#allocation1 + $0x38] sm:$0xff pattern:$0x75316420] }
  0x50   :  { %1096 = vmatpush.msra.mxu0 %v187_v40  ;;  %1115 = vmatpush.msra.mxu1 %v204_v41  ;;  %v2681_v34 = vld.sshfl [vmem:[#allocation1 + $0x30] sm:$0xff pattern:$0x75316420]  ;;  %v285_v40 = vld [vmem:[%s4418_s1 + $0x760] sm:$0xff]  ;;  %v302_v41 = vld [vmem:[%s4418_s1 + $0x7e8] sm:$0xff] }
  0x51   :  { %1136 = vmatpush.msra.mxu2 %v219_v42  ;;  %1155 = vmatpush.msra.mxu3 %v236_v43  ;;  %v252_v42 = vld [vmem:[%s4418_s1 + $0x658] sm:$0xff]  ;;  %v269_v43 = vld [vmem:[%s4418_s1 + $0x6e0] sm:$0xff] }
  0x52   :  { %1097 = vmatpush.msra.mxu0 %v186_v44  ;;  %1116 = vmatpush.msra.mxu1 %v203_v45  ;;  %v284_v44 = vld [vmem:[%s4418_s1 + $0x758] sm:$0xff]  ;;  %v301_v45 = vld [vmem:[%s4418_s1 + $0x7e0] sm:$0xff] }
  0x53   :  { %1137 = vmatpush.msra.mxu2 %v218_v46  ;;  %1156 = vmatpush.msra.mxu3 %v235_v47  ;;  %v251_v46 = vld [vmem:[%s4418_s1 + $0x650] sm:$0xff]  ;;  %v268_v47 = vld [vmem:[%s4418_s1 + $0x6d8] sm:$0xff] }
  0x54   :  { %1098 = vmatpush.msra.mxu0 %v185_v48  ;;  %1117 = vmatpush.msra.mxu1 %v202_v49  ;;  %v283_v48 = vld [vmem:[%s4418_s1 + $0x750] sm:$0xff]  ;;  %v300_v49 = vld [vmem:[%s4418_s1 + $0x7d8] sm:$0xff] }
  0x55   :  { %1138 = vmatpush.msra.mxu2 %v217_v50  ;;  %1157 = vmatpush.msra.mxu3 %v234_v51  ;;  %v250_v50 = vld [vmem:[%s4418_s1 + $0x648] sm:$0xff]  ;;  %v267_v51 = vld [vmem:[%s4418_s1 + $0x6d0] sm:$0xff] }
  0x56   :  { %1099 = vmatpush.msra.mxu0 %v184_v52  ;;  %1118 = vmatpush.msra.mxu1 %v201_v53  ;;  %v282_v52 = vld [vmem:[%s4418_s1 + $0x748] sm:$0xff]  ;;  %v299_v53 = vld [vmem:[%s4418_s1 + $0x7d0] sm:$0xff] }
  0x57   :  { %1139 = vmatpush.msra.mxu2 %v216_v54  ;;  %1158 = vmatpush.msra.mxu3 %v233_v55  ;;  %v249_v54 = vld [vmem:[%s4418_s1 + $0x640] sm:$0xff]  ;;  %v266_v55 = vld [vmem:[%s4418_s1 + $0x6c8] sm:$0xff] }
  0x58   :  { %1100 = vmatpush.msra.mxu0 %v183_v56  ;;  %1119 = vmatpush.msra.mxu1 %v200_v57  ;;  %v281_v56 = vld [vmem:[%s4418_s1 + $0x740] sm:$0xff]  ;;  %v298_v57 = vld [vmem:[%s4418_s1 + $0x7c8] sm:$0xff] }
  0x59   :  { %1140 = vmatpush.msra.mxu2 %v215_v58  ;;  %1159 = vmatpush.msra.mxu3 %v232_v59  ;;  %v248_v58 = vld [vmem:[%s4418_s1 + $0x638] sm:$0xff]  ;;  %v265_v59 = vld [vmem:[%s4418_s1 + $0x6c0] sm:$0xff] }
  0x5a   :  { %1101 = vmatpush.msra.mxu0 %v182_v60  ;;  %1120 = vmatpush.msra.mxu1 %v199_v61  ;;  %v280_v60 = vld [vmem:[%s4418_s1 + $0x738] sm:$0xff]  ;;  %v297_v61 = vld [vmem:[%s4418_s1 + $0x7c0] sm:$0xff] }
  0x5b   :  { %1141 = vmatpush.msra.mxu2 %v214_v62  ;;  %1160 = vmatpush.msra.mxu3 %v231_v63  ;;  %v247_v62 = vld [vmem:[%s4418_s1 + $0x630] sm:$0xff]  ;;  %v264_v63 = vld [vmem:[%s4418_s1 + $0x6b8] sm:$0xff] }
  0x5c   :  { %1102 = vmatpush.msra.mxu0 %v181_v0  ;;  %1121 = vmatpush.msra.mxu1 %v198_v1  ;;  %v279_v0 = vld [vmem:[%s4418_s1 + $0x730] sm:$0xff]  ;;  %v296_v1 = vld [vmem:[%s4418_s1 + $0x7b8] sm:$0xff] }
  0x5d   :  { %1142 = vmatpush.msra.mxu2 %v213_v2  ;;  %1161 = vmatpush.msra.mxu3 %v230_v3  ;;  %v246_v2 = vld [vmem:[%s4418_s1 + $0x628] sm:$0xff]  ;;  %v263_v3 = vld [vmem:[%s4418_s1 + $0x6b0] sm:$0xff] }
  0x5e   :  { %1103 = vmatpush.msra.mxu0 %v180_v4  ;;  %1122 = vmatpush.msra.mxu1 %v197_v5  ;;  %v278_v4 = vld [vmem:[%s4418_s1 + $0x728] sm:$0xff]  ;;  %v295_v5 = vld [vmem:[%s4418_s1 + $0x7b0] sm:$0xff] }
  0x5f   :  { %1143 = vmatpush.msra.mxu2 %v212_v6  ;;  %1162 = vmatpush.msra.mxu3 %v229_v7  ;;  %v245_v6 = vld [vmem:[%s4418_s1 + $0x620] sm:$0xff]  ;;  %v262_v7 = vld [vmem:[%s4418_s1 + $0x6a8] sm:$0xff] }
  0x60   :  { %1104 = vmatpush.msra.mxu0 %v179_v8  ;;  %1123 = vmatpush.msra.mxu1 %v196_v9  ;;  %v277_v8 = vld [vmem:[%s4418_s1 + $0x720] sm:$0xff]  ;;  %v294_v9 = vld [vmem:[%s4418_s1 + $0x7a8] sm:$0xff] }
  0x61   :  { %1144 = vmatpush.msra.mxu2 %v211_v10  ;;  %1163 = vmatpush.msra.mxu3 %v228_v11  ;;  %v244_v10 = vld [vmem:[%s4418_s1 + $0x618] sm:$0xff]  ;;  %v261_v11 = vld [vmem:[%s4418_s1 + $0x6a0] sm:$0xff] }
  0x62   :  { %1105 = vmatpush.msra.mxu0 %v178_v12  ;;  %1124 = vmatpush.msra.mxu1 %v195_v13  ;;  %v276_v12 = vld [vmem:[%s4418_s1 + $0x718] sm:$0xff]  ;;  %v293_v13 = vld [vmem:[%s4418_s1 + $0x7a0] sm:$0xff] }
  0x63   :  { %1145 = vmatpush.msra.mxu2 %v210_v14  ;;  %1164 = vmatpush.msra.mxu3 %v227_v15  ;;  %v243_v14 = vld [vmem:[%s4418_s1 + $0x610] sm:$0xff]  ;;  %v260_v15 = vld [vmem:[%s4418_s1 + $0x698] sm:$0xff] }
  0x64   :  { %1106 = vmatpush.msra.mxu0 %v177_v16  ;;  %1125 = vmatpush.msra.mxu1 %v194_v17  ;;  %v275_v16 = vld [vmem:[%s4418_s1 + $0x710] sm:$0xff]  ;;  %v292_v17 = vld [vmem:[%s4418_s1 + $0x798] sm:$0xff] }
  0x65   :  { %1146 = vmatpush.msra.mxu2 %v209_v18  ;;  %1165 = vmatpush.msra.mxu3 %v226_v19  ;;  %v242_v18 = vld [vmem:[%s4418_s1 + $0x608] sm:$0xff]  ;;  %v259_v19 = vld [vmem:[%s4418_s1 + $0x690] sm:$0xff] }
  0x66   :  { %1107 = vmatmul.f32.vlgmr.msra.gmra.mxu0 %v2482_v32  ;;  %1147 = vmatmul.f32.vlgmr.msra.gmra.mxu2 %v2484_v33  ;;  %v253_v32 = vld [vmem:[%s4418_s1 + $0x660] sm:$0xff] }
  0x67   :  { %1171 = vmatpush.msrb.mxu0 %v256_v20  ;;  %1211 = vmatpush.msrb.mxu2 %v288_v21  ;;  %v2679_v33 = vld.sshfl [vmem:[#allocation1 + $0x20] sm:$0xff pattern:$0x75316420]  ;;  %v274_v20 = vld [vmem:[%s4418_s1 + $0x708] sm:$0xff]  ;;  %v291_v21 = vld [vmem:[%s4418_s1 + $0x790] sm:$0xff] }
  0x68   :  { %1126 = vmatpush.msra.mxu1 %v193_v22  ;;  %1166 = vmatpush.msra.mxu3 %v225_v23  ;;  %v241_v22 = vld [vmem:[%s4418_s1 + $0x600] sm:$0xff]  ;;  %v258_v23 = vld [vmem:[%s4418_s1 + $0x688] sm:$0xff] }
  0x69   :  { %1127 = vmatmul.f32.vlgmr.msra.gmra.mxu1 %v2492_v36  ;;  %1167 = vmatmul.f32.vlgmr.msra.gmra.mxu3 %v2497_v38  ;;  %v36_v36 = vld [vmem:[%s4419_s0 + $0x50] sm:$0xff]  ;;  %v37_v38 = vld [vmem:[%s4419_s0 + $0x58] sm:$0xff] }
  0x6a   :  { %1172 = vmatpush.msrb.mxu0 %v255_v24  ;;  %1191 = vmatpush.msrb.mxu1 %v272_v25  ;;  %840 = vst [vmem:[#allocation1 + $0x20] ss:$2 sm:$0xff] %v36_v36  ;;  %v273_v24 = vld [vmem:[%s4418_s1 + $0x700] sm:$0xff]  ;;  %v290_v25 = vld [vmem:[%s4418_s1 + $0x788] sm:$0xff] }
  0x6b   :  { %1212 = vmatpush.msrb.mxu2 %v287_v26  ;;  %1231 = vmatpush.msrb.mxu3 %v304_v27  ;;  %841 = vst [vmem:[#allocation1 + $0x30] ss:$2 sm:$0xff] %v37_v38  ;;  %v320_v26 = vld [vmem:[%s4418_s1 + $0x878] sm:$0xff]  ;;  %v350_v36 = vld [vmem:[%s4418_s1 + $0x968] sm:$0xff]  ;;  %v367_v38 = vld [vmem:[%s4418_s1 + $0x9f0] sm:$0xff] }
  0x6c   :  { %1173 = vmatpush.msrb.mxu0 %v254_v28  ;;  %1192 = vmatpush.msrb.mxu1 %v271_v29  ;;  %v352_v27 = vld [vmem:[%s4418_s1 + $0x978] sm:$0xff]  ;;  %v257_v28 = vld [vmem:[%s4418_s1 + $0x680] sm:$0xff] }
  0x6d   :  { %1213 = vmatpush.msrb.mxu2 %v286_v30  ;;  %1232 = vmatpush.msrb.mxu3 %v303_v31  ;;  %v289_v29 = vld [vmem:[%s4418_s1 + $0x780] sm:$0xff]  ;;  %v319_v30 = vld [vmem:[%s4418_s1 + $0x870] sm:$0xff]  ;;  %v336_v31 = vld [vmem:[%s4418_s1 + $0x8f8] sm:$0xff] }
  0x6e   :  { %1174 = vmatpush.msrb.mxu0 %v253_v32  ;;  %1193 = vmatpush.msrb.mxu1 %v270_v35  ;;  %v351_v32 = vld [vmem:[%s4418_s1 + $0x970] sm:$0xff] }
  0x6f   :  { %1214 = vmatpush.msrb.mxu2 %v285_v40  ;;  %1233 = vmatpush.msrb.mxu3 %v302_v41  ;;  %v335_v35 = vld [vmem:[%s4418_s1 + $0x8f0] sm:$0xff]  ;;  %v317_v40 = vld [vmem:[%s4418_s1 + $0x860] sm:$0xff] }
  0x70   :  { %1175 = vmatpush.msrb.mxu0 %v252_v42  ;;  %1194 = vmatpush.msrb.mxu1 %v269_v43  ;;  %v2889_v41 = vld.sshfl [vmem:[#allocation1] sm:$0xff pattern:$0x75316420]  ;;  %v2891_v42 = vld.sshfl [vmem:[#allocation1 + $0x10] sm:$0xff pattern:$0x75316420] }
  0x71   :  { %1215 = vmatpush.msrb.mxu2 %v284_v44  ;;  %1234 = vmatpush.msrb.mxu3 %v301_v45  ;;  %v334_v43 = vld [vmem:[%s4418_s1 + $0x8e8] sm:$0xff]  ;;  %v2904_v45 = vld.sshfl [vmem:[#allocation1 + $0x18] sm:$0xff pattern:$0x75316420] }
  0x72   :  { %1176 = vmatpush.msrb.mxu0 %v251_v46  ;;  %1195 = vmatpush.msrb.mxu1 %v268_v47  ;;  %v2899_v44 = vld.sshfl [vmem:[#allocation1 + $0x8] sm:$0xff pattern:$0x75316420]  ;;  %v349_v46 = vld [vmem:[%s4418_s1 + $0x960] sm:$0xff] }
  0x73   :  { %1216 = vmatpush.msrb.mxu2 %v283_v48  ;;  %1235 = vmatpush.msrb.mxu3 %v300_v49  ;;  %v366_v47 = vld [vmem:[%s4418_s1 + $0x9e8] sm:$0xff]  ;;  %v316_v48 = vld [vmem:[%s4418_s1 + $0x858] sm:$0xff]  ;;  %v333_v49 = vld [vmem:[%s4418_s1 + $0x8e0] sm:$0xff] }
  0x74   :  { %1177 = vmatpush.msrb.mxu0 %v250_v50  ;;  %1196 = vmatpush.msrb.mxu1 %v267_v51  ;;  %v348_v50 = vld [vmem:[%s4418_s1 + $0x958] sm:$0xff]  ;;  %v365_v51 = vld [vmem:[%s4418_s1 + $0x9e0] sm:$0xff] }
  0x75   :  { %1217 = vmatpush.msrb.mxu2 %v282_v52  ;;  %1236 = vmatpush.msrb.mxu3 %v299_v53  ;;  %v315_v52 = vld [vmem:[%s4418_s1 + $0x850] sm:$0xff]  ;;  %v332_v53 = vld [vmem:[%s4418_s1 + $0x8d8] sm:$0xff] }
  0x76   :  { %1178 = vmatpush.msrb.mxu0 %v249_v54  ;;  %1197 = vmatpush.msrb.mxu1 %v266_v55  ;;  %v347_v54 = vld [vmem:[%s4418_s1 + $0x950] sm:$0xff]  ;;  %v364_v55 = vld [vmem:[%s4418_s1 + $0x9d8] sm:$0xff] }
  0x77   :  { %1218 = vmatpush.msrb.mxu2 %v281_v56  ;;  %1237 = vmatpush.msrb.mxu3 %v298_v57  ;;  %v314_v56 = vld [vmem:[%s4418_s1 + $0x848] sm:$0xff]  ;;  %v331_v57 = vld [vmem:[%s4418_s1 + $0x8d0] sm:$0xff] }
  0x78   :  { %1179 = vmatpush.msrb.mxu0 %v248_v58  ;;  %1198 = vmatpush.msrb.mxu1 %v265_v59  ;;  %v346_v58 = vld [vmem:[%s4418_s1 + $0x948] sm:$0xff]  ;;  %v363_v59 = vld [vmem:[%s4418_s1 + $0x9d0] sm:$0xff] }
  0x79   :  { %1219 = vmatpush.msrb.mxu2 %v280_v60  ;;  %1238 = vmatpush.msrb.mxu3 %v297_v61  ;;  %v313_v60 = vld [vmem:[%s4418_s1 + $0x840] sm:$0xff]  ;;  %v330_v61 = vld [vmem:[%s4418_s1 + $0x8c8] sm:$0xff] }
  0x7a   :  { %1180 = vmatpush.msrb.mxu0 %v247_v62  ;;  %1199 = vmatpush.msrb.mxu1 %v264_v63  ;;  %v345_v62 = vld [vmem:[%s4418_s1 + $0x940] sm:$0xff]  ;;  %v362_v63 = vld [vmem:[%s4418_s1 + $0x9c8] sm:$0xff] }
  0x7b   :  { %1220 = vmatpush.msrb.mxu2 %v279_v0  ;;  %1239 = vmatpush.msrb.mxu3 %v296_v1  ;;  %v312_v0 = vld [vmem:[%s4418_s1 + $0x838] sm:$0xff]  ;;  %v329_v1 = vld [vmem:[%s4418_s1 + $0x8c0] sm:$0xff] }
  0x7c   :  { %1181 = vmatpush.msrb.mxu0 %v246_v2  ;;  %1200 = vmatpush.msrb.mxu1 %v263_v3  ;;  %v344_v2 = vld [vmem:[%s4418_s1 + $0x938] sm:$0xff]  ;;  %v361_v3 = vld [vmem:[%s4418_s1 + $0x9c0] sm:$0xff] }
  0x7d   :  { %1221 = vmatpush.msrb.mxu2 %v278_v4  ;;  %1240 = vmatpush.msrb.mxu3 %v295_v5  ;;  %v311_v4 = vld [vmem:[%s4418_s1 + $0x830] sm:$0xff]  ;;  %v328_v5 = vld [vmem:[%s4418_s1 + $0x8b8] sm:$0xff] }
  0x7e   :  { %1182 = vmatpush.msrb.mxu0 %v245_v6  ;;  %1201 = vmatpush.msrb.mxu1 %v262_v7  ;;  %v343_v6 = vld [vmem:[%s4418_s1 + $0x930] sm:$0xff]  ;;  %v360_v7 = vld [vmem:[%s4418_s1 + $0x9b8] sm:$0xff] }
  0x7f   :  { %1222 = vmatpush.msrb.mxu2 %v277_v8  ;;  %1241 = vmatpush.msrb.mxu3 %v294_v9  ;;  %v310_v8 = vld [vmem:[%s4418_s1 + $0x828] sm:$0xff]  ;;  %v327_v9 = vld [vmem:[%s4418_s1 + $0x8b0] sm:$0xff] }
  0x80   :  { %1183 = vmatpush.msrb.mxu0 %v244_v10  ;;  %1202 = vmatpush.msrb.mxu1 %v261_v11  ;;  %v342_v10 = vld [vmem:[%s4418_s1 + $0x928] sm:$0xff]  ;;  %v359_v11 = vld [vmem:[%s4418_s1 + $0x9b0] sm:$0xff] }
  0x81   :  { %1223 = vmatpush.msrb.mxu2 %v276_v12  ;;  %1242 = vmatpush.msrb.mxu3 %v293_v13  ;;  %v309_v12 = vld [vmem:[%s4418_s1 + $0x820] sm:$0xff]  ;;  %v326_v13 = vld [vmem:[%s4418_s1 + $0x8a8] sm:$0xff] }
  0x82   :  { %1184 = vmatpush.msrb.mxu0 %v243_v14  ;;  %1203 = vmatpush.msrb.mxu1 %v260_v15  ;;  %v341_v14 = vld [vmem:[%s4418_s1 + $0x920] sm:$0xff]  ;;  %v358_v15 = vld [vmem:[%s4418_s1 + $0x9a8] sm:$0xff] }
  0x83   :  { %1224 = vmatpush.msrb.mxu2 %v275_v16  ;;  %1243 = vmatpush.msrb.mxu3 %v292_v17  ;;  %v308_v16 = vld [vmem:[%s4418_s1 + $0x818] sm:$0xff]  ;;  %v325_v17 = vld [vmem:[%s4418_s1 + $0x8a0] sm:$0xff] }
  0x84   :  { %1185 = vmatpush.msrb.mxu0 %v242_v18  ;;  %1204 = vmatpush.msrb.mxu1 %v259_v19  ;;  %v340_v18 = vld [vmem:[%s4418_s1 + $0x918] sm:$0xff]  ;;  %v357_v19 = vld [vmem:[%s4418_s1 + $0x9a0] sm:$0xff] }
  0x85   :  { %1225 = vmatpush.msrb.mxu2 %v274_v20  ;;  %1244 = vmatpush.msrb.mxu3 %v291_v21  ;;  %v307_v20 = vld [vmem:[%s4418_s1 + $0x810] sm:$0xff]  ;;  %v324_v21 = vld [vmem:[%s4418_s1 + $0x898] sm:$0xff] }
  0x86   :  { %1186 = vmatpush.msrb.mxu0 %v241_v22  ;;  %1205 = vmatpush.msrb.mxu1 %v258_v23  ;;  %v339_v22 = vld [vmem:[%s4418_s1 + $0x910] sm:$0xff]  ;;  %v356_v23 = vld [vmem:[%s4418_s1 + $0x998] sm:$0xff] }
  0x87   :  { %1226 = vmatpush.msrb.mxu2 %v273_v24  ;;  %1245 = vmatpush.msrb.mxu3 %v290_v25  ;;  %v306_v24 = vld [vmem:[%s4418_s1 + $0x808] sm:$0xff]  ;;  %v323_v25 = vld [vmem:[%s4418_s1 + $0x890] sm:$0xff] }
  0x88   :  { %1187 = vmatmul.f32.vlgmr.msrb.gmra.mxu0 %v2679_v33  ;;  %1227 = vmatmul.f32.vlgmr.msrb.gmra.mxu2 %v2681_v34  ;;  %v368_v33 = vld [vmem:[%s4418_s1 + $0x9f8] sm:$0xff]  ;;  %v318_v34 = vld [vmem:[%s4418_s1 + $0x868] sm:$0xff] }
  0x89   :  { %1251 = vmatpush.msra.mxu0 %v320_v26  ;;  %1291 = vmatpush.msra.mxu2 %v352_v27  ;;  %v338_v26 = vld [vmem:[%s4418_s1 + $0x908] sm:$0xff]  ;;  %v355_v27 = vld [vmem:[%s4418_s1 + $0x990] sm:$0xff] }
  0x8a   :  { %1206 = vmatpush.msrb.mxu1 %v257_v28  ;;  %1246 = vmatpush.msrb.mxu3 %v289_v29  ;;  %v305_v28 = vld [vmem:[%s4418_s1 + $0x800] sm:$0xff]  ;;  %v322_v29 = vld [vmem:[%s4418_s1 + $0x888] sm:$0xff] }
  0x8b   :  { %1207 = vmatmul.f32.vlgmr.msrb.gmra.mxu1 %v2689_v37  ;;  %1247 = vmatmul.f32.vlgmr.msrb.gmra.mxu3 %v2694_v39  ;;  %v38_v37 = vld [vmem:[%s4419_s0 + $0x60] sm:$0xff]  ;;  %v39_v39 = vld [vmem:[%s4419_s0 + $0x68] sm:$0xff] }
  0x8c   :  { %1252 = vmatpush.msra.mxu0 %v319_v30  ;;  %1271 = vmatpush.msra.mxu1 %v336_v31  ;;  %850 = vst [vmem:[#allocation1] ss:$2 sm:$0xff] %v38_v37  ;;  %v337_v30 = vld [vmem:[%s4418_s1 + $0x900] sm:$0xff]  ;;  %v354_v31 = vld [vmem:[%s4418_s1 + $0x988] sm:$0xff] }
  0x8d   :  { %1292 = vmatpush.msra.mxu2 %v351_v32  ;;  %1311 = vmatpush.msra.mxu3 %v368_v33  ;;  %851 = vst [vmem:[#allocation1 + $0x10] ss:$2 sm:$0xff] %v39_v39  ;;  %v384_v32 = vld [vmem:[%s4418_s1 + $0xa78] sm:$0xff]  ;;  %v414_v37 = vld [vmem:[%s4418_s1 + $0xb68] sm:$0xff]  ;;  %v431_v39 = vld [vmem:[%s4418_s1 + $0xbf0] sm:$0xff] }
  0x8e   :  { %1253 = vmatpush.msra.mxu0 %v318_v34  ;;  %1272 = vmatpush.msra.mxu1 %v335_v35  ;;  %v416_v33 = vld [vmem:[%s4418_s1 + $0xb78] sm:$0xff]  ;;  %v321_v34 = vld [vmem:[%s4418_s1 + $0x880] sm:$0xff] }
  0x8f   :  { %1293 = vmatpush.msra.mxu2 %v350_v36  ;;  %1312 = vmatpush.msra.mxu3 %v367_v38  ;;  %v353_v35 = vld [vmem:[%s4418_s1 + $0x980] sm:$0xff]  ;;  %v383_v36 = vld [vmem:[%s4418_s1 + $0xa70] sm:$0xff]  ;;  %v400_v38 = vld [vmem:[%s4418_s1 + $0xaf8] sm:$0xff] }
  0x90   :  { %1254 = vmatpush.msra.mxu0 %v317_v40  ;;  %1273 = vmatpush.msra.mxu1 %v334_v43  ;;  %v415_v40 = vld [vmem:[%s4418_s1 + $0xb70] sm:$0xff] }
  0x91   :  { %1294 = vmatpush.msra.mxu2 %v349_v46  ;;  %1313 = vmatpush.msra.mxu3 %v366_v47  ;;  %v399_v43 = vld [vmem:[%s4418_s1 + $0xaf0] sm:$0xff]  ;;  %v381_v46 = vld [vmem:[%s4418_s1 + $0xa60] sm:$0xff] }
  0x92   :  { %1255 = vmatpush.msra.mxu0 %v316_v48  ;;  %1274 = vmatpush.msra.mxu1 %v333_v49  ;;  %v3099_v47 = vld.sshfl [vmem:[#allocation1 + $0x20] sm:$0xff pattern:$0x75316420]  ;;  %v3101_v48 = vld.sshfl [vmem:[#allocation1 + $0x30] sm:$0xff pattern:$0x75316420] }
  0x93   :  { %1295 = vmatpush.msra.mxu2 %v348_v50  ;;  %1314 = vmatpush.msra.mxu3 %v365_v51  ;;  %v398_v49 = vld [vmem:[%s4418_s1 + $0xae8] sm:$0xff]  ;;  %v3114_v51 = vld.sshfl [vmem:[#allocation1 + $0x38] sm:$0xff pattern:$0x75316420] }
  0x94   :  { %1256 = vmatpush.msra.mxu0 %v315_v52  ;;  %1275 = vmatpush.msra.mxu1 %v332_v53  ;;  %v3109_v50 = vld.sshfl [vmem:[#allocation1 + $0x28] sm:$0xff pattern:$0x75316420]  ;;  %v413_v52 = vld [vmem:[%s4418_s1 + $0xb60] sm:$0xff] }
  0x95   :  { %1296 = vmatpush.msra.mxu2 %v347_v54  ;;  %1315 = vmatpush.msra.mxu3 %v364_v55  ;;  %v430_v53 = vld [vmem:[%s4418_s1 + $0xbe8] sm:$0xff]  ;;  %v380_v54 = vld [vmem:[%s4418_s1 + $0xa58] sm:$0xff]  ;;  %v397_v55 = vld [vmem:[%s4418_s1 + $0xae0] sm:$0xff] }
  0x96   :  { %1257 = vmatpush.msra.mxu0 %v314_v56  ;;  %1276 = vmatpush.msra.mxu1 %v331_v57  ;;  %v412_v56 = vld [vmem:[%s4418_s1 + $0xb58] sm:$0xff]  ;;  %v429_v57 = vld [vmem:[%s4418_s1 + $0xbe0] sm:$0xff] }
  0x97   :  { %1297 = vmatpush.msra.mxu2 %v346_v58  ;;  %1316 = vmatpush.msra.mxu3 %v363_v59  ;;  %v379_v58 = vld [vmem:[%s4418_s1 + $0xa50] sm:$0xff]  ;;  %v396_v59 = vld [vmem:[%s4418_s1 + $0xad8] sm:$0xff] }
  0x98   :  { %1258 = vmatpush.msra.mxu0 %v313_v60  ;;  %1277 = vmatpush.msra.mxu1 %v330_v61  ;;  %v411_v60 = vld [vmem:[%s4418_s1 + $0xb50] sm:$0xff]  ;;  %v428_v61 = vld [vmem:[%s4418_s1 + $0xbd8] sm:$0xff] }
  0x99   :  { %1298 = vmatpush.msra.mxu2 %v345_v62  ;;  %1317 = vmatpush.msra.mxu3 %v362_v63  ;;  %v378_v62 = vld [vmem:[%s4418_s1 + $0xa48] sm:$0xff]  ;;  %v395_v63 = vld [vmem:[%s4418_s1 + $0xad0] sm:$0xff] }
  0x9a   :  { %1259 = vmatpush.msra.mxu0 %v312_v0  ;;  %1278 = vmatpush.msra.mxu1 %v329_v1  ;;  %v410_v0 = vld [vmem:[%s4418_s1 + $0xb48] sm:$0xff]  ;;  %v427_v1 = vld [vmem:[%s4418_s1 + $0xbd0] sm:$0xff] }
  0x9b   :  { %1299 = vmatpush.msra.mxu2 %v344_v2  ;;  %1318 = vmatpush.msra.mxu3 %v361_v3  ;;  %v377_v2 = vld [vmem:[%s4418_s1 + $0xa40] sm:$0xff]  ;;  %v394_v3 = vld [vmem:[%s4418_s1 + $0xac8] sm:$0xff] }
  0x9c   :  { %1260 = vmatpush.msra.mxu0 %v311_v4  ;;  %1279 = vmatpush.msra.mxu1 %v328_v5  ;;  %v409_v4 = vld [vmem:[%s4418_s1 + $0xb40] sm:$0xff]  ;;  %v426_v5 = vld [vmem:[%s4418_s1 + $0xbc8] sm:$0xff] }
  0x9d   :  { %1300 = vmatpush.msra.mxu2 %v343_v6  ;;  %1319 = vmatpush.msra.mxu3 %v360_v7  ;;  %v376_v6 = vld [vmem:[%s4418_s1 + $0xa38] sm:$0xff]  ;;  %v393_v7 = vld [vmem:[%s4418_s1 + $0xac0] sm:$0xff] }
  0x9e   :  { %1261 = vmatpush.msra.mxu0 %v310_v8  ;;  %1280 = vmatpush.msra.mxu1 %v327_v9  ;;  %v408_v8 = vld [vmem:[%s4418_s1 + $0xb38] sm:$0xff]  ;;  %v425_v9 = vld [vmem:[%s4418_s1 + $0xbc0] sm:$0xff] }
  0x9f   :  { %1301 = vmatpush.msra.mxu2 %v342_v10  ;;  %1320 = vmatpush.msra.mxu3 %v359_v11  ;;  %v375_v10 = vld [vmem:[%s4418_s1 + $0xa30] sm:$0xff]  ;;  %v392_v11 = vld [vmem:[%s4418_s1 + $0xab8] sm:$0xff] }
  0xa0   :  { %1262 = vmatpush.msra.mxu0 %v309_v12  ;;  %1281 = vmatpush.msra.mxu1 %v326_v13  ;;  %v407_v12 = vld [vmem:[%s4418_s1 + $0xb30] sm:$0xff]  ;;  %v424_v13 = vld [vmem:[%s4418_s1 + $0xbb8] sm:$0xff] }
  0xa1   :  { %1302 = vmatpush.msra.mxu2 %v341_v14  ;;  %1321 = vmatpush.msra.mxu3 %v358_v15  ;;  %v374_v14 = vld [vmem:[%s4418_s1 + $0xa28] sm:$0xff]  ;;  %v391_v15 = vld [vmem:[%s4418_s1 + $0xab0] sm:$0xff] }
  0xa2   :  { %1263 = vmatpush.msra.mxu0 %v308_v16  ;;  %1282 = vmatpush.msra.mxu1 %v325_v17  ;;  %v406_v16 = vld [vmem:[%s4418_s1 + $0xb28] sm:$0xff]  ;;  %v423_v17 = vld [vmem:[%s4418_s1 + $0xbb0] sm:$0xff] }
  0xa3   :  { %1303 = vmatpush.msra.mxu2 %v340_v18  ;;  %1322 = vmatpush.msra.mxu3 %v357_v19  ;;  %v373_v18 = vld [vmem:[%s4418_s1 + $0xa20] sm:$0xff]  ;;  %v390_v19 = vld [vmem:[%s4418_s1 + $0xaa8] sm:$0xff] }
  0xa4   :  { %1264 = vmatpush.msra.mxu0 %v307_v20  ;;  %1283 = vmatpush.msra.mxu1 %v324_v21  ;;  %v405_v20 = vld [vmem:[%s4418_s1 + $0xb20] sm:$0xff]  ;;  %v422_v21 = vld [vmem:[%s4418_s1 + $0xba8] sm:$0xff] }
  0xa5   :  { %1304 = vmatpush.msra.mxu2 %v339_v22  ;;  %1323 = vmatpush.msra.mxu3 %v356_v23  ;;  %v372_v22 = vld [vmem:[%s4418_s1 + $0xa18] sm:$0xff]  ;;  %v389_v23 = vld [vmem:[%s4418_s1 + $0xaa0] sm:$0xff] }
  0xa6   :  { %1265 = vmatpush.msra.mxu0 %v306_v24  ;;  %1284 = vmatpush.msra.mxu1 %v323_v25  ;;  %v404_v24 = vld [vmem:[%s4418_s1 + $0xb18] sm:$0xff]  ;;  %v421_v25 = vld [vmem:[%s4418_s1 + $0xba0] sm:$0xff] }
  0xa7   :  { %1305 = vmatpush.msra.mxu2 %v338_v26  ;;  %1324 = vmatpush.msra.mxu3 %v355_v27  ;;  %v371_v26 = vld [vmem:[%s4418_s1 + $0xa10] sm:$0xff]  ;;  %v388_v27 = vld [vmem:[%s4418_s1 + $0xa98] sm:$0xff] }
  0xa8   :  { %1266 = vmatpush.msra.mxu0 %v305_v28  ;;  %1285 = vmatpush.msra.mxu1 %v322_v29  ;;  %v403_v28 = vld [vmem:[%s4418_s1 + $0xb10] sm:$0xff]  ;;  %v420_v29 = vld [vmem:[%s4418_s1 + $0xb98] sm:$0xff] }
  0xa9   :  { %1306 = vmatpush.msra.mxu2 %v337_v30  ;;  %1325 = vmatpush.msra.mxu3 %v354_v31  ;;  %v370_v30 = vld [vmem:[%s4418_s1 + $0xa08] sm:$0xff]  ;;  %v387_v31 = vld [vmem:[%s4418_s1 + $0xa90] sm:$0xff] }
  0xaa   :  { %1267 = vmatmul.f32.vlgmr.msra.gmra.mxu0 %v2889_v41  ;;  %1307 = vmatmul.f32.vlgmr.msra.gmra.mxu2 %v2891_v42  ;;  %v432_v41 = vld [vmem:[%s4418_s1 + $0xbf8] sm:$0xff]  ;;  %v382_v42 = vld [vmem:[%s4418_s1 + $0xa68] sm:$0xff] }
  0xab   :  { %1331 = vmatpush.msrb.mxu0 %v384_v32  ;;  %1371 = vmatpush.msrb.mxu2 %v416_v33  ;;  %v402_v32 = vld [vmem:[%s4418_s1 + $0xb08] sm:$0xff]  ;;  %v419_v33 = vld [vmem:[%s4418_s1 + $0xb90] sm:$0xff] }
  0xac   :  { %1286 = vmatpush.msra.mxu1 %v321_v34  ;;  %1326 = vmatpush.msra.mxu3 %v353_v35  ;;  %v369_v34 = vld [vmem:[%s4418_s1 + $0xa00] sm:$0xff]  ;;  %v386_v35 = vld [vmem:[%s4418_s1 + $0xa88] sm:$0xff] }
  0xad   :  { %1287 = vmatmul.f32.vlgmr.msra.gmra.mxu1 %v2899_v44  ;;  %1327 = vmatmul.f32.vlgmr.msra.gmra.mxu3 %v2904_v45  ;;  %v40_v44 = vld [vmem:[%s4419_s0 + $0x70] sm:$0xff]  ;;  %v41_v45 = vld [vmem:[%s4419_s0 + $0x78] sm:$0xff] }
  0xae   :  { %1332 = vmatpush.msrb.mxu0 %v383_v36  ;;  %1351 = vmatpush.msrb.mxu1 %v400_v38  ;;  %852 = vst [vmem:[#allocation1 + $0x20] ss:$2 sm:$0xff] %v40_v44  ;;  %v401_v36 = vld [vmem:[%s4418_s1 + $0xb00] sm:$0xff]  ;;  %v418_v38 = vld [vmem:[%s4418_s1 + $0xb88] sm:$0xff] }
  0xaf   :  { %1372 = vmatpush.msrb.mxu2 %v415_v40  ;;  %1391 = vmatpush.msrb.mxu3 %v432_v41  ;;  %853 = vst [vmem:[#allocation1 + $0x30] ss:$2 sm:$0xff] %v41_v45  ;;  %v448_v40 = vld [vmem:[%s4418_s1 + $0xc78] sm:$0xff]  ;;  %v478_v44 = vld [vmem:[%s4418_s1 + $0xd68] sm:$0xff]  ;;  %v495_v45 = vld [vmem:[%s4418_s1 + $0xdf0] sm:$0xff] }
  0xb0   :  { %1333 = vmatpush.msrb.mxu0 %v382_v42  ;;  %1352 = vmatpush.msrb.mxu1 %v399_v43  ;;  %v480_v41 = vld [vmem:[%s4418_s1 + $0xd78] sm:$0xff]  ;;  %v385_v42 = vld [vmem:[%s4418_s1 + $0xa80] sm:$0xff] }
  0xb1   :  { %1373 = vmatpush.msrb.mxu2 %v414_v37  ;;  %1392 = vmatpush.msrb.mxu3 %v431_v39  ;;  %v417_v43 = vld [vmem:[%s4418_s1 + $0xb80] sm:$0xff]  ;;  %v447_v37 = vld [vmem:[%s4418_s1 + $0xc70] sm:$0xff]  ;;  %v464_v39 = vld [vmem:[%s4418_s1 + $0xcf8] sm:$0xff] }
  0xb2   :  { %1334 = vmatpush.msrb.mxu0 %v381_v46  ;;  %1353 = vmatpush.msrb.mxu1 %v398_v49  ;;  %v479_v46 = vld [vmem:[%s4418_s1 + $0xd70] sm:$0xff] }
  0xb3   :  { %1374 = vmatpush.msrb.mxu2 %v413_v52  ;;  %1393 = vmatpush.msrb.mxu3 %v430_v53  ;;  %v463_v49 = vld [vmem:[%s4418_s1 + $0xcf0] sm:$0xff]  ;;  %v445_v52 = vld [vmem:[%s4418_s1 + $0xc60] sm:$0xff] }
  0xb4   :  { %1335 = vmatpush.msrb.mxu0 %v380_v54  ;;  %1354 = vmatpush.msrb.mxu1 %v397_v55  ;;  %v3309_v53 = vld.sshfl [vmem:[#allocation1] sm:$0xff pattern:$0x75316420]  ;;  %v3311_v54 = vld.sshfl [vmem:[#allocation1 + $0x10] sm:$0xff pattern:$0x75316420] }
  0xb5   :  { %1375 = vmatpush.msrb.mxu2 %v412_v56  ;;  %1394 = vmatpush.msrb.mxu3 %v429_v57  ;;  %v462_v55 = vld [vmem:[%s4418_s1 + $0xce8] sm:$0xff]  ;;  %v3324_v57 = vld.sshfl [vmem:[#allocation1 + $0x18] sm:$0xff pattern:$0x75316420] }
  0xb6   :  { %1336 = vmatpush.msrb.mxu0 %v379_v58  ;;  %1355 = vmatpush.msrb.mxu1 %v396_v59  ;;  %v3319_v56 = vld.sshfl [vmem:[#allocation1 + $0x8] sm:$0xff pattern:$0x75316420]  ;;  %v477_v58 = vld [vmem:[%s4418_s1 + $0xd60] sm:$0xff] }
  0xb7   :  { %1376 = vmatpush.msrb.mxu2 %v411_v60  ;;  %1395 = vmatpush.msrb.mxu3 %v428_v61  ;;  %v494_v59 = vld [vmem:[%s4418_s1 + $0xde8] sm:$0xff]  ;;  %v444_v60 = vld [vmem:[%s4418_s1 + $0xc58] sm:$0xff]  ;;  %v461_v61 = vld [vmem:[%s4418_s1 + $0xce0] sm:$0xff] }
  0xb8   :  { %1337 = vmatpush.msrb.mxu0 %v378_v62  ;;  %1356 = vmatpush.msrb.mxu1 %v395_v63  ;;  %v476_v62 = vld [vmem:[%s4418_s1 + $0xd58] sm:$0xff]  ;;  %v493_v63 = vld [vmem:[%s4418_s1 + $0xde0] sm:$0xff] }
  0xb9   :  { %1377 = vmatpush.msrb.mxu2 %v410_v0  ;;  %1396 = vmatpush.msrb.mxu3 %v427_v1  ;;  %v443_v0 = vld [vmem:[%s4418_s1 + $0xc50] sm:$0xff]  ;;  %v460_v1 = vld [vmem:[%s4418_s1 + $0xcd8] sm:$0xff] }
  0xba   :  { %1338 = vmatpush.msrb.mxu0 %v377_v2  ;;  %1357 = vmatpush.msrb.mxu1 %v394_v3  ;;  %v475_v2 = vld [vmem:[%s4418_s1 + $0xd50] sm:$0xff]  ;;  %v492_v3 = vld [vmem:[%s4418_s1 + $0xdd8] sm:$0xff] }
  0xbb   :  { %1378 = vmatpush.msrb.mxu2 %v409_v4  ;;  %1397 = vmatpush.msrb.mxu3 %v426_v5  ;;  %v442_v4 = vld [vmem:[%s4418_s1 + $0xc48] sm:$0xff]  ;;  %v459_v5 = vld [vmem:[%s4418_s1 + $0xcd0] sm:$0xff] }
  0xbc   :  { %1339 = vmatpush.msrb.mxu0 %v376_v6  ;;  %1358 = vmatpush.msrb.mxu1 %v393_v7  ;;  %v474_v6 = vld [vmem:[%s4418_s1 + $0xd48] sm:$0xff]  ;;  %v491_v7 = vld [vmem:[%s4418_s1 + $0xdd0] sm:$0xff] }
  0xbd   :  { %1379 = vmatpush.msrb.mxu2 %v408_v8  ;;  %1398 = vmatpush.msrb.mxu3 %v425_v9  ;;  %v441_v8 = vld [vmem:[%s4418_s1 + $0xc40] sm:$0xff]  ;;  %v458_v9 = vld [vmem:[%s4418_s1 + $0xcc8] sm:$0xff] }
  0xbe   :  { %1340 = vmatpush.msrb.mxu0 %v375_v10  ;;  %1359 = vmatpush.msrb.mxu1 %v392_v11  ;;  %v473_v10 = vld [vmem:[%s4418_s1 + $0xd40] sm:$0xff]  ;;  %v490_v11 = vld [vmem:[%s4418_s1 + $0xdc8] sm:$0xff] }
  0xbf   :  { %1380 = vmatpush.msrb.mxu2 %v407_v12  ;;  %1399 = vmatpush.msrb.mxu3 %v424_v13  ;;  %v440_v12 = vld [vmem:[%s4418_s1 + $0xc38] sm:$0xff]  ;;  %v457_v13 = vld [vmem:[%s4418_s1 + $0xcc0] sm:$0xff] }
  0xc0   :  { %1341 = vmatpush.msrb.mxu0 %v374_v14  ;;  %1360 = vmatpush.msrb.mxu1 %v391_v15  ;;  %v472_v14 = vld [vmem:[%s4418_s1 + $0xd38] sm:$0xff]  ;;  %v489_v15 = vld [vmem:[%s4418_s1 + $0xdc0] sm:$0xff] }
  0xc1   :  { %1381 = vmatpush.msrb.mxu2 %v406_v16  ;;  %1400 = vmatpush.msrb.mxu3 %v423_v17  ;;  %v439_v16 = vld [vmem:[%s4418_s1 + $0xc30] sm:$0xff]  ;;  %v456_v17 = vld [vmem:[%s4418_s1 + $0xcb8] sm:$0xff] }
  0xc2   :  { %1342 = vmatpush.msrb.mxu0 %v373_v18  ;;  %1361 = vmatpush.msrb.mxu1 %v390_v19  ;;  %v471_v18 = vld [vmem:[%s4418_s1 + $0xd30] sm:$0xff]  ;;  %v488_v19 = vld [vmem:[%s4418_s1 + $0xdb8] sm:$0xff] }
  0xc3   :  { %1382 = vmatpush.msrb.mxu2 %v405_v20  ;;  %1401 = vmatpush.msrb.mxu3 %v422_v21  ;;  %v438_v20 = vld [vmem:[%s4418_s1 + $0xc28] sm:$0xff]  ;;  %v455_v21 = vld [vmem:[%s4418_s1 + $0xcb0] sm:$0xff] }
  0xc4   :  { %1343 = vmatpush.msrb.mxu0 %v372_v22  ;;  %1362 = vmatpush.msrb.mxu1 %v389_v23  ;;  %v470_v22 = vld [vmem:[%s4418_s1 + $0xd28] sm:$0xff]  ;;  %v487_v23 = vld [vmem:[%s4418_s1 + $0xdb0] sm:$0xff] }
  0xc5   :  { %1383 = vmatpush.msrb.mxu2 %v404_v24  ;;  %1402 = vmatpush.msrb.mxu3 %v421_v25  ;;  %v437_v24 = vld [vmem:[%s4418_s1 + $0xc20] sm:$0xff]  ;;  %v454_v25 = vld [vmem:[%s4418_s1 + $0xca8] sm:$0xff] }
  0xc6   :  { %1344 = vmatpush.msrb.mxu0 %v371_v26  ;;  %1363 = vmatpush.msrb.mxu1 %v388_v27  ;;  %v469_v26 = vld [vmem:[%s4418_s1 + $0xd20] sm:$0xff]  ;;  %v486_v27 = vld [vmem:[%s4418_s1 + $0xda8] sm:$0xff] }
  0xc7   :  { %1384 = vmatpush.msrb.mxu2 %v403_v28  ;;  %1403 = vmatpush.msrb.mxu3 %v420_v29  ;;  %v436_v28 = vld [vmem:[%s4418_s1 + $0xc18] sm:$0xff]  ;;  %v453_v29 = vld [vmem:[%s4418_s1 + $0xca0] sm:$0xff] }
  0xc8   :  { %1345 = vmatpush.msrb.mxu0 %v370_v30  ;;  %1364 = vmatpush.msrb.mxu1 %v387_v31  ;;  %v468_v30 = vld [vmem:[%s4418_s1 + $0xd18] sm:$0xff]  ;;  %v485_v31 = vld [vmem:[%s4418_s1 + $0xda0] sm:$0xff] }
  0xc9   :  { %1385 = vmatpush.msrb.mxu2 %v402_v32  ;;  %1404 = vmatpush.msrb.mxu3 %v419_v33  ;;  %v435_v32 = vld [vmem:[%s4418_s1 + $0xc10] sm:$0xff]  ;;  %v452_v33 = vld [vmem:[%s4418_s1 + $0xc98] sm:$0xff] }
  0xca   :  { %1346 = vmatpush.msrb.mxu0 %v369_v34  ;;  %1365 = vmatpush.msrb.mxu1 %v386_v35  ;;  %v467_v34 = vld [vmem:[%s4418_s1 + $0xd10] sm:$0xff]  ;;  %v484_v35 = vld [vmem:[%s4418_s1 + $0xd98] sm:$0xff] }
  0xcb   :  { %1386 = vmatpush.msrb.mxu2 %v401_v36  ;;  %1405 = vmatpush.msrb.mxu3 %v418_v38  ;;  %v434_v36 = vld [vmem:[%s4418_s1 + $0xc08] sm:$0xff]  ;;  %v451_v38 = vld [vmem:[%s4418_s1 + $0xc90] sm:$0xff] }
  0xcc   :  { %1347 = vmatmul.f32.vlgmr.msrb.gmra.mxu0 %v3099_v47  ;;  %1387 = vmatmul.f32.vlgmr.msrb.gmra.mxu2 %v3101_v48  ;;  %v496_v47 = vld [vmem:[%s4418_s1 + $0xdf8] sm:$0xff]  ;;  %v446_v48 = vld [vmem:[%s4418_s1 + $0xc68] sm:$0xff] }
  0xcd   :  { %1411 = vmatpush.msra.mxu0 %v448_v40  ;;  %1451 = vmatpush.msra.mxu2 %v480_v41  ;;  %v466_v40 = vld [vmem:[%s4418_s1 + $0xd08] sm:$0xff]  ;;  %v483_v41 = vld [vmem:[%s4418_s1 + $0xd90] sm:$0xff] }
  0xce   :  { %1366 = vmatpush.msrb.mxu1 %v385_v42  ;;  %1406 = vmatpush.msrb.mxu3 %v417_v43  ;;  %v433_v42 = vld [vmem:[%s4418_s1 + $0xc00] sm:$0xff]  ;;  %v450_v43 = vld [vmem:[%s4418_s1 + $0xc88] sm:$0xff] }
  0xcf   :  { %1367 = vmatmul.f32.vlgmr.msrb.gmra.mxu1 %v3109_v50  ;;  %1407 = vmatmul.f32.vlgmr.msrb.gmra.mxu3 %v3114_v51  ;;  %v42_v50 = vld [vmem:[%s4419_s0 + $0x80] sm:$0xff]  ;;  %v43_v51 = vld [vmem:[%s4419_s0 + $0x88] sm:$0xff] }
  0xd0   :  { %1412 = vmatpush.msra.mxu0 %v447_v37  ;;  %1431 = vmatpush.msra.mxu1 %v464_v39  ;;  %862 = vst [vmem:[#allocation1] ss:$2 sm:$0xff] %v42_v50  ;;  %v465_v37 = vld [vmem:[%s4418_s1 + $0xd00] sm:$0xff]  ;;  %v482_v39 = vld [vmem:[%s4418_s1 + $0xd88] sm:$0xff] }
  0xd1   :  { %1452 = vmatpush.msra.mxu2 %v479_v46  ;;  %1471 = vmatpush.msra.mxu3 %v496_v47  ;;  %863 = vst [vmem:[#allocation1 + $0x10] ss:$2 sm:$0xff] %v43_v51  ;;  %v512_v46 = vld [vmem:[%s4418_s1 + $0xe78] sm:$0xff]  ;;  %v542_v50 = vld [vmem:[%s4418_s1 + $0xf68] sm:$0xff]  ;;  %v559_v51 = vld [vmem:[%s4418_s1 + $0xff0] sm:$0xff] }
  0xd2   :  { %1413 = vmatpush.msra.mxu0 %v446_v48  ;;  %1432 = vmatpush.msra.mxu1 %v463_v49  ;;  %v544_v47 = vld [vmem:[%s4418_s1 + $0xf78] sm:$0xff]  ;;  %v449_v48 = vld [vmem:[%s4418_s1 + $0xc80] sm:$0xff] }
  0xd3   :  { %1453 = vmatpush.msra.mxu2 %v478_v44  ;;  %1472 = vmatpush.msra.mxu3 %v495_v45  ;;  %v481_v49 = vld [vmem:[%s4418_s1 + $0xd80] sm:$0xff]  ;;  %v511_v44 = vld [vmem:[%s4418_s1 + $0xe70] sm:$0xff]  ;;  %v528_v45 = vld [vmem:[%s4418_s1 + $0xef8] sm:$0xff] }
  0xd4   :  { %1414 = vmatpush.msra.mxu0 %v445_v52  ;;  %1433 = vmatpush.msra.mxu1 %v462_v55  ;;  %v543_v52 = vld [vmem:[%s4418_s1 + $0xf70] sm:$0xff] }
  0xd5   :  { %1454 = vmatpush.msra.mxu2 %v477_v58  ;;  %1473 = vmatpush.msra.mxu3 %v494_v59  ;;  %v527_v55 = vld [vmem:[%s4418_s1 + $0xef0] sm:$0xff]  ;;  %v509_v58 = vld [vmem:[%s4418_s1 + $0xe60] sm:$0xff] }
  0xd6   :  { %1415 = vmatpush.msra.mxu0 %v444_v60  ;;  %1434 = vmatpush.msra.mxu1 %v461_v61  ;;  %v3519_v59 = vld.sshfl [vmem:[#allocation1 + $0x20] sm:$0xff pattern:$0x75316420]  ;;  %v3521_v60 = vld.sshfl [vmem:[#allocation1 + $0x30] sm:$0xff pattern:$0x75316420] }
  0xd7   :  { %1455 = vmatpush.msra.mxu2 %v476_v62  ;;  %1474 = vmatpush.msra.mxu3 %v493_v63  ;;  %v526_v61 = vld [vmem:[%s4418_s1 + $0xee8] sm:$0xff]  ;;  %v3534_v63 = vld.sshfl [vmem:[#allocation1 + $0x38] sm:$0xff pattern:$0x75316420] }
  0xd8   :  { %1416 = vmatpush.msra.mxu0 %v443_v0  ;;  %1435 = vmatpush.msra.mxu1 %v460_v1  ;;  %v3529_v62 = vld.sshfl [vmem:[#allocation1 + $0x28] sm:$0xff pattern:$0x75316420]  ;;  %v541_v0 = vld [vmem:[%s4418_s1 + $0xf60] sm:$0xff] }
  0xd9   :  { %1456 = vmatpush.msra.mxu2 %v475_v2  ;;  %1475 = vmatpush.msra.mxu3 %v492_v3  ;;  %v558_v1 = vld [vmem:[%s4418_s1 + $0xfe8] sm:$0xff]  ;;  %v508_v2 = vld [vmem:[%s4418_s1 + $0xe58] sm:$0xff]  ;;  %v525_v3 = vld [vmem:[%s4418_s1 + $0xee0] sm:$0xff] }
  0xda   :  { %1417 = vmatpush.msra.mxu0 %v442_v4  ;;  %1436 = vmatpush.msra.mxu1 %v459_v5  ;;  %v540_v4 = vld [vmem:[%s4418_s1 + $0xf58] sm:$0xff]  ;;  %v557_v5 = vld [vmem:[%s4418_s1 + $0xfe0] sm:$0xff] }
  0xdb   :  { %1457 = vmatpush.msra.mxu2 %v474_v6  ;;  %1476 = vmatpush.msra.mxu3 %v491_v7  ;;  %v507_v6 = vld [vmem:[%s4418_s1 + $0xe50] sm:$0xff]  ;;  %v524_v7 = vld [vmem:[%s4418_s1 + $0xed8] sm:$0xff] }
  0xdc   :  { %1418 = vmatpush.msra.mxu0 %v441_v8  ;;  %1437 = vmatpush.msra.mxu1 %v458_v9  ;;  %v539_v8 = vld [vmem:[%s4418_s1 + $0xf50] sm:$0xff]  ;;  %v556_v9 = vld [vmem:[%s4418_s1 + $0xfd8] sm:$0xff] }
  0xdd   :  { %1458 = vmatpush.msra.mxu2 %v473_v10  ;;  %1477 = vmatpush.msra.mxu3 %v490_v11  ;;  %v506_v10 = vld [vmem:[%s4418_s1 + $0xe48] sm:$0xff]  ;;  %v523_v11 = vld [vmem:[%s4418_s1 + $0xed0] sm:$0xff] }
  0xde   :  { %1419 = vmatpush.msra.mxu0 %v440_v12  ;;  %1438 = vmatpush.msra.mxu1 %v457_v13  ;;  %v538_v12 = vld [vmem:[%s4418_s1 + $0xf48] sm:$0xff]  ;;  %v555_v13 = vld [vmem:[%s4418_s1 + $0xfd0] sm:$0xff] }
  0xdf   :  { %1459 = vmatpush.msra.mxu2 %v472_v14  ;;  %1478 = vmatpush.msra.mxu3 %v489_v15  ;;  %v505_v14 = vld [vmem:[%s4418_s1 + $0xe40] sm:$0xff]  ;;  %v522_v15 = vld [vmem:[%s4418_s1 + $0xec8] sm:$0xff] }
  0xe0   :  { %1420 = vmatpush.msra.mxu0 %v439_v16  ;;  %1439 = vmatpush.msra.mxu1 %v456_v17  ;;  %v537_v16 = vld [vmem:[%s4418_s1 + $0xf40] sm:$0xff]  ;;  %v554_v17 = vld [vmem:[%s4418_s1 + $0xfc8] sm:$0xff] }
  0xe1   :  { %1460 = vmatpush.msra.mxu2 %v471_v18  ;;  %1479 = vmatpush.msra.mxu3 %v488_v19  ;;  %v504_v18 = vld [vmem:[%s4418_s1 + $0xe38] sm:$0xff]  ;;  %v521_v19 = vld [vmem:[%s4418_s1 + $0xec0] sm:$0xff] }
  0xe2   :  { %1421 = vmatpush.msra.mxu0 %v438_v20  ;;  %1440 = vmatpush.msra.mxu1 %v455_v21  ;;  %v536_v20 = vld [vmem:[%s4418_s1 + $0xf38] sm:$0xff]  ;;  %v553_v21 = vld [vmem:[%s4418_s1 + $0xfc0] sm:$0xff] }
  0xe3   :  { %1461 = vmatpush.msra.mxu2 %v470_v22  ;;  %1480 = vmatpush.msra.mxu3 %v487_v23  ;;  %v503_v22 = vld [vmem:[%s4418_s1 + $0xe30] sm:$0xff]  ;;  %v520_v23 = vld [vmem:[%s4418_s1 + $0xeb8] sm:$0xff] }
  0xe4   :  { %1422 = vmatpush.msra.mxu0 %v437_v24  ;;  %1441 = vmatpush.msra.mxu1 %v454_v25  ;;  %v535_v24 = vld [vmem:[%s4418_s1 + $0xf30] sm:$0xff]  ;;  %v552_v25 = vld [vmem:[%s4418_s1 + $0xfb8] sm:$0xff] }
  0xe5   :  { %1462 = vmatpush.msra.mxu2 %v469_v26  ;;  %1481 = vmatpush.msra.mxu3 %v486_v27  ;;  %v502_v26 = vld [vmem:[%s4418_s1 + $0xe28] sm:$0xff]  ;;  %v519_v27 = vld [vmem:[%s4418_s1 + $0xeb0] sm:$0xff] }
  0xe6   :  { %1423 = vmatpush.msra.mxu0 %v436_v28  ;;  %1442 = vmatpush.msra.mxu1 %v453_v29  ;;  %v534_v28 = vld [vmem:[%s4418_s1 + $0xf28] sm:$0xff]  ;;  %v551_v29 = vld [vmem:[%s4418_s1 + $0xfb0] sm:$0xff] }
  0xe7   :  { %1463 = vmatpush.msra.mxu2 %v468_v30  ;;  %1482 = vmatpush.msra.mxu3 %v485_v31  ;;  %v501_v30 = vld [vmem:[%s4418_s1 + $0xe20] sm:$0xff]  ;;  %v518_v31 = vld [vmem:[%s4418_s1 + $0xea8] sm:$0xff] }
  0xe8   :  { %1424 = vmatpush.msra.mxu0 %v435_v32  ;;  %1443 = vmatpush.msra.mxu1 %v452_v33  ;;  %v533_v32 = vld [vmem:[%s4418_s1 + $0xf20] sm:$0xff]  ;;  %v550_v33 = vld [vmem:[%s4418_s1 + $0xfa8] sm:$0xff] }
  0xe9   :  { %1464 = vmatpush.msra.mxu2 %v467_v34  ;;  %1483 = vmatpush.msra.mxu3 %v484_v35  ;;  %v500_v34 = vld [vmem:[%s4418_s1 + $0xe18] sm:$0xff]  ;;  %v517_v35 = vld [vmem:[%s4418_s1 + $0xea0] sm:$0xff] }
  0xea   :  { %1425 = vmatpush.msra.mxu0 %v434_v36  ;;  %1444 = vmatpush.msra.mxu1 %v451_v38  ;;  %v532_v36 = vld [vmem:[%s4418_s1 + $0xf18] sm:$0xff]  ;;  %v549_v38 = vld [vmem:[%s4418_s1 + $0xfa0] sm:$0xff] }
  0xeb   :  { %1465 = vmatpush.msra.mxu2 %v466_v40  ;;  %1484 = vmatpush.msra.mxu3 %v483_v41  ;;  %v499_v40 = vld [vmem:[%s4418_s1 + $0xe10] sm:$0xff]  ;;  %v516_v41 = vld [vmem:[%s4418_s1 + $0xe98] sm:$0xff] }
  0xec   :  { %1426 = vmatpush.msra.mxu0 %v433_v42  ;;  %1445 = vmatpush.msra.mxu1 %v450_v43  ;;  %v531_v42 = vld [vmem:[%s4418_s1 + $0xf10] sm:$0xff]  ;;  %v548_v43 = vld [vmem:[%s4418_s1 + $0xf98] sm:$0xff] }
  0xed   :  { %1466 = vmatpush.msra.mxu2 %v465_v37  ;;  %1485 = vmatpush.msra.mxu3 %v482_v39  ;;  %v498_v37 = vld [vmem:[%s4418_s1 + $0xe08] sm:$0xff]  ;;  %v515_v39 = vld [vmem:[%s4418_s1 + $0xe90] sm:$0xff] }
  0xee   :  { %1427 = vmatmul.f32.vlgmr.msra.gmra.mxu0 %v3309_v53  ;;  %1467 = vmatmul.f32.vlgmr.msra.gmra.mxu2 %v3311_v54  ;;  %v560_v53 = vld [vmem:[%s4418_s1 + $0xff8] sm:$0xff]  ;;  %v510_v54 = vld [vmem:[%s4418_s1 + $0xe68] sm:$0xff] }
  0xef   :  { %1491 = vmatpush.msrb.mxu0 %v512_v46  ;;  %1531 = vmatpush.msrb.mxu2 %v544_v47  ;;  %v530_v46 = vld [vmem:[%s4418_s1 + $0xf08] sm:$0xff]  ;;  %v547_v47 = vld [vmem:[%s4418_s1 + $0xf90] sm:$0xff] }
  0xf0   :  { %1446 = vmatpush.msra.mxu1 %v449_v48  ;;  %1486 = vmatpush.msra.mxu3 %v481_v49  ;;  %v497_v48 = vld [vmem:[%s4418_s1 + $0xe00] sm:$0xff]  ;;  %v514_v49 = vld [vmem:[%s4418_s1 + $0xe88] sm:$0xff] }
  0xf1   :  { %1447 = vmatmul.f32.vlgmr.msra.gmra.mxu1 %v3319_v56  ;;  %1487 = vmatmul.f32.vlgmr.msra.gmra.mxu3 %v3324_v57  ;;  %v44_v56 = vld [vmem:[%s4419_s0 + $0x90] sm:$0xff]  ;;  %v45_v57 = vld [vmem:[%s4419_s0 + $0x98] sm:$0xff] }
  0xf2   :  { %1492 = vmatpush.msrb.mxu0 %v511_v44  ;;  %1511 = vmatpush.msrb.mxu1 %v528_v45  ;;  %864 = vst [vmem:[#allocation1 + $0x20] ss:$2 sm:$0xff] %v44_v56  ;;  %v529_v44 = vld [vmem:[%s4418_s1 + $0xf00] sm:$0xff]  ;;  %v546_v45 = vld [vmem:[%s4418_s1 + $0xf88] sm:$0xff] }
  0xf3   :  { %1532 = vmatpush.msrb.mxu2 %v543_v52  ;;  %1551 = vmatpush.msrb.mxu3 %v560_v53  ;;  %865 = vst [vmem:[#allocation1 + $0x30] ss:$2 sm:$0xff] %v45_v57  ;;  %v576_v52 = vld [vmem:[%s4418_s1 + $0x1078] sm:$0xff]  ;;  %v606_v56 = vld [vmem:[%s4418_s1 + $0x1168] sm:$0xff]  ;;  %v573_v57 = vld [vmem:[%s4418_s1 + $0x1060] sm:$0xff] }
  0xf4   :  { %1493 = vmatpush.msrb.mxu0 %v510_v54  ;;  %1512 = vmatpush.msrb.mxu1 %v527_v55  ;;  %v608_v53 = vld [vmem:[%s4418_s1 + $0x1178] sm:$0xff]  ;;  %v513_v54 = vld [vmem:[%s4418_s1 + $0xe80] sm:$0xff] }
  0xf5   :  { %1533 = vmatpush.msrb.mxu2 %v542_v50  ;;  %1552 = vmatpush.msrb.mxu3 %v559_v51  ;;  %v545_v55 = vld [vmem:[%s4418_s1 + $0xf80] sm:$0xff]  ;;  %v575_v50 = vld [vmem:[%s4418_s1 + $0x1070] sm:$0xff]  ;;  %v592_v51 = vld [vmem:[%s4418_s1 + $0x10f8] sm:$0xff] }
  0xf6   :  { %1494 = vmatpush.msrb.mxu0 %v509_v58  ;;  %1513 = vmatpush.msrb.mxu1 %v526_v61  ;;  %v607_v58 = vld [vmem:[%s4418_s1 + $0x1170] sm:$0xff] }
  0xf7   :  { %1534 = vmatpush.msrb.mxu2 %v541_v0  ;;  %1553 = vmatpush.msrb.mxu3 %v558_v1  ;;  %v591_v61 = vld [vmem:[%s4418_s1 + $0x10f0] sm:$0xff]  ;;  %v605_v0 = vld [vmem:[%s4418_s1 + $0x1160] sm:$0xff]  ;;  %v622_v1 = vld [vmem:[%s4418_s1 + $0x11e8] sm:$0xff] }
  0xf8   :  { %1495 = vmatpush.msrb.mxu0 %v508_v2  ;;  %1514 = vmatpush.msrb.mxu1 %v525_v3  ;;  %v572_v2 = vld [vmem:[%s4418_s1 + $0x1058] sm:$0xff]  ;;  %v589_v3 = vld [vmem:[%s4418_s1 + $0x10e0] sm:$0xff] }
  0xf9   :  { %1535 = vmatpush.msrb.mxu2 %v540_v4  ;;  %1554 = vmatpush.msrb.mxu3 %v557_v5  ;;  %v604_v4 = vld [vmem:[%s4418_s1 + $0x1158] sm:$0xff]  ;;  %v621_v5 = vld [vmem:[%s4418_s1 + $0x11e0] sm:$0xff] }
  0xfa   :  { %1496 = vmatpush.msrb.mxu0 %v507_v6  ;;  %1515 = vmatpush.msrb.mxu1 %v524_v7  ;;  %v571_v6 = vld [vmem:[%s4418_s1 + $0x1050] sm:$0xff]  ;;  %v588_v7 = vld [vmem:[%s4418_s1 + $0x10d8] sm:$0xff] }
  0xfb   :  { %1536 = vmatpush.msrb.mxu2 %v539_v8  ;;  %1555 = vmatpush.msrb.mxu3 %v556_v9  ;;  %v603_v8 = vld [vmem:[%s4418_s1 + $0x1150] sm:$0xff]  ;;  %v620_v9 = vld [vmem:[%s4418_s1 + $0x11d8] sm:$0xff] }
  0xfc   :  { %1497 = vmatpush.msrb.mxu0 %v506_v10  ;;  %1516 = vmatpush.msrb.mxu1 %v523_v11  ;;  %v570_v10 = vld [vmem:[%s4418_s1 + $0x1048] sm:$0xff]  ;;  %v587_v11 = vld [vmem:[%s4418_s1 + $0x10d0] sm:$0xff] }
  0xfd   :  { %1537 = vmatpush.msrb.mxu2 %v538_v12  ;;  %1556 = vmatpush.msrb.mxu3 %v555_v13  ;;  %v602_v12 = vld [vmem:[%s4418_s1 + $0x1148] sm:$0xff]  ;;  %v619_v13 = vld [vmem:[%s4418_s1 + $0x11d0] sm:$0xff] }
  0xfe   :  { %1498 = vmatpush.msrb.mxu0 %v505_v14  ;;  %1517 = vmatpush.msrb.mxu1 %v522_v15  ;;  %v569_v14 = vld [vmem:[%s4418_s1 + $0x1040] sm:$0xff]  ;;  %v586_v15 = vld [vmem:[%s4418_s1 + $0x10c8] sm:$0xff] }
  0xff   :  { %1538 = vmatpush.msrb.mxu2 %v537_v16  ;;  %1557 = vmatpush.msrb.mxu3 %v554_v17  ;;  %v601_v16 = vld [vmem:[%s4418_s1 + $0x1140] sm:$0xff]  ;;  %v618_v17 = vld [vmem:[%s4418_s1 + $0x11c8] sm:$0xff] }
 0x100   :  { %1499 = vmatpush.msrb.mxu0 %v504_v18  ;;  %1518 = vmatpush.msrb.mxu1 %v521_v19  ;;  %v568_v18 = vld [vmem:[%s4418_s1 + $0x1038] sm:$0xff]  ;;  %v585_v19 = vld [vmem:[%s4418_s1 + $0x10c0] sm:$0xff] }
 0x101   :  { %1539 = vmatpush.msrb.mxu2 %v536_v20  ;;  %1558 = vmatpush.msrb.mxu3 %v553_v21  ;;  %v600_v20 = vld [vmem:[%s4418_s1 + $0x1138] sm:$0xff]  ;;  %v617_v21 = vld [vmem:[%s4418_s1 + $0x11c0] sm:$0xff] }
 0x102   :  { %1500 = vmatpush.msrb.mxu0 %v503_v22  ;;  %1519 = vmatpush.msrb.mxu1 %v520_v23  ;;  %v567_v22 = vld [vmem:[%s4418_s1 + $0x1030] sm:$0xff]  ;;  %v584_v23 = vld [vmem:[%s4418_s1 + $0x10b8] sm:$0xff] }
 0x103   :  { %1540 = vmatpush.msrb.mxu2 %v535_v24  ;;  %1559 = vmatpush.msrb.mxu3 %v552_v25  ;;  %v599_v24 = vld [vmem:[%s4418_s1 + $0x1130] sm:$0xff]  ;;  %v616_v25 = vld [vmem:[%s4418_s1 + $0x11b8] sm:$0xff] }
 0x104   :  { %1501 = vmatpush.msrb.mxu0 %v502_v26  ;;  %1520 = vmatpush.msrb.mxu1 %v519_v27  ;;  %v566_v26 = vld [vmem:[%s4418_s1 + $0x1028] sm:$0xff]  ;;  %v583_v27 = vld [vmem:[%s4418_s1 + $0x10b0] sm:$0xff] }
 0x105   :  { %1541 = vmatpush.msrb.mxu2 %v534_v28  ;;  %1560 = vmatpush.msrb.mxu3 %v551_v29  ;;  %v598_v28 = vld [vmem:[%s4418_s1 + $0x1128] sm:$0xff]  ;;  %v615_v29 = vld [vmem:[%s4418_s1 + $0x11b0] sm:$0xff] }
 0x106   :  { %1502 = vmatpush.msrb.mxu0 %v501_v30  ;;  %1521 = vmatpush.msrb.mxu1 %v518_v31  ;;  %v565_v30 = vld [vmem:[%s4418_s1 + $0x1020] sm:$0xff]  ;;  %v582_v31 = vld [vmem:[%s4418_s1 + $0x10a8] sm:$0xff] }
 0x107   :  { %1542 = vmatpush.msrb.mxu2 %v533_v32  ;;  %1561 = vmatpush.msrb.mxu3 %v550_v33  ;;  %v597_v32 = vld [vmem:[%s4418_s1 + $0x1120] sm:$0xff]  ;;  %v614_v33 = vld [vmem:[%s4418_s1 + $0x11a8] sm:$0xff] }
 0x108   :  { %1503 = vmatpush.msrb.mxu0 %v500_v34  ;;  %1522 = vmatpush.msrb.mxu1 %v517_v35  ;;  %v564_v34 = vld [vmem:[%s4418_s1 + $0x1018] sm:$0xff]  ;;  %v581_v35 = vld [vmem:[%s4418_s1 + $0x10a0] sm:$0xff] }
 0x109   :  { %1543 = vmatpush.msrb.mxu2 %v532_v36  ;;  %1562 = vmatpush.msrb.mxu3 %v549_v38  ;;  %v596_v36 = vld [vmem:[%s4418_s1 + $0x1118] sm:$0xff]  ;;  %v613_v38 = vld [vmem:[%s4418_s1 + $0x11a0] sm:$0xff] }
 0x10a   :  { %1504 = vmatpush.msrb.mxu0 %v499_v40  ;;  %1523 = vmatpush.msrb.mxu1 %v516_v41  ;;  %v563_v40 = vld [vmem:[%s4418_s1 + $0x1010] sm:$0xff]  ;;  %v580_v41 = vld [vmem:[%s4418_s1 + $0x1098] sm:$0xff] }
 0x10b   :  { %1544 = vmatpush.msrb.mxu2 %v531_v42  ;;  %1563 = vmatpush.msrb.mxu3 %v548_v43  ;;  %v595_v42 = vld [vmem:[%s4418_s1 + $0x1110] sm:$0xff]  ;;  %v612_v43 = vld [vmem:[%s4418_s1 + $0x1198] sm:$0xff] }
 0x10c   :  { %1505 = vmatpush.msrb.mxu0 %v498_v37  ;;  %1524 = vmatpush.msrb.mxu1 %v515_v39  ;;  %v562_v37 = vld [vmem:[%s4418_s1 + $0x1008] sm:$0xff]  ;;  %v579_v39 = vld [vmem:[%s4418_s1 + $0x1090] sm:$0xff] }
 0x10d   :  { %1545 = vmatpush.msrb.mxu2 %v530_v46  ;;  %1564 = vmatpush.msrb.mxu3 %v547_v47  ;;  %v594_v46 = vld [vmem:[%s4418_s1 + $0x1108] sm:$0xff]  ;;  %v611_v47 = vld [vmem:[%s4418_s1 + $0x1190] sm:$0xff] }
 0x10e   :  { %1506 = vmatpush.msrb.mxu0 %v497_v48  ;;  %1525 = vmatpush.msrb.mxu1 %v514_v49  ;;  %v561_v48 = vld [vmem:[%s4418_s1 + $0x1000] sm:$0xff]  ;;  %v578_v49 = vld [vmem:[%s4418_s1 + $0x1088] sm:$0xff] }
 0x10f   :  { %1546 = vmatpush.msrb.mxu2 %v529_v44  ;;  %1565 = vmatpush.msrb.mxu3 %v546_v45  ;;  %v593_v44 = vld [vmem:[%s4418_s1 + $0x1100] sm:$0xff]  ;;  %v610_v45 = vld [vmem:[%s4418_s1 + $0x1188] sm:$0xff] }
 0x110   :  { %1507 = vmatmul.f32.vlgmr.msrb.gmra.mxu0 %v3519_v59  ;;  %1547 = vmatmul.f32.vlgmr.msrb.gmra.mxu2 %v3521_v60  ;;  %v624_v59 = vld [vmem:[%s4418_s1 + $0x11f8] sm:$0xff]  ;;  %v574_v60 = vld [vmem:[%s4418_s1 + $0x1068] sm:$0xff] }
 0x111   :  { %1571 = vmatpush.msra.mxu0 %v576_v52  ;;  %1611 = vmatpush.msra.mxu2 %v608_v53  ;;  %v866_v52 = vld.sshfl [vmem:[#allocation1] sm:$0xff pattern:$0x75316420]  ;;  %v868_v53 = vld.sshfl [vmem:[#allocation1 + $0x10] sm:$0xff pattern:$0x75316420] }
 0x112   :  { %1526 = vmatpush.msrb.mxu1 %v513_v54  ;;  %1566 = vmatpush.msrb.mxu3 %v545_v55  ;;  %v640_v54 = vld [vmem:[%s4418_s1 + $0x1278] sm:$0xff] }
 0x113   :  { %1527 = vmatmul.f32.vlgmr.msrb.gmra.mxu1 %v3529_v62  ;;  %1567 = vmatmul.f32.vlgmr.msrb.gmra.mxu3 %v3534_v63  ;;  %v623_v62 = vld [vmem:[%s4418_s1 + $0x11f0] sm:$0xff]  ;;  %v590_v63 = vld [vmem:[%s4418_s1 + $0x10e8] sm:$0xff]  ;;  %v672_v55 = vld [vmem:[%s4418_s1 + $0x1378] sm:$0xff] }
 0x114   :  { %1572 = vmatpush.msra.mxu0 %v575_v50  ;;  %1591 = vmatpush.msra.mxu1 %v592_v51  ;;  %v577_v50 = vld [vmem:[%s4418_s1 + $0x1080] sm:$0xff] }
 0x115   :  { %1612 = vmatpush.msra.mxu2 %v607_v58  ;;  %1631 = vmatpush.msra.mxu3 %v624_v59  ;;  %v609_v51 = vld [vmem:[%s4418_s1 + $0x1180] sm:$0xff]  ;;  %v867_v58 = vld.sshfl [vmem:[#allocation1 + $0x8] sm:$0xff pattern:$0x75316420] }
 0x116   :  { %1573 = vmatpush.msra.mxu0 %v574_v60  ;;  %1592 = vmatpush.msra.mxu1 %v591_v61  ;;  %v869_v59 = vld.sshfl [vmem:[#allocation1 + $0x18] sm:$0xff pattern:$0x75316420]  ;;  %v639_v60 = vld [vmem:[%s4418_s1 + $0x1270] sm:$0xff] }
 0x117   :  { %1613 = vmatpush.msra.mxu2 %v606_v56  ;;  %1632 = vmatpush.msra.mxu3 %v623_v62  ;;  %v656_v61 = vld [vmem:[%s4418_s1 + $0x12f8] sm:$0xff]  ;;  %v671_v56 = vld [vmem:[%s4418_s1 + $0x1370] sm:$0xff] }
 0x118   :  { %1574 = vmatpush.msra.mxu0 %v573_v57  ;;  %1593 = vmatpush.msra.mxu1 %v590_v63  ;;  %v688_v62 = vld [vmem:[%s4418_s1 + $0x13f8] sm:$0xff]  ;;  %v638_v57 = vld [vmem:[%s4418_s1 + $0x1268] sm:$0xff]  ;;  %v655_v63 = vld [vmem:[%s4418_s1 + $0x12f0] sm:$0xff] }
 0x119   :  { %1614 = vmatpush.msra.mxu2 %v605_v0  ;;  %1633 = vmatpush.msra.mxu3 %v622_v1  ;;  %v670_v0 = vld [vmem:[%s4418_s1 + $0x1368] sm:$0xff]  ;;  %v687_v1 = vld [vmem:[%s4418_s1 + $0x13f0] sm:$0xff] }
 0x11a   :  { %1575 = vmatpush.msra.mxu0 %v572_v2  ;;  %1594 = vmatpush.msra.mxu1 %v589_v3  ;;  %v637_v2 = vld [vmem:[%s4418_s1 + $0x1260] sm:$0xff]  ;;  %v654_v3 = vld [vmem:[%s4418_s1 + $0x12e8] sm:$0xff] }
 0x11b   :  { %1615 = vmatpush.msra.mxu2 %v604_v4  ;;  %1634 = vmatpush.msra.mxu3 %v621_v5  ;;  %v669_v4 = vld [vmem:[%s4418_s1 + $0x1360] sm:$0xff]  ;;  %v686_v5 = vld [vmem:[%s4418_s1 + $0x13e8] sm:$0xff] }
 0x11c   :  { %1576 = vmatpush.msra.mxu0 %v571_v6  ;;  %1595 = vmatpush.msra.mxu1 %v588_v7  ;;  %v636_v6 = vld [vmem:[%s4418_s1 + $0x1258] sm:$0xff]  ;;  %v653_v7 = vld [vmem:[%s4418_s1 + $0x12e0] sm:$0xff] }
 0x11d   :  { %1616 = vmatpush.msra.mxu2 %v603_v8  ;;  %1635 = vmatpush.msra.mxu3 %v620_v9  ;;  %v668_v8 = vld [vmem:[%s4418_s1 + $0x1358] sm:$0xff]  ;;  %v685_v9 = vld [vmem:[%s4418_s1 + $0x13e0] sm:$0xff] }
 0x11e   :  { %1577 = vmatpush.msra.mxu0 %v570_v10  ;;  %1596 = vmatpush.msra.mxu1 %v587_v11  ;;  %v635_v10 = vld [vmem:[%s4418_s1 + $0x1250] sm:$0xff]  ;;  %v652_v11 = vld [vmem:[%s4418_s1 + $0x12d8] sm:$0xff] }
 0x11f   :  { %1617 = vmatpush.msra.mxu2 %v602_v12  ;;  %1636 = vmatpush.msra.mxu3 %v619_v13  ;;  %v667_v12 = vld [vmem:[%s4418_s1 + $0x1350] sm:$0xff]  ;;  %v684_v13 = vld [vmem:[%s4418_s1 + $0x13d8] sm:$0xff] }
 0x120   :  { %1578 = vmatpush.msra.mxu0 %v569_v14  ;;  %1597 = vmatpush.msra.mxu1 %v586_v15  ;;  %v634_v14 = vld [vmem:[%s4418_s1 + $0x1248] sm:$0xff]  ;;  %v651_v15 = vld [vmem:[%s4418_s1 + $0x12d0] sm:$0xff] }
 0x121   :  { %1618 = vmatpush.msra.mxu2 %v601_v16  ;;  %1637 = vmatpush.msra.mxu3 %v618_v17  ;;  %v666_v16 = vld [vmem:[%s4418_s1 + $0x1348] sm:$0xff]  ;;  %v683_v17 = vld [vmem:[%s4418_s1 + $0x13d0] sm:$0xff] }
 0x122   :  { %1579 = vmatpush.msra.mxu0 %v568_v18  ;;  %1598 = vmatpush.msra.mxu1 %v585_v19  ;;  %v633_v18 = vld [vmem:[%s4418_s1 + $0x1240] sm:$0xff]  ;;  %v650_v19 = vld [vmem:[%s4418_s1 + $0x12c8] sm:$0xff] }
 0x123   :  { %1619 = vmatpush.msra.mxu2 %v600_v20  ;;  %1638 = vmatpush.msra.mxu3 %v617_v21  ;;  %v665_v20 = vld [vmem:[%s4418_s1 + $0x1340] sm:$0xff]  ;;  %v682_v21 = vld [vmem:[%s4418_s1 + $0x13c8] sm:$0xff] }
 0x124   :  { %1580 = vmatpush.msra.mxu0 %v567_v22  ;;  %1599 = vmatpush.msra.mxu1 %v584_v23  ;;  %v632_v22 = vld [vmem:[%s4418_s1 + $0x1238] sm:$0xff]  ;;  %v649_v23 = vld [vmem:[%s4418_s1 + $0x12c0] sm:$0xff] }
 0x125   :  { %1620 = vmatpush.msra.mxu2 %v599_v24  ;;  %1639 = vmatpush.msra.mxu3 %v616_v25  ;;  %v664_v24 = vld [vmem:[%s4418_s1 + $0x1338] sm:$0xff]  ;;  %v681_v25 = vld [vmem:[%s4418_s1 + $0x13c0] sm:$0xff] }
 0x126   :  { %1581 = vmatpush.msra.mxu0 %v566_v26  ;;  %1600 = vmatpush.msra.mxu1 %v583_v27  ;;  %v631_v26 = vld [vmem:[%s4418_s1 + $0x1230] sm:$0xff]  ;;  %v648_v27 = vld [vmem:[%s4418_s1 + $0x12b8] sm:$0xff] }
 0x127   :  { %1621 = vmatpush.msra.mxu2 %v598_v28  ;;  %1640 = vmatpush.msra.mxu3 %v615_v29  ;;  %v663_v28 = vld [vmem:[%s4418_s1 + $0x1330] sm:$0xff]  ;;  %v680_v29 = vld [vmem:[%s4418_s1 + $0x13b8] sm:$0xff] }
 0x128   :  { %1582 = vmatpush.msra.mxu0 %v565_v30  ;;  %1601 = vmatpush.msra.mxu1 %v582_v31  ;;  %v630_v30 = vld [vmem:[%s4418_s1 + $0x1228] sm:$0xff]  ;;  %v647_v31 = vld [vmem:[%s4418_s1 + $0x12b0] sm:$0xff] }
 0x129   :  { %1622 = vmatpush.msra.mxu2 %v597_v32  ;;  %1641 = vmatpush.msra.mxu3 %v614_v33  ;;  %v662_v32 = vld [vmem:[%s4418_s1 + $0x1328] sm:$0xff]  ;;  %v679_v33 = vld [vmem:[%s4418_s1 + $0x13b0] sm:$0xff] }
 0x12a   :  { %1583 = vmatpush.msra.mxu0 %v564_v34  ;;  %1602 = vmatpush.msra.mxu1 %v581_v35  ;;  %v629_v34 = vld [vmem:[%s4418_s1 + $0x1220] sm:$0xff]  ;;  %v646_v35 = vld [vmem:[%s4418_s1 + $0x12a8] sm:$0xff] }
 0x12b   :  { %1623 = vmatpush.msra.mxu2 %v596_v36  ;;  %1642 = vmatpush.msra.mxu3 %v613_v38  ;;  %v661_v36 = vld [vmem:[%s4418_s1 + $0x1320] sm:$0xff]  ;;  %v678_v38 = vld [vmem:[%s4418_s1 + $0x13a8] sm:$0xff] }
 0x12c   :  { %1584 = vmatpush.msra.mxu0 %v563_v40  ;;  %1603 = vmatpush.msra.mxu1 %v580_v41  ;;  %v628_v40 = vld [vmem:[%s4418_s1 + $0x1218] sm:$0xff]  ;;  %v645_v41 = vld [vmem:[%s4418_s1 + $0x12a0] sm:$0xff] }
 0x12d   :  { %1624 = vmatpush.msra.mxu2 %v595_v42  ;;  %1643 = vmatpush.msra.mxu3 %v612_v43  ;;  %v660_v42 = vld [vmem:[%s4418_s1 + $0x1318] sm:$0xff]  ;;  %v677_v43 = vld [vmem:[%s4418_s1 + $0x13a0] sm:$0xff] }
 0x12e   :  { %1585 = vmatpush.msra.mxu0 %v562_v37  ;;  %1604 = vmatpush.msra.mxu1 %v579_v39  ;;  %v627_v37 = vld [vmem:[%s4418_s1 + $0x1210] sm:$0xff]  ;;  %v644_v39 = vld [vmem:[%s4418_s1 + $0x1298] sm:$0xff] }
 0x12f   :  { %1625 = vmatpush.msra.mxu2 %v594_v46  ;;  %1644 = vmatpush.msra.mxu3 %v611_v47  ;;  %v659_v46 = vld [vmem:[%s4418_s1 + $0x1310] sm:$0xff]  ;;  %v676_v47 = vld [vmem:[%s4418_s1 + $0x1398] sm:$0xff] }
 0x130   :  { %1586 = vmatpush.msra.mxu0 %v561_v48  ;;  %1605 = vmatpush.msra.mxu1 %v578_v49  ;;  %v626_v48 = vld [vmem:[%s4418_s1 + $0x1208] sm:$0xff]  ;;  %v643_v49 = vld [vmem:[%s4418_s1 + $0x1290] sm:$0xff] }
 0x131   :  { %1626 = vmatpush.msra.mxu2 %v593_v44  ;;  %1645 = vmatpush.msra.mxu3 %v610_v45  ;;  %v46_v44 = vld [vmem:[%s4419_s0 + $0xa0] sm:$0xff]  ;;  %v47_v45 = vld [vmem:[%s4419_s0 + $0xa8] sm:$0xff] }
 0x132   :  { %1587 = vmatmul.f32.vlgmr.msra.gmra.mxu0 %v866_v52  ;;  %1627 = vmatmul.f32.vlgmr.msra.gmra.mxu2 %v868_v53  ;;  %v658_v52 = vld [vmem:[%s4418_s1 + $0x1308] sm:$0xff]  ;;  %v675_v53 = vld [vmem:[%s4418_s1 + $0x1390] sm:$0xff]  ;;  %874 = vst [vmem:[#allocation1] ss:$2 sm:$0xff] %v46_v44 }
 0x133   :  { %1651 = vmatpush.msrb.mxu0 %v640_v54  ;;  %1691 = vmatpush.msrb.mxu2 %v672_v55  ;;  %v625_v54 = vld [vmem:[%s4418_s1 + $0x1200] sm:$0xff]  ;;  %v642_v55 = vld [vmem:[%s4418_s1 + $0x1288] sm:$0xff]  ;;  %875 = vst [vmem:[#allocation1 + $0x10] ss:$2 sm:$0xff] %v47_v45  ;;  %v691_v44 = vld [vmem:[%s4418_s1 + $0x1410] sm:$0xff] }
 0x134   :  { %1606 = vmatpush.msra.mxu1 %v577_v50  ;;  %1646 = vmatpush.msra.mxu3 %v609_v51  ;;  %v657_v50 = vld [vmem:[%s4418_s1 + $0x1300] sm:$0xff]  ;;  %v674_v51 = vld [vmem:[%s4418_s1 + $0x1388] sm:$0xff]  ;;  %v708_v45 = vld [vmem:[%s4418_s1 + $0x1498] sm:$0xff] }
 0x135   :  { %1607 = vmatmul.f32.vlgmr.msra.gmra.mxu1 %v867_v58  ;;  %1647 = vmatmul.f32.vlgmr.msra.gmra.mxu3 %v869_v59  ;;  %v870_v58 = vld.sshfl [vmem:[#allocation1 + $0x20] sm:$0xff pattern:$0x75316420]  ;;  %v872_v59 = vld.sshfl [vmem:[#allocation1 + $0x30] sm:$0xff pattern:$0x75316420] }
 0x136   :  { %1652 = vmatpush.msrb.mxu0 %v639_v60  ;;  %1671 = vmatpush.msrb.mxu1 %v656_v61  ;;  %v704_v60 = vld [vmem:[%s4418_s1 + $0x1478] sm:$0xff] }
 0x137   :  { %1692 = vmatpush.msrb.mxu2 %v671_v56  ;;  %1711 = vmatpush.msrb.mxu3 %v688_v62  ;;  %v736_v61 = vld [vmem:[%s4418_s1 + $0x1578] sm:$0xff]  ;;  %v641_v56 = vld [vmem:[%s4418_s1 + $0x1280] sm:$0xff] }
 0x138   :  { %1653 = vmatpush.msrb.mxu0 %v638_v57  ;;  %1672 = vmatpush.msrb.mxu1 %v655_v63  ;;  %v673_v62 = vld [vmem:[%s4418_s1 + $0x1380] sm:$0xff]  ;;  %v871_v57 = vld.sshfl [vmem:[#allocation1 + $0x28] sm:$0xff pattern:$0x75316420] }
 0x139   :  { %1693 = vmatpush.msrb.mxu2 %v670_v0  ;;  %1712 = vmatpush.msrb.mxu3 %v687_v1  ;;  %v873_v63 = vld.sshfl [vmem:[#allocation1 + $0x38] sm:$0xff pattern:$0x75316420]  ;;  %v703_v0 = vld [vmem:[%s4418_s1 + $0x1470] sm:$0xff] }
 0x13a   :  { %1654 = vmatpush.msrb.mxu0 %v637_v2  ;;  %1673 = vmatpush.msrb.mxu1 %v654_v3  ;;  %v720_v1 = vld [vmem:[%s4418_s1 + $0x14f8] sm:$0xff]  ;;  %v735_v2 = vld [vmem:[%s4418_s1 + $0x1570] sm:$0xff] }
 0x13b   :  { %1694 = vmatpush.msrb.mxu2 %v669_v4  ;;  %1713 = vmatpush.msrb.mxu3 %v686_v5  ;;  %v752_v3 = vld [vmem:[%s4418_s1 + $0x15f8] sm:$0xff]  ;;  %v702_v4 = vld [vmem:[%s4418_s1 + $0x1468] sm:$0xff]  ;;  %v719_v5 = vld [vmem:[%s4418_s1 + $0x14f0] sm:$0xff] }
 0x13c   :  { %1655 = vmatpush.msrb.mxu0 %v636_v6  ;;  %1674 = vmatpush.msrb.mxu1 %v653_v7  ;;  %v734_v6 = vld [vmem:[%s4418_s1 + $0x1568] sm:$0xff]  ;;  %v751_v7 = vld [vmem:[%s4418_s1 + $0x15f0] sm:$0xff] }
 0x13d   :  { %1695 = vmatpush.msrb.mxu2 %v668_v8  ;;  %1714 = vmatpush.msrb.mxu3 %v685_v9  ;;  %v701_v8 = vld [vmem:[%s4418_s1 + $0x1460] sm:$0xff]  ;;  %v718_v9 = vld [vmem:[%s4418_s1 + $0x14e8] sm:$0xff] }
 0x13e   :  { %1656 = vmatpush.msrb.mxu0 %v635_v10  ;;  %1675 = vmatpush.msrb.mxu1 %v652_v11  ;;  %v733_v10 = vld [vmem:[%s4418_s1 + $0x1560] sm:$0xff]  ;;  %v750_v11 = vld [vmem:[%s4418_s1 + $0x15e8] sm:$0xff] }
 0x13f   :  { %1696 = vmatpush.msrb.mxu2 %v667_v12  ;;  %1715 = vmatpush.msrb.mxu3 %v684_v13  ;;  %v700_v12 = vld [vmem:[%s4418_s1 + $0x1458] sm:$0xff]  ;;  %v717_v13 = vld [vmem:[%s4418_s1 + $0x14e0] sm:$0xff] }
 0x140   :  { %1657 = vmatpush.msrb.mxu0 %v634_v14  ;;  %1676 = vmatpush.msrb.mxu1 %v651_v15  ;;  %v732_v14 = vld [vmem:[%s4418_s1 + $0x1558] sm:$0xff]  ;;  %v749_v15 = vld [vmem:[%s4418_s1 + $0x15e0] sm:$0xff] }
 0x141   :  { %1697 = vmatpush.msrb.mxu2 %v666_v16  ;;  %1716 = vmatpush.msrb.mxu3 %v683_v17  ;;  %v699_v16 = vld [vmem:[%s4418_s1 + $0x1450] sm:$0xff]  ;;  %v716_v17 = vld [vmem:[%s4418_s1 + $0x14d8] sm:$0xff] }
 0x142   :  { %1658 = vmatpush.msrb.mxu0 %v633_v18  ;;  %1677 = vmatpush.msrb.mxu1 %v650_v19  ;;  %v731_v18 = vld [vmem:[%s4418_s1 + $0x1550] sm:$0xff]  ;;  %v748_v19 = vld [vmem:[%s4418_s1 + $0x15d8] sm:$0xff] }
 0x143   :  { %1698 = vmatpush.msrb.mxu2 %v665_v20  ;;  %1717 = vmatpush.msrb.mxu3 %v682_v21  ;;  %v698_v20 = vld [vmem:[%s4418_s1 + $0x1448] sm:$0xff]  ;;  %v715_v21 = vld [vmem:[%s4418_s1 + $0x14d0] sm:$0xff] }
 0x144   :  { %1659 = vmatpush.msrb.mxu0 %v632_v22  ;;  %1678 = vmatpush.msrb.mxu1 %v649_v23  ;;  %v730_v22 = vld [vmem:[%s4418_s1 + $0x1548] sm:$0xff]  ;;  %v747_v23 = vld [vmem:[%s4418_s1 + $0x15d0] sm:$0xff] }
 0x145   :  { %1699 = vmatpush.msrb.mxu2 %v664_v24  ;;  %1718 = vmatpush.msrb.mxu3 %v681_v25  ;;  %v697_v24 = vld [vmem:[%s4418_s1 + $0x1440] sm:$0xff]  ;;  %v714_v25 = vld [vmem:[%s4418_s1 + $0x14c8] sm:$0xff] }
 0x146   :  { %1660 = vmatpush.msrb.mxu0 %v631_v26  ;;  %1679 = vmatpush.msrb.mxu1 %v648_v27  ;;  %v729_v26 = vld [vmem:[%s4418_s1 + $0x1540] sm:$0xff]  ;;  %v746_v27 = vld [vmem:[%s4418_s1 + $0x15c8] sm:$0xff] }
 0x147   :  { %1700 = vmatpush.msrb.mxu2 %v663_v28  ;;  %1719 = vmatpush.msrb.mxu3 %v680_v29  ;;  %v696_v28 = vld [vmem:[%s4418_s1 + $0x1438] sm:$0xff]  ;;  %v713_v29 = vld [vmem:[%s4418_s1 + $0x14c0] sm:$0xff] }
 0x148   :  { %1661 = vmatpush.msrb.mxu0 %v630_v30  ;;  %1680 = vmatpush.msrb.mxu1 %v647_v31  ;;  %v728_v30 = vld [vmem:[%s4418_s1 + $0x1538] sm:$0xff]  ;;  %v745_v31 = vld [vmem:[%s4418_s1 + $0x15c0] sm:$0xff] }
 0x149   :  { %1701 = vmatpush.msrb.mxu2 %v662_v32  ;;  %1720 = vmatpush.msrb.mxu3 %v679_v33  ;;  %v695_v32 = vld [vmem:[%s4418_s1 + $0x1430] sm:$0xff]  ;;  %v712_v33 = vld [vmem:[%s4418_s1 + $0x14b8] sm:$0xff] }
 0x14a   :  { %1662 = vmatpush.msrb.mxu0 %v629_v34  ;;  %1681 = vmatpush.msrb.mxu1 %v646_v35  ;;  %v727_v34 = vld [vmem:[%s4418_s1 + $0x1530] sm:$0xff]  ;;  %v744_v35 = vld [vmem:[%s4418_s1 + $0x15b8] sm:$0xff] }
 0x14b   :  { %1702 = vmatpush.msrb.mxu2 %v661_v36  ;;  %1721 = vmatpush.msrb.mxu3 %v678_v38  ;;  %v694_v36 = vld [vmem:[%s4418_s1 + $0x1428] sm:$0xff]  ;;  %v711_v38 = vld [vmem:[%s4418_s1 + $0x14b0] sm:$0xff] }
 0x14c   :  { %1663 = vmatpush.msrb.mxu0 %v628_v40  ;;  %1682 = vmatpush.msrb.mxu1 %v645_v41  ;;  %v726_v40 = vld [vmem:[%s4418_s1 + $0x1528] sm:$0xff]  ;;  %v743_v41 = vld [vmem:[%s4418_s1 + $0x15b0] sm:$0xff] }
 0x14d   :  { %1703 = vmatpush.msrb.mxu2 %v660_v42  ;;  %1722 = vmatpush.msrb.mxu3 %v677_v43  ;;  %v693_v42 = vld [vmem:[%s4418_s1 + $0x1420] sm:$0xff]  ;;  %v710_v43 = vld [vmem:[%s4418_s1 + $0x14a8] sm:$0xff] }
 0x14e   :  { %1664 = vmatpush.msrb.mxu0 %v627_v37  ;;  %1683 = vmatpush.msrb.mxu1 %v644_v39  ;;  %v725_v37 = vld [vmem:[%s4418_s1 + $0x1520] sm:$0xff]  ;;  %v742_v39 = vld [vmem:[%s4418_s1 + $0x15a8] sm:$0xff] }
 0x14f   :  { %1704 = vmatpush.msrb.mxu2 %v659_v46  ;;  %1723 = vmatpush.msrb.mxu3 %v676_v47  ;;  %v692_v46 = vld [vmem:[%s4418_s1 + $0x1418] sm:$0xff]  ;;  %v709_v47 = vld [vmem:[%s4418_s1 + $0x14a0] sm:$0xff] }
 0x150   :  { %1665 = vmatpush.msrb.mxu0 %v626_v48  ;;  %1684 = vmatpush.msrb.mxu1 %v643_v49  ;;  %v724_v48 = vld [vmem:[%s4418_s1 + $0x1518] sm:$0xff]  ;;  %v741_v49 = vld [vmem:[%s4418_s1 + $0x15a0] sm:$0xff] }
 0x151   :  { %1705 = vmatpush.msrb.mxu2 %v658_v52  ;;  %1724 = vmatpush.msrb.mxu3 %v675_v53  ;;  %v48_v52 = vld [vmem:[%s4419_s0 + $0xb0] sm:$0xff] }
 0x152   :  { %1666 = vmatpush.msrb.mxu0 %v625_v54  ;;  %1685 = vmatpush.msrb.mxu1 %v642_v55  ;;  %v723_v53 = vld [vmem:[%s4418_s1 + $0x1510] sm:$0xff]  ;;  %v740_v54 = vld [vmem:[%s4418_s1 + $0x1598] sm:$0xff]  ;;  %876 = vst [vmem:[#allocation1 + $0x20] ss:$2 sm:$0xff] %v48_v52  ;;  %v690_v55 = vld [vmem:[%s4418_s1 + $0x1408] sm:$0xff] }
 0x153   :  { %1706 = vmatpush.msrb.mxu2 %v657_v50  ;;  %1725 = vmatpush.msrb.mxu3 %v674_v51  ;;  %v707_v50 = vld [vmem:[%s4418_s1 + $0x1490] sm:$0xff]  ;;  %v722_v51 = vld [vmem:[%s4418_s1 + $0x1508] sm:$0xff] }
 0x154   :  { %1667 = vmatmul.f32.vlgmr.msrb.gmra.mxu0 %v870_v58  ;;  %1707 = vmatmul.f32.vlgmr.msrb.gmra.mxu2 %v872_v59  ;;  %v739_v58 = vld [vmem:[%s4418_s1 + $0x1590] sm:$0xff]  ;;  %v689_v59 = vld [vmem:[%s4418_s1 + $0x1400] sm:$0xff] }
 0x155   :  { %1731 = vmatpush.msra.mxu0 %v704_v60  ;;  %1771 = vmatpush.msra.mxu2 %v736_v61  ;;  %v706_v60 = vld [vmem:[%s4418_s1 + $0x1488] sm:$0xff]  ;;  %v721_v61 = vld [vmem:[%s4418_s1 + $0x1500] sm:$0xff] }
 0x156   :  { %1686 = vmatpush.msrb.mxu1 %v641_v56  ;;  %1726 = vmatpush.msrb.mxu3 %v673_v62  ;;  %v738_v56 = vld [vmem:[%s4418_s1 + $0x1588] sm:$0xff]  ;;  %v877_v62 = vld.sshfl [vmem:[#allocation1] sm:$0xff pattern:$0x75316420] }
 0x157   :  { %1687 = vmatmul.f32.vlgmr.msrb.gmra.mxu1 %v871_v57  ;;  %1727 = vmatmul.f32.vlgmr.msrb.gmra.mxu3 %v873_v63  ;;  %v879_v57 = vld.sshfl [vmem:[#allocation1 + $0x10] sm:$0xff pattern:$0x75316420]  ;;  %v768_v63 = vld [vmem:[%s4418_s1 + $0x1678] sm:$0xff] }
 0x158   :  { %1732 = vmatpush.msra.mxu0 %v703_v0  ;;  %1751 = vmatpush.msra.mxu1 %v720_v1  ;;  %v705_v0 = vld [vmem:[%s4418_s1 + $0x1480] sm:$0xff] }
 0x159   :  { %1772 = vmatpush.msra.mxu2 %v735_v2  ;;  %1791 = vmatpush.msra.mxu3 %v752_v3  ;;  %v737_v1 = vld [vmem:[%s4418_s1 + $0x1580] sm:$0xff]  ;;  %v878_v2 = vld.sshfl [vmem:[#allocation1 + $0x8] sm:$0xff pattern:$0x75316420] }
 0x15a   :  { %1733 = vmatpush.msra.mxu0 %v702_v4  ;;  %1752 = vmatpush.msra.mxu1 %v719_v5  ;;  %v880_v3 = vld.sshfl [vmem:[#allocation1 + $0x18] sm:$0xff pattern:$0x75316420]  ;;  %v767_v4 = vld [vmem:[%s4418_s1 + $0x1670] sm:$0xff] }
 0x15b   :  { %1773 = vmatpush.msra.mxu2 %v734_v6  ;;  %1792 = vmatpush.msra.mxu3 %v751_v7  ;;  %v783_v5 = vld [vmem:[%s4418_s1 + $0x16f0] sm:$0xff]  ;;  %v766_v6 = vld [vmem:[%s4418_s1 + $0x1668] sm:$0xff] }
 0x15c   :  { %1734 = vmatpush.msra.mxu0 %v701_v8  ;;  %1753 = vmatpush.msra.mxu1 %v718_v9  ;;  %v782_v7 = vld [vmem:[%s4418_s1 + $0x16e8] sm:$0xff]  ;;  %v765_v8 = vld [vmem:[%s4418_s1 + $0x1660] sm:$0xff] }
 0x15d   :  { %1774 = vmatpush.msra.mxu2 %v733_v10  ;;  %1793 = vmatpush.msra.mxu3 %v750_v11  ;;  %v781_v9 = vld [vmem:[%s4418_s1 + $0x16e0] sm:$0xff]  ;;  %v764_v10 = vld [vmem:[%s4418_s1 + $0x1658] sm:$0xff] }
 0x15e   :  { %1735 = vmatpush.msra.mxu0 %v700_v12  ;;  %1754 = vmatpush.msra.mxu1 %v717_v13  ;;  %v780_v11 = vld [vmem:[%s4418_s1 + $0x16d8] sm:$0xff]  ;;  %v763_v12 = vld [vmem:[%s4418_s1 + $0x1650] sm:$0xff] }
 0x15f   :  { %1775 = vmatpush.msra.mxu2 %v732_v14  ;;  %1794 = vmatpush.msra.mxu3 %v749_v15  ;;  %v779_v13 = vld [vmem:[%s4418_s1 + $0x16d0] sm:$0xff]  ;;  %v762_v14 = vld [vmem:[%s4418_s1 + $0x1648] sm:$0xff] }
 0x160   :  { %1736 = vmatpush.msra.mxu0 %v699_v16  ;;  %1755 = vmatpush.msra.mxu1 %v716_v17  ;;  %v778_v15 = vld [vmem:[%s4418_s1 + $0x16c8] sm:$0xff]  ;;  %v761_v16 = vld [vmem:[%s4418_s1 + $0x1640] sm:$0xff] }
 0x161   :  { %1776 = vmatpush.msra.mxu2 %v731_v18  ;;  %1795 = vmatpush.msra.mxu3 %v748_v19  ;;  %v777_v17 = vld [vmem:[%s4418_s1 + $0x16c0] sm:$0xff]  ;;  %v760_v18 = vld [vmem:[%s4418_s1 + $0x1638] sm:$0xff] }
 0x162   :  { %1737 = vmatpush.msra.mxu0 %v698_v20  ;;  %1756 = vmatpush.msra.mxu1 %v715_v21  ;;  %v776_v19 = vld [vmem:[%s4418_s1 + $0x16b8] sm:$0xff]  ;;  %v1957_v20 = vld [vmem:[%s4420_s2] ss:$0 sm:$0xff]  ;;  %v759_v21 = vld [vmem:[%s4418_s1 + $0x1630] sm:$0xff] }
 0x163   :  { %1777 = vmatpush.msra.mxu2 %v730_v22  ;;  %1796 = vmatpush.msra.mxu3 %v747_v23  ;;  %v948_v22 = vpop.f32.mrf.mxu0  ;;  %v775_v23 = vld [vmem:[%s4418_s1 + $0x16b0] sm:$0xff] }
 0x164   :  { %1738 = vmatpush.msra.mxu0 %v697_v24  ;;  %1757 = vmatpush.msra.mxu1 %v714_v25  ;;  %v758_v24 = vld [vmem:[%s4418_s1 + $0x1628] sm:$0xff] }
 0x165   :  { %1778 = vmatpush.msra.mxu2 %v729_v26  ;;  %1797 = vmatpush.msra.mxu3 %v746_v27  ;;  %v774_v25 = vld [vmem:[%s4418_s1 + $0x16a8] sm:$0xff]  ;;  %v949_v26 = vadd.f32 %v1957_v20, %v948_v22  ;;  %v757_v27 = vld [vmem:[%s4418_s1 + $0x1620] sm:$0xff] }
 0x166   :  { %1739 = vmatpush.msra.mxu0 %v696_v28  ;;  %1758 = vmatpush.msra.mxu1 %v713_v29  ;;  %v968_v28 = vpop.f32.mrf.mxu1  ;;  %v773_v29 = vld [vmem:[%s4418_s1 + $0x16a0] sm:$0xff] }
 0x167   :  { %1779 = vmatpush.msra.mxu2 %v728_v30  ;;  %1798 = vmatpush.msra.mxu3 %v745_v31  ;;  %v756_v30 = vld [vmem:[%s4418_s1 + $0x1618] sm:$0xff] }
 0x168   :  { %1740 = vmatpush.msra.mxu0 %v695_v32  ;;  %1759 = vmatpush.msra.mxu1 %v712_v33  ;;  %v772_v31 = vld [vmem:[%s4418_s1 + $0x1698] sm:$0xff]  ;;  %v969_v32 = vadd.f32 %v968_v28, %v949_v26  ;;  %v755_v33 = vld [vmem:[%s4418_s1 + $0x1610] sm:$0xff] }
 0x169   :  { %1780 = vmatpush.msra.mxu2 %v727_v34  ;;  %1799 = vmatpush.msra.mxu3 %v744_v35  ;;  %v988_v34 = vpop.f32.mrf.mxu2  ;;  %v771_v35 = vld [vmem:[%s4418_s1 + $0x1690] sm:$0xff] }
 0x16a   :  { %1741 = vmatpush.msra.mxu0 %v694_v36  ;;  %1760 = vmatpush.msra.mxu1 %v711_v38  ;;  %v754_v36 = vld [vmem:[%s4418_s1 + $0x1608] sm:$0xff] }
 0x16b   :  { %1781 = vmatpush.msra.mxu2 %v726_v40  ;;  %1800 = vmatpush.msra.mxu3 %v743_v41  ;;  %v770_v38 = vld [vmem:[%s4418_s1 + $0x1688] sm:$0xff]  ;;  %v989_v40 = vadd.f32 %v988_v34, %v969_v32  ;;  %v753_v41 = vld [vmem:[%s4418_s1 + $0x1600] sm:$0xff] }
 0x16c   :  { %1742 = vmatpush.msra.mxu0 %v693_v42  ;;  %1761 = vmatpush.msra.mxu1 %v710_v43  ;;  %v1008_v42 = vpop.f32.mrf.mxu3  ;;  %v881_v43 = vld.sshfl [vmem:[#allocation1 + $0x20] sm:$0xff pattern:$0x75316420] }
 0x16d   :  { %1782 = vmatpush.msra.mxu2 %v725_v37  ;;  %1801 = vmatpush.msra.mxu3 %v742_v39  ;;  %v769_v37 = vld [vmem:[%s4418_s1 + $0x1680] sm:$0xff]  ;;  %v882_v39 = vld.sshfl [vmem:[#allocation1 + $0x28] sm:$0xff pattern:$0x75316420] }
 0x16e   :  { %1743 = vmatpush.msra.mxu0 %v692_v46  ;;  %1762 = vmatpush.msra.mxu1 %v709_v47  ;;  %v1009_v46 = vadd.f32 %v1008_v42, %v989_v40  ;;  %v1028_v47 = vpop.f32.mrf.mxu0 }
 0x16f   :  { %1783 = vmatpush.msra.mxu2 %v724_v48  ;;  %1802 = vmatpush.msra.mxu3 %v741_v49  ;;  %v1048_v49 = vpop.f32.mrf.mxu1 }
 0x170   :  { %1744 = vmatpush.msra.mxu0 %v691_v44  ;;  %1763 = vmatpush.msra.mxu1 %v708_v45  ;;  %v1029_v48 = vadd.f32 %v1028_v47, %v1009_v46 }
 0x171   :  { %1784 = vmatpush.msra.mxu2 %v723_v53  ;;  %1803 = vmatpush.msra.mxu3 %v740_v54  ;;  %v1068_v45 = vpop.f32.mrf.mxu2 }
 0x172   :  { %1745 = vmatpush.msra.mxu0 %v690_v55  ;;  %1764 = vmatpush.msra.mxu1 %v707_v50  ;;  %v1049_v44 = vadd.f32 %v1048_v49, %v1029_v48 }
 0x173   :  { %1785 = vmatpush.msra.mxu2 %v722_v51  ;;  %1804 = vmatpush.msra.mxu3 %v739_v58 }
 0x174   :  { %1746 = vmatpush.msra.mxu0 %v689_v59  ;;  %1765 = vmatpush.msra.mxu1 %v706_v60  ;;  %v1069_v52 = vadd.f32 %v1068_v45, %v1049_v44  ;;  %v1088_v53 = vpop.f32.mrf.mxu3 }
 0x175   :  { %1786 = vmatpush.msra.mxu2 %v721_v61  ;;  %1805 = vmatpush.msra.mxu3 %v738_v56 }
 0x176   :  { %1747 = vmatmul.f32.vlgmr.msra.gmra.mxu0 %v877_v62  ;;  %1787 = vmatmul.f32.vlgmr.msra.gmra.mxu2 %v879_v57  ;;  %v1108_v54 = vpop.f32.mrf.mxu0  ;;  %v1089_v55 = vadd.f32 %v1088_v53, %v1069_v52 }
 0x177   :  { %1811 = vmatpush.msrb.mxu0 %v768_v63  ;;  %1766 = vmatpush.msra.mxu1 %v705_v0  ;;  %v1128_v51 = vpop.f32.mrf.mxu1 }
 0x178   :  { %1806 = vmatpush.msra.mxu3 %v737_v1  ;;  %1767 = vmatmul.f32.vlgmr.msra.gmra.mxu1 %v878_v2  ;;  %v1109_v50 = vadd.f32 %v1108_v54, %v1089_v55 }
 0x179   :  { %1807 = vmatmul.f32.vlgmr.msra.gmra.mxu3 %v880_v3  ;;  %1812 = vmatpush.msrb.mxu0 %v767_v4  ;;  %v1148_v58 = vpop.f32.mrf.mxu2 }
 0x17a   :  { %1832 = vmatpush.msrb.mxu1 %v783_v5  ;;  %v1129_v59 = vadd.f32 %v1128_v51, %v1109_v50 }
 0x17b   :  { %1813 = vmatpush.msrb.mxu0 %v766_v6 }
 0x17c   :  { %1833 = vmatpush.msrb.mxu1 %v782_v7  ;;  %v1149_v60 = vadd.f32 %v1148_v58, %v1129_v59  ;;  %v1168_v61 = vpop.f32.mrf.mxu3  ;;  %v1969_v59 = vmov 4.0  }
 0x17d   :  { %1814 = vmatpush.msrb.mxu0 %v765_v8  ;;  %1961 = vrcp.f32 %v1969_v59 }
 0x17e   :  { %1834 = vmatpush.msrb.mxu1 %v781_v9  ;;  %v1188_v56 = vpop.f32.mrf.mxu0  ;;  %v1169_v62 = vadd.f32 %v1168_v61, %v1149_v60 }
 0x17f   :  { %1815 = vmatpush.msrb.mxu0 %v764_v10  ;;  %v1208_v63 = vpop.f32.mrf.mxu1 }
 0x180   :  { %1835 = vmatpush.msrb.mxu1 %v780_v11  ;;  %v1189_v57 = vadd.f32 %v1188_v56, %v1169_v62 }
 0x181   :  { %1816 = vmatpush.msrb.mxu0 %v763_v12  ;;  %v1228_v0 = vpop.f32.mrf.mxu2 }
 0x182   :  { %1836 = vmatpush.msrb.mxu1 %v779_v13  ;;  %v1209_v1 = vadd.f32 %v1208_v63, %v1189_v57 }
 0x183   :  { %1817 = vmatpush.msrb.mxu0 %v762_v14  ;;  %v1962_v62 = vpop.eup %1961 }
 0x184   :  { %1837 = vmatpush.msrb.mxu1 %v778_v15  ;;  %v1229_v2 = vadd.f32 %v1228_v0, %v1209_v1  ;;  %v1248_v3 = vpop.f32.mrf.mxu3  ;;  %vm1865_vm2 = vweird.f32 %v1962_v62 }
 0x185   :  { %1818 = vmatpush.msrb.mxu0 %v761_v16 }
 0x186   :  { %1838 = vmatpush.msrb.mxu1 %v777_v17  ;;  %v1268_v4 = vpop.f32.mrf.mxu0  ;;  %v1249_v5 = vadd.f32 %v1248_v3, %v1229_v2  ;;  %v1861_v2 = vmul.f32 4.0, %v1962_v62 }
 0x187   :  { %1819 = vmatpush.msrb.mxu0 %v760_v18  ;;  %v1288_v7 = vpop.f32.mrf.mxu1 }
 0x188   :  { %1839 = vmatpush.msrb.mxu1 %v776_v19  ;;  %v1269_v6 = vadd.f32 %v1268_v4, %v1249_v5  ;;  %v1862_v5 = vsub.f32 1.0, %v1861_v2 }
 0x189   :  { %1820 = vmatpush.msrb.mxu0 %v759_v21  ;;  %v1308_v8 = vpop.f32.mrf.mxu2 }
 0x18a   :  { %1840 = vmatpush.msrb.mxu1 %v775_v23  ;;  %v1289_v9 = vadd.f32 %v1288_v7, %v1269_v6 }
 0x18b   :  { %1821 = vmatpush.msrb.mxu0 %v758_v24 }
 0x18c   :  { %1841 = vmatpush.msrb.mxu1 %v774_v25  ;;  %v1309_v10 = vadd.f32 %v1308_v8, %v1289_v9  ;;  %v1328_v11 = vpop.f32.mrf.mxu3  ;;  %v1863_v8 = vmul.f32 %v1962_v62, %v1862_v5 }
 0x18d   :  { %1822 = vmatpush.msrb.mxu0 %v757_v27 }
 0x18e   :  { %1842 = vmatpush.msrb.mxu1 %v773_v29  ;;  %v1348_v12 = vpop.f32.mrf.mxu0  ;;  %v1329_v13 = vadd.f32 %v1328_v11, %v1309_v10  ;;  %v1864_v11 = vadd.f32 %v1962_v62, %v1863_v8 }
 0x18f   :  { %1823 = vmatpush.msrb.mxu0 %v756_v30  ;;  %v1368_v15 = vpop.f32.mrf.mxu1 }
 0x190   :  { %1843 = vmatpush.msrb.mxu1 %v772_v31  ;;  %v1349_v14 = vadd.f32 %v1348_v12, %v1329_v13 }
 0x191   :  { %1824 = vmatpush.msrb.mxu0 %v755_v33  ;;  %v1388_v16 = vpop.f32.mrf.mxu2 }
 0x192   :  { %1844 = vmatpush.msrb.mxu1 %v771_v35  ;;  %v1369_v17 = vadd.f32 %v1368_v15, %v1349_v14  ;;  %v1866_v14 = vsel %vm1865_vm2, %v1962_v62, %v1864_v11 }
 0x193   :  { %1825 = vmatpush.msrb.mxu0 %v754_v36 }
 0x194   :  { %1845 = vmatpush.msrb.mxu1 %v770_v38  ;;  %v1389_v18 = vadd.f32 %v1388_v16, %v1369_v17  ;;  %v1408_v19 = vpop.f32.mrf.mxu3  ;;  %v1907_v16 = vld [vmem:[%s4424_s5 + $0x38] sm:$0xff] }
 0x195   :  { %1826 = vmatpush.msrb.mxu0 %v753_v41  ;;  %1924 = vmatpush.msrb.mxu2 %v1907_v16 }
 0x196   :  { %1827 = vmatmul.f32.vlgmr.msrb.gmra.mxu0 %v881_v43  ;;  %1846 = vmatpush.msrb.mxu1 %v769_v37  ;;  %v1428_v20 = vpop.f32.mrf.mxu0  ;;  %v1409_v21 = vadd.f32 %v1408_v19, %v1389_v18  ;;  %v1906_v18 = vld [vmem:[%s4424_s5 + $0x30] sm:$0xff] }
 0x197   :  { %1954 = vmatmul.msk.f32.vlgmr.msrb.gmra.mxu1 %vm928_vm0, %v882_v39  ;;  %v1448_v23 = vpop.f32.mrf.mxu1  ;;  %1925 = vmatpush.msrb.mxu2 %v1906_v18 }
 0x198   :  { %v1429_v22 = vadd.f32 %v1428_v20, %v1409_v21  ;;  %v1905_v20 = vld [vmem:[%s4424_s5 + $0x28] sm:$0xff] }
 0x199   :  { %v1468_v24 = vpop.f32.mrf.mxu2  ;;  %1926 = vmatpush.msrb.mxu2 %v1905_v20 }
 0x19a   :  { %v1449_v25 = vadd.f32 %v1448_v23, %v1429_v22  ;;  %v1904_v22 = vld [vmem:[%s4424_s5 + $0x20] sm:$0xff] }
 0x19b   :  { %1927 = vmatpush.msrb.mxu2 %v1904_v22 }
 0x19c   :  { %v1469_v26 = vadd.f32 %v1468_v24, %v1449_v25  ;;  %v1488_v27 = vpop.f32.mrf.mxu3  ;;  %v1903_v25 = vld [vmem:[%s4424_s5 + $0x18] sm:$0xff] }
 0x19d   :  { %1928 = vmatpush.msrb.mxu2 %v1903_v25 }
 0x19e   :  { %v1508_v28 = vpop.f32.mrf.mxu0  ;;  %v1489_v29 = vadd.f32 %v1488_v27, %v1469_v26  ;;  %v1902_v27 = vld [vmem:[%s4424_s5 + $0x10] sm:$0xff] }
 0x19f   :  { %v1528_v31 = vpop.f32.mrf.mxu1  ;;  %1929 = vmatpush.msrb.mxu2 %v1902_v27 }
 0x1a0   :  { %v1509_v30 = vadd.f32 %v1508_v28, %v1489_v29  ;;  %v1901_v29 = vld [vmem:[%s4424_s5 + $0x8] sm:$0xff] }
 0x1a1   :  { %v1548_v32 = vpop.f32.mrf.mxu2  ;;  %1930 = vmatpush.msrb.mxu2 %v1901_v29 }
 0x1a2   :  { %v1529_v33 = vadd.f32 %v1528_v31, %v1509_v30  ;;  %v1900_v31 = vld [vmem:[%s4424_s5] sm:$0xff] }
 0x1a3   :  { %1931 = vmatpush.msrb.mxu2 %v1900_v31 }
 0x1a4   :  { %v1549_v34 = vadd.f32 %v1548_v32, %v1529_v33  ;;  %v1568_v35 = vpop.f32.mrf.mxu3 }
 0x1a6   :  { %v1569_v38 = vadd.f32 %v1568_v35, %v1549_v34 }
 0x1af   :  { %v1588_v36 = vpop.f32.mrf.mxu0 }
 0x1b0   :  { %v1589_v40 = vadd.f32 %v1588_v36, %v1569_v38 }
 0x1b2   :  { %v1608_v41 = vpop.f32.mrf.mxu1 }
 0x1b3   :  { %v1609_v43 = vadd.f32 %v1608_v41, %v1589_v40 }
 0x1b5   :  { %v1628_v42 = vpop.f32.mrf.mxu2 }
 0x1b6   :  { %v1629_v37 = vadd.f32 %v1628_v42, %v1609_v43 }
 0x1b8   :  { %v1648_v39 = vpop.f32.mrf.mxu3 }
 0x1b9   :  { %v1649_v47 = vadd.f32 %v1648_v39, %v1629_v37  ;;  %v1958_v37 = vld [vmem:[%s4421_s3] ss:$0 sm:$0xff] }
 0x1d1   :  { %v1668_v46 = vpop.f32.mrf.mxu0 }
 0x1d2   :  { %v1669_v48 = vadd.f32 %v1668_v46, %v1649_v47  ;;  %v1959_v47 = vld [vmem:[%s4422_s4] ss:$0 sm:$0xff] }
 0x1d4   :  { %v1688_v49 = vpop.f32.mrf.mxu1 }
 0x1d5   :  { %v1689_v45 = vadd.f32 %v1688_v49, %v1669_v48 }
 0x1d7   :  { %v1708_v44 = vpop.f32.mrf.mxu2 }
 0x1d8   :  { %v1709_v52 = vadd.f32 %v1708_v44, %v1689_v45  ;;  %v1960_v44 = vld [vmem:[%s4423_s6] ss:$0 sm:$0xff] }
 0x1da   :  { %v1728_v53 = vpop.f32.mrf.mxu3 }
 0x1db   :  { %v1729_v55 = vadd.f32 %v1728_v53, %v1709_v52 }
 0x1f3   :  { %v1748_v54 = vpop.f32.mrf.mxu0 }
 0x1f4   :  { %v1749_v50 = vadd.f32 %v1748_v54, %v1729_v55 }
 0x1f5   :  { %v1768_v51 = vpop.f32.mrf.mxu1 }
 0x1f6   :  { %v1769_v60 = vadd.f32 %v1768_v51, %v1749_v50 }
 0x1f9   :  { %v1788_v58 = vpop.f32.mrf.mxu2 }
 0x1fa   :  { %v1789_v61 = vadd.f32 %v1788_v58, %v1769_v60 }
 0x1fc   :  { %v1808_v56 = vpop.f32.mrf.mxu3 }
 0x1fd   :  { %v1809_v57 = vadd.f32 %v1808_v56, %v1789_v61 }
 0x213   :  { %v1828_v63 = vpop.f32.mrf.mxu0 }
 0x214   :  { %v1829_v0 = vadd.f32 %v1828_v63, %v1809_v57  ;;  %v1848_v1 = vpop.f32.mrf.mxu1 }
 0x216   :  { %v1849_v3 = vadd.f32 %v1848_v1, %v1829_v0 }
 0x218   :  { %v1851_v4 = vmax.f32 %v1849_v3, 0.0 }
 0x21a   :  { %v1853_v6 = vsel %vm1852_vm1, %v1851_v4, 0.0 }
 0x21b   :  { %v1854_v7 = vrot.slane %v1853_v6, 4 }
 0x21d   :  { %v1855_v9 = vadd.f32 %v1854_v7, %v1853_v6 }
 0x21f   :  { %v1856_v10 = vrot.slane %v1855_v9, 2 }
 0x221   :  { %v1857_v12 = vadd.f32 %v1856_v10, %v1855_v9 }
 0x223   :  { %v1858_v13 = vrot.slane %v1857_v12, 1 }
 0x225   :  { %v1859_v15 = vadd.f32 %v1858_v13, %v1857_v12 }
 0x227   :  { %v1867_v17 = vmul.f32 %v1866_v14, %v1859_v15 }
 0x229   :  { %v1868_v19 = vsub.f32 %v1851_v4, %v1867_v17 }
 0x22b   :  { %v1869_v21 = vmul.f32 %v1868_v19, %v1868_v19 }
 0x22d   :  { %v1870_v23 = vsel %vm1852_vm1, %v1869_v21, 0.0 }
 0x22e   :  { %v1871_v24 = vrot.slane %v1870_v23, 4 }
 0x230   :  { %v1872_v26 = vadd.f32 %v1871_v24, %v1870_v23 }
 0x232   :  { %v1873_v28 = vrot.slane %v1872_v26, 2 }
 0x234   :  { %v1874_v30 = vadd.f32 %v1873_v28, %v1872_v26 }
 0x236   :  { %v1875_v32 = vrot.slane %v1874_v30, 1 }
 0x238   :  { %v1876_v33 = vadd.f32 %v1875_v32, %v1874_v30 }
 0x23a   :  { %v1877_v34 = vmul.f32 %v1876_v33, %v1866_v14 }
 0x23c   :  { %v1878_v35 = vadd.f32 1e-05, %v1877_v34 }
 0x23e   :  { %1963 = vrsqrt.f32 %v1878_v35  ;;  %vm1885_vm4 = vweird.f32 %v1878_v35 }
 0x244   :  { %v1964_v36 = vpop.eup %1963 }
 0x245   :  { %v1880_v38 = vmul.f32 %v1964_v36, %v1878_v35  ;;  %vm1886_vm3 = vweird.f32 %v1964_v36 }
 0x246   :  { %vm1887_vm5 = vmor %vm1885_vm4, %vm1886_vm3 }
 0x247   :  { %v1881_v40 = vmul.f32 %v1964_v36, %v1880_v38 }
 0x249   :  { %v1882_v41 = vmul.f32 0.5, %v1881_v40 }
 0x24b   :  { %v1883_v42 = vsub.f32 1.5, %v1882_v41 }
 0x24d   :  { %v1884_v43 = vmul.f32 %v1964_v36, %v1883_v42 }
 0x24f   :  { %v1888_v39 = vsel %vm1887_vm5, %v1964_v36, %v1884_v43 }
 0x250   :  { %v1889_v46 = vmul.f32 %v1888_v39, %v1868_v19 }
 0x252   :  { %v1894_v48 = vmul.f32 %v1958_v37, %v1889_v46 }
 0x254   :  { %v1899_v49 = vadd.f32 %v1959_v47, %v1894_v48 }
 0x256   :  { %1955 = vmatmul.msk.f32.vlgmr.msrb.gmra.mxu2 %vm1912_vm6, %v1899_v49 }
 0x2d9   :  { %v1933_v45 = vpop.f32.mrf.mxu2 }
 0x2da   :  { %v1934_v52 = vadd.f32 %v1960_v44, %v1933_v45 }
 0x2dc   :  { %v1936_v53 = vmax.f32 %v1934_v52, 0.0 }
 0x2de   :  { %v1938_v54 = vsel %vm1937_vm7, %v1936_v53, -inf }
 0x2df   :  { %1939 = vmax.xlane.f32.xlu0 %v1938_v54 }
 0x352   :  { %v1940_v55 = vpop.xlane.xlu0 %1939 }
 0x353   :  { %v1941_v50 = vsub.f32 %v1936_v53, %v1940_v55 }
 0x355   :  { %v1942_v51 = vmul.f32 1.442695, %v1941_v50 }
 0x357   :  { %1965 = vpow2.f32 %v1942_v51 }
 0x35d   :  { %v1966_v58 = vpop.eup %1965 }
 0x35e   :  { %v1944_v59 = vsel %vm1937_vm7, %v1966_v58, 0.0 }
 0x35f   :  { %1945 = vadd.xlane.f32.xlu0 %v1944_v59 }
 0x3d2   :  { %v1946_v60 = vpop.xlane.xlu0 %1945 }
 0x3d3   :  { %1967 = vrcp.f32 %v1946_v60 }
 0x3d9   :  { %v1968_v61 = vpop.eup %1967 }
 0x3da   :  { %v1948_v56 = vmul.f32 %v1968_v61, %v1966_v58 }
 0x3dc   :  { %1949 = vst.msk [vmem:[%s4425_s7] sm:$0xf] %vm1937_vm7, %v1948_v56 }

</bundles_post_ra>
